<compile_context>
chip_gen: v5e
topology: v5e:2x2
jax: 0.10.0
libtpu: 0.0.40
codegen_flags: <defaults>
</compile_context>

<pallas_src>
import functools

import jax
import jax.numpy as jnp
from jax.experimental import pallas as pl
from jax.experimental.pallas import tpu as pltpu


def _round_up(a, b):
    return (a + b - 1) // b * b


# ---------------------------------------------------------------------------
# Fused matmul + per-channel shift (+ ReLU) Pallas kernel.
# Single K block, bf16 MXU inputs, f32 accumulation, lane-dense output.
# ---------------------------------------------------------------------------
def _matmul_shift_kernel(p_ref, w_ref, shift_ref, o_ref, *, relu):
    y = jnp.dot(p_ref[...], w_ref[...], preferred_element_type=jnp.float32)
    y = y + shift_ref[...]
    if relu:
        y = jnp.maximum(y, 0.0)
    o_ref[...] = y.astype(o_ref.dtype)


def _fused_matmul(p, w, shift, *, relu):
    """(M,K) @ (K,N) + shift[N] (+ReLU) on the MXU via Pallas."""
    m, k = p.shape
    _, n = w.shape

    n_pad = _round_up(n, 128)            # lane-dense output columns
    m_pad = _round_up(m, 8)
    tm = min(m_pad, 512)                 # single M tile at these sizes
    m_pad = _round_up(m_pad, tm)

    p = p.astype(jnp.bfloat16)
    w = w.astype(jnp.bfloat16)
    if m_pad != m:
        p = jnp.pad(p, ((0, m_pad - m), (0, 0)))
    if n_pad != n:
        w = jnp.pad(w, ((0, 0), (0, n_pad - n)))
    shift = shift.astype(jnp.float32).reshape(1, n)
    if n_pad != n:
        shift = jnp.pad(shift, ((0, 0), (0, n_pad - n)))

    out = pl.pallas_call(
        functools.partial(_matmul_shift_kernel, relu=relu),
        out_shape=jax.ShapeDtypeStruct((m_pad, n_pad), jnp.float32),
        grid_spec=pltpu.PrefetchScalarGridSpec(
            num_scalar_prefetch=0,
            grid=(m_pad // tm,),
            in_specs=[
                pl.BlockSpec((tm, k), lambda i: (i, 0)),
                pl.BlockSpec((k, n_pad), lambda i: (0, 0)),
                pl.BlockSpec((1, n_pad), lambda i: (0, 0)),
            ],
            out_specs=pl.BlockSpec((tm, n_pad), lambda i: (i, 0)),
        ),
        compiler_params=pltpu.CompilerParams(
            dimension_semantics=("parallel",)),
    )(p, w, shift)
    if m_pad != m or n_pad != n:
        out = out[:m, :n]
    return out


# ---------------------------------------------------------------------------
# Plain-JAX glue (gather / resize / pooling / tiny convs).
# ---------------------------------------------------------------------------
def _conv_bn_params(gamma, beta, mean, var, eps=1e-5):
    scale = gamma * jax.lax.rsqrt(var + eps)
    return scale, beta - mean * scale


def _conv2d_nhwc(x, w_oihw, bias=None, pad=0):
    """Tiny offset conv: plain XLA conv (not worth a Pallas launch)."""
    y = jax.lax.conv_general_dilated(
        x, jnp.transpose(w_oihw, (2, 3, 1, 0)), (1, 1),
        [(pad, pad), (pad, pad)],
        dimension_numbers=("NHWC", "HWIO", "NHWC"))
    if bias is not None:
        y = y + bias
    return y


def _deform_patches(x, offset, ks, pad):
    """Bilinear sampling of deformable-conv patches (no mask, 1 offset grp).

    Returns (N*Ho*Wo, k2*cin) with K index = q*cin + ci (no activation
    transpose; the weight rows are permuted to match instead).
    """
    n, h, w, c = x.shape
    _, ho, wo, _ = offset.shape
    k2 = ks * ks
    off = offset.reshape(n, ho, wo, k2, 2)
    dy, dx = off[..., 0], off[..., 1]

    ky = (jnp.arange(k2) // ks).astype(jnp.float32)
    kx = (jnp.arange(k2) % ks).astype(jnp.float32)
    py = (jnp.arange(ho, dtype=jnp.float32)[None, :, None, None] - pad
          + ky[None, None, None, :] + dy)
    px = (jnp.arange(wo, dtype=jnp.float32)[None, None, :, None] - pad
          + kx[None, None, None, :] + dx)

    y0, x0 = jnp.floor(py), jnp.floor(px)
    wy1, wx1 = py - y0, px - x0
    wy0, wx0 = 1.0 - wy1, 1.0 - wx1

    x_flat = x.reshape(n * h * w, c)
    nbase = (jnp.arange(n, dtype=jnp.int32) * (h * w))[:, None, None, None]

    def corner(yc, xc, wgt):
        valid = (yc >= 0) & (yc <= h - 1) & (xc >= 0) & (xc <= w - 1)
        yi = jnp.clip(yc, 0, h - 1).astype(jnp.int32)
        xi = jnp.clip(xc, 0, w - 1).astype(jnp.int32)
        vals = jnp.take(x_flat, nbase + yi * w + xi, axis=0)  # (N,Ho,Wo,K2,C)
        return vals * (wgt * valid.astype(x.dtype))[..., None]

    samples = (corner(y0, x0, wy0 * wx0) + corner(y0, x0 + 1, wy0 * wx1)
               + corner(y0 + 1, x0, wy1 * wx0)
               + corner(y0 + 1, x0 + 1, wy1 * wx1))
    return samples.reshape(n * ho * wo, k2 * c)


def _bilinear_resize_nhwc(x, out_hw):
    """F.interpolate(mode='bilinear', align_corners=False) on NHWC."""
    n, h, w, c = x.shape
    ho, wo = out_hw
    if (h, w) == (ho, wo):
        return x

    def coords(out_size, in_size):
        o = jnp.arange(out_size, dtype=jnp.float32)
        src = jnp.clip((o + 0.5) * (in_size / out_size) - 0.5,
                       0.0, in_size - 1)
        lo = jnp.floor(src).astype(jnp.int32)
        hi = jnp.minimum(lo + 1, in_size - 1)
        return lo, hi, src - lo.astype(jnp.float32)

    ylo, yhi, yf = coords(ho, h)
    xlo, xhi, xf = coords(wo, w)
    top, bot = jnp.take(x, ylo, axis=1), jnp.take(x, yhi, axis=1)
    xh = top + (bot - top) * yf[None, :, None, None]
    left, right = jnp.take(xh, xlo, axis=2), jnp.take(xh, xhi, axis=2)
    return left + (right - left) * xf[None, None, :, None]


# ---------------------------------------------------------------------------
# ASPPDeformableV2 forward
# ---------------------------------------------------------------------------
@jax.jit
def aspp_deformable_v2(x, params):
    """x: (N, Cin, H, W) -> (N, Cout, H, W)."""
    n, cin, h, w = x.shape
    x_nhwc = jnp.transpose(x, (0, 2, 3, 1))

    branch_outs = []
    for br in params["branches"]:
        ks = br["reg_w"].shape[-1]
        planes = br["reg_w"].shape[0]
        pad = 0                                   # all ASPP branches: pad=0
        # offset conv (tiny -> plain XLA conv).  The modulator conv's result
        # never reaches deform_conv2d in the reference forward -> skipped.
        offset = _conv2d_nhwc(x_nhwc, br["offset_w"], br["offset_b"], pad)
        ho, wo = offset.shape[1], offset.shape[2]

        # deformable bilinear patch gather (data-dependent glue, plain JAX)
        dpatches = _deform_patches(x_nhwc, offset, ks, pad)

        # deformable conv + folded eval-mode BN + ReLU (Pallas, bf16 MXU).
        # Weight rows permuted to (k2, cin) ordering to match the gather.
        scale, shift = _conv_bn_params(br["gamma"], br["beta"],
                                       br["mean"], br["var"])
        wmat = jnp.transpose(br["reg_w"].reshape(planes, cin, ks * ks),
                             (2, 1, 0)).reshape(ks * ks * cin, planes)
        wmat = wmat * scale[None, :]
        y = _fused_matmul(dpatches, wmat, shift, relu=True)
        branch_outs.append(y.reshape(n, ho, wo, planes))

    h1, w1 = branch_outs[0].shape[1:3]
    feats = [branch_outs[0]] + [_bilinear_resize_nhwc(b, (h1, w1))
                                for b in branch_outs[1:]]
    xcat = jnp.concatenate(feats, axis=-1)          # (N,H1,W1,4*planes)

    planes = params["conv1_w"].shape[0]
    m1 = n * h1 * w1
    w1m = jnp.transpose(params["conv1_w"].reshape(planes, 4 * planes))
    x_ = _fused_matmul(xcat.reshape(m1, 4 * planes), w1m,
                       jnp.zeros((planes,), jnp.float32), relu=False)
    x_ = x_.reshape(n, h1, w1, planes)

    # Global avg / max pooling heads: M == batch -> plain jnp.dot (no Pallas).
    avg = jnp.mean(x_, axis=(1, 2))
    mx = jnp.max(x_, axis=(1, 2))
    gs, gsh = _conv_bn_params(params["gap_gamma"], params["gap_beta"],
                              params["gap_mean"], params["gap_var"])
    gw = jnp.transpose(params["gap_w"].reshape(planes, planes)) * gs[None, :]
    x5 = jax.nn.relu(jnp.dot(avg, gw) + gsh)
    ms, msh = _conv_bn_params(params["gmp_gamma"], params["gmp_beta"],
                              params["gmp_mean"], params["gmp_var"])
    mw = jnp.transpose(params["gmp_w"].reshape(planes, planes)) * ms[None, :]
    x6 = jax.nn.relu(jnp.dot(mx, mw) + msh)

    s = jax.nn.sigmoid(x5 + x6)
    xg = x_ * s[:, None, None, :]

    # conv2 + bn1 + relu: only out_ch output channels -> plain jnp.dot.
    # Dropout(0.5) is eval-mode identity.
    out_ch = params["conv2_w"].shape[0]
    b1s, b1sh = _conv_bn_params(params["bn1_gamma"], params["bn1_beta"],
                                params["bn1_mean"], params["bn1_var"])
    w2m = jnp.transpose(params["conv2_w"].reshape(out_ch, planes)) * b1s[None, :]
    y = jax.nn.relu(jnp.dot(xg.reshape(m1, planes), w2m) + b1sh)
    return jnp.transpose(y.reshape(n, h1, w1, out_ch), (0, 3, 1, 2))


# ---------------------------------------------------------------------------
# Pure-XLA reference (offset convs are zero-initialized as in the PyTorch
# module, so deform_conv2d reduces exactly to the regular convolution).
# ---------------------------------------------------------------------------
def _reference(x, params, eps=1e-5):
    def conv(inp, wgt, pad=0):
        return jax.lax.conv_general_dilated(
            inp, wgt, (1, 1), [(pad, pad), (pad, pad)],
            dimension_numbers=("NCHW", "OIHW", "NCHW"))

    def bn(inp, g, b, m, v):
        s = g * jax.lax.rsqrt(v + eps)
        return inp * s.reshape(1, -1, 1, 1) + (b - m * s).reshape(1, -1, 1, 1)

    outs = []
    for br in params["branches"]:
        y = conv(x, br["reg_w"], pad=0)
        outs.append(jax.nn.relu(bn(y, br["gamma"], br["beta"],
                                   br["mean"], br["var"])))
    tgt = outs[0].shape[2:]

    def resize(a):
        a = jnp.transpose(a, (0, 2, 3, 1))
        return jnp.transpose(_bilinear_resize_nhwc(a, tgt), (0, 3, 1, 2))

    xcat = jnp.concatenate([outs[0]] + [resize(o) for o in outs[1:]], axis=1)
    x_ = conv(xcat, params["conv1_w"])
    avg = jnp.mean(x_, axis=(2, 3), keepdims=True)
    mx = jnp.max(x_, axis=(2, 3), keepdims=True)
    x5 = jax.nn.relu(bn(conv(avg, params["gap_w"]), params["gap_gamma"],
                        params["gap_beta"], params["gap_mean"],
                        params["gap_var"]))
    x6 = jax.nn.relu(bn(conv(mx, params["gmp_w"]), params["gmp_gamma"],
                        params["gmp_beta"], params["gmp_mean"],
                        params["gmp_var"]))
    y = conv(x_ * jax.nn.sigmoid(x5 + x6), params["conv2_w"])
    return jax.nn.relu(bn(y, params["bn1_gamma"], params["bn1_beta"],
                          params["bn1_mean"], params["bn1_var"]))


if __name__ == "__main__":
    key = jax.random.PRNGKey(0)
    n, cin, h, w = 2, 4, 16, 16
    planes = 256                    # in_channelster = 256 // down_scale
    out_ch = cin                    # out_channels defaults to in_channels

    def nrm(k, shape, scl):
        return jax.random.normal(k, shape, dtype=jnp.float32) * scl

    keys = iter(jax.random.split(key, 64))
    params = {"branches": []}
    for ks in (1, 3, 5, 7):
        fan = cin * ks * ks
        params["branches"].append({
            # offset conv weight/bias are zero-initialized, as in the module
            "offset_w": jnp.zeros((2 * ks * ks, cin, ks, ks), jnp.float32),
            "offset_b": jnp.zeros((2 * ks * ks,), jnp.float32),
            "reg_w": nrm(next(keys), (planes, cin, ks, ks), fan ** -0.5),
            "gamma": 1.0 + nrm(next(keys), (planes,), 0.1),
            "beta": nrm(next(keys), (planes,), 0.1),
            "mean": nrm(next(keys), (planes,), 0.1),
            "var": jax.nn.softplus(nrm(next(keys), (planes,), 1.0)) + 0.5,
        })
    params.update({
        "conv1_w": nrm(next(keys), (planes, 4 * planes, 1, 1),
                       (4 * planes) ** -0.5),
        "gap_w": nrm(next(keys), (planes, planes, 1, 1), planes ** -0.5),
        "gap_gamma": 1.0 + nrm(next(keys), (planes,), 0.1),
        "gap_beta": nrm(next(keys), (planes,), 0.1),
        "gap_mean": nrm(next(keys), (planes,), 0.1),
        "gap_var": jax.nn.softplus(nrm(next(keys), (planes,), 1.0)) + 0.5,
        "gmp_w": nrm(next(keys), (planes, planes, 1, 1), planes ** -0.5),
        "gmp_gamma": 1.0 + nrm(next(keys), (planes,), 0.1),
        "gmp_beta": nrm(next(keys), (planes,), 0.1),
        "gmp_mean": nrm(next(keys), (planes,), 0.1),
        "gmp_var": jax.nn.softplus(nrm(next(keys), (planes,), 1.0)) + 0.5,
        "conv2_w": nrm(next(keys), (out_ch, planes, 1, 1), planes ** -0.5),
        "bn1_gamma": 1.0 + nrm(next(keys), (out_ch,), 0.1),
        "bn1_beta": nrm(next(keys), (out_ch,), 0.1),
        "bn1_mean": nrm(next(keys), (out_ch,), 0.1),
        "bn1_var": jax.nn.softplus(nrm(next(keys), (out_ch,), 1.0)) + 0.5,
    })

    x = jax.random.normal(next(keys), (n, cin, h, w), dtype=jnp.float32)

    out = jax.block_until_ready(aspp_deformable_v2(x, params))
    assert out.shape == (n, out_ch, h, w), out.shape

    ref = _reference(x, params)
    err = float(jnp.max(jnp.abs(out - ref)))
    # bf16 MXU inputs with f32 accumulation across two chained matmuls ->
    # relaxed-but-tight tolerance for O(1)-magnitude outputs.
    assert jnp.allclose(out, ref, atol=2e-2, rtol=2e-2), err

    print("KERNEL_OK")
</pallas_src>

<mosaic_0001>
module attributes {stable_mosaic.version = 11 : i64} {
  func.func @_matmul_shift_kernel(%arg0: i32, %arg1: memref<512x4xbf16, #tpu.memory_space<vmem>>, %arg2: memref<4x256xbf16, #tpu.memory_space<vmem>>, %arg3: memref<1x256xf32, #tpu.memory_space<vmem>>, %arg4: memref<512x256xf32, #tpu.memory_space<vmem>>) attributes {dimension_semantics = [#tpu.dimension_semantics<parallel>], iteration_bounds = array<i64: 1>, scalar_prefetch = 0 : i64, scratch_operands = 0 : i64, tpu.core_type = #tpu.core_type<tc>, window_params = [{transform_indices = @transform_0, window_bounds = array<i64: 512, 4>}, {pipeline_mode = #tpu.pipeline_mode<synchronous>, transform_indices = @transform_1, window_bounds = array<i64: 4, 256>}, {pipeline_mode = #tpu.pipeline_mode<synchronous>, transform_indices = @transform_2, window_bounds = array<i64: 1, 256>}, {transform_indices = @transform_3, window_bounds = array<i64: 512, 256>}]} {
    %c0 = arith.constant 0 : index
    %c0_0 = arith.constant 0 : index
    %0 = vector.load %arg1[%c0, %c0_0] : memref<512x4xbf16, #tpu.memory_space<vmem>>, vector<512x4xbf16>
    %c0_1 = arith.constant 0 : index
    %c0_2 = arith.constant 0 : index
    %1 = vector.load %arg2[%c0_1, %c0_2] : memref<4x256xbf16, #tpu.memory_space<vmem>>, vector<4x256xbf16>
    %cst = arith.constant dense<0.000000e+00> : vector<512x256xf32>
    %2 = tpu.matmul %0, %1, %cst {dimension_numbers = #tpu.dot_dimension_numbers<[1], [0], [0], [1], [0, 0, 1, 1], [], []>} : vector<512x4xbf16>, vector<4x256xbf16>, vector<512x256xf32> -> vector<512x256xf32>
    %c0_3 = arith.constant 0 : index
    %c0_4 = arith.constant 0 : index
    %3 = vector.load %arg3[%c0_3, %c0_4] : memref<1x256xf32, #tpu.memory_space<vmem>>, vector<1x256xf32>
    %4 = vector.broadcast %3 : vector<1x256xf32> to vector<512x256xf32>
    %5 = arith.addf %2, %4 : vector<512x256xf32>
    %cst_5 = arith.constant 0.000000e+00 : f32
    %6 = vector.broadcast %cst_5 : f32 to vector<512x256xf32>
    %7 = arith.maximumf %5, %6 : vector<512x256xf32>
    %c0_6 = arith.constant 0 : index
    %c0_7 = arith.constant 0 : index
    %8 = vector.load %arg4[%c0_6, %c0_7] : memref<512x256xf32, #tpu.memory_space<vmem>>, vector<512x256xf32>
    tpu.vector_store %arg4[%c0_6, %c0_7], %7 {strides = array<i32>} : memref<512x256xf32, #tpu.memory_space<vmem>>, vector<512x256xf32>,
    return
  }
  func.func @transform_0(%arg0: i32) -> (i32, i32) {
    %c0_i32 = arith.constant 0 : i32
    %c0_i32_0 = arith.constant 0 : i32
    return %arg0, %c0_i32 : i32, i32
  }
  func.func @transform_1(%arg0: i32) -> (i32, i32) {
    %c0_i32 = arith.constant 0 : i32
    %c0_i32_0 = arith.constant 0 : i32
    %c0_i32_1 = arith.constant 0 : i32
    return %c0_i32, %c0_i32_0 : i32, i32
  }
  func.func @transform_2(%arg0: i32) -> (i32, i32) {
    %c0_i32 = arith.constant 0 : i32
    %c0_i32_0 = arith.constant 0 : i32
    %c0_i32_1 = arith.constant 0 : i32
    return %c0_i32, %c0_i32_0 : i32, i32
  }
  func.func @transform_3(%arg0: i32) -> (i32, i32) {
    %c0_i32 = arith.constant 0 : i32
    %c0_i32_0 = arith.constant 0 : i32
    return %arg0, %c0_i32 : i32, i32
  }
}

module attributes {stable_mosaic.version = 11 : i64} {
  func.func @_matmul_shift_kernel(%arg0: i32, %arg1: memref<392x36xbf16, #tpu.memory_space<vmem>>, %arg2: memref<36x256xbf16, #tpu.memory_space<vmem>>, %arg3: memref<1x256xf32, #tpu.memory_space<vmem>>, %arg4: memref<392x256xf32, #tpu.memory_space<vmem>>) attributes {dimension_semantics = [#tpu.dimension_semantics<parallel>], iteration_bounds = array<i64: 1>, scalar_prefetch = 0 : i64, scratch_operands = 0 : i64, tpu.core_type = #tpu.core_type<tc>, window_params = [{transform_indices = @transform_0, window_bounds = array<i64: 392, 36>}, {pipeline_mode = #tpu.pipeline_mode<synchronous>, transform_indices = @transform_1, window_bounds = array<i64: 36, 256>}, {pipeline_mode = #tpu.pipeline_mode<synchronous>, transform_indices = @transform_2, window_bounds = array<i64: 1, 256>}, {transform_indices = @transform_3, window_bounds = array<i64: 392, 256>}]} {
    %c0 = arith.constant 0 : index
    %c0_0 = arith.constant 0 : index
    %0 = vector.load %arg1[%c0, %c0_0] : memref<392x36xbf16, #tpu.memory_space<vmem>>, vector<392x36xbf16>
    %c0_1 = arith.constant 0 : index
    %c0_2 = arith.constant 0 : index
    %1 = vector.load %arg2[%c0_1, %c0_2] : memref<36x256xbf16, #tpu.memory_space<vmem>>, vector<36x256xbf16>
    %cst = arith.constant dense<0.000000e+00> : vector<392x256xf32>
    %2 = tpu.matmul %0, %1, %cst {dimension_numbers = #tpu.dot_dimension_numbers<[1], [0], [0], [1], [0, 0, 1, 1], [], []>} : vector<392x36xbf16>, vector<36x256xbf16>, vector<392x256xf32> -> vector<392x256xf32>
    %c0_3 = arith.constant 0 : index
    %c0_4 = arith.constant 0 : index
    %3 = vector.load %arg3[%c0_3, %c0_4] : memref<1x256xf32, #tpu.memory_space<vmem>>, vector<1x256xf32>
    %4 = vector.broadcast %3 : vector<1x256xf32> to vector<392x256xf32>
    %5 = arith.addf %2, %4 : vector<392x256xf32>
    %cst_5 = arith.constant 0.000000e+00 : f32
    %6 = vector.broadcast %cst_5 : f32 to vector<392x256xf32>
    %7 = arith.maximumf %5, %6 : vector<392x256xf32>
    %c0_6 = arith.constant 0 : index
    %c0_7 = arith.constant 0 : index
    %8 = vector.load %arg4[%c0_6, %c0_7] : memref<392x256xf32, #tpu.memory_space<vmem>>, vector<392x256xf32>
    tpu.vector_store %arg4[%c0_6, %c0_7], %7 {strides = array<i32>} : memref<392x256xf32, #tpu.memory_space<vmem>>, vector<392x256xf32>,
    return
  }
  func.func @transform_0(%arg0: i32) -> (i32, i32) {
    %c0_i32 = arith.constant 0 : i32
    %c0_i32_0 = arith.constant 0 : i32
    return %arg0, %c0_i32 : i32, i32
  }
  func.func @transform_1(%arg0: i32) -> (i32, i32) {
    %c0_i32 = arith.constant 0 : i32
    %c0_i32_0 = arith.constant 0 : i32
    %c0_i32_1 = arith.constant 0 : i32
    return %c0_i32, %c0_i32_0 : i32, i32
  }
  func.func @transform_2(%arg0: i32) -> (i32, i32) {
    %c0_i32 = arith.constant 0 : i32
    %c0_i32_0 = arith.constant 0 : i32
    %c0_i32_1 = arith.constant 0 : i32
    return %c0_i32, %c0_i32_0 : i32, i32
  }
  func.func @transform_3(%arg0: i32) -> (i32, i32) {
    %c0_i32 = arith.constant 0 : i32
    %c0_i32_0 = arith.constant 0 : i32
    return %arg0, %c0_i32 : i32, i32
  }
}

module attributes {stable_mosaic.version = 11 : i64} {
  func.func @_matmul_shift_kernel(%arg0: i32, %arg1: memref<288x100xbf16, #tpu.memory_space<vmem>>, %arg2: memref<100x256xbf16, #tpu.memory_space<vmem>>, %arg3: memref<1x256xf32, #tpu.memory_space<vmem>>, %arg4: memref<288x256xf32, #tpu.memory_space<vmem>>) attributes {dimension_semantics = [#tpu.dimension_semantics<parallel>], iteration_bounds = array<i64: 1>, scalar_prefetch = 0 : i64, scratch_operands = 0 : i64, tpu.core_type = #tpu.core_type<tc>, window_params = [{transform_indices = @transform_0, window_bounds = array<i64: 288, 100>}, {pipeline_mode = #tpu.pipeline_mode<synchronous>, transform_indices = @transform_1, window_bounds = array<i64: 100, 256>}, {pipeline_mode = #tpu.pipeline_mode<synchronous>, transform_indices = @transform_2, window_bounds = array<i64: 1, 256>}, {transform_indices = @transform_3, window_bounds = array<i64: 288, 256>}]} {
    %c0 = arith.constant 0 : index
    %c0_0 = arith.constant 0 : index
    %0 = vector.load %arg1[%c0, %c0_0] : memref<288x100xbf16, #tpu.memory_space<vmem>>, vector<288x100xbf16>
    %c0_1 = arith.constant 0 : index
    %c0_2 = arith.constant 0 : index
    %1 = vector.load %arg2[%c0_1, %c0_2] : memref<100x256xbf16, #tpu.memory_space<vmem>>, vector<100x256xbf16>
    %cst = arith.constant dense<0.000000e+00> : vector<288x256xf32>
    %2 = tpu.matmul %0, %1, %cst {dimension_numbers = #tpu.dot_dimension_numbers<[1], [0], [0], [1], [0, 0, 1, 1], [], []>} : vector<288x100xbf16>, vector<100x256xbf16>, vector<288x256xf32> -> vector<288x256xf32>
    %c0_3 = arith.constant 0 : index
    %c0_4 = arith.constant 0 : index
    %3 = vector.load %arg3[%c0_3, %c0_4] : memref<1x256xf32, #tpu.memory_space<vmem>>, vector<1x256xf32>
    %4 = vector.broadcast %3 : vector<1x256xf32> to vector<288x256xf32>
    %5 = arith.addf %2, %4 : vector<288x256xf32>
    %cst_5 = arith.constant 0.000000e+00 : f32
    %6 = vector.broadcast %cst_5 : f32 to vector<288x256xf32>
    %7 = arith.maximumf %5, %6 : vector<288x256xf32>
    %c0_6 = arith.constant 0 : index
    %c0_7 = arith.constant 0 : index
    %8 = vector.load %arg4[%c0_6, %c0_7] : memref<288x256xf32, #tpu.memory_space<vmem>>, vector<288x256xf32>
    tpu.vector_store %arg4[%c0_6, %c0_7], %7 {strides = array<i32>} : memref<288x256xf32, #tpu.memory_space<vmem>>, vector<288x256xf32>,
    return
  }
  func.func @transform_0(%arg0: i32) -> (i32, i32) {
    %c0_i32 = arith.constant 0 : i32
    %c0_i32_0 = arith.constant 0 : i32
    return %arg0, %c0_i32 : i32, i32
  }
  func.func @transform_1(%arg0: i32) -> (i32, i32) {
    %c0_i32 = arith.constant 0 : i32
    %c0_i32_0 = arith.constant 0 : i32
    %c0_i32_1 = arith.constant 0 : i32
    return %c0_i32, %c0_i32_0 : i32, i32
  }
  func.func @transform_2(%arg0: i32) -> (i32, i32) {
    %c0_i32 = arith.constant 0 : i32
    %c0_i32_0 = arith.constant 0 : i32
    %c0_i32_1 = arith.constant 0 : i32
    return %c0_i32, %c0_i32_0 : i32, i32
  }
  func.func @transform_3(%arg0: i32) -> (i32, i32) {
    %c0_i32 = arith.constant 0 : i32
    %c0_i32_0 = arith.constant 0 : i32
    return %arg0, %c0_i32 : i32, i32
  }
}

module attributes {stable_mosaic.version = 11 : i64} {
  func.func @_matmul_shift_kernel(%arg0: i32, %arg1: memref<200x196xbf16, #tpu.memory_space<vmem>>, %arg2: memref<196x256xbf16, #tpu.memory_space<vmem>>, %arg3: memref<1x256xf32, #tpu.memory_space<vmem>>, %arg4: memref<200x256xf32, #tpu.memory_space<vmem>>) attributes {dimension_semantics = [#tpu.dimension_semantics<parallel>], iteration_bounds = array<i64: 1>, scalar_prefetch = 0 : i64, scratch_operands = 0 : i64, tpu.core_type = #tpu.core_type<tc>, window_params = [{transform_indices = @transform_0, window_bounds = array<i64: 200, 196>}, {pipeline_mode = #tpu.pipeline_mode<synchronous>, transform_indices = @transform_1, window_bounds = array<i64: 196, 256>}, {pipeline_mode = #tpu.pipeline_mode<synchronous>, transform_indices = @transform_2, window_bounds = array<i64: 1, 256>}, {transform_indices = @transform_3, window_bounds = array<i64: 200, 256>}]} {
    %c0 = arith.constant 0 : index
    %c0_0 = arith.constant 0 : index
    %0 = vector.load %arg1[%c0, %c0_0] : memref<200x196xbf16, #tpu.memory_space<vmem>>, vector<200x196xbf16>
    %c0_1 = arith.constant 0 : index
    %c0_2 = arith.constant 0 : index
    %1 = vector.load %arg2[%c0_1, %c0_2] : memref<196x256xbf16, #tpu.memory_space<vmem>>, vector<196x256xbf16>
    %cst = arith.constant dense<0.000000e+00> : vector<200x256xf32>
    %2 = tpu.matmul %0, %1, %cst {dimension_numbers = #tpu.dot_dimension_numbers<[1], [0], [0], [1], [0, 0, 1, 1], [], []>} : vector<200x196xbf16>, vector<196x256xbf16>, vector<200x256xf32> -> vector<200x256xf32>
    %c0_3 = arith.constant 0 : index
    %c0_4 = arith.constant 0 : index
    %3 = vector.load %arg3[%c0_3, %c0_4] : memref<1x256xf32, #tpu.memory_space<vmem>>, vector<1x256xf32>
    %4 = vector.broadcast %3 : vector<1x256xf32> to vector<200x256xf32>
    %5 = arith.addf %2, %4 : vector<200x256xf32>
    %cst_5 = arith.constant 0.000000e+00 : f32
    %6 = vector.broadcast %cst_5 : f32 to vector<200x256xf32>
    %7 = arith.maximumf %5, %6 : vector<200x256xf32>
    %c0_6 = arith.constant 0 : index
    %c0_7 = arith.constant 0 : index
    %8 = vector.load %arg4[%c0_6, %c0_7] : memref<200x256xf32, #tpu.memory_space<vmem>>, vector<200x256xf32>
    tpu.vector_store %arg4[%c0_6, %c0_7], %7 {strides = array<i32>} : memref<200x256xf32, #tpu.memory_space<vmem>>, vector<200x256xf32>,
    return
  }
  func.func @transform_0(%arg0: i32) -> (i32, i32) {
    %c0_i32 = arith.constant 0 : i32
    %c0_i32_0 = arith.constant 0 : i32
    return %arg0, %c0_i32 : i32, i32
  }
  func.func @transform_1(%arg0: i32) -> (i32, i32) {
    %c0_i32 = arith.constant 0 : i32
    %c0_i32_0 = arith.constant 0 : i32
    %c0_i32_1 = arith.constant 0 : i32
    return %c0_i32, %c0_i32_0 : i32, i32
  }
  func.func @transform_2(%arg0: i32) -> (i32, i32) {
    %c0_i32 = arith.constant 0 : i32
    %c0_i32_0 = arith.constant 0 : i32
    %c0_i32_1 = arith.constant 0 : i32
    return %c0_i32, %c0_i32_0 : i32, i32
  }
  func.func @transform_3(%arg0: i32) -> (i32, i32) {
    %c0_i32 = arith.constant 0 : i32
    %c0_i32_0 = arith.constant 0 : i32
    return %arg0, %c0_i32 : i32, i32
  }
}

module attributes {stable_mosaic.version = 11 : i64} {
  func.func @_matmul_shift_kernel(%arg0: i32, %arg1: memref<512x1024xbf16, #tpu.memory_space<vmem>>, %arg2: memref<1024x256xbf16, #tpu.memory_space<vmem>>, %arg3: memref<1x256xf32, #tpu.memory_space<vmem>>, %arg4: memref<512x256xf32, #tpu.memory_space<vmem>>) attributes {dimension_semantics = [#tpu.dimension_semantics<parallel>], iteration_bounds = array<i64: 1>, scalar_prefetch = 0 : i64, scratch_operands = 0 : i64, tpu.core_type = #tpu.core_type<tc>, window_params = [{transform_indices = @transform_0, window_bounds = array<i64: 512, 1024>}, {pipeline_mode = #tpu.pipeline_mode<synchronous>, transform_indices = @transform_1, window_bounds = array<i64: 1024, 256>}, {pipeline_mode = #tpu.pipeline_mode<synchronous>, transform_indices = @transform_2, window_bounds = array<i64: 1, 256>}, {transform_indices = @transform_3, window_bounds = array<i64: 512, 256>}]} {
    %c0 = arith.constant 0 : index
    %c0_0 = arith.constant 0 : index
    %0 = vector.load %arg1[%c0, %c0_0] : memref<512x1024xbf16, #tpu.memory_space<vmem>>, vector<512x1024xbf16>
    %c0_1 = arith.constant 0 : index
    %c0_2 = arith.constant 0 : index
    %1 = vector.load %arg2[%c0_1, %c0_2] : memref<1024x256xbf16, #tpu.memory_space<vmem>>, vector<1024x256xbf16>
    %cst = arith.constant dense<0.000000e+00> : vector<512x256xf32>
    %2 = tpu.matmul %0, %1, %cst {dimension_numbers = #tpu.dot_dimension_numbers<[1], [0], [0], [1], [0, 0, 1, 1], [], []>} : vector<512x1024xbf16>, vector<1024x256xbf16>, vector<512x256xf32> -> vector<512x256xf32>
    %c0_3 = arith.constant 0 : index
    %c0_4 = arith.constant 0 : index
    %3 = vector.load %arg3[%c0_3, %c0_4] : memref<1x256xf32, #tpu.memory_space<vmem>>, vector<1x256xf32>
    %4 = vector.broadcast %3 : vector<1x256xf32> to vector<512x256xf32>
    %5 = arith.addf %2, %4 : vector<512x256xf32>
    %c0_5 = arith.constant 0 : index
    %c0_6 = arith.constant 0 : index
    %6 = vector.load %arg4[%c0_5, %c0_6] : memref<512x256xf32, #tpu.memory_space<vmem>>, vector<512x256xf32>
    tpu.vector_store %arg4[%c0_5, %c0_6], %5 {strides = array<i32>} : memref<512x256xf32, #tpu.memory_space<vmem>>, vector<512x256xf32>,
    return
  }
  func.func @transform_0(%arg0: i32) -> (i32, i32) {
    %c0_i32 = arith.constant 0 : i32
    %c0_i32_0 = arith.constant 0 : i32
    return %arg0, %c0_i32 : i32, i32
  }
  func.func @transform_1(%arg0: i32) -> (i32, i32) {
    %c0_i32 = arith.constant 0 : i32
    %c0_i32_0 = arith.constant 0 : i32
    %c0_i32_1 = arith.constant 0 : i32
    return %c0_i32, %c0_i32_0 : i32, i32
  }
  func.func @transform_2(%arg0: i32) -> (i32, i32) {
    %c0_i32 = arith.constant 0 : i32
    %c0_i32_0 = arith.constant 0 : i32
    %c0_i32_1 = arith.constant 0 : i32
    return %c0_i32, %c0_i32_0 : i32, i32
  }
  func.func @transform_3(%arg0: i32) -> (i32, i32) {
    %c0_i32 = arith.constant 0 : i32
    %c0_i32_0 = arith.constant 0 : i32
    return %arg0, %c0_i32 : i32, i32
  }
}

</mosaic_0001>

<bundles_post_ra>
// kernel: aspp_deformable_v2.5
= control target key start
LH: loop header
LB: loop body
LE: loop exit
PB: predicated region body
PF: predicated region fallthrough
CT: control target
= control target key end

     0   :  { %vm347_vm0 = vcmask 1041408   ;;  %vm250_vm1 = vcmask 31744   ;;  %s1878_s1 = inlined_call_operand.vmem [shape: bf16[4,256], index: 1, kind: input, shape index: {}]   ;;  %s1879_s0 = inlined_call_operand.vmem [shape: bf16[512,4], index: 0, kind: input, shape index: {}]   ;;  %s1880_s2 = inlined_call_operand.vmem [shape: f32[1,256], index: 2, kind: input, shape index: {}]   ;;  %s1881_s3 = inlined_call_operand.vmem [shape: f32[512,256], index: 3, kind: output, shape index: {}]  }
   0x1   :  { %v79_v0 = vld [vmem:[%s1878_s1] sm:$0xf]  ;;  %v1143_v7 = vld [vmem:[%s1879_s0 + $0x8] sm:$0xff]  ;;  %v1144_v9 = vld [vmem:[%s1879_s0 + $0x10] sm:$0xff] }
   0x2   :  { %247 = vst [vmem:[#allocation1] ss:$4 sm:$0xff] %v79_v0  ;;  %v1142_v5 = vld [vmem:[%s1879_s0] sm:$0xff]  ;;  %v1159_v8 = vld [vmem:[%s1879_s0 + $0x88] sm:$0xff]  ;;  %v1160_v10 = vld [vmem:[%s1879_s0 + $0x90] sm:$0xff] }
   0x3   :  { %v1158_v6 = vld [vmem:[%s1879_s0 + $0x80] sm:$0xff]  ;;  %v1145_v11 = vld [vmem:[%s1879_s0 + $0x18] sm:$0xff]  ;;  %v1147_v15 = vld [vmem:[%s1879_s0 + $0x28] sm:$0xff] }
   0x4   :  { %v1161_v12 = vld [vmem:[%s1879_s0 + $0x98] sm:$0xff]  ;;  %v1146_v13 = vld [vmem:[%s1879_s0 + $0x20] sm:$0xff]  ;;  %v1163_v16 = vld [vmem:[%s1879_s0 + $0xa8] sm:$0xff] }
   0x5   :  { %v1162_v14 = vld [vmem:[%s1879_s0 + $0xa0] sm:$0xff]  ;;  %v1148_v17 = vld [vmem:[%s1879_s0 + $0x30] sm:$0xff]  ;;  %v1149_v19 = vld [vmem:[%s1879_s0 + $0x38] sm:$0xff] }
   0x6   :  { %v1164_v18 = vld [vmem:[%s1879_s0 + $0xb0] sm:$0xff]  ;;  %v1165_v20 = vld [vmem:[%s1879_s0 + $0xb8] sm:$0xff]  ;;  %v80_v21 = vld [vmem:[%s1880_s2] sm:$0x3] }
   0x7   :  { %v1282_v22 = vperm.slane %v80_v21, 0  ;;  %v1284_v23 = vperm.slane %v80_v21, 1  ;;  %v1150_v24 = vld [vmem:[%s1879_s0 + $0x40] sm:$0xff]  ;;  %v1151_v47 = vld [vmem:[%s1879_s0 + $0x48] sm:$0xff] }
   0x8   :  { %v1166_v25 = vld [vmem:[%s1879_s0 + $0xc0] sm:$0xff]  ;;  %v1167_v48 = vld [vmem:[%s1879_s0 + $0xc8] sm:$0xff] }
   0x9   :  { %v248_v1 = vld.sshfl [vmem:[#allocation1] sm:$0xff pattern:$0x73625140]  ;;  %v249_v2 = vld.sshfl [vmem:[#allocation1 + $0x8] sm:$0xff pattern:$0x73625140] }
   0xa   :  { %v348_v3 = vsel %vm347_vm0, %v248_v1, 0  ;;  %v350_v4 = vsel %vm347_vm0, %v249_v2, 0 }
   0xb   :  { %359 = vmatpush.bf16.msra.mxu0 %v348_v3  ;;  %1174 = vmatpush.bf16.msra.mxu2 %v348_v3 }
   0xc   :  { %528 = vmatpush.bf16.msra.mxu1 %v350_v4  ;;  %1175 = vmatpush.bf16.msra.mxu3 %v350_v4 }
   0xe   :  { %1078 = vmatmul.msk.bf16.vlgmr.msra.gmra.mxu0 %vm250_vm1, %v1142_v5  ;;  %1094 = vmatmul.msk.bf16.vlgmr.msra.gmra.mxu2 %vm250_vm1, %v1158_v6 }
   0xf   :  { %1110 = vmatmul.msk.bf16.vlgmr.msra.gmra.mxu1 %vm250_vm1, %v1142_v5  ;;  %1126 = vmatmul.msk.bf16.vlgmr.msra.gmra.mxu3 %vm250_vm1, %v1158_v6 }
  0x1e   :  { %1079 = vmatmul.msk.bf16.gmra.mxu0 %vm250_vm1, %v1143_v7  ;;  %1095 = vmatmul.msk.bf16.gmra.mxu2 %vm250_vm1, %v1159_v8 }
  0x1f   :  { %1111 = vmatmul.msk.bf16.gmra.mxu1 %vm250_vm1, %v1143_v7  ;;  %1127 = vmatmul.msk.bf16.gmra.mxu3 %vm250_vm1, %v1159_v8 }
  0x2e   :  { %1080 = vmatmul.msk.bf16.gmra.mxu0 %vm250_vm1, %v1144_v9  ;;  %1096 = vmatmul.msk.bf16.gmra.mxu2 %vm250_vm1, %v1160_v10 }
  0x2f   :  { %1112 = vmatmul.msk.bf16.gmra.mxu1 %vm250_vm1, %v1144_v9  ;;  %1128 = vmatmul.msk.bf16.gmra.mxu3 %vm250_vm1, %v1160_v10  ;;  %v1152_v9 = vld [vmem:[%s1879_s0 + $0x50] sm:$0xff] }
  0x30   :  { %v1168_v10 = vld [vmem:[%s1879_s0 + $0xd0] sm:$0xff] }
  0x3e   :  { %1081 = vmatmul.msk.bf16.gmra.mxu0 %vm250_vm1, %v1145_v11  ;;  %1097 = vmatmul.msk.bf16.gmra.mxu2 %vm250_vm1, %v1161_v12 }
  0x3f   :  { %1113 = vmatmul.msk.bf16.gmra.mxu1 %vm250_vm1, %v1145_v11  ;;  %1129 = vmatmul.msk.bf16.gmra.mxu3 %vm250_vm1, %v1161_v12 }
  0x4e   :  { %1082 = vmatmul.msk.bf16.gmra.mxu0 %vm250_vm1, %v1146_v13  ;;  %1098 = vmatmul.msk.bf16.gmra.mxu2 %vm250_vm1, %v1162_v14 }
  0x4f   :  { %1114 = vmatmul.msk.bf16.gmra.mxu1 %vm250_vm1, %v1146_v13  ;;  %1130 = vmatmul.msk.bf16.gmra.mxu3 %vm250_vm1, %v1162_v14 }
  0x5e   :  { %1083 = vmatmul.msk.bf16.gmra.mxu0 %vm250_vm1, %v1147_v15  ;;  %1099 = vmatmul.msk.bf16.gmra.mxu2 %vm250_vm1, %v1163_v16 }
  0x5f   :  { %1115 = vmatmul.msk.bf16.gmra.mxu1 %vm250_vm1, %v1147_v15  ;;  %1131 = vmatmul.msk.bf16.gmra.mxu3 %vm250_vm1, %v1163_v16 }
  0x6e   :  { %1084 = vmatmul.msk.bf16.gmra.mxu0 %vm250_vm1, %v1148_v17  ;;  %1100 = vmatmul.msk.bf16.gmra.mxu2 %vm250_vm1, %v1164_v18 }
  0x6f   :  { %1116 = vmatmul.msk.bf16.gmra.mxu1 %vm250_vm1, %v1148_v17  ;;  %1132 = vmatmul.msk.bf16.gmra.mxu3 %vm250_vm1, %v1164_v18 }
  0x7e   :  { %1085 = vmatmul.msk.bf16.gmra.mxu0 %vm250_vm1, %v1149_v19  ;;  %1101 = vmatmul.msk.bf16.gmra.mxu2 %vm250_vm1, %v1165_v20 }
  0x7f   :  { %1117 = vmatmul.msk.bf16.gmra.mxu1 %vm250_vm1, %v1149_v19  ;;  %1133 = vmatmul.msk.bf16.gmra.mxu3 %vm250_vm1, %v1165_v20 }
  0x8b   :  { %v361_v26 = vpop.f32.mrf.mxu0 }
  0x8c   :  { %v362_v27 = vadd.f32 %v361_v26, %v1282_v22  ;;  %v530_v28 = vpop.f32.mrf.mxu1 }
  0x8d   :  { %v531_v29 = vadd.f32 %v530_v28, %v1284_v23 }
  0x8e   :  { %v690_v30 = vmax.f32 %v362_v27, 0.0  ;;  %1086 = vmatmul.msk.bf16.gmra.mxu0 %vm250_vm1, %v1150_v24  ;;  %1102 = vmatmul.msk.bf16.gmra.mxu2 %vm250_vm1, %v1166_v25 }
  0x8f   :  { %v691_v31 = vmax.f32 %v531_v29, 0.0  ;;  %1118 = vmatmul.msk.bf16.gmra.mxu1 %vm250_vm1, %v1150_v24  ;;  %1134 = vmatmul.msk.bf16.gmra.mxu3 %vm250_vm1, %v1166_v25 }
  0x90   :  { %818 = vst [vmem:[%s1881_s3] sm:$0xff] %v690_v30 }
  0x91   :  { %819 = vst [vmem:[%s1881_s3 + $0x8] sm:$0xff] %v691_v31  ;;  %v441_v32 = vpop.f32.mrf.mxu2 }
  0x92   :  { %v442_v33 = vadd.f32 %v441_v32, %v1282_v22  ;;  %v610_v34 = vpop.f32.mrf.mxu3 }
  0x93   :  { %v611_v35 = vadd.f32 %v610_v34, %v1284_v23  ;;  %v363_v36 = vpop.f32.mrf.mxu0 }
  0x94   :  { %v754_v37 = vmax.f32 %v442_v33, 0.0  ;;  %v364_v38 = vadd.f32 %v363_v36, %v1282_v22  ;;  %v532_v39 = vpop.f32.mrf.mxu1 }
  0x95   :  { %v755_v40 = vmax.f32 %v611_v35, 0.0  ;;  %v533_v41 = vadd.f32 %v532_v39, %v1284_v23 }
  0x96   :  { %882 = vst [vmem:[%s1881_s3 + $0x200] sm:$0xff] %v754_v37  ;;  %v692_v42 = vmax.f32 %v364_v38, 0.0  ;;  %v1153_v37 = vld [vmem:[%s1879_s0 + $0x58] sm:$0xff] }
  0x97   :  { %883 = vst [vmem:[%s1881_s3 + $0x208] sm:$0xff] %v755_v40  ;;  %v693_v43 = vmax.f32 %v533_v41, 0.0  ;;  %v1169_v38 = vld [vmem:[%s1879_s0 + $0xd8] sm:$0xff] }
  0x98   :  { %820 = vst [vmem:[%s1881_s3 + $0x10] sm:$0xff] %v692_v42 }
  0x99   :  { %821 = vst [vmem:[%s1881_s3 + $0x18] sm:$0xff] %v693_v43  ;;  %v443_v44 = vpop.f32.mrf.mxu2 }
  0x9a   :  { %v444_v45 = vadd.f32 %v443_v44, %v1282_v22  ;;  %v612_v46 = vpop.f32.mrf.mxu3 }
  0x9b   :  { %v613_v49 = vadd.f32 %v612_v46, %v1284_v23  ;;  %v366_v50 = vpop.f32.mrf.mxu0 }
  0x9c   :  { %v756_v51 = vmax.f32 %v444_v45, 0.0  ;;  %v367_v52 = vadd.f32 %v366_v50, %v1282_v22  ;;  %v535_v53 = vpop.f32.mrf.mxu1 }
  0x9d   :  { %v757_v54 = vmax.f32 %v613_v49, 0.0  ;;  %v536_v55 = vadd.f32 %v535_v53, %v1284_v23 }
  0x9e   :  { %884 = vst [vmem:[%s1881_s3 + $0x210] sm:$0xff] %v756_v51  ;;  %v694_v56 = vmax.f32 %v367_v52, 0.0  ;;  %1087 = vmatmul.msk.bf16.gmra.mxu0 %vm250_vm1, %v1151_v47  ;;  %1103 = vmatmul.msk.bf16.gmra.mxu2 %vm250_vm1, %v1167_v48 }
  0x9f   :  { %885 = vst [vmem:[%s1881_s3 + $0x218] sm:$0xff] %v757_v54  ;;  %v695_v57 = vmax.f32 %v536_v55, 0.0  ;;  %1119 = vmatmul.msk.bf16.gmra.mxu1 %vm250_vm1, %v1151_v47  ;;  %1135 = vmatmul.msk.bf16.gmra.mxu3 %vm250_vm1, %v1167_v48 }
  0xa0   :  { %822 = vst [vmem:[%s1881_s3 + $0x20] sm:$0xff] %v694_v56 }
  0xa1   :  { %823 = vst [vmem:[%s1881_s3 + $0x28] sm:$0xff] %v695_v57  ;;  %v446_v58 = vpop.f32.mrf.mxu2 }
  0xa2   :  { %v447_v59 = vadd.f32 %v446_v58, %v1282_v22  ;;  %v615_v60 = vpop.f32.mrf.mxu3 }
  0xa3   :  { %v616_v61 = vadd.f32 %v615_v60, %v1284_v23  ;;  %v368_v62 = vpop.f32.mrf.mxu0 }
  0xa4   :  { %v758_v63 = vmax.f32 %v447_v59, 0.0  ;;  %v369_v0 = vadd.f32 %v368_v62, %v1282_v22  ;;  %v537_v1 = vpop.f32.mrf.mxu1 }
  0xa5   :  { %v759_v2 = vmax.f32 %v616_v61, 0.0  ;;  %v538_v3 = vadd.f32 %v537_v1, %v1284_v23 }
  0xa6   :  { %886 = vst [vmem:[%s1881_s3 + $0x220] sm:$0xff] %v758_v63  ;;  %v696_v4 = vmax.f32 %v369_v0, 0.0  ;;  %v1154_v63 = vld [vmem:[%s1879_s0 + $0x60] sm:$0xff] }
  0xa7   :  { %887 = vst [vmem:[%s1881_s3 + $0x228] sm:$0xff] %v759_v2  ;;  %v697_v5 = vmax.f32 %v538_v3, 0.0  ;;  %v1170_v0 = vld [vmem:[%s1879_s0 + $0xe0] sm:$0xff] }
  0xa8   :  { %824 = vst [vmem:[%s1881_s3 + $0x30] sm:$0xff] %v696_v4 }
  0xa9   :  { %825 = vst [vmem:[%s1881_s3 + $0x38] sm:$0xff] %v697_v5  ;;  %v448_v6 = vpop.f32.mrf.mxu2 }
  0xaa   :  { %v449_v7 = vadd.f32 %v448_v6, %v1282_v22  ;;  %v617_v8 = vpop.f32.mrf.mxu3 }
  0xab   :  { %v618_v11 = vadd.f32 %v617_v8, %v1284_v23  ;;  %v371_v12 = vpop.f32.mrf.mxu0 }
  0xac   :  { %v760_v13 = vmax.f32 %v449_v7, 0.0  ;;  %v372_v14 = vadd.f32 %v371_v12, %v1282_v22  ;;  %v540_v15 = vpop.f32.mrf.mxu1 }
  0xad   :  { %v761_v16 = vmax.f32 %v618_v11, 0.0  ;;  %v541_v17 = vadd.f32 %v540_v15, %v1284_v23 }
  0xae   :  { %888 = vst [vmem:[%s1881_s3 + $0x230] sm:$0xff] %v760_v13  ;;  %v698_v18 = vmax.f32 %v372_v14, 0.0  ;;  %1088 = vmatmul.msk.bf16.gmra.mxu0 %vm250_vm1, %v1152_v9  ;;  %1104 = vmatmul.msk.bf16.gmra.mxu2 %vm250_vm1, %v1168_v10 }
  0xaf   :  { %889 = vst [vmem:[%s1881_s3 + $0x238] sm:$0xff] %v761_v16  ;;  %v699_v19 = vmax.f32 %v541_v17, 0.0  ;;  %1120 = vmatmul.msk.bf16.gmra.mxu1 %vm250_vm1, %v1152_v9  ;;  %1136 = vmatmul.msk.bf16.gmra.mxu3 %vm250_vm1, %v1168_v10 }
  0xb0   :  { %826 = vst [vmem:[%s1881_s3 + $0x40] sm:$0xff] %v698_v18 }
  0xb1   :  { %827 = vst [vmem:[%s1881_s3 + $0x48] sm:$0xff] %v699_v19  ;;  %v451_v20 = vpop.f32.mrf.mxu2 }
  0xb2   :  { %v452_v21 = vadd.f32 %v451_v20, %v1282_v22  ;;  %v620_v24 = vpop.f32.mrf.mxu3 }
  0xb3   :  { %v621_v25 = vadd.f32 %v620_v24, %v1284_v23  ;;  %v373_v26 = vpop.f32.mrf.mxu0 }
  0xb4   :  { %v762_v27 = vmax.f32 %v452_v21, 0.0  ;;  %v374_v28 = vadd.f32 %v373_v26, %v1282_v22  ;;  %v542_v29 = vpop.f32.mrf.mxu1 }
  0xb5   :  { %v763_v30 = vmax.f32 %v621_v25, 0.0  ;;  %v543_v31 = vadd.f32 %v542_v29, %v1284_v23 }
  0xb6   :  { %890 = vst [vmem:[%s1881_s3 + $0x240] sm:$0xff] %v762_v27  ;;  %v700_v32 = vmax.f32 %v374_v28, 0.0  ;;  %v1155_v27 = vld [vmem:[%s1879_s0 + $0x68] sm:$0xff] }
  0xb7   :  { %891 = vst [vmem:[%s1881_s3 + $0x248] sm:$0xff] %v763_v30  ;;  %v701_v33 = vmax.f32 %v543_v31, 0.0  ;;  %v1171_v28 = vld [vmem:[%s1879_s0 + $0xe8] sm:$0xff] }
  0xb8   :  { %828 = vst [vmem:[%s1881_s3 + $0x50] sm:$0xff] %v700_v32 }
  0xb9   :  { %829 = vst [vmem:[%s1881_s3 + $0x58] sm:$0xff] %v701_v33  ;;  %v453_v34 = vpop.f32.mrf.mxu2 }
  0xba   :  { %v454_v35 = vadd.f32 %v453_v34, %v1282_v22  ;;  %v622_v36 = vpop.f32.mrf.mxu3 }
  0xbb   :  { %v623_v39 = vadd.f32 %v622_v36, %v1284_v23  ;;  %v376_v40 = vpop.f32.mrf.mxu0 }
  0xbc   :  { %v764_v41 = vmax.f32 %v454_v35, 0.0  ;;  %v377_v42 = vadd.f32 %v376_v40, %v1282_v22  ;;  %v545_v43 = vpop.f32.mrf.mxu1 }
  0xbd   :  { %v765_v44 = vmax.f32 %v623_v39, 0.0  ;;  %v546_v45 = vadd.f32 %v545_v43, %v1284_v23 }
  0xbe   :  { %892 = vst [vmem:[%s1881_s3 + $0x250] sm:$0xff] %v764_v41  ;;  %v702_v46 = vmax.f32 %v377_v42, 0.0  ;;  %1089 = vmatmul.msk.bf16.gmra.mxu0 %vm250_vm1, %v1153_v37  ;;  %1105 = vmatmul.msk.bf16.gmra.mxu2 %vm250_vm1, %v1169_v38 }
  0xbf   :  { %893 = vst [vmem:[%s1881_s3 + $0x258] sm:$0xff] %v765_v44  ;;  %v703_v47 = vmax.f32 %v546_v45, 0.0  ;;  %1121 = vmatmul.msk.bf16.gmra.mxu1 %vm250_vm1, %v1153_v37  ;;  %1137 = vmatmul.msk.bf16.gmra.mxu3 %vm250_vm1, %v1169_v38 }
  0xc0   :  { %830 = vst [vmem:[%s1881_s3 + $0x60] sm:$0xff] %v702_v46 }
  0xc1   :  { %831 = vst [vmem:[%s1881_s3 + $0x68] sm:$0xff] %v703_v47  ;;  %v456_v48 = vpop.f32.mrf.mxu2 }
  0xc2   :  { %v457_v49 = vadd.f32 %v456_v48, %v1282_v22  ;;  %v625_v50 = vpop.f32.mrf.mxu3 }
  0xc3   :  { %v626_v51 = vadd.f32 %v625_v50, %v1284_v23  ;;  %v378_v52 = vpop.f32.mrf.mxu0 }
  0xc4   :  { %v766_v53 = vmax.f32 %v457_v49, 0.0  ;;  %v379_v54 = vadd.f32 %v378_v52, %v1282_v22  ;;  %v547_v55 = vpop.f32.mrf.mxu1 }
  0xc5   :  { %v767_v56 = vmax.f32 %v626_v51, 0.0  ;;  %v548_v57 = vadd.f32 %v547_v55, %v1284_v23 }
  0xc6   :  { %894 = vst [vmem:[%s1881_s3 + $0x260] sm:$0xff] %v766_v53  ;;  %v704_v58 = vmax.f32 %v379_v54, 0.0  ;;  %v1156_v53 = vld [vmem:[%s1879_s0 + $0x70] sm:$0xff] }
  0xc7   :  { %895 = vst [vmem:[%s1881_s3 + $0x268] sm:$0xff] %v767_v56  ;;  %v705_v59 = vmax.f32 %v548_v57, 0.0  ;;  %v1172_v54 = vld [vmem:[%s1879_s0 + $0xf0] sm:$0xff] }
  0xc8   :  { %832 = vst [vmem:[%s1881_s3 + $0x70] sm:$0xff] %v704_v58 }
  0xc9   :  { %833 = vst [vmem:[%s1881_s3 + $0x78] sm:$0xff] %v705_v59  ;;  %v458_v60 = vpop.f32.mrf.mxu2 }
  0xca   :  { %v459_v61 = vadd.f32 %v458_v60, %v1282_v22  ;;  %v627_v62 = vpop.f32.mrf.mxu3 }
  0xcb   :  { %v628_v1 = vadd.f32 %v627_v62, %v1284_v23  ;;  %v381_v2 = vpop.f32.mrf.mxu0 }
  0xcc   :  { %v768_v3 = vmax.f32 %v459_v61, 0.0  ;;  %v382_v4 = vadd.f32 %v381_v2, %v1282_v22  ;;  %v550_v5 = vpop.f32.mrf.mxu1 }
  0xcd   :  { %v769_v6 = vmax.f32 %v628_v1, 0.0  ;;  %v551_v7 = vadd.f32 %v550_v5, %v1284_v23 }
  0xce   :  { %896 = vst [vmem:[%s1881_s3 + $0x270] sm:$0xff] %v768_v3  ;;  %v706_v8 = vmax.f32 %v382_v4, 0.0  ;;  %1090 = vmatmul.msk.bf16.gmra.mxu0 %vm250_vm1, %v1154_v63  ;;  %1106 = vmatmul.msk.bf16.gmra.mxu2 %vm250_vm1, %v1170_v0 }
  0xcf   :  { %897 = vst [vmem:[%s1881_s3 + $0x278] sm:$0xff] %v769_v6  ;;  %v707_v9 = vmax.f32 %v551_v7, 0.0  ;;  %1122 = vmatmul.msk.bf16.gmra.mxu1 %vm250_vm1, %v1154_v63  ;;  %1138 = vmatmul.msk.bf16.gmra.mxu3 %vm250_vm1, %v1170_v0 }
  0xd0   :  { %834 = vst [vmem:[%s1881_s3 + $0x80] sm:$0xff] %v706_v8 }
  0xd1   :  { %835 = vst [vmem:[%s1881_s3 + $0x88] sm:$0xff] %v707_v9  ;;  %v461_v10 = vpop.f32.mrf.mxu2 }
  0xd2   :  { %v462_v11 = vadd.f32 %v461_v10, %v1282_v22  ;;  %v630_v12 = vpop.f32.mrf.mxu3 }
  0xd3   :  { %v631_v13 = vadd.f32 %v630_v12, %v1284_v23  ;;  %v383_v14 = vpop.f32.mrf.mxu0 }
  0xd4   :  { %v770_v15 = vmax.f32 %v462_v11, 0.0  ;;  %v384_v16 = vadd.f32 %v383_v14, %v1282_v22  ;;  %v552_v17 = vpop.f32.mrf.mxu1 }
  0xd5   :  { %v771_v18 = vmax.f32 %v631_v13, 0.0  ;;  %v553_v19 = vadd.f32 %v552_v17, %v1284_v23 }
  0xd6   :  { %898 = vst [vmem:[%s1881_s3 + $0x280] sm:$0xff] %v770_v15  ;;  %v708_v20 = vmax.f32 %v384_v16, 0.0  ;;  %v1157_v15 = vld [vmem:[%s1879_s0 + $0x78] sm:$0xff] }
  0xd7   :  { %899 = vst [vmem:[%s1881_s3 + $0x288] sm:$0xff] %v771_v18  ;;  %v709_v21 = vmax.f32 %v553_v19, 0.0  ;;  %v1173_v16 = vld [vmem:[%s1879_s0 + $0xf8] sm:$0xff] }
  0xd8   :  { %836 = vst [vmem:[%s1881_s3 + $0x90] sm:$0xff] %v708_v20 }
  0xd9   :  { %837 = vst [vmem:[%s1881_s3 + $0x98] sm:$0xff] %v709_v21  ;;  %v463_v24 = vpop.f32.mrf.mxu2 }
  0xda   :  { %v464_v25 = vadd.f32 %v463_v24, %v1282_v22  ;;  %v632_v26 = vpop.f32.mrf.mxu3 }
  0xdb   :  { %v633_v29 = vadd.f32 %v632_v26, %v1284_v23  ;;  %v386_v30 = vpop.f32.mrf.mxu0 }
  0xdc   :  { %v772_v31 = vmax.f32 %v464_v25, 0.0  ;;  %v387_v32 = vadd.f32 %v386_v30, %v1282_v22  ;;  %v555_v33 = vpop.f32.mrf.mxu1 }
  0xdd   :  { %v773_v34 = vmax.f32 %v633_v29, 0.0  ;;  %v556_v35 = vadd.f32 %v555_v33, %v1284_v23 }
  0xde   :  { %900 = vst [vmem:[%s1881_s3 + $0x290] sm:$0xff] %v772_v31  ;;  %v710_v36 = vmax.f32 %v387_v32, 0.0  ;;  %1091 = vmatmul.msk.bf16.gmra.mxu0 %vm250_vm1, %v1155_v27  ;;  %1107 = vmatmul.msk.bf16.gmra.mxu2 %vm250_vm1, %v1171_v28 }
  0xdf   :  { %901 = vst [vmem:[%s1881_s3 + $0x298] sm:$0xff] %v773_v34  ;;  %v711_v37 = vmax.f32 %v556_v35, 0.0  ;;  %1123 = vmatmul.msk.bf16.gmra.mxu1 %vm250_vm1, %v1155_v27  ;;  %1139 = vmatmul.msk.bf16.gmra.mxu3 %vm250_vm1, %v1171_v28 }
  0xe0   :  { %838 = vst [vmem:[%s1881_s3 + $0xa0] sm:$0xff] %v710_v36 }
  0xe1   :  { %839 = vst [vmem:[%s1881_s3 + $0xa8] sm:$0xff] %v711_v37  ;;  %v466_v38 = vpop.f32.mrf.mxu2 }
  0xe2   :  { %v467_v39 = vadd.f32 %v466_v38, %v1282_v22  ;;  %v635_v40 = vpop.f32.mrf.mxu3 }
  0xe3   :  { %v636_v41 = vadd.f32 %v635_v40, %v1284_v23  ;;  %v388_v42 = vpop.f32.mrf.mxu0 }
  0xe4   :  { %v774_v43 = vmax.f32 %v467_v39, 0.0  ;;  %v389_v44 = vadd.f32 %v388_v42, %v1282_v22  ;;  %v557_v45 = vpop.f32.mrf.mxu1 }
  0xe5   :  { %v775_v46 = vmax.f32 %v636_v41, 0.0  ;;  %v558_v47 = vadd.f32 %v557_v45, %v1284_v23 }
  0xe6   :  { %902 = vst [vmem:[%s1881_s3 + $0x2a0] sm:$0xff] %v774_v43  ;;  %v712_v48 = vmax.f32 %v389_v44, 0.0 }
  0xe7   :  { %903 = vst [vmem:[%s1881_s3 + $0x2a8] sm:$0xff] %v775_v46  ;;  %v713_v49 = vmax.f32 %v558_v47, 0.0 }
  0xe8   :  { %840 = vst [vmem:[%s1881_s3 + $0xb0] sm:$0xff] %v712_v48 }
  0xe9   :  { %841 = vst [vmem:[%s1881_s3 + $0xb8] sm:$0xff] %v713_v49  ;;  %v468_v50 = vpop.f32.mrf.mxu2 }
  0xea   :  { %v469_v51 = vadd.f32 %v468_v50, %v1282_v22  ;;  %v637_v52 = vpop.f32.mrf.mxu3 }
  0xeb   :  { %v638_v55 = vadd.f32 %v637_v52, %v1284_v23  ;;  %v391_v56 = vpop.f32.mrf.mxu0 }
  0xec   :  { %v776_v57 = vmax.f32 %v469_v51, 0.0  ;;  %v392_v58 = vadd.f32 %v391_v56, %v1282_v22  ;;  %v560_v59 = vpop.f32.mrf.mxu1 }
  0xed   :  { %v777_v60 = vmax.f32 %v638_v55, 0.0  ;;  %v561_v61 = vadd.f32 %v560_v59, %v1284_v23 }
  0xee   :  { %904 = vst [vmem:[%s1881_s3 + $0x2b0] sm:$0xff] %v776_v57  ;;  %v714_v62 = vmax.f32 %v392_v58, 0.0  ;;  %1092 = vmatmul.msk.bf16.gmra.mxu0 %vm250_vm1, %v1156_v53  ;;  %1108 = vmatmul.msk.bf16.gmra.mxu2 %vm250_vm1, %v1172_v54 }
  0xef   :  { %905 = vst [vmem:[%s1881_s3 + $0x2b8] sm:$0xff] %v777_v60  ;;  %v715_v63 = vmax.f32 %v561_v61, 0.0  ;;  %1124 = vmatmul.msk.bf16.gmra.mxu1 %vm250_vm1, %v1156_v53  ;;  %1140 = vmatmul.msk.bf16.gmra.mxu3 %vm250_vm1, %v1172_v54 }
  0xf0   :  { %842 = vst [vmem:[%s1881_s3 + $0xc0] sm:$0xff] %v714_v62 }
  0xf1   :  { %843 = vst [vmem:[%s1881_s3 + $0xc8] sm:$0xff] %v715_v63  ;;  %v471_v0 = vpop.f32.mrf.mxu2 }
  0xf2   :  { %v472_v1 = vadd.f32 %v471_v0, %v1282_v22  ;;  %v640_v2 = vpop.f32.mrf.mxu3 }
  0xf3   :  { %v641_v3 = vadd.f32 %v640_v2, %v1284_v23  ;;  %v393_v4 = vpop.f32.mrf.mxu0 }
  0xf4   :  { %v778_v5 = vmax.f32 %v472_v1, 0.0  ;;  %v394_v6 = vadd.f32 %v393_v4, %v1282_v22  ;;  %v562_v7 = vpop.f32.mrf.mxu1 }
  0xf5   :  { %v779_v8 = vmax.f32 %v641_v3, 0.0  ;;  %v563_v9 = vadd.f32 %v562_v7, %v1284_v23 }
  0xf6   :  { %906 = vst [vmem:[%s1881_s3 + $0x2c0] sm:$0xff] %v778_v5  ;;  %v716_v10 = vmax.f32 %v394_v6, 0.0 }
  0xf7   :  { %907 = vst [vmem:[%s1881_s3 + $0x2c8] sm:$0xff] %v779_v8  ;;  %v717_v11 = vmax.f32 %v563_v9, 0.0 }
  0xf8   :  { %844 = vst [vmem:[%s1881_s3 + $0xd0] sm:$0xff] %v716_v10 }
  0xf9   :  { %845 = vst [vmem:[%s1881_s3 + $0xd8] sm:$0xff] %v717_v11  ;;  %v473_v12 = vpop.f32.mrf.mxu2 }
  0xfa   :  { %v474_v13 = vadd.f32 %v473_v12, %v1282_v22  ;;  %v642_v14 = vpop.f32.mrf.mxu3 }
  0xfb   :  { %v643_v17 = vadd.f32 %v642_v14, %v1284_v23  ;;  %v396_v18 = vpop.f32.mrf.mxu0 }
  0xfc   :  { %v780_v19 = vmax.f32 %v474_v13, 0.0  ;;  %v397_v20 = vadd.f32 %v396_v18, %v1282_v22  ;;  %v565_v21 = vpop.f32.mrf.mxu1 }
  0xfd   :  { %v781_v24 = vmax.f32 %v643_v17, 0.0  ;;  %v566_v25 = vadd.f32 %v565_v21, %v1284_v23 }
  0xfe   :  { %908 = vst [vmem:[%s1881_s3 + $0x2d0] sm:$0xff] %v780_v19  ;;  %v718_v26 = vmax.f32 %v397_v20, 0.0  ;;  %1093 = vmatmul.msk.bf16.gmra.mxu0 %vm250_vm1, %v1157_v15  ;;  %1109 = vmatmul.msk.bf16.gmra.mxu2 %vm250_vm1, %v1173_v16 }
  0xff   :  { %909 = vst [vmem:[%s1881_s3 + $0x2d8] sm:$0xff] %v781_v24  ;;  %v719_v27 = vmax.f32 %v566_v25, 0.0  ;;  %1125 = vmatmul.msk.bf16.gmra.mxu1 %vm250_vm1, %v1157_v15  ;;  %1141 = vmatmul.msk.bf16.gmra.mxu3 %vm250_vm1, %v1173_v16 }
 0x100   :  { %846 = vst [vmem:[%s1881_s3 + $0xe0] sm:$0xff] %v718_v26 }
 0x101   :  { %847 = vst [vmem:[%s1881_s3 + $0xe8] sm:$0xff] %v719_v27  ;;  %v476_v28 = vpop.f32.mrf.mxu2 }
 0x102   :  { %v477_v29 = vadd.f32 %v476_v28, %v1282_v22  ;;  %v645_v30 = vpop.f32.mrf.mxu3 }
 0x103   :  { %v646_v31 = vadd.f32 %v645_v30, %v1284_v23  ;;  %v398_v32 = vpop.f32.mrf.mxu0 }
 0x104   :  { %v782_v33 = vmax.f32 %v477_v29, 0.0  ;;  %v399_v34 = vadd.f32 %v398_v32, %v1282_v22  ;;  %v567_v35 = vpop.f32.mrf.mxu1 }
 0x105   :  { %v783_v36 = vmax.f32 %v646_v31, 0.0  ;;  %v568_v37 = vadd.f32 %v567_v35, %v1284_v23 }
 0x106   :  { %910 = vst [vmem:[%s1881_s3 + $0x2e0] sm:$0xff] %v782_v33  ;;  %v720_v38 = vmax.f32 %v399_v34, 0.0 }
 0x107   :  { %911 = vst [vmem:[%s1881_s3 + $0x2e8] sm:$0xff] %v783_v36  ;;  %v721_v39 = vmax.f32 %v568_v37, 0.0 }
 0x108   :  { %848 = vst [vmem:[%s1881_s3 + $0xf0] sm:$0xff] %v720_v38 }
 0x109   :  { %849 = vst [vmem:[%s1881_s3 + $0xf8] sm:$0xff] %v721_v39  ;;  %v478_v40 = vpop.f32.mrf.mxu2 }
 0x10a   :  { %v479_v41 = vadd.f32 %v478_v40, %v1282_v22  ;;  %v647_v42 = vpop.f32.mrf.mxu3 }
 0x10b   :  { %v648_v43 = vadd.f32 %v647_v42, %v1284_v23  ;;  %v401_v44 = vpop.f32.mrf.mxu0 }
 0x10c   :  { %v784_v45 = vmax.f32 %v479_v41, 0.0  ;;  %v402_v46 = vadd.f32 %v401_v44, %v1282_v22  ;;  %v570_v47 = vpop.f32.mrf.mxu1 }
 0x10d   :  { %v785_v48 = vmax.f32 %v648_v43, 0.0  ;;  %v571_v49 = vadd.f32 %v570_v47, %v1284_v23 }
 0x10e   :  { %912 = vst [vmem:[%s1881_s3 + $0x2f0] sm:$0xff] %v784_v45  ;;  %v722_v50 = vmax.f32 %v402_v46, 0.0 }
 0x10f   :  { %913 = vst [vmem:[%s1881_s3 + $0x2f8] sm:$0xff] %v785_v48  ;;  %v723_v51 = vmax.f32 %v571_v49, 0.0 }
 0x110   :  { %850 = vst [vmem:[%s1881_s3 + $0x100] sm:$0xff] %v722_v50 }
 0x111   :  { %851 = vst [vmem:[%s1881_s3 + $0x108] sm:$0xff] %v723_v51  ;;  %v481_v52 = vpop.f32.mrf.mxu2 }
 0x112   :  { %v482_v53 = vadd.f32 %v481_v52, %v1282_v22  ;;  %v650_v54 = vpop.f32.mrf.mxu3 }
 0x113   :  { %v651_v55 = vadd.f32 %v650_v54, %v1284_v23  ;;  %v403_v56 = vpop.f32.mrf.mxu0 }
 0x114   :  { %v786_v57 = vmax.f32 %v482_v53, 0.0  ;;  %v404_v58 = vadd.f32 %v403_v56, %v1282_v22  ;;  %v572_v59 = vpop.f32.mrf.mxu1 }
 0x115   :  { %v787_v60 = vmax.f32 %v651_v55, 0.0  ;;  %v573_v61 = vadd.f32 %v572_v59, %v1284_v23 }
 0x116   :  { %914 = vst [vmem:[%s1881_s3 + $0x300] sm:$0xff] %v786_v57  ;;  %v724_v62 = vmax.f32 %v404_v58, 0.0 }
 0x117   :  { %915 = vst [vmem:[%s1881_s3 + $0x308] sm:$0xff] %v787_v60  ;;  %v725_v63 = vmax.f32 %v573_v61, 0.0 }
 0x118   :  { %852 = vst [vmem:[%s1881_s3 + $0x110] sm:$0xff] %v724_v62 }
 0x119   :  { %853 = vst [vmem:[%s1881_s3 + $0x118] sm:$0xff] %v725_v63  ;;  %v483_v0 = vpop.f32.mrf.mxu2 }
 0x11a   :  { %v484_v1 = vadd.f32 %v483_v0, %v1282_v22  ;;  %v652_v2 = vpop.f32.mrf.mxu3 }
 0x11b   :  { %v653_v3 = vadd.f32 %v652_v2, %v1284_v23  ;;  %v406_v4 = vpop.f32.mrf.mxu0 }
 0x11c   :  { %v788_v5 = vmax.f32 %v484_v1, 0.0  ;;  %v407_v6 = vadd.f32 %v406_v4, %v1282_v22  ;;  %v575_v7 = vpop.f32.mrf.mxu1 }
 0x11d   :  { %v789_v8 = vmax.f32 %v653_v3, 0.0  ;;  %v576_v9 = vadd.f32 %v575_v7, %v1284_v23 }
 0x11e   :  { %916 = vst [vmem:[%s1881_s3 + $0x310] sm:$0xff] %v788_v5  ;;  %v726_v10 = vmax.f32 %v407_v6, 0.0 }
 0x11f   :  { %917 = vst [vmem:[%s1881_s3 + $0x318] sm:$0xff] %v789_v8  ;;  %v727_v11 = vmax.f32 %v576_v9, 0.0 }
 0x120   :  { %854 = vst [vmem:[%s1881_s3 + $0x120] sm:$0xff] %v726_v10 }
 0x121   :  { %855 = vst [vmem:[%s1881_s3 + $0x128] sm:$0xff] %v727_v11  ;;  %v486_v12 = vpop.f32.mrf.mxu2 }
 0x122   :  { %v487_v13 = vadd.f32 %v486_v12, %v1282_v22  ;;  %v655_v14 = vpop.f32.mrf.mxu3 }
 0x123   :  { %v656_v15 = vadd.f32 %v655_v14, %v1284_v23  ;;  %v408_v16 = vpop.f32.mrf.mxu0 }
 0x124   :  { %v790_v17 = vmax.f32 %v487_v13, 0.0  ;;  %v409_v18 = vadd.f32 %v408_v16, %v1282_v22  ;;  %v577_v19 = vpop.f32.mrf.mxu1 }
 0x125   :  { %v791_v20 = vmax.f32 %v656_v15, 0.0  ;;  %v578_v21 = vadd.f32 %v577_v19, %v1284_v23 }
 0x126   :  { %918 = vst [vmem:[%s1881_s3 + $0x320] sm:$0xff] %v790_v17  ;;  %v728_v24 = vmax.f32 %v409_v18, 0.0 }
 0x127   :  { %919 = vst [vmem:[%s1881_s3 + $0x328] sm:$0xff] %v791_v20  ;;  %v729_v25 = vmax.f32 %v578_v21, 0.0 }
 0x128   :  { %856 = vst [vmem:[%s1881_s3 + $0x130] sm:$0xff] %v728_v24 }
 0x129   :  { %857 = vst [vmem:[%s1881_s3 + $0x138] sm:$0xff] %v729_v25  ;;  %v488_v26 = vpop.f32.mrf.mxu2 }
 0x12a   :  { %v489_v27 = vadd.f32 %v488_v26, %v1282_v22  ;;  %v657_v28 = vpop.f32.mrf.mxu3 }
 0x12b   :  { %v658_v29 = vadd.f32 %v657_v28, %v1284_v23  ;;  %v411_v30 = vpop.f32.mrf.mxu0 }
 0x12c   :  { %v792_v31 = vmax.f32 %v489_v27, 0.0  ;;  %v412_v32 = vadd.f32 %v411_v30, %v1282_v22  ;;  %v580_v33 = vpop.f32.mrf.mxu1 }
 0x12d   :  { %v793_v34 = vmax.f32 %v658_v29, 0.0  ;;  %v581_v35 = vadd.f32 %v580_v33, %v1284_v23 }
 0x12e   :  { %920 = vst [vmem:[%s1881_s3 + $0x330] sm:$0xff] %v792_v31  ;;  %v730_v36 = vmax.f32 %v412_v32, 0.0 }
 0x12f   :  { %921 = vst [vmem:[%s1881_s3 + $0x338] sm:$0xff] %v793_v34  ;;  %v731_v37 = vmax.f32 %v581_v35, 0.0 }
 0x130   :  { %858 = vst [vmem:[%s1881_s3 + $0x140] sm:$0xff] %v730_v36 }
 0x131   :  { %859 = vst [vmem:[%s1881_s3 + $0x148] sm:$0xff] %v731_v37  ;;  %v491_v38 = vpop.f32.mrf.mxu2 }
 0x132   :  { %v492_v39 = vadd.f32 %v491_v38, %v1282_v22  ;;  %v660_v40 = vpop.f32.mrf.mxu3 }
 0x133   :  { %v661_v41 = vadd.f32 %v660_v40, %v1284_v23  ;;  %v413_v42 = vpop.f32.mrf.mxu0 }
 0x134   :  { %v794_v43 = vmax.f32 %v492_v39, 0.0  ;;  %v414_v44 = vadd.f32 %v413_v42, %v1282_v22  ;;  %v582_v45 = vpop.f32.mrf.mxu1 }
 0x135   :  { %v795_v46 = vmax.f32 %v661_v41, 0.0  ;;  %v583_v47 = vadd.f32 %v582_v45, %v1284_v23 }
 0x136   :  { %922 = vst [vmem:[%s1881_s3 + $0x340] sm:$0xff] %v794_v43  ;;  %v732_v48 = vmax.f32 %v414_v44, 0.0 }
 0x137   :  { %923 = vst [vmem:[%s1881_s3 + $0x348] sm:$0xff] %v795_v46  ;;  %v733_v49 = vmax.f32 %v583_v47, 0.0 }
 0x138   :  { %860 = vst [vmem:[%s1881_s3 + $0x150] sm:$0xff] %v732_v48 }
 0x139   :  { %861 = vst [vmem:[%s1881_s3 + $0x158] sm:$0xff] %v733_v49  ;;  %v493_v50 = vpop.f32.mrf.mxu2 }
 0x13a   :  { %v494_v51 = vadd.f32 %v493_v50, %v1282_v22  ;;  %v662_v52 = vpop.f32.mrf.mxu3 }
 0x13b   :  { %v663_v53 = vadd.f32 %v662_v52, %v1284_v23  ;;  %v416_v54 = vpop.f32.mrf.mxu0 }
 0x13c   :  { %v796_v55 = vmax.f32 %v494_v51, 0.0  ;;  %v417_v56 = vadd.f32 %v416_v54, %v1282_v22  ;;  %v585_v57 = vpop.f32.mrf.mxu1 }
 0x13d   :  { %v797_v58 = vmax.f32 %v663_v53, 0.0  ;;  %v586_v59 = vadd.f32 %v585_v57, %v1284_v23 }
 0x13e   :  { %924 = vst [vmem:[%s1881_s3 + $0x350] sm:$0xff] %v796_v55  ;;  %v734_v60 = vmax.f32 %v417_v56, 0.0 }
 0x13f   :  { %925 = vst [vmem:[%s1881_s3 + $0x358] sm:$0xff] %v797_v58  ;;  %v735_v61 = vmax.f32 %v586_v59, 0.0 }
 0x140   :  { %862 = vst [vmem:[%s1881_s3 + $0x160] sm:$0xff] %v734_v60 }
 0x141   :  { %863 = vst [vmem:[%s1881_s3 + $0x168] sm:$0xff] %v735_v61  ;;  %v496_v62 = vpop.f32.mrf.mxu2 }
 0x142   :  { %v497_v63 = vadd.f32 %v496_v62, %v1282_v22  ;;  %v665_v0 = vpop.f32.mrf.mxu3 }
 0x143   :  { %v666_v1 = vadd.f32 %v665_v0, %v1284_v23  ;;  %v418_v2 = vpop.f32.mrf.mxu0 }
 0x144   :  { %v798_v3 = vmax.f32 %v497_v63, 0.0  ;;  %v419_v4 = vadd.f32 %v418_v2, %v1282_v22  ;;  %v587_v5 = vpop.f32.mrf.mxu1 }
 0x145   :  { %v799_v6 = vmax.f32 %v666_v1, 0.0  ;;  %v588_v7 = vadd.f32 %v587_v5, %v1284_v23 }
 0x146   :  { %926 = vst [vmem:[%s1881_s3 + $0x360] sm:$0xff] %v798_v3  ;;  %v736_v8 = vmax.f32 %v419_v4, 0.0 }
 0x147   :  { %927 = vst [vmem:[%s1881_s3 + $0x368] sm:$0xff] %v799_v6  ;;  %v737_v9 = vmax.f32 %v588_v7, 0.0 }
 0x148   :  { %864 = vst [vmem:[%s1881_s3 + $0x170] sm:$0xff] %v736_v8 }
 0x149   :  { %865 = vst [vmem:[%s1881_s3 + $0x178] sm:$0xff] %v737_v9  ;;  %v498_v10 = vpop.f32.mrf.mxu2 }
 0x14a   :  { %v499_v11 = vadd.f32 %v498_v10, %v1282_v22  ;;  %v667_v12 = vpop.f32.mrf.mxu3 }
 0x14b   :  { %v668_v13 = vadd.f32 %v667_v12, %v1284_v23  ;;  %v421_v14 = vpop.f32.mrf.mxu0 }
 0x14c   :  { %v800_v15 = vmax.f32 %v499_v11, 0.0  ;;  %v422_v16 = vadd.f32 %v421_v14, %v1282_v22  ;;  %v590_v17 = vpop.f32.mrf.mxu1 }
 0x14d   :  { %v801_v18 = vmax.f32 %v668_v13, 0.0  ;;  %v591_v19 = vadd.f32 %v590_v17, %v1284_v23 }
 0x14e   :  { %928 = vst [vmem:[%s1881_s3 + $0x370] sm:$0xff] %v800_v15  ;;  %v738_v20 = vmax.f32 %v422_v16, 0.0 }
 0x14f   :  { %929 = vst [vmem:[%s1881_s3 + $0x378] sm:$0xff] %v801_v18  ;;  %v739_v21 = vmax.f32 %v591_v19, 0.0 }
 0x150   :  { %866 = vst [vmem:[%s1881_s3 + $0x180] sm:$0xff] %v738_v20 }
 0x151   :  { %867 = vst [vmem:[%s1881_s3 + $0x188] sm:$0xff] %v739_v21  ;;  %v501_v24 = vpop.f32.mrf.mxu2 }
 0x152   :  { %v502_v25 = vadd.f32 %v501_v24, %v1282_v22  ;;  %v670_v26 = vpop.f32.mrf.mxu3 }
 0x153   :  { %v671_v27 = vadd.f32 %v670_v26, %v1284_v23  ;;  %v423_v28 = vpop.f32.mrf.mxu0 }
 0x154   :  { %v802_v29 = vmax.f32 %v502_v25, 0.0  ;;  %v424_v30 = vadd.f32 %v423_v28, %v1282_v22  ;;  %v592_v31 = vpop.f32.mrf.mxu1 }
 0x155   :  { %v803_v32 = vmax.f32 %v671_v27, 0.0  ;;  %v593_v33 = vadd.f32 %v592_v31, %v1284_v23 }
 0x156   :  { %930 = vst [vmem:[%s1881_s3 + $0x380] sm:$0xff] %v802_v29  ;;  %v740_v34 = vmax.f32 %v424_v30, 0.0 }
 0x157   :  { %931 = vst [vmem:[%s1881_s3 + $0x388] sm:$0xff] %v803_v32  ;;  %v741_v35 = vmax.f32 %v593_v33, 0.0 }
 0x158   :  { %868 = vst [vmem:[%s1881_s3 + $0x190] sm:$0xff] %v740_v34 }
 0x159   :  { %869 = vst [vmem:[%s1881_s3 + $0x198] sm:$0xff] %v741_v35  ;;  %v503_v36 = vpop.f32.mrf.mxu2 }
 0x15a   :  { %v504_v37 = vadd.f32 %v503_v36, %v1282_v22  ;;  %v672_v38 = vpop.f32.mrf.mxu3 }
 0x15b   :  { %v673_v39 = vadd.f32 %v672_v38, %v1284_v23  ;;  %v426_v40 = vpop.f32.mrf.mxu0 }
 0x15c   :  { %v804_v41 = vmax.f32 %v504_v37, 0.0  ;;  %v427_v42 = vadd.f32 %v426_v40, %v1282_v22  ;;  %v595_v43 = vpop.f32.mrf.mxu1 }
 0x15d   :  { %v805_v44 = vmax.f32 %v673_v39, 0.0  ;;  %v596_v45 = vadd.f32 %v595_v43, %v1284_v23 }
 0x15e   :  { %932 = vst [vmem:[%s1881_s3 + $0x390] sm:$0xff] %v804_v41  ;;  %v742_v46 = vmax.f32 %v427_v42, 0.0 }
 0x15f   :  { %933 = vst [vmem:[%s1881_s3 + $0x398] sm:$0xff] %v805_v44  ;;  %v743_v47 = vmax.f32 %v596_v45, 0.0 }
 0x160   :  { %870 = vst [vmem:[%s1881_s3 + $0x1a0] sm:$0xff] %v742_v46 }
 0x161   :  { %871 = vst [vmem:[%s1881_s3 + $0x1a8] sm:$0xff] %v743_v47  ;;  %v506_v48 = vpop.f32.mrf.mxu2 }
 0x162   :  { %v507_v49 = vadd.f32 %v506_v48, %v1282_v22  ;;  %v675_v50 = vpop.f32.mrf.mxu3 }
 0x163   :  { %v676_v51 = vadd.f32 %v675_v50, %v1284_v23  ;;  %v428_v52 = vpop.f32.mrf.mxu0 }
 0x164   :  { %v806_v53 = vmax.f32 %v507_v49, 0.0  ;;  %v429_v54 = vadd.f32 %v428_v52, %v1282_v22  ;;  %v597_v55 = vpop.f32.mrf.mxu1 }
 0x165   :  { %v807_v56 = vmax.f32 %v676_v51, 0.0  ;;  %v598_v57 = vadd.f32 %v597_v55, %v1284_v23 }
 0x166   :  { %934 = vst [vmem:[%s1881_s3 + $0x3a0] sm:$0xff] %v806_v53  ;;  %v744_v58 = vmax.f32 %v429_v54, 0.0 }
 0x167   :  { %935 = vst [vmem:[%s1881_s3 + $0x3a8] sm:$0xff] %v807_v56  ;;  %v745_v59 = vmax.f32 %v598_v57, 0.0 }
 0x168   :  { %872 = vst [vmem:[%s1881_s3 + $0x1b0] sm:$0xff] %v744_v58 }
 0x169   :  { %873 = vst [vmem:[%s1881_s3 + $0x1b8] sm:$0xff] %v745_v59  ;;  %v508_v60 = vpop.f32.mrf.mxu2 }
 0x16a   :  { %v509_v61 = vadd.f32 %v508_v60, %v1282_v22  ;;  %v677_v62 = vpop.f32.mrf.mxu3 }
 0x16b   :  { %v678_v63 = vadd.f32 %v677_v62, %v1284_v23  ;;  %v431_v0 = vpop.f32.mrf.mxu0 }
 0x16c   :  { %v808_v1 = vmax.f32 %v509_v61, 0.0  ;;  %v432_v2 = vadd.f32 %v431_v0, %v1282_v22  ;;  %v600_v3 = vpop.f32.mrf.mxu1 }
 0x16d   :  { %v809_v4 = vmax.f32 %v678_v63, 0.0  ;;  %v601_v5 = vadd.f32 %v600_v3, %v1284_v23 }
 0x16e   :  { %936 = vst [vmem:[%s1881_s3 + $0x3b0] sm:$0xff] %v808_v1  ;;  %v746_v6 = vmax.f32 %v432_v2, 0.0 }
 0x16f   :  { %937 = vst [vmem:[%s1881_s3 + $0x3b8] sm:$0xff] %v809_v4  ;;  %v747_v7 = vmax.f32 %v601_v5, 0.0 }
 0x170   :  { %874 = vst [vmem:[%s1881_s3 + $0x1c0] sm:$0xff] %v746_v6 }
 0x171   :  { %875 = vst [vmem:[%s1881_s3 + $0x1c8] sm:$0xff] %v747_v7  ;;  %v511_v8 = vpop.f32.mrf.mxu2 }
 0x172   :  { %v512_v9 = vadd.f32 %v511_v8, %v1282_v22  ;;  %v680_v10 = vpop.f32.mrf.mxu3 }
 0x173   :  { %v681_v11 = vadd.f32 %v680_v10, %v1284_v23  ;;  %v433_v12 = vpop.f32.mrf.mxu0 }
 0x174   :  { %v810_v13 = vmax.f32 %v512_v9, 0.0  ;;  %v434_v14 = vadd.f32 %v433_v12, %v1282_v22  ;;  %v602_v15 = vpop.f32.mrf.mxu1 }
 0x175   :  { %v811_v16 = vmax.f32 %v681_v11, 0.0  ;;  %v603_v17 = vadd.f32 %v602_v15, %v1284_v23 }
 0x176   :  { %938 = vst [vmem:[%s1881_s3 + $0x3c0] sm:$0xff] %v810_v13  ;;  %v748_v18 = vmax.f32 %v434_v14, 0.0 }
 0x177   :  { %939 = vst [vmem:[%s1881_s3 + $0x3c8] sm:$0xff] %v811_v16  ;;  %v749_v19 = vmax.f32 %v603_v17, 0.0 }
 0x178   :  { %876 = vst [vmem:[%s1881_s3 + $0x1d0] sm:$0xff] %v748_v18 }
 0x179   :  { %877 = vst [vmem:[%s1881_s3 + $0x1d8] sm:$0xff] %v749_v19  ;;  %v513_v20 = vpop.f32.mrf.mxu2 }
 0x17a   :  { %v514_v21 = vadd.f32 %v513_v20, %v1282_v22  ;;  %v682_v24 = vpop.f32.mrf.mxu3 }
 0x17b   :  { %v683_v25 = vadd.f32 %v682_v24, %v1284_v23  ;;  %v436_v26 = vpop.f32.mrf.mxu0 }
 0x17c   :  { %v812_v27 = vmax.f32 %v514_v21, 0.0  ;;  %v437_v28 = vadd.f32 %v436_v26, %v1282_v22  ;;  %v605_v29 = vpop.f32.mrf.mxu1 }
 0x17d   :  { %v813_v30 = vmax.f32 %v683_v25, 0.0  ;;  %v606_v31 = vadd.f32 %v605_v29, %v1284_v23 }
 0x17e   :  { %940 = vst [vmem:[%s1881_s3 + $0x3d0] sm:$0xff] %v812_v27  ;;  %v750_v32 = vmax.f32 %v437_v28, 0.0 }
 0x17f   :  { %941 = vst [vmem:[%s1881_s3 + $0x3d8] sm:$0xff] %v813_v30  ;;  %v751_v33 = vmax.f32 %v606_v31, 0.0 }
 0x180   :  { %878 = vst [vmem:[%s1881_s3 + $0x1e0] sm:$0xff] %v750_v32 }
 0x181   :  { %879 = vst [vmem:[%s1881_s3 + $0x1e8] sm:$0xff] %v751_v33  ;;  %v516_v34 = vpop.f32.mrf.mxu2 }
 0x182   :  { %v517_v35 = vadd.f32 %v516_v34, %v1282_v22  ;;  %v685_v36 = vpop.f32.mrf.mxu3 }
 0x183   :  { %v686_v37 = vadd.f32 %v685_v36, %v1284_v23  ;;  %v438_v38 = vpop.f32.mrf.mxu0 }
 0x184   :  { %v814_v39 = vmax.f32 %v517_v35, 0.0  ;;  %v439_v40 = vadd.f32 %v438_v38, %v1282_v22  ;;  %v607_v41 = vpop.f32.mrf.mxu1 }
 0x185   :  { %v815_v42 = vmax.f32 %v686_v37, 0.0  ;;  %v608_v43 = vadd.f32 %v607_v41, %v1284_v23 }
 0x186   :  { %942 = vst [vmem:[%s1881_s3 + $0x3e0] sm:$0xff] %v814_v39  ;;  %v752_v44 = vmax.f32 %v439_v40, 0.0 }
 0x187   :  { %943 = vst [vmem:[%s1881_s3 + $0x3e8] sm:$0xff] %v815_v42  ;;  %v753_v45 = vmax.f32 %v608_v43, 0.0 }
 0x188   :  { %880 = vst [vmem:[%s1881_s3 + $0x1f0] sm:$0xff] %v752_v44 }
 0x189   :  { %881 = vst [vmem:[%s1881_s3 + $0x1f8] sm:$0xff] %v753_v45  ;;  %v518_v46 = vpop.f32.mrf.mxu2 }
 0x18a   :  { %v519_v47 = vadd.f32 %v518_v46, %v1282_v22  ;;  %v687_v48 = vpop.f32.mrf.mxu3 }
 0x18b   :  { %v688_v49 = vadd.f32 %v687_v48, %v1284_v23 }
 0x18c   :  { %v816_v50 = vmax.f32 %v519_v47, 0.0 }
 0x18d   :  { %v817_v51 = vmax.f32 %v688_v49, 0.0 }
 0x18e   :  { %944 = vst [vmem:[%s1881_s3 + $0x3f0] sm:$0xff] %v816_v50 }
 0x18f   :  { %945 = vst [vmem:[%s1881_s3 + $0x3f8] sm:$0xff] %v817_v51 }

// kernel: aspp_deformable_v2.6
= control target key start
LH: loop header
LB: loop body
LE: loop exit
PB: predicated region body
PF: predicated region fallthrough
CT: control target
= control target key end

     0   :  { %vm299_vm0 = vcmask 1041408   ;;  %vm223_vm1 = vcmask 293888   ;;  %s1539_s1 = inlined_call_operand.vmem [shape: bf16[36,256], index: 1, kind: input, shape index: {}]   ;;  %s1540_s0 = inlined_call_operand.vmem [shape: bf16[392,36], index: 0, kind: input, shape index: {}]   ;;  %s1541_s2 = inlined_call_operand.vmem [shape: f32[1,256], index: 2, kind: input, shape index: {}]   ;;  %s1542_s3 = inlined_call_operand.vmem [shape: f32[392,256], index: 3, kind: output, shape index: {}]  }
   0x1   :  { %v68_v0 = vld [vmem:[%s1539_s1 + $0x20] sm:$0x33]  ;;  %v878_v3 = vld [vmem:[%s1539_s1 + $0x10] sm:$0xf]  ;;  %v961_v6 = vld [vmem:[%s1539_s1 + $0x14] sm:$0xf0] }
   0x2   :  { %v211_v1 = vunpack.c.l.b16 %v68_v0  ;;  %v212_v2 = vunpack.c.h.b16 %v68_v0  ;;  %v960_v7 = vld [vmem:[%s1539_s1 + $0x14] sm:$0xf]  ;;  %v880_v8 = vld [vmem:[%s1539_s1 + $0x18] sm:$0xf0]  ;;  %v879_v11 = vor.u32 %v961_v6, %v878_v3  ;;  %v870_v13 = vld [vmem:[%s1539_s1] sm:$0xf] }
   0x3   :  { %v883_v12 = vor.u32 %v960_v7, %v880_v8  ;;  %v959_v14 = vld [vmem:[%s1539_s1 + $0x4] sm:$0xf0]  ;;  %v958_v15 = vld [vmem:[%s1539_s1 + $0x4] sm:$0xf]  ;;  %v872_v16 = vld [vmem:[%s1539_s1 + $0x8] sm:$0xf0] }
   0x4   :  { %v217_v4 = vpack.c.b16 %v211_v1, %v211_v1  ;;  %v218_v5 = vpack.c.b16 %v212_v2, %v212_v2  ;;  %v871_v17 = vor.u32 %v959_v14, %v870_v13  ;;  %v875_v18 = vor.u32 %v958_v15, %v872_v16  ;;  %v934_v19 = vld [vmem:[%s1540_s0] sm:$0xff]  ;;  %v947_v20 = vld [vmem:[%s1540_s0 + $0x68] sm:$0xff]  ;;  %v948_v22 = vld [vmem:[%s1540_s0 + $0x70] sm:$0xff] }
   0x5   :  { %v935_v21 = vld [vmem:[%s1540_s0 + $0x8] sm:$0xff]  ;;  %v936_v23 = vld [vmem:[%s1540_s0 + $0x10] sm:$0xff]  ;;  %v949_v24 = vld [vmem:[%s1540_s0 + $0x78] sm:$0xff] }
   0x6   :  { %v301_v9 = vsel %vm299_vm0, %v217_v4, 0  ;;  %v304_v10 = vsel %vm299_vm0, %v218_v5, 0  ;;  %v937_v25 = vld [vmem:[%s1540_s0 + $0x18] sm:$0xff]  ;;  %v950_v26 = vld [vmem:[%s1540_s0 + $0x80] sm:$0xff]  ;;  %v951_v28 = vld [vmem:[%s1540_s0 + $0x88] sm:$0xff] }
   0x7   :  { %311 = vmatpush.bf16.msra.mxu0 %v301_v9  ;;  %444 = vmatpush.bf16.msra.mxu1 %v304_v10  ;;  %v938_v27 = vld [vmem:[%s1540_s0 + $0x20] sm:$0xff]  ;;  %v939_v29 = vld [vmem:[%s1540_s0 + $0x28] sm:$0xff]  ;;  %v952_v30 = vld [vmem:[%s1540_s0 + $0x90] sm:$0xff] }
   0x8   :  { %962 = vmatpush.bf16.msra.mxu2 %v301_v9  ;;  %965 = vmatpush.bf16.msra.mxu3 %v304_v10  ;;  %v940_v31 = vld [vmem:[%s1540_s0 + $0x30] sm:$0xff]  ;;  %v953_v32 = vld [vmem:[%s1540_s0 + $0x98] sm:$0xff]  ;;  %v954_v34 = vld [vmem:[%s1540_s0 + $0xa0] sm:$0xff] }
   0x9   :  { %v941_v33 = vld [vmem:[%s1540_s0 + $0x38] sm:$0xff]  ;;  %v69_v35 = vld [vmem:[%s1541_s2] sm:$0x3]  ;;  %v955_v41 = vld [vmem:[%s1540_s0 + $0xa8] sm:$0xff] }
   0xa   :  { %v1098_v36 = vperm.slane %v69_v35, 0  ;;  %v1100_v37 = vperm.slane %v69_v35, 1  ;;  %v942_v38 = vld [vmem:[%s1540_s0 + $0x40] sm:$0xff]  ;;  %v943_v58 = vld [vmem:[%s1540_s0 + $0x48] sm:$0xff]  ;;  %v956_v1 = vld [vmem:[%s1540_s0 + $0xb0] sm:$0xff] }
   0xb   :  { %312 = vmatpush.bf16.msra.mxu0 %v879_v11  ;;  %445 = vmatpush.bf16.msra.mxu1 %v883_v12 }
   0xc   :  { %963 = vmatpush.bf16.msra.mxu2 %v879_v11  ;;  %966 = vmatpush.bf16.msra.mxu3 %v883_v12 }
   0xf   :  { %313 = vmatpush.bf16.msra.mxu0 %v871_v17  ;;  %446 = vmatpush.bf16.msra.mxu1 %v875_v18 }
  0x10   :  { %964 = vmatpush.bf16.msra.mxu2 %v871_v17  ;;  %967 = vmatpush.bf16.msra.mxu3 %v875_v18 }
  0x12   :  { %884 = vmatmul.msk.bf16.vlgmr.msra.gmra.mxu0 %vm223_vm1, %v934_v19  ;;  %909 = vmatmul.msk.bf16.vlgmr.msra.gmra.mxu1 %vm223_vm1, %v934_v19 }
  0x13   :  { %897 = vmatmul.msk.bf16.vlgmr.msra.gmra.mxu2 %vm223_vm1, %v947_v20  ;;  %922 = vmatmul.msk.bf16.vlgmr.msra.gmra.mxu3 %vm223_vm1, %v947_v20  ;;  %v944_v20 = vld [vmem:[%s1540_s0 + $0x50] sm:$0xff] }
  0x22   :  { %885 = vmatmul.msk.bf16.gmra.mxu0 %vm223_vm1, %v935_v21  ;;  %910 = vmatmul.msk.bf16.gmra.mxu1 %vm223_vm1, %v935_v21 }
  0x23   :  { %898 = vmatmul.msk.bf16.gmra.mxu2 %vm223_vm1, %v948_v22  ;;  %923 = vmatmul.msk.bf16.gmra.mxu3 %vm223_vm1, %v948_v22 }
  0x32   :  { %886 = vmatmul.msk.bf16.gmra.mxu0 %vm223_vm1, %v936_v23  ;;  %911 = vmatmul.msk.bf16.gmra.mxu1 %vm223_vm1, %v936_v23 }
  0x33   :  { %899 = vmatmul.msk.bf16.gmra.mxu2 %vm223_vm1, %v949_v24  ;;  %924 = vmatmul.msk.bf16.gmra.mxu3 %vm223_vm1, %v949_v24 }
  0x42   :  { %887 = vmatmul.msk.bf16.gmra.mxu0 %vm223_vm1, %v937_v25  ;;  %912 = vmatmul.msk.bf16.gmra.mxu1 %vm223_vm1, %v937_v25 }
  0x43   :  { %900 = vmatmul.msk.bf16.gmra.mxu2 %vm223_vm1, %v950_v26  ;;  %925 = vmatmul.msk.bf16.gmra.mxu3 %vm223_vm1, %v950_v26 }
  0x52   :  { %888 = vmatmul.msk.bf16.gmra.mxu0 %vm223_vm1, %v938_v27  ;;  %913 = vmatmul.msk.bf16.gmra.mxu1 %vm223_vm1, %v938_v27  ;;  %v957_v27 = vld [vmem:[%s1540_s0 + $0xb8] sm:$0xff] }
  0x53   :  { %901 = vmatmul.msk.bf16.gmra.mxu2 %vm223_vm1, %v951_v28  ;;  %926 = vmatmul.msk.bf16.gmra.mxu3 %vm223_vm1, %v951_v28 }
  0x62   :  { %889 = vmatmul.msk.bf16.gmra.mxu0 %vm223_vm1, %v939_v29  ;;  %914 = vmatmul.msk.bf16.gmra.mxu1 %vm223_vm1, %v939_v29 }
  0x63   :  { %902 = vmatmul.msk.bf16.gmra.mxu2 %vm223_vm1, %v952_v30  ;;  %927 = vmatmul.msk.bf16.gmra.mxu3 %vm223_vm1, %v952_v30 }
  0x72   :  { %890 = vmatmul.msk.bf16.gmra.mxu0 %vm223_vm1, %v940_v31  ;;  %915 = vmatmul.msk.bf16.gmra.mxu1 %vm223_vm1, %v940_v31 }
  0x73   :  { %903 = vmatmul.msk.bf16.gmra.mxu2 %vm223_vm1, %v953_v32  ;;  %928 = vmatmul.msk.bf16.gmra.mxu3 %vm223_vm1, %v953_v32 }
  0x82   :  { %891 = vmatmul.msk.bf16.gmra.mxu0 %vm223_vm1, %v941_v33  ;;  %916 = vmatmul.msk.bf16.gmra.mxu1 %vm223_vm1, %v941_v33 }
  0x83   :  { %904 = vmatmul.msk.bf16.gmra.mxu2 %vm223_vm1, %v954_v34  ;;  %929 = vmatmul.msk.bf16.gmra.mxu3 %vm223_vm1, %v954_v34 }
  0x8f   :  { %v315_v39 = vpop.f32.mrf.mxu0  ;;  %v448_v40 = vpop.f32.mrf.mxu1 }
  0x90   :  { %v316_v42 = vadd.f32 %v315_v39, %v1098_v36  ;;  %v449_v43 = vadd.f32 %v448_v40, %v1100_v37 }
  0x92   :  { %v572_v44 = vmax.f32 %v316_v42, 0.0  ;;  %v573_v45 = vmax.f32 %v449_v43, 0.0  ;;  %892 = vmatmul.msk.bf16.gmra.mxu0 %vm223_vm1, %v942_v38  ;;  %917 = vmatmul.msk.bf16.gmra.mxu1 %vm223_vm1, %v942_v38 }
  0x93   :  { %905 = vmatmul.msk.bf16.gmra.mxu2 %vm223_vm1, %v955_v41  ;;  %930 = vmatmul.msk.bf16.gmra.mxu3 %vm223_vm1, %v955_v41 }
  0x94   :  { %670 = vst [vmem:[%s1542_s3] sm:$0xff] %v572_v44  ;;  %v63_v44 = vld [vmem:[%s1540_s0 + $0xc0] sm:$0xf] }
  0x95   :  { %671 = vst [vmem:[%s1542_s3 + $0x8] sm:$0xff] %v573_v45 }
  0x96   :  { %v380_v46 = vpop.f32.mrf.mxu2  ;;  %v513_v47 = vpop.f32.mrf.mxu3 }
  0x97   :  { %v317_v48 = vpop.f32.mrf.mxu0  ;;  %v450_v49 = vpop.f32.mrf.mxu1  ;;  %v381_v50 = vadd.f32 %v380_v46, %v1098_v36  ;;  %v514_v51 = vadd.f32 %v513_v47, %v1100_v37 }
  0x98   :  { %v318_v52 = vadd.f32 %v317_v48, %v1098_v36  ;;  %v451_v53 = vadd.f32 %v450_v49, %v1100_v37  ;;  %v172_v49 = vunpack.c.l.b16 %v63_v44 }
  0x99   :  { %v624_v54 = vmax.f32 %v381_v50, 0.0  ;;  %v625_v57 = vmax.f32 %v514_v51, 0.0  ;;  %v945_v50 = vld [vmem:[%s1540_s0 + $0x58] sm:$0xff] }
  0x9a   :  { %v574_v55 = vmax.f32 %v318_v52, 0.0  ;;  %v575_v56 = vmax.f32 %v451_v53, 0.0 }
  0x9b   :  { %722 = vst [vmem:[%s1542_s3 + $0x1a0] sm:$0xff] %v624_v54 }
  0x9c   :  { %672 = vst [vmem:[%s1542_s3 + $0x10] sm:$0xff] %v574_v55 }
  0x9d   :  { %673 = vst [vmem:[%s1542_s3 + $0x18] sm:$0xff] %v575_v56 }
  0x9e   :  { %723 = vst [vmem:[%s1542_s3 + $0x1a8] sm:$0xff] %v625_v57  ;;  %v382_v59 = vpop.f32.mrf.mxu2  ;;  %v515_v60 = vpop.f32.mrf.mxu3  ;;  %v197_v57 = vpack.c.b16 %v172_v49, %v172_v49 }
  0x9f   :  { %v320_v61 = vpop.f32.mrf.mxu0  ;;  %v453_v62 = vpop.f32.mrf.mxu1  ;;  %v383_v63 = vadd.f32 %v382_v59, %v1098_v36  ;;  %v516_v0 = vadd.f32 %v515_v60, %v1100_v37 }
  0xa0   :  { %v321_v2 = vadd.f32 %v320_v61, %v1098_v36  ;;  %v454_v3 = vadd.f32 %v453_v62, %v1100_v37 }
  0xa1   :  { %v626_v4 = vmax.f32 %v383_v63, 0.0  ;;  %v627_v7 = vmax.f32 %v516_v0, 0.0 }
  0xa2   :  { %v576_v5 = vmax.f32 %v321_v2, 0.0  ;;  %v577_v6 = vmax.f32 %v454_v3, 0.0  ;;  %893 = vmatmul.msk.bf16.gmra.mxu0 %vm223_vm1, %v943_v58  ;;  %918 = vmatmul.msk.bf16.gmra.mxu1 %vm223_vm1, %v943_v58 }
  0xa3   :  { %724 = vst [vmem:[%s1542_s3 + $0x1b0] sm:$0xff] %v626_v4  ;;  %906 = vmatmul.msk.bf16.gmra.mxu2 %vm223_vm1, %v956_v1  ;;  %931 = vmatmul.msk.bf16.gmra.mxu3 %vm223_vm1, %v956_v1 }
  0xa4   :  { %674 = vst [vmem:[%s1542_s3 + $0x20] sm:$0xff] %v576_v5 }
  0xa5   :  { %675 = vst [vmem:[%s1542_s3 + $0x28] sm:$0xff] %v577_v6 }
  0xa6   :  { %725 = vst [vmem:[%s1542_s3 + $0x1b8] sm:$0xff] %v627_v7  ;;  %v385_v8 = vpop.f32.mrf.mxu2  ;;  %v518_v9 = vpop.f32.mrf.mxu3 }
  0xa7   :  { %v322_v10 = vpop.f32.mrf.mxu0  ;;  %v455_v11 = vpop.f32.mrf.mxu1  ;;  %v386_v12 = vadd.f32 %v385_v8, %v1098_v36  ;;  %v519_v13 = vadd.f32 %v518_v9, %v1100_v37 }
  0xa8   :  { %v323_v14 = vadd.f32 %v322_v10, %v1098_v36  ;;  %v456_v15 = vadd.f32 %v455_v11, %v1100_v37 }
  0xa9   :  { %v628_v16 = vmax.f32 %v386_v12, 0.0  ;;  %v629_v19 = vmax.f32 %v519_v13, 0.0  ;;  %v946_v12 = vld [vmem:[%s1540_s0 + $0x60] sm:$0xff] }
  0xaa   :  { %v578_v17 = vmax.f32 %v323_v14, 0.0  ;;  %v579_v18 = vmax.f32 %v456_v15, 0.0 }
  0xab   :  { %726 = vst [vmem:[%s1542_s3 + $0x1c0] sm:$0xff] %v628_v16 }
  0xac   :  { %676 = vst [vmem:[%s1542_s3 + $0x30] sm:$0xff] %v578_v17 }
  0xad   :  { %677 = vst [vmem:[%s1542_s3 + $0x38] sm:$0xff] %v579_v18 }
  0xae   :  { %727 = vst [vmem:[%s1542_s3 + $0x1c8] sm:$0xff] %v629_v19  ;;  %v387_v21 = vpop.f32.mrf.mxu2  ;;  %v520_v22 = vpop.f32.mrf.mxu3 }
  0xaf   :  { %v325_v23 = vpop.f32.mrf.mxu0  ;;  %v458_v24 = vpop.f32.mrf.mxu1  ;;  %v388_v25 = vadd.f32 %v387_v21, %v1098_v36  ;;  %v521_v26 = vadd.f32 %v520_v22, %v1100_v37 }
  0xb0   :  { %v326_v28 = vadd.f32 %v325_v23, %v1098_v36  ;;  %v459_v29 = vadd.f32 %v458_v24, %v1100_v37 }
  0xb1   :  { %v630_v30 = vmax.f32 %v388_v25, 0.0  ;;  %v631_v33 = vmax.f32 %v521_v26, 0.0 }
  0xb2   :  { %v580_v31 = vmax.f32 %v326_v28, 0.0  ;;  %v581_v32 = vmax.f32 %v459_v29, 0.0  ;;  %894 = vmatmul.msk.bf16.gmra.mxu0 %vm223_vm1, %v944_v20  ;;  %919 = vmatmul.msk.bf16.gmra.mxu1 %vm223_vm1, %v944_v20 }
  0xb3   :  { %728 = vst [vmem:[%s1542_s3 + $0x1d0] sm:$0xff] %v630_v30  ;;  %907 = vmatmul.msk.bf16.gmra.mxu2 %vm223_vm1, %v957_v27  ;;  %932 = vmatmul.msk.bf16.gmra.mxu3 %vm223_vm1, %v957_v27 }
  0xb4   :  { %678 = vst [vmem:[%s1542_s3 + $0x40] sm:$0xff] %v580_v31 }
  0xb5   :  { %679 = vst [vmem:[%s1542_s3 + $0x48] sm:$0xff] %v581_v32 }
  0xb6   :  { %729 = vst [vmem:[%s1542_s3 + $0x1d8] sm:$0xff] %v631_v33  ;;  %v390_v34 = vpop.f32.mrf.mxu2  ;;  %v523_v35 = vpop.f32.mrf.mxu3 }
  0xb7   :  { %v327_v38 = vpop.f32.mrf.mxu0  ;;  %v460_v39 = vpop.f32.mrf.mxu1  ;;  %v391_v40 = vadd.f32 %v390_v34, %v1098_v36  ;;  %v524_v41 = vadd.f32 %v523_v35, %v1100_v37 }
  0xb8   :  { %v328_v42 = vadd.f32 %v327_v38, %v1098_v36  ;;  %v461_v43 = vadd.f32 %v460_v39, %v1100_v37 }
  0xb9   :  { %v632_v45 = vmax.f32 %v391_v40, 0.0  ;;  %v633_v48 = vmax.f32 %v524_v41, 0.0 }
  0xba   :  { %v582_v46 = vmax.f32 %v328_v42, 0.0  ;;  %v583_v47 = vmax.f32 %v461_v43, 0.0 }
  0xbb   :  { %730 = vst [vmem:[%s1542_s3 + $0x1e0] sm:$0xff] %v632_v45 }
  0xbc   :  { %680 = vst [vmem:[%s1542_s3 + $0x50] sm:$0xff] %v582_v46 }
  0xbd   :  { %681 = vst [vmem:[%s1542_s3 + $0x58] sm:$0xff] %v583_v47 }
  0xbe   :  { %731 = vst [vmem:[%s1542_s3 + $0x1e8] sm:$0xff] %v633_v48  ;;  %v392_v51 = vpop.f32.mrf.mxu2  ;;  %v525_v52 = vpop.f32.mrf.mxu3 }
  0xbf   :  { %v330_v53 = vpop.f32.mrf.mxu0  ;;  %v463_v54 = vpop.f32.mrf.mxu1  ;;  %v393_v55 = vadd.f32 %v392_v51, %v1098_v36  ;;  %v526_v56 = vadd.f32 %v525_v52, %v1100_v37 }
  0xc0   :  { %v331_v58 = vadd.f32 %v330_v53, %v1098_v36  ;;  %v464_v59 = vadd.f32 %v463_v54, %v1100_v37 }
  0xc1   :  { %v634_v60 = vmax.f32 %v393_v55, 0.0  ;;  %v635_v63 = vmax.f32 %v526_v56, 0.0 }
  0xc2   :  { %v584_v61 = vmax.f32 %v331_v58, 0.0  ;;  %v585_v62 = vmax.f32 %v464_v59, 0.0  ;;  %895 = vmatmul.msk.bf16.gmra.mxu0 %vm223_vm1, %v945_v50  ;;  %920 = vmatmul.msk.bf16.gmra.mxu1 %vm223_vm1, %v945_v50 }
  0xc3   :  { %732 = vst [vmem:[%s1542_s3 + $0x1f0] sm:$0xff] %v634_v60  ;;  %908 = vmatmul.msk.bf16.gmra.mxu2 %vm223_vm1, %v197_v57  ;;  %933 = vmatmul.msk.bf16.gmra.mxu3 %vm223_vm1, %v197_v57 }
  0xc4   :  { %682 = vst [vmem:[%s1542_s3 + $0x60] sm:$0xff] %v584_v61 }
  0xc5   :  { %683 = vst [vmem:[%s1542_s3 + $0x68] sm:$0xff] %v585_v62 }
  0xc6   :  { %733 = vst [vmem:[%s1542_s3 + $0x1f8] sm:$0xff] %v635_v63  ;;  %v395_v0 = vpop.f32.mrf.mxu2  ;;  %v528_v1 = vpop.f32.mrf.mxu3 }
  0xc7   :  { %v332_v2 = vpop.f32.mrf.mxu0  ;;  %v465_v3 = vpop.f32.mrf.mxu1  ;;  %v396_v4 = vadd.f32 %v395_v0, %v1098_v36  ;;  %v529_v5 = vadd.f32 %v528_v1, %v1100_v37 }
  0xc8   :  { %v333_v6 = vadd.f32 %v332_v2, %v1098_v36  ;;  %v466_v7 = vadd.f32 %v465_v3, %v1100_v37 }
  0xc9   :  { %v636_v8 = vmax.f32 %v396_v4, 0.0  ;;  %v637_v11 = vmax.f32 %v529_v5, 0.0 }
  0xca   :  { %v586_v9 = vmax.f32 %v333_v6, 0.0  ;;  %v587_v10 = vmax.f32 %v466_v7, 0.0 }
  0xcb   :  { %734 = vst [vmem:[%s1542_s3 + $0x200] sm:$0xff] %v636_v8 }
  0xcc   :  { %684 = vst [vmem:[%s1542_s3 + $0x70] sm:$0xff] %v586_v9 }
  0xcd   :  { %685 = vst [vmem:[%s1542_s3 + $0x78] sm:$0xff] %v587_v10 }
  0xce   :  { %735 = vst [vmem:[%s1542_s3 + $0x208] sm:$0xff] %v637_v11  ;;  %v397_v13 = vpop.f32.mrf.mxu2  ;;  %v530_v14 = vpop.f32.mrf.mxu3 }
  0xcf   :  { %v335_v15 = vpop.f32.mrf.mxu0  ;;  %v468_v16 = vpop.f32.mrf.mxu1  ;;  %v398_v17 = vadd.f32 %v397_v13, %v1098_v36  ;;  %v531_v18 = vadd.f32 %v530_v14, %v1100_v37 }
  0xd0   :  { %v336_v19 = vadd.f32 %v335_v15, %v1098_v36  ;;  %v469_v20 = vadd.f32 %v468_v16, %v1100_v37 }
  0xd1   :  { %v638_v21 = vmax.f32 %v398_v17, 0.0  ;;  %v639_v24 = vmax.f32 %v531_v18, 0.0 }
  0xd2   :  { %v588_v22 = vmax.f32 %v336_v19, 0.0  ;;  %v589_v23 = vmax.f32 %v469_v20, 0.0  ;;  %896 = vmatmul.msk.bf16.gmra.mxu0 %vm223_vm1, %v946_v12  ;;  %921 = vmatmul.msk.bf16.gmra.mxu1 %vm223_vm1, %v946_v12 }
  0xd3   :  { %736 = vst [vmem:[%s1542_s3 + $0x210] sm:$0xff] %v638_v21 }
  0xd4   :  { %686 = vst [vmem:[%s1542_s3 + $0x80] sm:$0xff] %v588_v22 }
  0xd5   :  { %687 = vst [vmem:[%s1542_s3 + $0x88] sm:$0xff] %v589_v23 }
  0xd6   :  { %737 = vst [vmem:[%s1542_s3 + $0x218] sm:$0xff] %v639_v24  ;;  %v400_v25 = vpop.f32.mrf.mxu2  ;;  %v533_v26 = vpop.f32.mrf.mxu3 }
  0xd7   :  { %v337_v27 = vpop.f32.mrf.mxu0  ;;  %v470_v28 = vpop.f32.mrf.mxu1  ;;  %v401_v29 = vadd.f32 %v400_v25, %v1098_v36  ;;  %v534_v30 = vadd.f32 %v533_v26, %v1100_v37 }
  0xd8   :  { %v338_v31 = vadd.f32 %v337_v27, %v1098_v36  ;;  %v471_v32 = vadd.f32 %v470_v28, %v1100_v37 }
  0xd9   :  { %v640_v33 = vmax.f32 %v401_v29, 0.0  ;;  %v641_v38 = vmax.f32 %v534_v30, 0.0 }
  0xda   :  { %v590_v34 = vmax.f32 %v338_v31, 0.0  ;;  %v591_v35 = vmax.f32 %v471_v32, 0.0 }
  0xdb   :  { %738 = vst [vmem:[%s1542_s3 + $0x220] sm:$0xff] %v640_v33 }
  0xdc   :  { %688 = vst [vmem:[%s1542_s3 + $0x90] sm:$0xff] %v590_v34 }
  0xdd   :  { %689 = vst [vmem:[%s1542_s3 + $0x98] sm:$0xff] %v591_v35 }
  0xde   :  { %739 = vst [vmem:[%s1542_s3 + $0x228] sm:$0xff] %v641_v38  ;;  %v402_v39 = vpop.f32.mrf.mxu2  ;;  %v535_v40 = vpop.f32.mrf.mxu3 }
  0xdf   :  { %v340_v41 = vpop.f32.mrf.mxu0  ;;  %v473_v42 = vpop.f32.mrf.mxu1  ;;  %v403_v43 = vadd.f32 %v402_v39, %v1098_v36  ;;  %v536_v44 = vadd.f32 %v535_v40, %v1100_v37 }
  0xe0   :  { %v341_v45 = vadd.f32 %v340_v41, %v1098_v36  ;;  %v474_v46 = vadd.f32 %v473_v42, %v1100_v37 }
  0xe1   :  { %v642_v47 = vmax.f32 %v403_v43, 0.0  ;;  %v643_v50 = vmax.f32 %v536_v44, 0.0 }
  0xe2   :  { %v592_v48 = vmax.f32 %v341_v45, 0.0  ;;  %v593_v49 = vmax.f32 %v474_v46, 0.0 }
  0xe3   :  { %740 = vst [vmem:[%s1542_s3 + $0x230] sm:$0xff] %v642_v47 }
  0xe4   :  { %690 = vst [vmem:[%s1542_s3 + $0xa0] sm:$0xff] %v592_v48 }
  0xe5   :  { %691 = vst [vmem:[%s1542_s3 + $0xa8] sm:$0xff] %v593_v49 }
  0xe6   :  { %741 = vst [vmem:[%s1542_s3 + $0x238] sm:$0xff] %v643_v50  ;;  %v405_v51 = vpop.f32.mrf.mxu2  ;;  %v538_v52 = vpop.f32.mrf.mxu3 }
  0xe7   :  { %v342_v53 = vpop.f32.mrf.mxu0  ;;  %v475_v54 = vpop.f32.mrf.mxu1  ;;  %v406_v55 = vadd.f32 %v405_v51, %v1098_v36  ;;  %v539_v56 = vadd.f32 %v538_v52, %v1100_v37 }
  0xe8   :  { %v343_v57 = vadd.f32 %v342_v53, %v1098_v36  ;;  %v476_v58 = vadd.f32 %v475_v54, %v1100_v37 }
  0xe9   :  { %v644_v59 = vmax.f32 %v406_v55, 0.0  ;;  %v645_v62 = vmax.f32 %v539_v56, 0.0 }
  0xea   :  { %v594_v60 = vmax.f32 %v343_v57, 0.0  ;;  %v595_v61 = vmax.f32 %v476_v58, 0.0 }
  0xeb   :  { %742 = vst [vmem:[%s1542_s3 + $0x240] sm:$0xff] %v644_v59 }
  0xec   :  { %692 = vst [vmem:[%s1542_s3 + $0xb0] sm:$0xff] %v594_v60 }
  0xed   :  { %693 = vst [vmem:[%s1542_s3 + $0xb8] sm:$0xff] %v595_v61 }
  0xee   :  { %743 = vst [vmem:[%s1542_s3 + $0x248] sm:$0xff] %v645_v62  ;;  %v407_v63 = vpop.f32.mrf.mxu2  ;;  %v540_v0 = vpop.f32.mrf.mxu3 }
  0xef   :  { %v345_v1 = vpop.f32.mrf.mxu0  ;;  %v478_v2 = vpop.f32.mrf.mxu1  ;;  %v408_v3 = vadd.f32 %v407_v63, %v1098_v36  ;;  %v541_v4 = vadd.f32 %v540_v0, %v1100_v37 }
  0xf0   :  { %v346_v5 = vadd.f32 %v345_v1, %v1098_v36  ;;  %v479_v6 = vadd.f32 %v478_v2, %v1100_v37 }
  0xf1   :  { %v646_v7 = vmax.f32 %v408_v3, 0.0  ;;  %v647_v10 = vmax.f32 %v541_v4, 0.0 }
  0xf2   :  { %v596_v8 = vmax.f32 %v346_v5, 0.0  ;;  %v597_v9 = vmax.f32 %v479_v6, 0.0 }
  0xf3   :  { %744 = vst [vmem:[%s1542_s3 + $0x250] sm:$0xff] %v646_v7 }
  0xf4   :  { %694 = vst [vmem:[%s1542_s3 + $0xc0] sm:$0xff] %v596_v8 }
  0xf5   :  { %695 = vst [vmem:[%s1542_s3 + $0xc8] sm:$0xff] %v597_v9 }
  0xf6   :  { %745 = vst [vmem:[%s1542_s3 + $0x258] sm:$0xff] %v647_v10  ;;  %v410_v11 = vpop.f32.mrf.mxu2  ;;  %v543_v12 = vpop.f32.mrf.mxu3 }
  0xf7   :  { %v347_v13 = vpop.f32.mrf.mxu0  ;;  %v480_v14 = vpop.f32.mrf.mxu1  ;;  %v411_v15 = vadd.f32 %v410_v11, %v1098_v36  ;;  %v544_v16 = vadd.f32 %v543_v12, %v1100_v37 }
  0xf8   :  { %v348_v17 = vadd.f32 %v347_v13, %v1098_v36  ;;  %v481_v18 = vadd.f32 %v480_v14, %v1100_v37 }
  0xf9   :  { %v648_v19 = vmax.f32 %v411_v15, 0.0  ;;  %v649_v22 = vmax.f32 %v544_v16, 0.0 }
  0xfa   :  { %v598_v20 = vmax.f32 %v348_v17, 0.0  ;;  %v599_v21 = vmax.f32 %v481_v18, 0.0 }
  0xfb   :  { %746 = vst [vmem:[%s1542_s3 + $0x260] sm:$0xff] %v648_v19 }
  0xfc   :  { %696 = vst [vmem:[%s1542_s3 + $0xd0] sm:$0xff] %v598_v20 }
  0xfd   :  { %697 = vst [vmem:[%s1542_s3 + $0xd8] sm:$0xff] %v599_v21 }
  0xfe   :  { %747 = vst [vmem:[%s1542_s3 + $0x268] sm:$0xff] %v649_v22  ;;  %v412_v23 = vpop.f32.mrf.mxu2  ;;  %v545_v24 = vpop.f32.mrf.mxu3 }
  0xff   :  { %v350_v25 = vpop.f32.mrf.mxu0  ;;  %v483_v26 = vpop.f32.mrf.mxu1  ;;  %v413_v27 = vadd.f32 %v412_v23, %v1098_v36  ;;  %v546_v28 = vadd.f32 %v545_v24, %v1100_v37 }
 0x100   :  { %v351_v29 = vadd.f32 %v350_v25, %v1098_v36  ;;  %v484_v30 = vadd.f32 %v483_v26, %v1100_v37 }
 0x101   :  { %v650_v31 = vmax.f32 %v413_v27, 0.0  ;;  %v651_v34 = vmax.f32 %v546_v28, 0.0 }
 0x102   :  { %v600_v32 = vmax.f32 %v351_v29, 0.0  ;;  %v601_v33 = vmax.f32 %v484_v30, 0.0 }
 0x103   :  { %748 = vst [vmem:[%s1542_s3 + $0x270] sm:$0xff] %v650_v31 }
 0x104   :  { %698 = vst [vmem:[%s1542_s3 + $0xe0] sm:$0xff] %v600_v32 }
 0x105   :  { %699 = vst [vmem:[%s1542_s3 + $0xe8] sm:$0xff] %v601_v33 }
 0x106   :  { %749 = vst [vmem:[%s1542_s3 + $0x278] sm:$0xff] %v651_v34  ;;  %v415_v35 = vpop.f32.mrf.mxu2  ;;  %v548_v38 = vpop.f32.mrf.mxu3 }
 0x107   :  { %v352_v39 = vpop.f32.mrf.mxu0  ;;  %v485_v40 = vpop.f32.mrf.mxu1  ;;  %v416_v41 = vadd.f32 %v415_v35, %v1098_v36  ;;  %v549_v42 = vadd.f32 %v548_v38, %v1100_v37 }
 0x108   :  { %v353_v43 = vadd.f32 %v352_v39, %v1098_v36  ;;  %v486_v44 = vadd.f32 %v485_v40, %v1100_v37 }
 0x109   :  { %v652_v45 = vmax.f32 %v416_v41, 0.0  ;;  %v653_v48 = vmax.f32 %v549_v42, 0.0 }
 0x10a   :  { %v602_v46 = vmax.f32 %v353_v43, 0.0  ;;  %v603_v47 = vmax.f32 %v486_v44, 0.0 }
 0x10b   :  { %750 = vst [vmem:[%s1542_s3 + $0x280] sm:$0xff] %v652_v45 }
 0x10c   :  { %700 = vst [vmem:[%s1542_s3 + $0xf0] sm:$0xff] %v602_v46 }
 0x10d   :  { %701 = vst [vmem:[%s1542_s3 + $0xf8] sm:$0xff] %v603_v47 }
 0x10e   :  { %751 = vst [vmem:[%s1542_s3 + $0x288] sm:$0xff] %v653_v48  ;;  %v417_v49 = vpop.f32.mrf.mxu2  ;;  %v550_v50 = vpop.f32.mrf.mxu3 }
 0x10f   :  { %v355_v51 = vpop.f32.mrf.mxu0  ;;  %v488_v52 = vpop.f32.mrf.mxu1  ;;  %v418_v53 = vadd.f32 %v417_v49, %v1098_v36  ;;  %v551_v54 = vadd.f32 %v550_v50, %v1100_v37 }
 0x110   :  { %v356_v55 = vadd.f32 %v355_v51, %v1098_v36  ;;  %v489_v56 = vadd.f32 %v488_v52, %v1100_v37 }
 0x111   :  { %v654_v57 = vmax.f32 %v418_v53, 0.0  ;;  %v655_v60 = vmax.f32 %v551_v54, 0.0 }
 0x112   :  { %v604_v58 = vmax.f32 %v356_v55, 0.0  ;;  %v605_v59 = vmax.f32 %v489_v56, 0.0 }
 0x113   :  { %752 = vst [vmem:[%s1542_s3 + $0x290] sm:$0xff] %v654_v57 }
 0x114   :  { %702 = vst [vmem:[%s1542_s3 + $0x100] sm:$0xff] %v604_v58 }
 0x115   :  { %703 = vst [vmem:[%s1542_s3 + $0x108] sm:$0xff] %v605_v59 }
 0x116   :  { %753 = vst [vmem:[%s1542_s3 + $0x298] sm:$0xff] %v655_v60  ;;  %v420_v61 = vpop.f32.mrf.mxu2  ;;  %v553_v62 = vpop.f32.mrf.mxu3 }
 0x117   :  { %v357_v63 = vpop.f32.mrf.mxu0  ;;  %v490_v0 = vpop.f32.mrf.mxu1  ;;  %v421_v1 = vadd.f32 %v420_v61, %v1098_v36  ;;  %v554_v2 = vadd.f32 %v553_v62, %v1100_v37 }
 0x118   :  { %v358_v3 = vadd.f32 %v357_v63, %v1098_v36  ;;  %v491_v4 = vadd.f32 %v490_v0, %v1100_v37 }
 0x119   :  { %v656_v5 = vmax.f32 %v421_v1, 0.0  ;;  %v657_v8 = vmax.f32 %v554_v2, 0.0 }
 0x11a   :  { %v606_v6 = vmax.f32 %v358_v3, 0.0  ;;  %v607_v7 = vmax.f32 %v491_v4, 0.0 }
 0x11b   :  { %754 = vst [vmem:[%s1542_s3 + $0x2a0] sm:$0xff] %v656_v5 }
 0x11c   :  { %704 = vst [vmem:[%s1542_s3 + $0x110] sm:$0xff] %v606_v6 }
 0x11d   :  { %705 = vst [vmem:[%s1542_s3 + $0x118] sm:$0xff] %v607_v7 }
 0x11e   :  { %755 = vst [vmem:[%s1542_s3 + $0x2a8] sm:$0xff] %v657_v8  ;;  %v422_v9 = vpop.f32.mrf.mxu2  ;;  %v555_v10 = vpop.f32.mrf.mxu3 }
 0x11f   :  { %v360_v11 = vpop.f32.mrf.mxu0  ;;  %v493_v12 = vpop.f32.mrf.mxu1  ;;  %v423_v13 = vadd.f32 %v422_v9, %v1098_v36  ;;  %v556_v14 = vadd.f32 %v555_v10, %v1100_v37 }
 0x120   :  { %v361_v15 = vadd.f32 %v360_v11, %v1098_v36  ;;  %v494_v16 = vadd.f32 %v493_v12, %v1100_v37 }
 0x121   :  { %v658_v17 = vmax.f32 %v423_v13, 0.0  ;;  %v659_v20 = vmax.f32 %v556_v14, 0.0 }
 0x122   :  { %v608_v18 = vmax.f32 %v361_v15, 0.0  ;;  %v609_v19 = vmax.f32 %v494_v16, 0.0 }
 0x123   :  { %756 = vst [vmem:[%s1542_s3 + $0x2b0] sm:$0xff] %v658_v17 }
 0x124   :  { %706 = vst [vmem:[%s1542_s3 + $0x120] sm:$0xff] %v608_v18 }
 0x125   :  { %707 = vst [vmem:[%s1542_s3 + $0x128] sm:$0xff] %v609_v19 }
 0x126   :  { %757 = vst [vmem:[%s1542_s3 + $0x2b8] sm:$0xff] %v659_v20  ;;  %v425_v21 = vpop.f32.mrf.mxu2  ;;  %v558_v22 = vpop.f32.mrf.mxu3 }
 0x127   :  { %v362_v23 = vpop.f32.mrf.mxu0  ;;  %v495_v24 = vpop.f32.mrf.mxu1  ;;  %v426_v25 = vadd.f32 %v425_v21, %v1098_v36  ;;  %v559_v26 = vadd.f32 %v558_v22, %v1100_v37 }
 0x128   :  { %v363_v27 = vadd.f32 %v362_v23, %v1098_v36  ;;  %v496_v28 = vadd.f32 %v495_v24, %v1100_v37 }
 0x129   :  { %v660_v29 = vmax.f32 %v426_v25, 0.0  ;;  %v661_v32 = vmax.f32 %v559_v26, 0.0 }
 0x12a   :  { %v610_v30 = vmax.f32 %v363_v27, 0.0  ;;  %v611_v31 = vmax.f32 %v496_v28, 0.0 }
 0x12b   :  { %758 = vst [vmem:[%s1542_s3 + $0x2c0] sm:$0xff] %v660_v29 }
 0x12c   :  { %708 = vst [vmem:[%s1542_s3 + $0x130] sm:$0xff] %v610_v30 }
 0x12d   :  { %709 = vst [vmem:[%s1542_s3 + $0x138] sm:$0xff] %v611_v31 }
 0x12e   :  { %759 = vst [vmem:[%s1542_s3 + $0x2c8] sm:$0xff] %v661_v32  ;;  %v427_v33 = vpop.f32.mrf.mxu2  ;;  %v560_v34 = vpop.f32.mrf.mxu3 }
 0x12f   :  { %v365_v35 = vpop.f32.mrf.mxu0  ;;  %v498_v38 = vpop.f32.mrf.mxu1  ;;  %v428_v39 = vadd.f32 %v427_v33, %v1098_v36  ;;  %v561_v40 = vadd.f32 %v560_v34, %v1100_v37 }
 0x130   :  { %v366_v41 = vadd.f32 %v365_v35, %v1098_v36  ;;  %v499_v42 = vadd.f32 %v498_v38, %v1100_v37 }
 0x131   :  { %v662_v43 = vmax.f32 %v428_v39, 0.0  ;;  %v663_v46 = vmax.f32 %v561_v40, 0.0 }
 0x132   :  { %v612_v44 = vmax.f32 %v366_v41, 0.0  ;;  %v613_v45 = vmax.f32 %v499_v42, 0.0 }
 0x133   :  { %760 = vst [vmem:[%s1542_s3 + $0x2d0] sm:$0xff] %v662_v43 }
 0x134   :  { %710 = vst [vmem:[%s1542_s3 + $0x140] sm:$0xff] %v612_v44 }
 0x135   :  { %711 = vst [vmem:[%s1542_s3 + $0x148] sm:$0xff] %v613_v45 }
 0x136   :  { %761 = vst [vmem:[%s1542_s3 + $0x2d8] sm:$0xff] %v663_v46  ;;  %v430_v47 = vpop.f32.mrf.mxu2  ;;  %v563_v48 = vpop.f32.mrf.mxu3 }
 0x137   :  { %v367_v49 = vpop.f32.mrf.mxu0  ;;  %v500_v50 = vpop.f32.mrf.mxu1  ;;  %v431_v51 = vadd.f32 %v430_v47, %v1098_v36  ;;  %v564_v52 = vadd.f32 %v563_v48, %v1100_v37 }
 0x138   :  { %v368_v53 = vadd.f32 %v367_v49, %v1098_v36  ;;  %v501_v54 = vadd.f32 %v500_v50, %v1100_v37 }
 0x139   :  { %v664_v55 = vmax.f32 %v431_v51, 0.0  ;;  %v665_v58 = vmax.f32 %v564_v52, 0.0 }
 0x13a   :  { %v614_v56 = vmax.f32 %v368_v53, 0.0  ;;  %v615_v57 = vmax.f32 %v501_v54, 0.0 }
 0x13b   :  { %762 = vst [vmem:[%s1542_s3 + $0x2e0] sm:$0xff] %v664_v55 }
 0x13c   :  { %712 = vst [vmem:[%s1542_s3 + $0x150] sm:$0xff] %v614_v56 }
 0x13d   :  { %713 = vst [vmem:[%s1542_s3 + $0x158] sm:$0xff] %v615_v57 }
 0x13e   :  { %763 = vst [vmem:[%s1542_s3 + $0x2e8] sm:$0xff] %v665_v58  ;;  %v432_v59 = vpop.f32.mrf.mxu2  ;;  %v565_v60 = vpop.f32.mrf.mxu3 }
 0x13f   :  { %v370_v61 = vpop.f32.mrf.mxu0  ;;  %v503_v62 = vpop.f32.mrf.mxu1  ;;  %v433_v63 = vadd.f32 %v432_v59, %v1098_v36  ;;  %v566_v0 = vadd.f32 %v565_v60, %v1100_v37 }
 0x140   :  { %v371_v1 = vadd.f32 %v370_v61, %v1098_v36  ;;  %v504_v2 = vadd.f32 %v503_v62, %v1100_v37 }
 0x141   :  { %v666_v3 = vmax.f32 %v433_v63, 0.0  ;;  %v667_v6 = vmax.f32 %v566_v0, 0.0 }
 0x142   :  { %v616_v4 = vmax.f32 %v371_v1, 0.0  ;;  %v617_v5 = vmax.f32 %v504_v2, 0.0 }
 0x143   :  { %764 = vst [vmem:[%s1542_s3 + $0x2f0] sm:$0xff] %v666_v3 }
 0x144   :  { %714 = vst [vmem:[%s1542_s3 + $0x160] sm:$0xff] %v616_v4 }
 0x145   :  { %715 = vst [vmem:[%s1542_s3 + $0x168] sm:$0xff] %v617_v5 }
 0x146   :  { %765 = vst [vmem:[%s1542_s3 + $0x2f8] sm:$0xff] %v667_v6  ;;  %v435_v7 = vpop.f32.mrf.mxu2  ;;  %v568_v8 = vpop.f32.mrf.mxu3 }
 0x147   :  { %v372_v9 = vpop.f32.mrf.mxu0  ;;  %v505_v10 = vpop.f32.mrf.mxu1  ;;  %v436_v11 = vadd.f32 %v435_v7, %v1098_v36  ;;  %v569_v12 = vadd.f32 %v568_v8, %v1100_v37 }
 0x148   :  { %v373_v13 = vadd.f32 %v372_v9, %v1098_v36  ;;  %v506_v14 = vadd.f32 %v505_v10, %v1100_v37 }
 0x149   :  { %v668_v15 = vmax.f32 %v436_v11, 0.0  ;;  %v669_v18 = vmax.f32 %v569_v12, 0.0 }
 0x14a   :  { %v618_v16 = vmax.f32 %v373_v13, 0.0  ;;  %v619_v17 = vmax.f32 %v506_v14, 0.0 }
 0x14b   :  { %766 = vst [vmem:[%s1542_s3 + $0x300] sm:$0xff] %v668_v15 }
 0x14c   :  { %716 = vst [vmem:[%s1542_s3 + $0x170] sm:$0xff] %v618_v16 }
 0x14d   :  { %717 = vst [vmem:[%s1542_s3 + $0x178] sm:$0xff] %v619_v17 }
 0x14e   :  { %767 = vst [vmem:[%s1542_s3 + $0x308] sm:$0xff] %v669_v18  ;;  %v437_v19 = vpop.f32.mrf.mxu2  ;;  %v570_v20 = vpop.f32.mrf.mxu3 }
 0x14f   :  { %v375_v21 = vpop.f32.mrf.mxu0  ;;  %v508_v22 = vpop.f32.mrf.mxu1 }
 0x150   :  { %v376_v23 = vadd.f32 %v375_v21, %v1098_v36  ;;  %v509_v24 = vadd.f32 %v508_v22, %v1100_v37 }
 0x152   :  { %v620_v25 = vmax.f32 %v376_v23, 0.0  ;;  %v621_v26 = vmax.f32 %v509_v24, 0.0 }
 0x154   :  { %718 = vst [vmem:[%s1542_s3 + $0x180] sm:$0xff] %v620_v25 }
 0x155   :  { %719 = vst [vmem:[%s1542_s3 + $0x188] sm:$0xff] %v621_v26 }
 0x157   :  { %v377_v27 = vpop.f32.mrf.mxu0  ;;  %v510_v28 = vpop.f32.mrf.mxu1 }
 0x158   :  { %v378_v29 = vadd.f32 %v377_v27, %v1098_v36  ;;  %v511_v30 = vadd.f32 %v510_v28, %v1100_v37 }
 0x15a   :  { %v622_v31 = vmax.f32 %v378_v29, 0.0  ;;  %v623_v32 = vmax.f32 %v511_v30, 0.0 }
 0x15c   :  { %720 = vst [vmem:[%s1542_s3 + $0x190] sm:$0xff] %v622_v31 }
 0x15d   :  { %721 = vst [vmem:[%s1542_s3 + $0x198] sm:$0xff] %v623_v32 }

// kernel: aspp_deformable_v2.7
= control target key start
LH: loop header
LB: loop body
LE: loop exit
PB: predicated region body
PF: predicated region fallthrough
CT: control target
= control target key end

     0   :  { %vm280_vm0 = vcmask 1041408   ;;  %vm225_vm1 = vcmask 818176   ;;  %s1313_s1 = inlined_call_operand.vmem [shape: bf16[100,256], index: 1, kind: input, shape index: {}]   ;;  %s1314_s0 = inlined_call_operand.vmem [shape: bf16[288,100], index: 0, kind: input, shape index: {}]   ;;  %s1315_s2 = inlined_call_operand.vmem [shape: f32[1,256], index: 2, kind: input, shape index: {}]   ;;  %s1316_s3 = inlined_call_operand.vmem [shape: f32[288,256], index: 3, kind: output, shape index: {}]  }
   0x1   :  { %v63_v0 = vld [vmem:[%s1313_s1 + $0x60] sm:$0x33]  ;;  %v747_v5 = vld [vmem:[%s1313_s1 + $0x50] sm:$0xf]  ;;  %v818_v6 = vld [vmem:[%s1313_s1 + $0x54] sm:$0xf0] }
   0x2   :  { %v197_v1 = vunpack.c.l.b16 %v63_v0  ;;  %v198_v2 = vunpack.c.h.b16 %v63_v0  ;;  %v817_v7 = vld [vmem:[%s1313_s1 + $0x54] sm:$0xf]  ;;  %v749_v8 = vld [vmem:[%s1313_s1 + $0x58] sm:$0xf0]  ;;  %v748_v11 = vor.u32 %v818_v6, %v747_v5  ;;  %v739_v13 = vld [vmem:[%s1313_s1 + $0x40] sm:$0xf] }
   0x3   :  { %v752_v12 = vor.u32 %v817_v7, %v749_v8  ;;  %v816_v14 = vld [vmem:[%s1313_s1 + $0x44] sm:$0xf0]  ;;  %v815_v15 = vld [vmem:[%s1313_s1 + $0x44] sm:$0xf]  ;;  %v741_v16 = vld [vmem:[%s1313_s1 + $0x48] sm:$0xf0] }
   0x4   :  { %v211_v3 = vpack.c.b16 %v197_v1, %v197_v1  ;;  %v212_v4 = vpack.c.b16 %v198_v2, %v198_v2  ;;  %v740_v17 = vor.u32 %v816_v14, %v739_v13  ;;  %v744_v18 = vor.u32 %v815_v15, %v741_v16  ;;  %v731_v19 = vld [vmem:[%s1313_s1 + $0x30] sm:$0xf]  ;;  %v814_v20 = vld [vmem:[%s1313_s1 + $0x34] sm:$0xf0]  ;;  %v813_v21 = vld [vmem:[%s1313_s1 + $0x34] sm:$0xf] }
   0x5   :  { %v733_v22 = vld [vmem:[%s1313_s1 + $0x38] sm:$0xf0]  ;;  %v732_v23 = vor.u32 %v814_v20, %v731_v19  ;;  %v723_v25 = vld [vmem:[%s1313_s1 + $0x20] sm:$0xf]  ;;  %v812_v26 = vld [vmem:[%s1313_s1 + $0x24] sm:$0xf0] }
   0x6   :  { %v282_v9 = vsel %vm280_vm0, %v211_v3, 0  ;;  %v285_v10 = vsel %vm280_vm0, %v212_v4, 0  ;;  %v736_v24 = vor.u32 %v813_v21, %v733_v22  ;;  %v811_v27 = vld [vmem:[%s1313_s1 + $0x24] sm:$0xf]  ;;  %v725_v28 = vld [vmem:[%s1313_s1 + $0x28] sm:$0xf0]  ;;  %v724_v29 = vor.u32 %v812_v26, %v723_v25 }
   0x7   :  { %288 = vmatpush.bf16.msra.mxu0 %v282_v9  ;;  %819 = vmatpush.bf16.msra.mxu2 %v282_v9  ;;  %v728_v30 = vor.u32 %v811_v27, %v725_v28  ;;  %v715_v31 = vld [vmem:[%s1313_s1 + $0x10] sm:$0xf]  ;;  %v810_v32 = vld [vmem:[%s1313_s1 + $0x14] sm:$0xf0]  ;;  %v809_v33 = vld [vmem:[%s1313_s1 + $0x14] sm:$0xf] }
   0x8   :  { %387 = vmatpush.bf16.msra.mxu1 %v285_v10  ;;  %826 = vmatpush.bf16.msra.mxu3 %v285_v10  ;;  %v717_v34 = vld [vmem:[%s1313_s1 + $0x18] sm:$0xf0]  ;;  %v716_v35 = vor.u32 %v810_v32, %v715_v31  ;;  %v707_v37 = vld [vmem:[%s1313_s1] sm:$0xf]  ;;  %v808_v38 = vld [vmem:[%s1313_s1 + $0x4] sm:$0xf0] }
   0x9   :  { %v720_v36 = vor.u32 %v809_v33, %v717_v34  ;;  %v807_v39 = vld [vmem:[%s1313_s1 + $0x4] sm:$0xf]  ;;  %v709_v40 = vld [vmem:[%s1313_s1 + $0x8] sm:$0xf0]  ;;  %v708_v41 = vor.u32 %v808_v38, %v707_v37  ;;  %v799_v46 = vld [vmem:[%s1314_s0 + $0x50] sm:$0xff] }
   0xa   :  { %v712_v42 = vor.u32 %v807_v39, %v709_v40  ;;  %v789_v43 = vld [vmem:[%s1314_s0] sm:$0xff]  ;;  %v798_v44 = vld [vmem:[%s1314_s0 + $0x48] sm:$0xff]  ;;  %v791_v47 = vld [vmem:[%s1314_s0 + $0x10] sm:$0xff] }
   0xb   :  { %289 = vmatpush.bf16.msra.mxu0 %v748_v11  ;;  %820 = vmatpush.bf16.msra.mxu2 %v748_v11  ;;  %v790_v45 = vld [vmem:[%s1314_s0 + $0x8] sm:$0xff]  ;;  %v800_v48 = vld [vmem:[%s1314_s0 + $0x58] sm:$0xff]  ;;  %v801_v50 = vld [vmem:[%s1314_s0 + $0x60] sm:$0xff] }
   0xc   :  { %388 = vmatpush.bf16.msra.mxu1 %v752_v12  ;;  %827 = vmatpush.bf16.msra.mxu3 %v752_v12  ;;  %v792_v49 = vld [vmem:[%s1314_s0 + $0x18] sm:$0xff]  ;;  %v793_v51 = vld [vmem:[%s1314_s0 + $0x20] sm:$0xff]  ;;  %v802_v52 = vld [vmem:[%s1314_s0 + $0x68] sm:$0xff] }
   0xd   :  { %v794_v53 = vld [vmem:[%s1314_s0 + $0x28] sm:$0xff]  ;;  %v803_v54 = vld [vmem:[%s1314_s0 + $0x70] sm:$0xff]  ;;  %v804_v56 = vld [vmem:[%s1314_s0 + $0x78] sm:$0xff] }
   0xe   :  { %v795_v55 = vld [vmem:[%s1314_s0 + $0x30] sm:$0xff]  ;;  %v796_v57 = vld [vmem:[%s1314_s0 + $0x38] sm:$0xff]  ;;  %v805_v58 = vld [vmem:[%s1314_s0 + $0x80] sm:$0xff] }
   0xf   :  { %290 = vmatpush.bf16.msra.mxu0 %v740_v17  ;;  %821 = vmatpush.bf16.msra.mxu2 %v740_v17  ;;  %v64_v59 = vld [vmem:[%s1315_s2] sm:$0x3]  ;;  %v806_v63 = vld [vmem:[%s1314_s0 + $0x88] sm:$0xff] }
  0x10   :  { %389 = vmatpush.bf16.msra.mxu1 %v744_v18  ;;  %828 = vmatpush.bf16.msra.mxu3 %v744_v18  ;;  %v1011_v60 = vperm.slane %v64_v59, 0  ;;  %v1013_v61 = vperm.slane %v64_v59, 1  ;;  %v797_v62 = vld [vmem:[%s1314_s0 + $0x40] sm:$0xff] }
  0x13   :  { %291 = vmatpush.bf16.msra.mxu0 %v732_v23  ;;  %822 = vmatpush.bf16.msra.mxu2 %v732_v23 }
  0x14   :  { %390 = vmatpush.bf16.msra.mxu1 %v736_v24  ;;  %829 = vmatpush.bf16.msra.mxu3 %v736_v24 }
  0x17   :  { %292 = vmatpush.bf16.msra.mxu0 %v724_v29  ;;  %823 = vmatpush.bf16.msra.mxu2 %v724_v29 }
  0x18   :  { %391 = vmatpush.bf16.msra.mxu1 %v728_v30  ;;  %830 = vmatpush.bf16.msra.mxu3 %v728_v30 }
  0x1b   :  { %293 = vmatpush.bf16.msra.mxu0 %v716_v35  ;;  %824 = vmatpush.bf16.msra.mxu2 %v716_v35 }
  0x1c   :  { %392 = vmatpush.bf16.msra.mxu1 %v720_v36  ;;  %831 = vmatpush.bf16.msra.mxu3 %v720_v36 }
  0x1f   :  { %294 = vmatpush.bf16.msra.mxu0 %v708_v41  ;;  %825 = vmatpush.bf16.msra.mxu2 %v708_v41 }
  0x20   :  { %393 = vmatpush.bf16.msra.mxu1 %v712_v42  ;;  %832 = vmatpush.bf16.msra.mxu3 %v712_v42 }
  0x22   :  { %753 = vmatmul.msk.bf16.vlgmr.msra.gmra.mxu0 %vm225_vm1, %v789_v43  ;;  %762 = vmatmul.msk.bf16.vlgmr.msra.gmra.mxu2 %vm225_vm1, %v798_v44 }
  0x23   :  { %771 = vmatmul.msk.bf16.vlgmr.msra.gmra.mxu1 %vm225_vm1, %v789_v43  ;;  %780 = vmatmul.msk.bf16.vlgmr.msra.gmra.mxu3 %vm225_vm1, %v798_v44 }
  0x32   :  { %754 = vmatmul.msk.bf16.gmra.mxu0 %vm225_vm1, %v790_v45  ;;  %763 = vmatmul.msk.bf16.gmra.mxu2 %vm225_vm1, %v799_v46 }
  0x33   :  { %772 = vmatmul.msk.bf16.gmra.mxu1 %vm225_vm1, %v790_v45  ;;  %781 = vmatmul.msk.bf16.gmra.mxu3 %vm225_vm1, %v799_v46 }
  0x42   :  { %755 = vmatmul.msk.bf16.gmra.mxu0 %vm225_vm1, %v791_v47  ;;  %764 = vmatmul.msk.bf16.gmra.mxu2 %vm225_vm1, %v800_v48 }
  0x43   :  { %773 = vmatmul.msk.bf16.gmra.mxu1 %vm225_vm1, %v791_v47  ;;  %782 = vmatmul.msk.bf16.gmra.mxu3 %vm225_vm1, %v800_v48 }
  0x52   :  { %756 = vmatmul.msk.bf16.gmra.mxu0 %vm225_vm1, %v792_v49  ;;  %765 = vmatmul.msk.bf16.gmra.mxu2 %vm225_vm1, %v801_v50 }
  0x53   :  { %774 = vmatmul.msk.bf16.gmra.mxu1 %vm225_vm1, %v792_v49  ;;  %783 = vmatmul.msk.bf16.gmra.mxu3 %vm225_vm1, %v801_v50 }
  0x62   :  { %757 = vmatmul.msk.bf16.gmra.mxu0 %vm225_vm1, %v793_v51  ;;  %766 = vmatmul.msk.bf16.gmra.mxu2 %vm225_vm1, %v802_v52 }
  0x63   :  { %775 = vmatmul.msk.bf16.gmra.mxu1 %vm225_vm1, %v793_v51  ;;  %784 = vmatmul.msk.bf16.gmra.mxu3 %vm225_vm1, %v802_v52 }
  0x72   :  { %758 = vmatmul.msk.bf16.gmra.mxu0 %vm225_vm1, %v794_v53  ;;  %767 = vmatmul.msk.bf16.gmra.mxu2 %vm225_vm1, %v803_v54 }
  0x73   :  { %776 = vmatmul.msk.bf16.gmra.mxu1 %vm225_vm1, %v794_v53  ;;  %785 = vmatmul.msk.bf16.gmra.mxu3 %vm225_vm1, %v803_v54 }
  0x82   :  { %759 = vmatmul.msk.bf16.gmra.mxu0 %vm225_vm1, %v795_v55  ;;  %768 = vmatmul.msk.bf16.gmra.mxu2 %vm225_vm1, %v804_v56 }
  0x83   :  { %777 = vmatmul.msk.bf16.gmra.mxu1 %vm225_vm1, %v795_v55  ;;  %786 = vmatmul.msk.bf16.gmra.mxu3 %vm225_vm1, %v804_v56 }
  0x92   :  { %760 = vmatmul.msk.bf16.gmra.mxu0 %vm225_vm1, %v796_v57  ;;  %769 = vmatmul.msk.bf16.gmra.mxu2 %vm225_vm1, %v805_v58 }
  0x93   :  { %778 = vmatmul.msk.bf16.gmra.mxu1 %vm225_vm1, %v796_v57  ;;  %787 = vmatmul.msk.bf16.gmra.mxu3 %vm225_vm1, %v805_v58 }
  0x9f   :  { %v296_v0 = vpop.f32.mrf.mxu0 }
  0xa0   :  { %v297_v1 = vadd.f32 %v296_v0, %v1011_v60  ;;  %v395_v2 = vpop.f32.mrf.mxu1 }
  0xa1   :  { %v396_v3 = vadd.f32 %v395_v2, %v1013_v61 }
  0xa2   :  { %v485_v4 = vmax.f32 %v297_v1, 0.0  ;;  %761 = vmatmul.msk.bf16.gmra.mxu0 %vm225_vm1, %v797_v62  ;;  %770 = vmatmul.msk.bf16.gmra.mxu2 %vm225_vm1, %v806_v63 }
  0xa3   :  { %v486_v5 = vmax.f32 %v396_v3, 0.0  ;;  %779 = vmatmul.msk.bf16.gmra.mxu1 %vm225_vm1, %v797_v62  ;;  %788 = vmatmul.msk.bf16.gmra.mxu3 %vm225_vm1, %v806_v63 }
  0xa4   :  { %557 = vst [vmem:[%s1316_s3] sm:$0xff] %v485_v4 }
  0xa5   :  { %558 = vst [vmem:[%s1316_s3 + $0x8] sm:$0xff] %v486_v5  ;;  %v341_v6 = vpop.f32.mrf.mxu2 }
  0xa6   :  { %v342_v7 = vadd.f32 %v341_v6, %v1011_v60  ;;  %v440_v8 = vpop.f32.mrf.mxu3 }
  0xa7   :  { %v441_v9 = vadd.f32 %v440_v8, %v1013_v61  ;;  %v298_v10 = vpop.f32.mrf.mxu0 }
  0xa8   :  { %v521_v11 = vmax.f32 %v342_v7, 0.0  ;;  %v299_v12 = vadd.f32 %v298_v10, %v1011_v60  ;;  %v397_v13 = vpop.f32.mrf.mxu1 }
  0xa9   :  { %v522_v14 = vmax.f32 %v441_v9, 0.0  ;;  %v398_v15 = vadd.f32 %v397_v13, %v1013_v61 }
  0xaa   :  { %593 = vst [vmem:[%s1316_s3 + $0x120] sm:$0xff] %v521_v11  ;;  %v487_v16 = vmax.f32 %v299_v12, 0.0 }
  0xab   :  { %594 = vst [vmem:[%s1316_s3 + $0x128] sm:$0xff] %v522_v14  ;;  %v488_v17 = vmax.f32 %v398_v15, 0.0 }
  0xac   :  { %559 = vst [vmem:[%s1316_s3 + $0x10] sm:$0xff] %v487_v16 }
  0xad   :  { %560 = vst [vmem:[%s1316_s3 + $0x18] sm:$0xff] %v488_v17  ;;  %v343_v18 = vpop.f32.mrf.mxu2 }
  0xae   :  { %v344_v19 = vadd.f32 %v343_v18, %v1011_v60  ;;  %v442_v20 = vpop.f32.mrf.mxu3 }
  0xaf   :  { %v443_v21 = vadd.f32 %v442_v20, %v1013_v61  ;;  %v301_v22 = vpop.f32.mrf.mxu0 }
  0xb0   :  { %v523_v23 = vmax.f32 %v344_v19, 0.0  ;;  %v302_v24 = vadd.f32 %v301_v22, %v1011_v60  ;;  %v400_v25 = vpop.f32.mrf.mxu1 }
  0xb1   :  { %v524_v26 = vmax.f32 %v443_v21, 0.0  ;;  %v401_v27 = vadd.f32 %v400_v25, %v1013_v61 }
  0xb2   :  { %595 = vst [vmem:[%s1316_s3 + $0x130] sm:$0xff] %v523_v23  ;;  %v489_v28 = vmax.f32 %v302_v24, 0.0 }
  0xb3   :  { %596 = vst [vmem:[%s1316_s3 + $0x138] sm:$0xff] %v524_v26  ;;  %v490_v29 = vmax.f32 %v401_v27, 0.0 }
  0xb4   :  { %561 = vst [vmem:[%s1316_s3 + $0x20] sm:$0xff] %v489_v28 }
  0xb5   :  { %562 = vst [vmem:[%s1316_s3 + $0x28] sm:$0xff] %v490_v29  ;;  %v346_v30 = vpop.f32.mrf.mxu2 }
  0xb6   :  { %v347_v31 = vadd.f32 %v346_v30, %v1011_v60  ;;  %v445_v32 = vpop.f32.mrf.mxu3 }
  0xb7   :  { %v446_v33 = vadd.f32 %v445_v32, %v1013_v61  ;;  %v303_v34 = vpop.f32.mrf.mxu0 }
  0xb8   :  { %v525_v35 = vmax.f32 %v347_v31, 0.0  ;;  %v304_v36 = vadd.f32 %v303_v34, %v1011_v60  ;;  %v402_v37 = vpop.f32.mrf.mxu1 }
  0xb9   :  { %v526_v38 = vmax.f32 %v446_v33, 0.0  ;;  %v403_v39 = vadd.f32 %v402_v37, %v1013_v61 }
  0xba   :  { %597 = vst [vmem:[%s1316_s3 + $0x140] sm:$0xff] %v525_v35  ;;  %v491_v40 = vmax.f32 %v304_v36, 0.0 }
  0xbb   :  { %598 = vst [vmem:[%s1316_s3 + $0x148] sm:$0xff] %v526_v38  ;;  %v492_v41 = vmax.f32 %v403_v39, 0.0 }
  0xbc   :  { %563 = vst [vmem:[%s1316_s3 + $0x30] sm:$0xff] %v491_v40 }
  0xbd   :  { %564 = vst [vmem:[%s1316_s3 + $0x38] sm:$0xff] %v492_v41  ;;  %v348_v42 = vpop.f32.mrf.mxu2 }
  0xbe   :  { %v349_v43 = vadd.f32 %v348_v42, %v1011_v60  ;;  %v447_v44 = vpop.f32.mrf.mxu3 }
  0xbf   :  { %v448_v45 = vadd.f32 %v447_v44, %v1013_v61  ;;  %v306_v46 = vpop.f32.mrf.mxu0 }
  0xc0   :  { %v527_v47 = vmax.f32 %v349_v43, 0.0  ;;  %v307_v48 = vadd.f32 %v306_v46, %v1011_v60  ;;  %v405_v49 = vpop.f32.mrf.mxu1 }
  0xc1   :  { %v528_v50 = vmax.f32 %v448_v45, 0.0  ;;  %v406_v51 = vadd.f32 %v405_v49, %v1013_v61 }
  0xc2   :  { %599 = vst [vmem:[%s1316_s3 + $0x150] sm:$0xff] %v527_v47  ;;  %v493_v52 = vmax.f32 %v307_v48, 0.0 }
  0xc3   :  { %600 = vst [vmem:[%s1316_s3 + $0x158] sm:$0xff] %v528_v50  ;;  %v494_v53 = vmax.f32 %v406_v51, 0.0 }
  0xc4   :  { %565 = vst [vmem:[%s1316_s3 + $0x40] sm:$0xff] %v493_v52 }
  0xc5   :  { %566 = vst [vmem:[%s1316_s3 + $0x48] sm:$0xff] %v494_v53  ;;  %v351_v54 = vpop.f32.mrf.mxu2 }
  0xc6   :  { %v352_v55 = vadd.f32 %v351_v54, %v1011_v60  ;;  %v450_v56 = vpop.f32.mrf.mxu3 }
  0xc7   :  { %v451_v57 = vadd.f32 %v450_v56, %v1013_v61  ;;  %v308_v58 = vpop.f32.mrf.mxu0 }
  0xc8   :  { %v529_v59 = vmax.f32 %v352_v55, 0.0  ;;  %v309_v62 = vadd.f32 %v308_v58, %v1011_v60  ;;  %v407_v63 = vpop.f32.mrf.mxu1 }
  0xc9   :  { %v530_v0 = vmax.f32 %v451_v57, 0.0  ;;  %v408_v1 = vadd.f32 %v407_v63, %v1013_v61 }
  0xca   :  { %601 = vst [vmem:[%s1316_s3 + $0x160] sm:$0xff] %v529_v59  ;;  %v495_v2 = vmax.f32 %v309_v62, 0.0 }
  0xcb   :  { %602 = vst [vmem:[%s1316_s3 + $0x168] sm:$0xff] %v530_v0  ;;  %v496_v3 = vmax.f32 %v408_v1, 0.0 }
  0xcc   :  { %567 = vst [vmem:[%s1316_s3 + $0x50] sm:$0xff] %v495_v2 }
  0xcd   :  { %568 = vst [vmem:[%s1316_s3 + $0x58] sm:$0xff] %v496_v3  ;;  %v353_v4 = vpop.f32.mrf.mxu2 }
  0xce   :  { %v354_v5 = vadd.f32 %v353_v4, %v1011_v60  ;;  %v452_v6 = vpop.f32.mrf.mxu3 }
  0xcf   :  { %v453_v7 = vadd.f32 %v452_v6, %v1013_v61  ;;  %v311_v8 = vpop.f32.mrf.mxu0 }
  0xd0   :  { %v531_v9 = vmax.f32 %v354_v5, 0.0  ;;  %v312_v10 = vadd.f32 %v311_v8, %v1011_v60  ;;  %v410_v11 = vpop.f32.mrf.mxu1 }
  0xd1   :  { %v532_v12 = vmax.f32 %v453_v7, 0.0  ;;  %v411_v13 = vadd.f32 %v410_v11, %v1013_v61 }
  0xd2   :  { %603 = vst [vmem:[%s1316_s3 + $0x170] sm:$0xff] %v531_v9  ;;  %v497_v14 = vmax.f32 %v312_v10, 0.0 }
  0xd3   :  { %604 = vst [vmem:[%s1316_s3 + $0x178] sm:$0xff] %v532_v12  ;;  %v498_v15 = vmax.f32 %v411_v13, 0.0 }
  0xd4   :  { %569 = vst [vmem:[%s1316_s3 + $0x60] sm:$0xff] %v497_v14 }
  0xd5   :  { %570 = vst [vmem:[%s1316_s3 + $0x68] sm:$0xff] %v498_v15  ;;  %v356_v16 = vpop.f32.mrf.mxu2 }
  0xd6   :  { %v357_v17 = vadd.f32 %v356_v16, %v1011_v60  ;;  %v455_v18 = vpop.f32.mrf.mxu3 }
  0xd7   :  { %v456_v19 = vadd.f32 %v455_v18, %v1013_v61  ;;  %v313_v20 = vpop.f32.mrf.mxu0 }
  0xd8   :  { %v533_v21 = vmax.f32 %v357_v17, 0.0  ;;  %v314_v22 = vadd.f32 %v313_v20, %v1011_v60  ;;  %v412_v23 = vpop.f32.mrf.mxu1 }
  0xd9   :  { %v534_v24 = vmax.f32 %v456_v19, 0.0  ;;  %v413_v25 = vadd.f32 %v412_v23, %v1013_v61 }
  0xda   :  { %605 = vst [vmem:[%s1316_s3 + $0x180] sm:$0xff] %v533_v21  ;;  %v499_v26 = vmax.f32 %v314_v22, 0.0 }
  0xdb   :  { %606 = vst [vmem:[%s1316_s3 + $0x188] sm:$0xff] %v534_v24  ;;  %v500_v27 = vmax.f32 %v413_v25, 0.0 }
  0xdc   :  { %571 = vst [vmem:[%s1316_s3 + $0x70] sm:$0xff] %v499_v26 }
  0xdd   :  { %572 = vst [vmem:[%s1316_s3 + $0x78] sm:$0xff] %v500_v27  ;;  %v358_v28 = vpop.f32.mrf.mxu2 }
  0xde   :  { %v359_v29 = vadd.f32 %v358_v28, %v1011_v60  ;;  %v457_v30 = vpop.f32.mrf.mxu3 }
  0xdf   :  { %v458_v31 = vadd.f32 %v457_v30, %v1013_v61  ;;  %v316_v32 = vpop.f32.mrf.mxu0 }
  0xe0   :  { %v535_v33 = vmax.f32 %v359_v29, 0.0  ;;  %v317_v34 = vadd.f32 %v316_v32, %v1011_v60  ;;  %v415_v35 = vpop.f32.mrf.mxu1 }
  0xe1   :  { %v536_v36 = vmax.f32 %v458_v31, 0.0  ;;  %v416_v37 = vadd.f32 %v415_v35, %v1013_v61 }
  0xe2   :  { %607 = vst [vmem:[%s1316_s3 + $0x190] sm:$0xff] %v535_v33  ;;  %v501_v38 = vmax.f32 %v317_v34, 0.0 }
  0xe3   :  { %608 = vst [vmem:[%s1316_s3 + $0x198] sm:$0xff] %v536_v36  ;;  %v502_v39 = vmax.f32 %v416_v37, 0.0 }
  0xe4   :  { %573 = vst [vmem:[%s1316_s3 + $0x80] sm:$0xff] %v501_v38 }
  0xe5   :  { %574 = vst [vmem:[%s1316_s3 + $0x88] sm:$0xff] %v502_v39  ;;  %v361_v40 = vpop.f32.mrf.mxu2 }
  0xe6   :  { %v362_v41 = vadd.f32 %v361_v40, %v1011_v60  ;;  %v460_v42 = vpop.f32.mrf.mxu3 }
  0xe7   :  { %v461_v43 = vadd.f32 %v460_v42, %v1013_v61  ;;  %v318_v44 = vpop.f32.mrf.mxu0 }
  0xe8   :  { %v537_v45 = vmax.f32 %v362_v41, 0.0  ;;  %v319_v46 = vadd.f32 %v318_v44, %v1011_v60  ;;  %v417_v47 = vpop.f32.mrf.mxu1 }
  0xe9   :  { %v538_v48 = vmax.f32 %v461_v43, 0.0  ;;  %v418_v49 = vadd.f32 %v417_v47, %v1013_v61 }
  0xea   :  { %609 = vst [vmem:[%s1316_s3 + $0x1a0] sm:$0xff] %v537_v45  ;;  %v503_v50 = vmax.f32 %v319_v46, 0.0 }
  0xeb   :  { %610 = vst [vmem:[%s1316_s3 + $0x1a8] sm:$0xff] %v538_v48  ;;  %v504_v51 = vmax.f32 %v418_v49, 0.0 }
  0xec   :  { %575 = vst [vmem:[%s1316_s3 + $0x90] sm:$0xff] %v503_v50 }
  0xed   :  { %576 = vst [vmem:[%s1316_s3 + $0x98] sm:$0xff] %v504_v51  ;;  %v363_v52 = vpop.f32.mrf.mxu2 }
  0xee   :  { %v364_v53 = vadd.f32 %v363_v52, %v1011_v60  ;;  %v462_v54 = vpop.f32.mrf.mxu3 }
  0xef   :  { %v463_v55 = vadd.f32 %v462_v54, %v1013_v61  ;;  %v321_v56 = vpop.f32.mrf.mxu0 }
  0xf0   :  { %v539_v57 = vmax.f32 %v364_v53, 0.0  ;;  %v322_v58 = vadd.f32 %v321_v56, %v1011_v60  ;;  %v420_v59 = vpop.f32.mrf.mxu1 }
  0xf1   :  { %v540_v62 = vmax.f32 %v463_v55, 0.0  ;;  %v421_v63 = vadd.f32 %v420_v59, %v1013_v61 }
  0xf2   :  { %611 = vst [vmem:[%s1316_s3 + $0x1b0] sm:$0xff] %v539_v57  ;;  %v505_v0 = vmax.f32 %v322_v58, 0.0 }
  0xf3   :  { %612 = vst [vmem:[%s1316_s3 + $0x1b8] sm:$0xff] %v540_v62  ;;  %v506_v1 = vmax.f32 %v421_v63, 0.0 }
  0xf4   :  { %577 = vst [vmem:[%s1316_s3 + $0xa0] sm:$0xff] %v505_v0 }
  0xf5   :  { %578 = vst [vmem:[%s1316_s3 + $0xa8] sm:$0xff] %v506_v1  ;;  %v366_v2 = vpop.f32.mrf.mxu2 }
  0xf6   :  { %v367_v3 = vadd.f32 %v366_v2, %v1011_v60  ;;  %v465_v4 = vpop.f32.mrf.mxu3 }
  0xf7   :  { %v466_v5 = vadd.f32 %v465_v4, %v1013_v61  ;;  %v323_v6 = vpop.f32.mrf.mxu0 }
  0xf8   :  { %v541_v7 = vmax.f32 %v367_v3, 0.0  ;;  %v324_v8 = vadd.f32 %v323_v6, %v1011_v60  ;;  %v422_v9 = vpop.f32.mrf.mxu1 }
  0xf9   :  { %v542_v10 = vmax.f32 %v466_v5, 0.0  ;;  %v423_v11 = vadd.f32 %v422_v9, %v1013_v61 }
  0xfa   :  { %613 = vst [vmem:[%s1316_s3 + $0x1c0] sm:$0xff] %v541_v7  ;;  %v507_v12 = vmax.f32 %v324_v8, 0.0 }
  0xfb   :  { %614 = vst [vmem:[%s1316_s3 + $0x1c8] sm:$0xff] %v542_v10  ;;  %v508_v13 = vmax.f32 %v423_v11, 0.0 }
  0xfc   :  { %579 = vst [vmem:[%s1316_s3 + $0xb0] sm:$0xff] %v507_v12 }
  0xfd   :  { %580 = vst [vmem:[%s1316_s3 + $0xb8] sm:$0xff] %v508_v13  ;;  %v368_v14 = vpop.f32.mrf.mxu2 }
  0xfe   :  { %v369_v15 = vadd.f32 %v368_v14, %v1011_v60  ;;  %v467_v16 = vpop.f32.mrf.mxu3 }
  0xff   :  { %v468_v17 = vadd.f32 %v467_v16, %v1013_v61  ;;  %v326_v18 = vpop.f32.mrf.mxu0 }
 0x100   :  { %v543_v19 = vmax.f32 %v369_v15, 0.0  ;;  %v327_v20 = vadd.f32 %v326_v18, %v1011_v60  ;;  %v425_v21 = vpop.f32.mrf.mxu1 }
 0x101   :  { %v544_v22 = vmax.f32 %v468_v17, 0.0  ;;  %v426_v23 = vadd.f32 %v425_v21, %v1013_v61 }
 0x102   :  { %615 = vst [vmem:[%s1316_s3 + $0x1d0] sm:$0xff] %v543_v19  ;;  %v509_v24 = vmax.f32 %v327_v20, 0.0 }
 0x103   :  { %616 = vst [vmem:[%s1316_s3 + $0x1d8] sm:$0xff] %v544_v22  ;;  %v510_v25 = vmax.f32 %v426_v23, 0.0 }
 0x104   :  { %581 = vst [vmem:[%s1316_s3 + $0xc0] sm:$0xff] %v509_v24 }
 0x105   :  { %582 = vst [vmem:[%s1316_s3 + $0xc8] sm:$0xff] %v510_v25  ;;  %v371_v26 = vpop.f32.mrf.mxu2 }
 0x106   :  { %v372_v27 = vadd.f32 %v371_v26, %v1011_v60  ;;  %v470_v28 = vpop.f32.mrf.mxu3 }
 0x107   :  { %v471_v29 = vadd.f32 %v470_v28, %v1013_v61  ;;  %v328_v30 = vpop.f32.mrf.mxu0 }
 0x108   :  { %v545_v31 = vmax.f32 %v372_v27, 0.0  ;;  %v329_v32 = vadd.f32 %v328_v30, %v1011_v60  ;;  %v427_v33 = vpop.f32.mrf.mxu1 }
 0x109   :  { %v546_v34 = vmax.f32 %v471_v29, 0.0  ;;  %v428_v35 = vadd.f32 %v427_v33, %v1013_v61 }
 0x10a   :  { %617 = vst [vmem:[%s1316_s3 + $0x1e0] sm:$0xff] %v545_v31  ;;  %v511_v36 = vmax.f32 %v329_v32, 0.0 }
 0x10b   :  { %618 = vst [vmem:[%s1316_s3 + $0x1e8] sm:$0xff] %v546_v34  ;;  %v512_v37 = vmax.f32 %v428_v35, 0.0 }
 0x10c   :  { %583 = vst [vmem:[%s1316_s3 + $0xd0] sm:$0xff] %v511_v36 }
 0x10d   :  { %584 = vst [vmem:[%s1316_s3 + $0xd8] sm:$0xff] %v512_v37  ;;  %v373_v38 = vpop.f32.mrf.mxu2 }
 0x10e   :  { %v374_v39 = vadd.f32 %v373_v38, %v1011_v60  ;;  %v472_v40 = vpop.f32.mrf.mxu3 }
 0x10f   :  { %v473_v41 = vadd.f32 %v472_v40, %v1013_v61  ;;  %v331_v42 = vpop.f32.mrf.mxu0 }
 0x110   :  { %v547_v43 = vmax.f32 %v374_v39, 0.0  ;;  %v332_v44 = vadd.f32 %v331_v42, %v1011_v60  ;;  %v430_v45 = vpop.f32.mrf.mxu1 }
 0x111   :  { %v548_v46 = vmax.f32 %v473_v41, 0.0  ;;  %v431_v47 = vadd.f32 %v430_v45, %v1013_v61 }
 0x112   :  { %619 = vst [vmem:[%s1316_s3 + $0x1f0] sm:$0xff] %v547_v43  ;;  %v513_v48 = vmax.f32 %v332_v44, 0.0 }
 0x113   :  { %620 = vst [vmem:[%s1316_s3 + $0x1f8] sm:$0xff] %v548_v46  ;;  %v514_v49 = vmax.f32 %v431_v47, 0.0 }
 0x114   :  { %585 = vst [vmem:[%s1316_s3 + $0xe0] sm:$0xff] %v513_v48 }
 0x115   :  { %586 = vst [vmem:[%s1316_s3 + $0xe8] sm:$0xff] %v514_v49  ;;  %v376_v50 = vpop.f32.mrf.mxu2 }
 0x116   :  { %v377_v51 = vadd.f32 %v376_v50, %v1011_v60  ;;  %v475_v52 = vpop.f32.mrf.mxu3 }
 0x117   :  { %v476_v53 = vadd.f32 %v475_v52, %v1013_v61  ;;  %v333_v54 = vpop.f32.mrf.mxu0 }
 0x118   :  { %v549_v55 = vmax.f32 %v377_v51, 0.0  ;;  %v334_v56 = vadd.f32 %v333_v54, %v1011_v60  ;;  %v432_v57 = vpop.f32.mrf.mxu1 }
 0x119   :  { %v550_v58 = vmax.f32 %v476_v53, 0.0  ;;  %v433_v59 = vadd.f32 %v432_v57, %v1013_v61 }
 0x11a   :  { %621 = vst [vmem:[%s1316_s3 + $0x200] sm:$0xff] %v549_v55  ;;  %v515_v62 = vmax.f32 %v334_v56, 0.0 }
 0x11b   :  { %622 = vst [vmem:[%s1316_s3 + $0x208] sm:$0xff] %v550_v58  ;;  %v516_v63 = vmax.f32 %v433_v59, 0.0 }
 0x11c   :  { %587 = vst [vmem:[%s1316_s3 + $0xf0] sm:$0xff] %v515_v62 }
 0x11d   :  { %588 = vst [vmem:[%s1316_s3 + $0xf8] sm:$0xff] %v516_v63  ;;  %v378_v0 = vpop.f32.mrf.mxu2 }
 0x11e   :  { %v379_v1 = vadd.f32 %v378_v0, %v1011_v60  ;;  %v477_v2 = vpop.f32.mrf.mxu3 }
 0x11f   :  { %v478_v3 = vadd.f32 %v477_v2, %v1013_v61  ;;  %v336_v4 = vpop.f32.mrf.mxu0 }
 0x120   :  { %v551_v5 = vmax.f32 %v379_v1, 0.0  ;;  %v337_v6 = vadd.f32 %v336_v4, %v1011_v60  ;;  %v435_v7 = vpop.f32.mrf.mxu1 }
 0x121   :  { %v552_v8 = vmax.f32 %v478_v3, 0.0  ;;  %v436_v9 = vadd.f32 %v435_v7, %v1013_v61 }
 0x122   :  { %623 = vst [vmem:[%s1316_s3 + $0x210] sm:$0xff] %v551_v5  ;;  %v517_v10 = vmax.f32 %v337_v6, 0.0 }
 0x123   :  { %624 = vst [vmem:[%s1316_s3 + $0x218] sm:$0xff] %v552_v8  ;;  %v518_v11 = vmax.f32 %v436_v9, 0.0 }
 0x124   :  { %589 = vst [vmem:[%s1316_s3 + $0x100] sm:$0xff] %v517_v10 }
 0x125   :  { %590 = vst [vmem:[%s1316_s3 + $0x108] sm:$0xff] %v518_v11  ;;  %v381_v12 = vpop.f32.mrf.mxu2 }
 0x126   :  { %v382_v13 = vadd.f32 %v381_v12, %v1011_v60  ;;  %v480_v14 = vpop.f32.mrf.mxu3 }
 0x127   :  { %v481_v15 = vadd.f32 %v480_v14, %v1013_v61  ;;  %v338_v16 = vpop.f32.mrf.mxu0 }
 0x128   :  { %v553_v17 = vmax.f32 %v382_v13, 0.0  ;;  %v339_v18 = vadd.f32 %v338_v16, %v1011_v60  ;;  %v437_v19 = vpop.f32.mrf.mxu1 }
 0x129   :  { %v554_v20 = vmax.f32 %v481_v15, 0.0  ;;  %v438_v21 = vadd.f32 %v437_v19, %v1013_v61 }
 0x12a   :  { %625 = vst [vmem:[%s1316_s3 + $0x220] sm:$0xff] %v553_v17  ;;  %v519_v22 = vmax.f32 %v339_v18, 0.0 }
 0x12b   :  { %626 = vst [vmem:[%s1316_s3 + $0x228] sm:$0xff] %v554_v20  ;;  %v520_v23 = vmax.f32 %v438_v21, 0.0 }
 0x12c   :  { %591 = vst [vmem:[%s1316_s3 + $0x110] sm:$0xff] %v519_v22 }
 0x12d   :  { %592 = vst [vmem:[%s1316_s3 + $0x118] sm:$0xff] %v520_v23  ;;  %v383_v24 = vpop.f32.mrf.mxu2 }
 0x12e   :  { %v384_v25 = vadd.f32 %v383_v24, %v1011_v60  ;;  %v482_v26 = vpop.f32.mrf.mxu3 }
 0x12f   :  { %v483_v27 = vadd.f32 %v482_v26, %v1013_v61 }
 0x130   :  { %v555_v28 = vmax.f32 %v384_v25, 0.0 }
 0x131   :  { %v556_v29 = vmax.f32 %v483_v27, 0.0 }
 0x132   :  { %627 = vst [vmem:[%s1316_s3 + $0x230] sm:$0xff] %v555_v28 }
 0x133   :  { %628 = vst [vmem:[%s1316_s3 + $0x238] sm:$0xff] %v556_v29 }

// kernel: aspp_deformable_v2.8
= control target key start
LH: loop header
LB: loop body
LE: loop exit
PB: predicated region body
PF: predicated region fallthrough
CT: control target
= control target key end

     0   :  { %vm350_vm0 = vcmask 1041408   ;;  %vm310_vm1 = vcmask 556032   ;;  %s1566_s1 = inlined_call_operand.vmem [shape: bf16[196,256], index: 1, kind: input, shape index: {}]   ;;  %s1567_s0 = inlined_call_operand.vmem [shape: bf16[200,196], index: 0, kind: input, shape index: {}]   ;;  %s1568_s2 = inlined_call_operand.vmem [shape: f32[1,256], index: 2, kind: input, shape index: {}]   ;;  %s1569_s3 = inlined_call_operand.vmem [shape: f32[200,256], index: 3, kind: output, shape index: {}]  }
   0x1   :  { %v907_v0 = vld [vmem:[%s1566_s1 + $0x70] sm:$0xf]  ;;  %v1010_v1 = vld [vmem:[%s1566_s1 + $0x74] sm:$0xf0]  ;;  %v1009_v2 = vld [vmem:[%s1566_s1 + $0x74] sm:$0xf] }
   0x2   :  { %v908_v3 = vor.u32 %v1010_v1, %v907_v0  ;;  %v909_v4 = vld [vmem:[%s1566_s1 + $0x78] sm:$0xf0]  ;;  %v899_v5 = vld [vmem:[%s1566_s1 + $0x60] sm:$0xf]  ;;  %v1008_v6 = vld [vmem:[%s1566_s1 + $0x64] sm:$0xf0] }
   0x3   :  { %v912_v7 = vor.u32 %v1009_v2, %v909_v4  ;;  %v1007_v8 = vld [vmem:[%s1566_s1 + $0x64] sm:$0xf]  ;;  %v901_v9 = vld [vmem:[%s1566_s1 + $0x68] sm:$0xf0]  ;;  %v900_v11 = vor.u32 %v1008_v6, %v899_v5  ;;  %v891_v15 = vld [vmem:[%s1566_s1 + $0x50] sm:$0xf] }
   0x4   :  { %v64_v10 = vld [vmem:[%s1566_s1 + $0xc0] sm:$0x33]  ;;  %357 = vmatpush.bf16.msra.mxu0 %v908_v3  ;;  %v904_v14 = vor.u32 %v1007_v8, %v901_v9  ;;  %v1006_v16 = vld [vmem:[%s1566_s1 + $0x54] sm:$0xf0]  ;;  %v1005_v17 = vld [vmem:[%s1566_s1 + $0x54] sm:$0xf] }
   0x5   :  { %v259_v12 = vunpack.c.h.b16 %v64_v10  ;;  %v258_v13 = vunpack.c.l.b16 %v64_v10  ;;  %503 = vmatpush.bf16.msra.mxu2 %v912_v7  ;;  %v893_v19 = vld [vmem:[%s1566_s1 + $0x58] sm:$0xf0]  ;;  %v1017_v20 = vld [vmem:[%s1566_s1 + $0xb4] sm:$0xf]  ;;  %v892_v24 = vor.u32 %v1006_v16, %v891_v15  ;;  %v939_v26 = vld [vmem:[%s1566_s1 + $0xb0] sm:$0xf] }
   0x6   :  { %v941_v21 = vld [vmem:[%s1566_s1 + $0xb8] sm:$0xf0]  ;;  %v1018_v27 = vld [vmem:[%s1566_s1 + $0xb4] sm:$0xf0]  ;;  %v896_v28 = vor.u32 %v1005_v17, %v893_v19  ;;  %v883_v30 = vld [vmem:[%s1566_s1 + $0x40] sm:$0xf] }
   0x7   :  { %v285_v18 = vpack.c.b16 %v259_v12, %v259_v12  ;;  %v284_v22 = vpack.c.b16 %v258_v13, %v258_v13  ;;  %v944_v29 = vor.u32 %v1017_v20, %v941_v21  ;;  %v1004_v31 = vld [vmem:[%s1566_s1 + $0x44] sm:$0xf0]  ;;  %v1003_v32 = vld [vmem:[%s1566_s1 + $0x44] sm:$0xf]  ;;  %v885_v33 = vld [vmem:[%s1566_s1 + $0x48] sm:$0xf0]  ;;  %v940_v36 = vor.u32 %v1018_v27, %v939_v26 }
   0x8   :  { %358 = vmatpush.bf16.msra.mxu0 %v900_v11  ;;  %v1015_v34 = vld [vmem:[%s1566_s1 + $0xa4] sm:$0xf]  ;;  %v933_v35 = vld [vmem:[%s1566_s1 + $0xa8] sm:$0xf0]  ;;  %v931_v37 = vld [vmem:[%s1566_s1 + $0xa0] sm:$0xf]  ;;  %v884_v39 = vor.u32 %v1004_v31, %v883_v30  ;;  %v888_v40 = vor.u32 %v1003_v32, %v885_v33 }
   0x9   :  { %v355_v23 = vsel %vm350_vm0, %v285_v18, 0  ;;  %v352_v25 = vsel %vm350_vm0, %v284_v22, 0  ;;  %504 = vmatpush.bf16.msra.mxu2 %v904_v14  ;;  %v1016_v38 = vld [vmem:[%s1566_s1 + $0xa4] sm:$0xf0]  ;;  %v936_v41 = vor.u32 %v1015_v34, %v933_v35  ;;  %v875_v42 = vld [vmem:[%s1566_s1 + $0x30] sm:$0xf] }
   0xa   :  { %579 = vmatpush.bf16.msra.mxu3 %v355_v23  ;;  %433 = vmatpush.bf16.msra.mxu1 %v352_v25  ;;  %v1002_v43 = vld [vmem:[%s1566_s1 + $0x34] sm:$0xf0]  ;;  %v1001_v44 = vld [vmem:[%s1566_s1 + $0x34] sm:$0xf]  ;;  %v877_v45 = vld [vmem:[%s1566_s1 + $0x38] sm:$0xf0]  ;;  %v932_v48 = vor.u32 %v1016_v38, %v931_v37 }
   0xb   :  { %v1013_v46 = vld [vmem:[%s1566_s1 + $0x94] sm:$0xf]  ;;  %v925_v47 = vld [vmem:[%s1566_s1 + $0x98] sm:$0xf0]  ;;  %v923_v49 = vld [vmem:[%s1566_s1 + $0x90] sm:$0xf]  ;;  %v876_v51 = vor.u32 %v1002_v43, %v875_v42  ;;  %v880_v52 = vor.u32 %v1001_v44, %v877_v45 }
   0xc   :  { %359 = vmatpush.bf16.msra.mxu0 %v892_v24  ;;  %v1014_v50 = vld [vmem:[%s1566_s1 + $0x94] sm:$0xf0]  ;;  %v928_v53 = vor.u32 %v1013_v46, %v925_v47  ;;  %v867_v54 = vld [vmem:[%s1566_s1 + $0x20] sm:$0xf]  ;;  %v1000_v55 = vld [vmem:[%s1566_s1 + $0x24] sm:$0xf0] }
   0xd   :  { %505 = vmatpush.bf16.msra.mxu2 %v896_v28  ;;  %v999_v56 = vld [vmem:[%s1566_s1 + $0x24] sm:$0xf]  ;;  %v869_v57 = vld [vmem:[%s1566_s1 + $0x28] sm:$0xf0]  ;;  %v924_v60 = vor.u32 %v1014_v50, %v923_v49  ;;  %v915_v61 = vld [vmem:[%s1566_s1 + $0x80] sm:$0xf]  ;;  %v868_v63 = vor.u32 %v1000_v55, %v867_v54 }
   0xe   :  { %580 = vmatpush.bf16.msra.mxu3 %v944_v29  ;;  %434 = vmatpush.bf16.msra.mxu1 %v940_v36  ;;  %v1011_v58 = vld [vmem:[%s1566_s1 + $0x84] sm:$0xf]  ;;  %v917_v59 = vld [vmem:[%s1566_s1 + $0x88] sm:$0xf0]  ;;  %v1012_v62 = vld [vmem:[%s1566_s1 + $0x84] sm:$0xf0]  ;;  %v872_v1 = vor.u32 %v999_v56, %v869_v57 }
   0xf   :  { %v971_v0 = vld [vmem:[%s1567_s0 + $0x4] sm:$0xf]  ;;  %v920_v2 = vor.u32 %v1011_v58, %v917_v59  ;;  %v757_v3 = vld [vmem:[%s1567_s0 + $0x8] sm:$0xf0]  ;;  %v859_v4 = vld [vmem:[%s1566_s1 + $0x10] sm:$0xf]  ;;  %v916_v8 = vor.u32 %v1012_v62, %v915_v61 }
  0x10   :  { %360 = vmatpush.bf16.msra.mxu0 %v884_v39  ;;  %v998_v5 = vld [vmem:[%s1566_s1 + $0x14] sm:$0xf0]  ;;  %v997_v6 = vld [vmem:[%s1566_s1 + $0x14] sm:$0xf]  ;;  %v861_v7 = vld [vmem:[%s1566_s1 + $0x18] sm:$0xf0]  ;;  %v760_v9 = vor.u32 %v971_v0, %v757_v3 }
  0x11   :  { %506 = vmatpush.bf16.msra.mxu2 %v888_v40  ;;  %v860_v10 = vor.u32 %v998_v5, %v859_v4  ;;  %v864_v11 = vor.u32 %v997_v6, %v861_v7  ;;  %v851_v12 = vld [vmem:[%s1566_s1] sm:$0xf]  ;;  %v996_v13 = vld [vmem:[%s1566_s1 + $0x4] sm:$0xf0]  ;;  %v995_v14 = vld [vmem:[%s1566_s1 + $0x4] sm:$0xf] }
  0x12   :  { %581 = vmatpush.bf16.msra.mxu3 %v936_v41  ;;  %435 = vmatpush.bf16.msra.mxu1 %v932_v48  ;;  %v853_v15 = vld [vmem:[%s1566_s1 + $0x8] sm:$0xf0]  ;;  %v852_v16 = vor.u32 %v996_v13, %v851_v12  ;;  %v755_v17 = vld [vmem:[%s1567_s0] sm:$0xf]  ;;  %v972_v18 = vld [vmem:[%s1567_s0 + $0x4] sm:$0xf0] }
  0x13   :  { %v856_v19 = vor.u32 %v995_v14, %v853_v15  ;;  %v756_v20 = vor.u32 %v972_v18, %v755_v17  ;;  %v973_v21 = vld [vmem:[%s1567_s0 + $0x14] sm:$0xf]  ;;  %v765_v22 = vld [vmem:[%s1567_s0 + $0x18] sm:$0xf0]  ;;  %v763_v24 = vld [vmem:[%s1567_s0 + $0x10] sm:$0xf] }
  0x14   :  { %361 = vmatpush.bf16.msra.mxu0 %v876_v51  ;;  %v768_v23 = vor.u32 %v973_v21, %v765_v22  ;;  %v974_v25 = vld [vmem:[%s1567_s0 + $0x14] sm:$0xf0]  ;;  %v975_v27 = vld [vmem:[%s1567_s0 + $0x24] sm:$0xf]  ;;  %v773_v28 = vld [vmem:[%s1567_s0 + $0x28] sm:$0xf0] }
  0x15   :  { %507 = vmatpush.bf16.msra.mxu2 %v880_v52  ;;  %v764_v26 = vor.u32 %v974_v25, %v763_v24  ;;  %v776_v29 = vor.u32 %v975_v27, %v773_v28  ;;  %v771_v30 = vld [vmem:[%s1567_s0 + $0x20] sm:$0xf]  ;;  %v976_v31 = vld [vmem:[%s1567_s0 + $0x24] sm:$0xf0]  ;;  %v977_v33 = vld [vmem:[%s1567_s0 + $0x34] sm:$0xf] }
  0x16   :  { %582 = vmatpush.bf16.msra.mxu3 %v928_v53  ;;  %436 = vmatpush.bf16.msra.mxu1 %v924_v60  ;;  %v772_v32 = vor.u32 %v976_v31, %v771_v30  ;;  %v781_v34 = vld [vmem:[%s1567_s0 + $0x38] sm:$0xf0]  ;;  %v779_v36 = vld [vmem:[%s1567_s0 + $0x30] sm:$0xf]  ;;  %v978_v37 = vld [vmem:[%s1567_s0 + $0x34] sm:$0xf0] }
  0x17   :  { %v784_v35 = vor.u32 %v977_v33, %v781_v34  ;;  %v780_v38 = vor.u32 %v978_v37, %v779_v36  ;;  %v979_v39 = vld [vmem:[%s1567_s0 + $0x44] sm:$0xf]  ;;  %v789_v40 = vld [vmem:[%s1567_s0 + $0x48] sm:$0xf0]  ;;  %v787_v42 = vld [vmem:[%s1567_s0 + $0x40] sm:$0xf] }
  0x18   :  { %362 = vmatpush.bf16.msra.mxu0 %v868_v63  ;;  %v792_v41 = vor.u32 %v979_v39, %v789_v40  ;;  %v980_v43 = vld [vmem:[%s1567_s0 + $0x44] sm:$0xf0]  ;;  %v981_v45 = vld [vmem:[%s1567_s0 + $0x54] sm:$0xf]  ;;  %v797_v46 = vld [vmem:[%s1567_s0 + $0x58] sm:$0xf0] }
  0x19   :  { %508 = vmatpush.bf16.msra.mxu2 %v872_v1  ;;  %v788_v44 = vor.u32 %v980_v43, %v787_v42  ;;  %v800_v47 = vor.u32 %v981_v45, %v797_v46  ;;  %v795_v48 = vld [vmem:[%s1567_s0 + $0x50] sm:$0xf]  ;;  %v982_v49 = vld [vmem:[%s1567_s0 + $0x54] sm:$0xf0]  ;;  %v983_v51 = vld [vmem:[%s1567_s0 + $0x64] sm:$0xf] }
  0x1a   :  { %583 = vmatpush.bf16.msra.mxu3 %v920_v2  ;;  %437 = vmatpush.bf16.msra.mxu1 %v916_v8  ;;  %v796_v50 = vor.u32 %v982_v49, %v795_v48  ;;  %v805_v52 = vld [vmem:[%s1567_s0 + $0x68] sm:$0xf0]  ;;  %v803_v54 = vld [vmem:[%s1567_s0 + $0x60] sm:$0xf]  ;;  %v984_v55 = vld [vmem:[%s1567_s0 + $0x64] sm:$0xf0] }
  0x1b   :  { %v808_v53 = vor.u32 %v983_v51, %v805_v52  ;;  %v804_v56 = vor.u32 %v984_v55, %v803_v54  ;;  %v985_v57 = vld [vmem:[%s1567_s0 + $0x74] sm:$0xf]  ;;  %v813_v58 = vld [vmem:[%s1567_s0 + $0x78] sm:$0xf0]  ;;  %v811_v60 = vld [vmem:[%s1567_s0 + $0x70] sm:$0xf] }
  0x1c   :  { %363 = vmatpush.bf16.msra.mxu0 %v860_v10  ;;  %v816_v59 = vor.u32 %v985_v57, %v813_v58  ;;  %v986_v61 = vld [vmem:[%s1567_s0 + $0x74] sm:$0xf0]  ;;  %v987_v63 = vld [vmem:[%s1567_s0 + $0x84] sm:$0xf]  ;;  %v821_v0 = vld [vmem:[%s1567_s0 + $0x88] sm:$0xf0] }
  0x1d   :  { %958 = vmatmul.msk.bf16.vlgmr.msra.gmra.mxu3 %vm310_vm1, %v760_v9  ;;  %509 = vmatpush.bf16.msra.mxu2 %v864_v11  ;;  %v812_v62 = vor.u32 %v986_v61, %v811_v60  ;;  %v824_v1 = vor.u32 %v987_v63, %v821_v0  ;;  %v65_v3 = vld [vmem:[%s1568_s2] sm:$0x3]  ;;  %v988_v5 = vld [vmem:[%s1567_s0 + $0x84] sm:$0xf0]  ;;  %v989_v15 = vld [vmem:[%s1567_s0 + $0x94] sm:$0xf] }
  0x1e   :  { %945 = vmatmul.msk.bf16.vlgmr.msra.gmra.mxu1 %vm310_vm1, %v760_v9  ;;  %v819_v4 = vld [vmem:[%s1567_s0 + $0x80] sm:$0xf]  ;;  %v1314_v6 = vperm.slane %v65_v3, 0  ;;  %v1318_v13 = vperm.slane %v65_v3, 1  ;;  %v827_v27 = vld [vmem:[%s1567_s0 + $0x90] sm:$0xf] }
  0x1f   :  { %v820_v8 = vor.u32 %v988_v5, %v819_v4  ;;  %v990_v28 = vld [vmem:[%s1567_s0 + $0x94] sm:$0xf0]  ;;  %v837_v42 = vld [vmem:[%s1567_s0 + $0xa8] sm:$0xf0]  ;;  %v992_v54 = vld [vmem:[%s1567_s0 + $0xa4] sm:$0xf0] }
  0x20   :  { %364 = vmatpush.bf16.msra.mxu0 %v852_v16  ;;  %v829_v16 = vld [vmem:[%s1567_s0 + $0x98] sm:$0xf0]  ;;  %v993_v3 = vld [vmem:[%s1567_s0 + $0xb4] sm:$0xf] }
  0x21   :  { %510 = vmatpush.bf16.msra.mxu2 %v856_v19  ;;  %v832_v21 = vor.u32 %v989_v15, %v829_v16  ;;  %v845_v4 = vld [vmem:[%s1567_s0 + $0xb8] sm:$0xf0] }
  0x23   :  { %365 = vmatmul.bf16.vlgmr.msra.gmra.mxu0 %v756_v20 }
  0x24   :  { %511 = vmatmul.bf16.vlgmr.msra.gmra.mxu2 %v756_v20 }
  0x2d   :  { %959 = vmatmul.msk.bf16.gmra.mxu3 %vm310_vm1, %v768_v23 }
  0x2e   :  { %946 = vmatmul.msk.bf16.gmra.mxu1 %vm310_vm1, %v768_v23 }
  0x33   :  { %370 = vmatmul.bf16.gmra.mxu0 %v764_v26 }
  0x34   :  { %516 = vmatmul.bf16.gmra.mxu2 %v764_v26 }
  0x3d   :  { %960 = vmatmul.msk.bf16.gmra.mxu3 %vm310_vm1, %v776_v29 }
  0x3e   :  { %947 = vmatmul.msk.bf16.gmra.mxu1 %vm310_vm1, %v776_v29 }
  0x43   :  { %375 = vmatmul.bf16.gmra.mxu0 %v772_v32 }
  0x44   :  { %521 = vmatmul.bf16.gmra.mxu2 %v772_v32  ;;  %v828_v32 = vor.u32 %v990_v28, %v827_v27 }
  0x4d   :  { %961 = vmatmul.msk.bf16.gmra.mxu3 %vm310_vm1, %v784_v35 }
  0x4e   :  { %948 = vmatmul.msk.bf16.gmra.mxu1 %vm310_vm1, %v784_v35 }
  0x53   :  { %380 = vmatmul.bf16.gmra.mxu0 %v780_v38 }
  0x54   :  { %526 = vmatmul.bf16.gmra.mxu2 %v780_v38 }
  0x5d   :  { %962 = vmatmul.msk.bf16.gmra.mxu3 %vm310_vm1, %v792_v41 }
  0x5e   :  { %949 = vmatmul.msk.bf16.gmra.mxu1 %vm310_vm1, %v792_v41  ;;  %v991_v41 = vld [vmem:[%s1567_s0 + $0xa4] sm:$0xf] }
  0x63   :  { %385 = vmatmul.bf16.gmra.mxu0 %v788_v44 }
  0x64   :  { %531 = vmatmul.bf16.gmra.mxu2 %v788_v44 }
  0x6d   :  { %963 = vmatmul.msk.bf16.gmra.mxu3 %vm310_vm1, %v800_v47 }
  0x6e   :  { %950 = vmatmul.msk.bf16.gmra.mxu1 %vm310_vm1, %v800_v47  ;;  %v840_v47 = vor.u32 %v991_v41, %v837_v42 }
  0x73   :  { %390 = vmatmul.bf16.gmra.mxu0 %v796_v50 }
  0x74   :  { %536 = vmatmul.bf16.gmra.mxu2 %v796_v50 }
  0x7d   :  { %964 = vmatmul.msk.bf16.gmra.mxu3 %vm310_vm1, %v808_v53 }
  0x7e   :  { %951 = vmatmul.msk.bf16.gmra.mxu1 %vm310_vm1, %v808_v53  ;;  %v835_v53 = vld [vmem:[%s1567_s0 + $0xa0] sm:$0xf] }
  0x7f   :  { %v836_v58 = vor.u32 %v992_v54, %v835_v53 }
  0x83   :  { %395 = vmatmul.bf16.gmra.mxu0 %v804_v56 }
  0x84   :  { %541 = vmatmul.bf16.gmra.mxu2 %v804_v56 }
  0x8d   :  { %965 = vmatmul.msk.bf16.gmra.mxu3 %vm310_vm1, %v816_v59 }
  0x8e   :  { %952 = vmatmul.msk.bf16.gmra.mxu1 %vm310_vm1, %v816_v59 }
  0x93   :  { %400 = vmatmul.bf16.gmra.mxu0 %v812_v62 }
  0x94   :  { %546 = vmatmul.bf16.gmra.mxu2 %v812_v62 }
  0x9b   :  { %v439_v2 = vpop.f32.mrf.mxu1 }
  0x9d   :  { %966 = vmatmul.msk.bf16.gmra.mxu3 %vm310_vm1, %v824_v1 }
  0x9e   :  { %953 = vmatmul.msk.bf16.gmra.mxu1 %vm310_vm1, %v824_v1 }
  0xa0   :  { %v585_v7 = vpop.f32.mrf.mxu3  ;;  %v366_v9 = vpop.f32.mrf.mxu0 }
  0xa1   :  { %v367_v10 = vadd.f32 %v366_v9, %v1314_v6 }
  0xa3   :  { %v441_v11 = vpop.f32.mrf.mxu1  ;;  %v440_v12 = vadd.f32 %v439_v2, %v367_v10  ;;  %405 = vmatmul.bf16.gmra.mxu0 %v820_v8  ;;  %v848_v10 = vor.u32 %v993_v3, %v845_v4 }
  0xa4   :  { %551 = vmatmul.bf16.gmra.mxu2 %v820_v8 }
  0xa5   :  { %v649_v14 = vmax.f32 %v440_v12, 0.0 }
  0xa7   :  { %699 = vst [vmem:[%s1569_s3] sm:$0xff] %v649_v14  ;;  %v512_v17 = vpop.f32.mrf.mxu2 }
  0xa8   :  { %v587_v18 = vpop.f32.mrf.mxu3  ;;  %v513_v19 = vadd.f32 %v512_v17, %v1318_v13  ;;  %v368_v20 = vpop.f32.mrf.mxu0  ;;  %v843_v17 = vld [vmem:[%s1567_s0 + $0xb0] sm:$0xf] }
  0xa9   :  { %v369_v22 = vadd.f32 %v368_v20, %v1314_v6 }
  0xaa   :  { %v586_v23 = vadd.f32 %v585_v7, %v513_v19 }
  0xab   :  { %v444_v24 = vpop.f32.mrf.mxu1  ;;  %v442_v25 = vadd.f32 %v441_v11, %v369_v22 }
  0xac   :  { %v650_v26 = vmax.f32 %v586_v23, 0.0 }
  0xad   :  { %967 = vmatmul.msk.bf16.gmra.mxu3 %vm310_vm1, %v832_v21  ;;  %v651_v29 = vmax.f32 %v442_v25, 0.0 }
  0xae   :  { %954 = vmatmul.msk.bf16.gmra.mxu1 %vm310_vm1, %v832_v21  ;;  %700 = vst [vmem:[%s1569_s3 + $0x8] sm:$0xff] %v650_v26  ;;  %v39_v26 = vld [vmem:[%s1567_s0 + $0xc0] sm:$0xff] }
  0xaf   :  { %701 = vst [vmem:[%s1569_s3 + $0x10] sm:$0xff] %v651_v29  ;;  %v514_v30 = vpop.f32.mrf.mxu2  ;;  %v144_v42 = vunpack.c.l.b16 %v39_v26 }
  0xb0   :  { %v590_v31 = vpop.f32.mrf.mxu3  ;;  %v515_v33 = vadd.f32 %v514_v30, %v1318_v13  ;;  %v371_v34 = vpop.f32.mrf.mxu0 }
  0xb1   :  { %v372_v35 = vadd.f32 %v371_v34, %v1314_v6 }
  0xb2   :  { %v588_v36 = vadd.f32 %v587_v18, %v515_v33  ;;  %v994_v18 = vld [vmem:[%s1567_s0 + $0xb4] sm:$0xf0] }
  0xb3   :  { %v446_v37 = vpop.f32.mrf.mxu1  ;;  %v445_v38 = vadd.f32 %v444_v24, %v372_v35  ;;  %410 = vmatmul.bf16.gmra.mxu0 %v828_v32  ;;  %v844_v22 = vor.u32 %v994_v18, %v843_v17 }
  0xb4   :  { %v652_v39 = vmax.f32 %v588_v36, 0.0  ;;  %556 = vmatmul.bf16.gmra.mxu2 %v828_v32 }
  0xb5   :  { %v653_v40 = vmax.f32 %v445_v38, 0.0 }
  0xb6   :  { %702 = vst [vmem:[%s1569_s3 + $0x18] sm:$0xff] %v652_v39 }
  0xb7   :  { %703 = vst [vmem:[%s1569_s3 + $0x20] sm:$0xff] %v653_v40  ;;  %v517_v43 = vpop.f32.mrf.mxu2 }
  0xb8   :  { %v592_v44 = vpop.f32.mrf.mxu3  ;;  %v518_v45 = vadd.f32 %v517_v43, %v1318_v13  ;;  %v373_v46 = vpop.f32.mrf.mxu0 }
  0xb9   :  { %v374_v48 = vadd.f32 %v373_v46, %v1314_v6 }
  0xba   :  { %v591_v49 = vadd.f32 %v590_v31, %v518_v45  ;;  %v145_v31 = vunpack.c.h.b16 %v39_v26 }
  0xbb   :  { %v449_v50 = vpop.f32.mrf.mxu1  ;;  %v447_v51 = vadd.f32 %v446_v37, %v374_v48 }
  0xbc   :  { %v654_v52 = vmax.f32 %v591_v49, 0.0  ;;  %v171_v37 = vpack.c.b16 %v145_v31, %v145_v31 }
  0xbd   :  { %968 = vmatmul.msk.bf16.gmra.mxu3 %vm310_vm1, %v840_v47  ;;  %v655_v55 = vmax.f32 %v447_v51, 0.0 }
  0xbe   :  { %955 = vmatmul.msk.bf16.gmra.mxu1 %vm310_vm1, %v840_v47  ;;  %704 = vst [vmem:[%s1569_s3 + $0x28] sm:$0xff] %v654_v52  ;;  %v170_v47 = vpack.c.b16 %v144_v42, %v144_v42 }
  0xbf   :  { %705 = vst [vmem:[%s1569_s3 + $0x30] sm:$0xff] %v655_v55  ;;  %v519_v56 = vpop.f32.mrf.mxu2 }
  0xc0   :  { %v595_v57 = vpop.f32.mrf.mxu3  ;;  %v520_v59 = vadd.f32 %v519_v56, %v1318_v13  ;;  %v376_v60 = vpop.f32.mrf.mxu0 }
  0xc1   :  { %v377_v61 = vadd.f32 %v376_v60, %v1314_v6 }
  0xc2   :  { %v593_v62 = vadd.f32 %v592_v44, %v520_v59 }
  0xc3   :  { %v451_v63 = vpop.f32.mrf.mxu1  ;;  %v450_v0 = vadd.f32 %v449_v50, %v377_v61  ;;  %415 = vmatmul.bf16.gmra.mxu0 %v836_v58 }
  0xc4   :  { %v656_v1 = vmax.f32 %v593_v62, 0.0  ;;  %561 = vmatmul.bf16.gmra.mxu2 %v836_v58 }
  0xc5   :  { %v657_v2 = vmax.f32 %v450_v0, 0.0 }
  0xc6   :  { %706 = vst [vmem:[%s1569_s3 + $0x38] sm:$0xff] %v656_v1 }
  0xc7   :  { %707 = vst [vmem:[%s1569_s3 + $0x40] sm:$0xff] %v657_v2  ;;  %v522_v5 = vpop.f32.mrf.mxu2 }
  0xc8   :  { %v597_v7 = vpop.f32.mrf.mxu3  ;;  %v523_v8 = vadd.f32 %v522_v5, %v1318_v13  ;;  %v378_v9 = vpop.f32.mrf.mxu0 }
  0xc9   :  { %v379_v11 = vadd.f32 %v378_v9, %v1314_v6 }
  0xca   :  { %v596_v12 = vadd.f32 %v595_v57, %v523_v8 }
  0xcb   :  { %v454_v14 = vpop.f32.mrf.mxu1  ;;  %v452_v15 = vadd.f32 %v451_v63, %v379_v11 }
  0xcc   :  { %v658_v16 = vmax.f32 %v596_v12, 0.0 }
  0xcd   :  { %969 = vmatmul.msk.bf16.gmra.mxu3 %vm310_vm1, %v848_v10  ;;  %v659_v19 = vmax.f32 %v452_v15, 0.0 }
  0xce   :  { %956 = vmatmul.msk.bf16.gmra.mxu1 %vm310_vm1, %v848_v10  ;;  %708 = vst [vmem:[%s1569_s3 + $0x48] sm:$0xff] %v658_v16 }
  0xcf   :  { %709 = vst [vmem:[%s1569_s3 + $0x50] sm:$0xff] %v659_v19  ;;  %v524_v20 = vpop.f32.mrf.mxu2 }
  0xd0   :  { %v600_v21 = vpop.f32.mrf.mxu3  ;;  %v525_v23 = vadd.f32 %v524_v20, %v1318_v13  ;;  %v381_v24 = vpop.f32.mrf.mxu0 }
  0xd1   :  { %v382_v25 = vadd.f32 %v381_v24, %v1314_v6 }
  0xd2   :  { %v598_v27 = vadd.f32 %v597_v7, %v525_v23 }
  0xd3   :  { %v456_v28 = vpop.f32.mrf.mxu1  ;;  %v455_v29 = vadd.f32 %v454_v14, %v382_v25  ;;  %420 = vmatmul.bf16.gmra.mxu0 %v844_v22 }
  0xd4   :  { %v660_v30 = vmax.f32 %v598_v27, 0.0  ;;  %566 = vmatmul.bf16.gmra.mxu2 %v844_v22 }
  0xd5   :  { %v661_v32 = vmax.f32 %v455_v29, 0.0 }
  0xd6   :  { %710 = vst [vmem:[%s1569_s3 + $0x58] sm:$0xff] %v660_v30 }
  0xd7   :  { %711 = vst [vmem:[%s1569_s3 + $0x60] sm:$0xff] %v661_v32  ;;  %v527_v33 = vpop.f32.mrf.mxu2 }
  0xd8   :  { %v602_v34 = vpop.f32.mrf.mxu3  ;;  %v528_v35 = vadd.f32 %v527_v33, %v1318_v13  ;;  %v383_v36 = vpop.f32.mrf.mxu0 }
  0xd9   :  { %v384_v38 = vadd.f32 %v383_v36, %v1314_v6 }
  0xda   :  { %v601_v39 = vadd.f32 %v600_v21, %v528_v35 }
  0xdb   :  { %v459_v40 = vpop.f32.mrf.mxu1  ;;  %v457_v41 = vadd.f32 %v456_v28, %v384_v38 }
  0xdc   :  { %v662_v43 = vmax.f32 %v601_v39, 0.0 }
  0xdd   :  { %970 = vmatmul.msk.bf16.gmra.mxu3 %vm310_vm1, %v171_v37  ;;  %v663_v44 = vmax.f32 %v457_v41, 0.0 }
  0xde   :  { %957 = vmatmul.msk.bf16.gmra.mxu1 %vm310_vm1, %v171_v37  ;;  %712 = vst [vmem:[%s1569_s3 + $0x68] sm:$0xff] %v662_v43 }
  0xdf   :  { %713 = vst [vmem:[%s1569_s3 + $0x70] sm:$0xff] %v663_v44  ;;  %v529_v45 = vpop.f32.mrf.mxu2 }
  0xe0   :  { %v605_v46 = vpop.f32.mrf.mxu3  ;;  %v530_v48 = vadd.f32 %v529_v45, %v1318_v13  ;;  %v386_v49 = vpop.f32.mrf.mxu0 }
  0xe1   :  { %v387_v50 = vadd.f32 %v386_v49, %v1314_v6 }
  0xe2   :  { %v603_v51 = vadd.f32 %v602_v34, %v530_v48 }
  0xe3   :  { %v461_v52 = vpop.f32.mrf.mxu1  ;;  %v460_v53 = vadd.f32 %v459_v40, %v387_v50  ;;  %425 = vmatmul.bf16.gmra.mxu0 %v170_v47 }
  0xe4   :  { %v664_v54 = vmax.f32 %v603_v51, 0.0  ;;  %571 = vmatmul.bf16.gmra.mxu2 %v170_v47 }
  0xe5   :  { %v665_v55 = vmax.f32 %v460_v53, 0.0 }
  0xe6   :  { %714 = vst [vmem:[%s1569_s3 + $0x78] sm:$0xff] %v664_v54 }
  0xe7   :  { %715 = vst [vmem:[%s1569_s3 + $0x80] sm:$0xff] %v665_v55  ;;  %v532_v56 = vpop.f32.mrf.mxu2 }
  0xe8   :  { %v607_v57 = vpop.f32.mrf.mxu3  ;;  %v533_v58 = vadd.f32 %v532_v56, %v1318_v13  ;;  %v388_v59 = vpop.f32.mrf.mxu0 }
  0xe9   :  { %v389_v60 = vadd.f32 %v388_v59, %v1314_v6 }
  0xea   :  { %v606_v61 = vadd.f32 %v605_v46, %v533_v58 }
  0xeb   :  { %v464_v62 = vpop.f32.mrf.mxu1  ;;  %v462_v63 = vadd.f32 %v461_v52, %v389_v60 }
  0xec   :  { %v666_v0 = vmax.f32 %v606_v61, 0.0 }
  0xed   :  { %v667_v1 = vmax.f32 %v462_v63, 0.0 }
  0xee   :  { %716 = vst [vmem:[%s1569_s3 + $0x88] sm:$0xff] %v666_v0 }
  0xef   :  { %717 = vst [vmem:[%s1569_s3 + $0x90] sm:$0xff] %v667_v1  ;;  %v534_v2 = vpop.f32.mrf.mxu2 }
  0xf0   :  { %v610_v3 = vpop.f32.mrf.mxu3  ;;  %v535_v4 = vadd.f32 %v534_v2, %v1318_v13  ;;  %v391_v5 = vpop.f32.mrf.mxu0 }
  0xf1   :  { %v392_v7 = vadd.f32 %v391_v5, %v1314_v6 }
  0xf2   :  { %v608_v8 = vadd.f32 %v607_v57, %v535_v4 }
  0xf3   :  { %v466_v9 = vpop.f32.mrf.mxu1  ;;  %v465_v10 = vadd.f32 %v464_v62, %v392_v7 }
  0xf4   :  { %v668_v11 = vmax.f32 %v608_v8, 0.0 }
  0xf5   :  { %v669_v12 = vmax.f32 %v465_v10, 0.0 }
  0xf6   :  { %718 = vst [vmem:[%s1569_s3 + $0x98] sm:$0xff] %v668_v11 }
  0xf7   :  { %719 = vst [vmem:[%s1569_s3 + $0xa0] sm:$0xff] %v669_v12  ;;  %v537_v14 = vpop.f32.mrf.mxu2 }
  0xf8   :  { %v612_v15 = vpop.f32.mrf.mxu3  ;;  %v538_v16 = vadd.f32 %v537_v14, %v1318_v13  ;;  %v393_v17 = vpop.f32.mrf.mxu0 }
  0xf9   :  { %v394_v18 = vadd.f32 %v393_v17, %v1314_v6 }
  0xfa   :  { %v611_v19 = vadd.f32 %v610_v3, %v538_v16 }
  0xfb   :  { %v469_v20 = vpop.f32.mrf.mxu1  ;;  %v467_v21 = vadd.f32 %v466_v9, %v394_v18 }
  0xfc   :  { %v670_v22 = vmax.f32 %v611_v19, 0.0 }
  0xfd   :  { %v671_v23 = vmax.f32 %v467_v21, 0.0 }
  0xfe   :  { %720 = vst [vmem:[%s1569_s3 + $0xa8] sm:$0xff] %v670_v22 }
  0xff   :  { %721 = vst [vmem:[%s1569_s3 + $0xb0] sm:$0xff] %v671_v23  ;;  %v539_v24 = vpop.f32.mrf.mxu2 }
 0x100   :  { %v615_v25 = vpop.f32.mrf.mxu3  ;;  %v540_v26 = vadd.f32 %v539_v24, %v1318_v13  ;;  %v396_v27 = vpop.f32.mrf.mxu0 }
 0x101   :  { %v397_v28 = vadd.f32 %v396_v27, %v1314_v6 }
 0x102   :  { %v613_v29 = vadd.f32 %v612_v15, %v540_v26 }
 0x103   :  { %v471_v30 = vpop.f32.mrf.mxu1  ;;  %v470_v31 = vadd.f32 %v469_v20, %v397_v28 }
 0x104   :  { %v672_v32 = vmax.f32 %v613_v29, 0.0 }
 0x105   :  { %v673_v33 = vmax.f32 %v470_v31, 0.0 }
 0x106   :  { %722 = vst [vmem:[%s1569_s3 + $0xb8] sm:$0xff] %v672_v32 }
 0x107   :  { %723 = vst [vmem:[%s1569_s3 + $0xc0] sm:$0xff] %v673_v33  ;;  %v542_v34 = vpop.f32.mrf.mxu2 }
 0x108   :  { %v617_v35 = vpop.f32.mrf.mxu3  ;;  %v543_v36 = vadd.f32 %v542_v34, %v1318_v13  ;;  %v398_v37 = vpop.f32.mrf.mxu0 }
 0x109   :  { %v399_v38 = vadd.f32 %v398_v37, %v1314_v6 }
 0x10a   :  { %v616_v39 = vadd.f32 %v615_v25, %v543_v36 }
 0x10b   :  { %v474_v40 = vpop.f32.mrf.mxu1  ;;  %v472_v41 = vadd.f32 %v471_v30, %v399_v38 }
 0x10c   :  { %v674_v42 = vmax.f32 %v616_v39, 0.0 }
 0x10d   :  { %v675_v43 = vmax.f32 %v472_v41, 0.0 }
 0x10e   :  { %724 = vst [vmem:[%s1569_s3 + $0xc8] sm:$0xff] %v674_v42 }
 0x10f   :  { %725 = vst [vmem:[%s1569_s3 + $0xd0] sm:$0xff] %v675_v43  ;;  %v544_v44 = vpop.f32.mrf.mxu2 }
 0x110   :  { %v620_v45 = vpop.f32.mrf.mxu3  ;;  %v545_v46 = vadd.f32 %v544_v44, %v1318_v13  ;;  %v401_v47 = vpop.f32.mrf.mxu0 }
 0x111   :  { %v402_v48 = vadd.f32 %v401_v47, %v1314_v6 }
 0x112   :  { %v618_v49 = vadd.f32 %v617_v35, %v545_v46 }
 0x113   :  { %v476_v50 = vpop.f32.mrf.mxu1  ;;  %v475_v51 = vadd.f32 %v474_v40, %v402_v48 }
 0x114   :  { %v676_v52 = vmax.f32 %v618_v49, 0.0 }
 0x115   :  { %v677_v53 = vmax.f32 %v475_v51, 0.0 }
 0x116   :  { %726 = vst [vmem:[%s1569_s3 + $0xd8] sm:$0xff] %v676_v52 }
 0x117   :  { %727 = vst [vmem:[%s1569_s3 + $0xe0] sm:$0xff] %v677_v53  ;;  %v547_v54 = vpop.f32.mrf.mxu2 }
 0x118   :  { %v622_v55 = vpop.f32.mrf.mxu3  ;;  %v548_v56 = vadd.f32 %v547_v54, %v1318_v13  ;;  %v403_v57 = vpop.f32.mrf.mxu0 }
 0x119   :  { %v404_v58 = vadd.f32 %v403_v57, %v1314_v6 }
 0x11a   :  { %v621_v59 = vadd.f32 %v620_v45, %v548_v56 }
 0x11b   :  { %v479_v60 = vpop.f32.mrf.mxu1  ;;  %v477_v61 = vadd.f32 %v476_v50, %v404_v58 }
 0x11c   :  { %v678_v62 = vmax.f32 %v621_v59, 0.0 }
 0x11d   :  { %v679_v63 = vmax.f32 %v477_v61, 0.0 }
 0x11e   :  { %728 = vst [vmem:[%s1569_s3 + $0xe8] sm:$0xff] %v678_v62 }
 0x11f   :  { %729 = vst [vmem:[%s1569_s3 + $0xf0] sm:$0xff] %v679_v63  ;;  %v549_v0 = vpop.f32.mrf.mxu2 }
 0x120   :  { %v625_v1 = vpop.f32.mrf.mxu3  ;;  %v550_v2 = vadd.f32 %v549_v0, %v1318_v13  ;;  %v406_v3 = vpop.f32.mrf.mxu0 }
 0x121   :  { %v407_v4 = vadd.f32 %v406_v3, %v1314_v6 }
 0x122   :  { %v623_v5 = vadd.f32 %v622_v55, %v550_v2 }
 0x123   :  { %v481_v7 = vpop.f32.mrf.mxu1  ;;  %v480_v8 = vadd.f32 %v479_v60, %v407_v4 }
 0x124   :  { %v680_v9 = vmax.f32 %v623_v5, 0.0 }
 0x125   :  { %v681_v10 = vmax.f32 %v480_v8, 0.0 }
 0x126   :  { %730 = vst [vmem:[%s1569_s3 + $0xf8] sm:$0xff] %v680_v9 }
 0x127   :  { %731 = vst [vmem:[%s1569_s3 + $0x100] sm:$0xff] %v681_v10  ;;  %v552_v11 = vpop.f32.mrf.mxu2 }
 0x128   :  { %v627_v12 = vpop.f32.mrf.mxu3  ;;  %v553_v14 = vadd.f32 %v552_v11, %v1318_v13  ;;  %v408_v15 = vpop.f32.mrf.mxu0 }
 0x129   :  { %v409_v16 = vadd.f32 %v408_v15, %v1314_v6 }
 0x12a   :  { %v626_v17 = vadd.f32 %v625_v1, %v553_v14 }
 0x12b   :  { %v484_v18 = vpop.f32.mrf.mxu1  ;;  %v482_v19 = vadd.f32 %v481_v7, %v409_v16 }
 0x12c   :  { %v682_v20 = vmax.f32 %v626_v17, 0.0 }
 0x12d   :  { %v683_v21 = vmax.f32 %v482_v19, 0.0 }
 0x12e   :  { %732 = vst [vmem:[%s1569_s3 + $0x108] sm:$0xff] %v682_v20 }
 0x12f   :  { %733 = vst [vmem:[%s1569_s3 + $0x110] sm:$0xff] %v683_v21  ;;  %v554_v22 = vpop.f32.mrf.mxu2 }
 0x130   :  { %v630_v23 = vpop.f32.mrf.mxu3  ;;  %v555_v24 = vadd.f32 %v554_v22, %v1318_v13  ;;  %v411_v25 = vpop.f32.mrf.mxu0 }
 0x131   :  { %v412_v26 = vadd.f32 %v411_v25, %v1314_v6 }
 0x132   :  { %v628_v27 = vadd.f32 %v627_v12, %v555_v24 }
 0x133   :  { %v486_v28 = vpop.f32.mrf.mxu1  ;;  %v485_v29 = vadd.f32 %v484_v18, %v412_v26 }
 0x134   :  { %v684_v30 = vmax.f32 %v628_v27, 0.0 }
 0x135   :  { %v685_v31 = vmax.f32 %v485_v29, 0.0 }
 0x136   :  { %734 = vst [vmem:[%s1569_s3 + $0x118] sm:$0xff] %v684_v30 }
 0x137   :  { %735 = vst [vmem:[%s1569_s3 + $0x120] sm:$0xff] %v685_v31  ;;  %v557_v32 = vpop.f32.mrf.mxu2 }
 0x138   :  { %v632_v33 = vpop.f32.mrf.mxu3  ;;  %v558_v34 = vadd.f32 %v557_v32, %v1318_v13  ;;  %v413_v35 = vpop.f32.mrf.mxu0 }
 0x139   :  { %v414_v36 = vadd.f32 %v413_v35, %v1314_v6 }
 0x13a   :  { %v631_v37 = vadd.f32 %v630_v23, %v558_v34 }
 0x13b   :  { %v489_v38 = vpop.f32.mrf.mxu1  ;;  %v487_v39 = vadd.f32 %v486_v28, %v414_v36 }
 0x13c   :  { %v686_v40 = vmax.f32 %v631_v37, 0.0 }
 0x13d   :  { %v687_v41 = vmax.f32 %v487_v39, 0.0 }
 0x13e   :  { %736 = vst [vmem:[%s1569_s3 + $0x128] sm:$0xff] %v686_v40 }
 0x13f   :  { %737 = vst [vmem:[%s1569_s3 + $0x130] sm:$0xff] %v687_v41  ;;  %v559_v42 = vpop.f32.mrf.mxu2 }
 0x140   :  { %v635_v43 = vpop.f32.mrf.mxu3  ;;  %v560_v44 = vadd.f32 %v559_v42, %v1318_v13  ;;  %v416_v45 = vpop.f32.mrf.mxu0 }
 0x141   :  { %v417_v46 = vadd.f32 %v416_v45, %v1314_v6 }
 0x142   :  { %v633_v47 = vadd.f32 %v632_v33, %v560_v44 }
 0x143   :  { %v491_v48 = vpop.f32.mrf.mxu1  ;;  %v490_v49 = vadd.f32 %v489_v38, %v417_v46 }
 0x144   :  { %v688_v50 = vmax.f32 %v633_v47, 0.0 }
 0x145   :  { %v689_v51 = vmax.f32 %v490_v49, 0.0 }
 0x146   :  { %738 = vst [vmem:[%s1569_s3 + $0x138] sm:$0xff] %v688_v50 }
 0x147   :  { %739 = vst [vmem:[%s1569_s3 + $0x140] sm:$0xff] %v689_v51  ;;  %v562_v52 = vpop.f32.mrf.mxu2 }
 0x148   :  { %v637_v53 = vpop.f32.mrf.mxu3  ;;  %v563_v54 = vadd.f32 %v562_v52, %v1318_v13  ;;  %v418_v55 = vpop.f32.mrf.mxu0 }
 0x149   :  { %v419_v56 = vadd.f32 %v418_v55, %v1314_v6 }
 0x14a   :  { %v636_v57 = vadd.f32 %v635_v43, %v563_v54 }
 0x14b   :  { %v494_v58 = vpop.f32.mrf.mxu1  ;;  %v492_v59 = vadd.f32 %v491_v48, %v419_v56 }
 0x14c   :  { %v690_v60 = vmax.f32 %v636_v57, 0.0 }
 0x14d   :  { %v691_v61 = vmax.f32 %v492_v59, 0.0 }
 0x14e   :  { %740 = vst [vmem:[%s1569_s3 + $0x148] sm:$0xff] %v690_v60 }
 0x14f   :  { %741 = vst [vmem:[%s1569_s3 + $0x150] sm:$0xff] %v691_v61  ;;  %v564_v62 = vpop.f32.mrf.mxu2 }
 0x150   :  { %v640_v63 = vpop.f32.mrf.mxu3  ;;  %v565_v0 = vadd.f32 %v564_v62, %v1318_v13  ;;  %v421_v1 = vpop.f32.mrf.mxu0 }
 0x151   :  { %v422_v2 = vadd.f32 %v421_v1, %v1314_v6 }
 0x152   :  { %v638_v3 = vadd.f32 %v637_v53, %v565_v0 }
 0x153   :  { %v496_v4 = vpop.f32.mrf.mxu1  ;;  %v495_v5 = vadd.f32 %v494_v58, %v422_v2 }
 0x154   :  { %v692_v7 = vmax.f32 %v638_v3, 0.0 }
 0x155   :  { %v693_v8 = vmax.f32 %v495_v5, 0.0 }
 0x156   :  { %742 = vst [vmem:[%s1569_s3 + $0x158] sm:$0xff] %v692_v7 }
 0x157   :  { %743 = vst [vmem:[%s1569_s3 + $0x160] sm:$0xff] %v693_v8  ;;  %v567_v9 = vpop.f32.mrf.mxu2 }
 0x158   :  { %v642_v10 = vpop.f32.mrf.mxu3  ;;  %v568_v11 = vadd.f32 %v567_v9, %v1318_v13  ;;  %v423_v12 = vpop.f32.mrf.mxu0 }
 0x159   :  { %v424_v14 = vadd.f32 %v423_v12, %v1314_v6 }
 0x15a   :  { %v641_v15 = vadd.f32 %v640_v63, %v568_v11 }
 0x15b   :  { %v499_v16 = vpop.f32.mrf.mxu1  ;;  %v497_v17 = vadd.f32 %v496_v4, %v424_v14 }
 0x15c   :  { %v694_v18 = vmax.f32 %v641_v15, 0.0 }
 0x15d   :  { %v695_v19 = vmax.f32 %v497_v17, 0.0 }
 0x15e   :  { %744 = vst [vmem:[%s1569_s3 + $0x168] sm:$0xff] %v694_v18 }
 0x15f   :  { %745 = vst [vmem:[%s1569_s3 + $0x170] sm:$0xff] %v695_v19  ;;  %v569_v20 = vpop.f32.mrf.mxu2 }
 0x160   :  { %v645_v21 = vpop.f32.mrf.mxu3  ;;  %v570_v22 = vadd.f32 %v569_v20, %v1318_v13  ;;  %v426_v23 = vpop.f32.mrf.mxu0 }
 0x161   :  { %v427_v24 = vadd.f32 %v426_v23, %v1314_v6 }
 0x162   :  { %v643_v25 = vadd.f32 %v642_v10, %v570_v22 }
 0x163   :  { %v501_v26 = vpop.f32.mrf.mxu1  ;;  %v500_v27 = vadd.f32 %v499_v16, %v427_v24 }
 0x164   :  { %v696_v28 = vmax.f32 %v643_v25, 0.0 }
 0x165   :  { %v697_v29 = vmax.f32 %v500_v27, 0.0 }
 0x166   :  { %746 = vst [vmem:[%s1569_s3 + $0x178] sm:$0xff] %v696_v28 }
 0x167   :  { %747 = vst [vmem:[%s1569_s3 + $0x180] sm:$0xff] %v697_v29  ;;  %v572_v30 = vpop.f32.mrf.mxu2 }
 0x168   :  { %v647_v31 = vpop.f32.mrf.mxu3  ;;  %v573_v32 = vadd.f32 %v572_v30, %v1318_v13  ;;  %v428_v33 = vpop.f32.mrf.mxu0 }
 0x16a   :  { %v646_v34 = vadd.f32 %v645_v21, %v573_v32 }
 0x16c   :  { %v698_v6 = vmax.f32 %v646_v34, 0.0 }
 0x16e   :  { %748 = vst [vmem:[%s1569_s3 + $0x188] sm:$0xff] %v698_v6 }
 0x16f   :  { %v574_v35 = vpop.f32.mrf.mxu2 }

// kernel: aspp_deformable_v2.9
= control target key start
LH: loop header
LB: loop body
LE: loop exit
PB: predicated region body
PF: predicated region fallthrough
CT: control target
= control target key end

     0   :  { %s11335_s1 = inlined_call_operand.vmem [shape: bf16[1024,256], index: 1, kind: input, shape index: {}]   ;;  %s11336_s0 = inlined_call_operand.vmem [shape: bf16[512,1024], index: 0, kind: input, shape index: {}]   ;;  %s11337_s2 = inlined_call_operand.vmem [shape: f32[1,256], index: 2, kind: input, shape index: {}]   ;;  %s11338_s3 = inlined_call_operand.vmem [shape: f32[512,256], index: 3, kind: output, shape index: {}]  }
   0x1   :  { %v6242_v0 = vld [vmem:[%s11335_s1 + $0x70] sm:$0xf]  ;;  %v6967_v1 = vld [vmem:[%s11335_s1 + $0x74] sm:$0xf0]  ;;  %v6234_v11 = vld [vmem:[%s11335_s1 + $0x60] sm:$0xf] }
   0x2   :  { %v6306_v2 = vld [vmem:[%s11335_s1 + $0xf0] sm:$0xf]  ;;  %v6243_v3 = vor.u32 %v6967_v1, %v6242_v0  ;;  %v6983_v4 = vld [vmem:[%s11335_s1 + $0xf4] sm:$0xf0]  ;;  %v6965_v13 = vld [vmem:[%s11335_s1 + $0x64] sm:$0xf0] }
   0x3   :  { %v6370_v5 = vld [vmem:[%s11335_s1 + $0x170] sm:$0xf]  ;;  %v6999_v6 = vld [vmem:[%s11335_s1 + $0x174] sm:$0xf0]  ;;  %v6307_v7 = vor.u32 %v6983_v4, %v6306_v2  ;;  %v6298_v14 = vld [vmem:[%s11335_s1 + $0xe0] sm:$0xf]  ;;  %v6235_v16 = vor.u32 %v6965_v13, %v6234_v11 }
   0x4   :  { %v6371_v8 = vor.u32 %v6999_v6, %v6370_v5  ;;  %v6434_v9 = vld [vmem:[%s11335_s1 + $0x1f0] sm:$0xf]  ;;  %v7015_v10 = vld [vmem:[%s11335_s1 + $0x1f4] sm:$0xf0]  ;;  %2324 = vmatpush.bf16.msra.mxu0 %v6243_v3  ;;  %v6981_v15 = vld [vmem:[%s11335_s1 + $0xe4] sm:$0xf0] }
   0x5   :  { %v6435_v12 = vor.u32 %v7015_v10, %v6434_v9  ;;  %2493 = vmatpush.bf16.msra.mxu1 %v6307_v7  ;;  %v6299_v17 = vor.u32 %v6981_v15, %v6298_v14  ;;  %v6362_v18 = vld [vmem:[%s11335_s1 + $0x160] sm:$0xf]  ;;  %v6997_v19 = vld [vmem:[%s11335_s1 + $0x164] sm:$0xf0]  ;;  %v6226_v23 = vld [vmem:[%s11335_s1 + $0x50] sm:$0xf] }
   0x6   :  { %2662 = vmatpush.bf16.msra.mxu2 %v6371_v8  ;;  %v6426_v20 = vld [vmem:[%s11335_s1 + $0x1e0] sm:$0xf]  ;;  %v6363_v21 = vor.u32 %v6997_v19, %v6362_v18  ;;  %v7013_v22 = vld [vmem:[%s11335_s1 + $0x1e4] sm:$0xf0]  ;;  %v6963_v24 = vld [vmem:[%s11335_s1 + $0x54] sm:$0xf0] }
   0x7   :  { %2831 = vmatpush.bf16.msra.mxu3 %v6435_v12  ;;  %v6427_v25 = vor.u32 %v7013_v22, %v6426_v20  ;;  %v6290_v26 = vld [vmem:[%s11335_s1 + $0xd0] sm:$0xf]  ;;  %v6979_v27 = vld [vmem:[%s11335_s1 + $0xd4] sm:$0xf0]  ;;  %v6227_v29 = vor.u32 %v6963_v24, %v6226_v23  ;;  %v6218_v35 = vld [vmem:[%s11335_s1 + $0x40] sm:$0xf] }
   0x8   :  { %v6354_v28 = vld [vmem:[%s11335_s1 + $0x150] sm:$0xf]  ;;  %2325 = vmatpush.bf16.msra.mxu0 %v6235_v16  ;;  %v6995_v30 = vld [vmem:[%s11335_s1 + $0x154] sm:$0xf0]  ;;  %v6291_v33 = vor.u32 %v6979_v27, %v6290_v26  ;;  %v6961_v36 = vld [vmem:[%s11335_s1 + $0x44] sm:$0xf0] }
   0x9   :  { %v6418_v31 = vld [vmem:[%s11335_s1 + $0x1d0] sm:$0xf]  ;;  %v7011_v32 = vld [vmem:[%s11335_s1 + $0x1d4] sm:$0xf0]  ;;  %2494 = vmatpush.bf16.msra.mxu1 %v6299_v17  ;;  %v6355_v34 = vor.u32 %v6995_v30, %v6354_v28  ;;  %v6282_v37 = vld [vmem:[%s11335_s1 + $0xc0] sm:$0xf]  ;;  %v6219_v44 = vor.u32 %v6961_v36, %v6218_v35 }
   0xa   :  { %2663 = vmatpush.bf16.msra.mxu2 %v6363_v21  ;;  %v6419_v38 = vor.u32 %v7011_v32, %v6418_v31  ;;  %v6977_v39 = vld [vmem:[%s11335_s1 + $0xc4] sm:$0xf0]  ;;  %v6346_v40 = vld [vmem:[%s11335_s1 + $0x140] sm:$0xf]  ;;  %v6210_v47 = vld [vmem:[%s11335_s1 + $0x30] sm:$0xf] }
   0xb   :  { %2832 = vmatpush.bf16.msra.mxu3 %v6427_v25  ;;  %v6993_v41 = vld [vmem:[%s11335_s1 + $0x144] sm:$0xf0]  ;;  %v6410_v42 = vld [vmem:[%s11335_s1 + $0x1c0] sm:$0xf]  ;;  %v6283_v45 = vor.u32 %v6977_v39, %v6282_v37  ;;  %v6959_v48 = vld [vmem:[%s11335_s1 + $0x34] sm:$0xf0] }
   0xc   :  { %v7009_v43 = vld [vmem:[%s11335_s1 + $0x1c4] sm:$0xf0]  ;;  %2326 = vmatpush.bf16.msra.mxu0 %v6227_v29  ;;  %v6347_v46 = vor.u32 %v6993_v41, %v6346_v40  ;;  %v6274_v49 = vld [vmem:[%s11335_s1 + $0xb0] sm:$0xf]  ;;  %v6975_v51 = vld [vmem:[%s11335_s1 + $0xb4] sm:$0xf0]  ;;  %v6211_v56 = vor.u32 %v6959_v48, %v6210_v47 }
   0xd   :  { %2495 = vmatpush.bf16.msra.mxu1 %v6291_v33  ;;  %v6411_v50 = vor.u32 %v7009_v43, %v6410_v42  ;;  %v6338_v52 = vld [vmem:[%s11335_s1 + $0x130] sm:$0xf]  ;;  %v6991_v53 = vld [vmem:[%s11335_s1 + $0x134] sm:$0xf0]  ;;  %v6275_v57 = vor.u32 %v6975_v51, %v6274_v49  ;;  %v6202_v59 = vld [vmem:[%s11335_s1 + $0x20] sm:$0xf] }
   0xe   :  { %2664 = vmatpush.bf16.msra.mxu2 %v6355_v34  ;;  %v6402_v54 = vld [vmem:[%s11335_s1 + $0x1b0] sm:$0xf]  ;;  %v7007_v55 = vld [vmem:[%s11335_s1 + $0x1b4] sm:$0xf0]  ;;  %v6339_v58 = vor.u32 %v6991_v53, %v6338_v52  ;;  %v6957_v60 = vld [vmem:[%s11335_s1 + $0x24] sm:$0xf0] }
   0xf   :  { %2833 = vmatpush.bf16.msra.mxu3 %v6419_v38  ;;  %v6266_v61 = vld [vmem:[%s11335_s1 + $0xa0] sm:$0xf]  ;;  %v6403_v62 = vor.u32 %v7007_v55, %v6402_v54  ;;  %v6973_v63 = vld [vmem:[%s11335_s1 + $0xa4] sm:$0xf0]  ;;  %v6203_v4 = vor.u32 %v6957_v60, %v6202_v59  ;;  %v6194_v7 = vld [vmem:[%s11335_s1 + $0x10] sm:$0xf] }
  0x10   :  { %2327 = vmatpush.bf16.msra.mxu0 %v6219_v44  ;;  %v6330_v0 = vld [vmem:[%s11335_s1 + $0x120] sm:$0xf]  ;;  %v6989_v1 = vld [vmem:[%s11335_s1 + $0x124] sm:$0xf0]  ;;  %v6267_v5 = vor.u32 %v6973_v63, %v6266_v61  ;;  %v6955_v8 = vld [vmem:[%s11335_s1 + $0x14] sm:$0xf0] }
  0x11   :  { %2496 = vmatpush.bf16.msra.mxu1 %v6283_v45  ;;  %v6394_v2 = vld [vmem:[%s11335_s1 + $0x1a0] sm:$0xf]  ;;  %v7005_v3 = vld [vmem:[%s11335_s1 + $0x1a4] sm:$0xf0]  ;;  %v6331_v6 = vor.u32 %v6989_v1, %v6330_v0  ;;  %v6258_v9 = vld [vmem:[%s11335_s1 + $0x90] sm:$0xf]  ;;  %v6195_v17 = vor.u32 %v6955_v8, %v6194_v7 }
  0x12   :  { %2665 = vmatpush.bf16.msra.mxu2 %v6347_v46  ;;  %v6395_v10 = vor.u32 %v7005_v3, %v6394_v2  ;;  %v6971_v11 = vld [vmem:[%s11335_s1 + $0x94] sm:$0xf0]  ;;  %v6322_v12 = vld [vmem:[%s11335_s1 + $0x110] sm:$0xf]  ;;  %v6186_v16 = vld [vmem:[%s11335_s1] sm:$0xf] }
  0x13   :  { %2834 = vmatpush.bf16.msra.mxu3 %v6411_v50  ;;  %v6987_v13 = vld [vmem:[%s11335_s1 + $0x114] sm:$0xf0]  ;;  %v6386_v14 = vld [vmem:[%s11335_s1 + $0x190] sm:$0xf]  ;;  %v6953_v18 = vld [vmem:[%s11335_s1 + $0x4] sm:$0xf0]  ;;  %v6259_v21 = vor.u32 %v6971_v11, %v6258_v9 }
  0x14   :  { %2328 = vmatpush.bf16.msra.mxu0 %v6211_v56  ;;  %v7003_v15 = vld [vmem:[%s11335_s1 + $0x194] sm:$0xf0]  ;;  %v6250_v19 = vld [vmem:[%s11335_s1 + $0x80] sm:$0xf]  ;;  %v6969_v20 = vld [vmem:[%s11335_s1 + $0x84] sm:$0xf0]  ;;  %v6323_v22 = vor.u32 %v6987_v13, %v6322_v12  ;;  %v6187_v33 = vor.u32 %v6953_v18, %v6186_v16 }
  0x15   :  { %2497 = vmatpush.bf16.msra.mxu1 %v6275_v57  ;;  %v6314_v23 = vld [vmem:[%s11335_s1 + $0x100] sm:$0xf]  ;;  %v6985_v24 = vld [vmem:[%s11335_s1 + $0x104] sm:$0xf0]  ;;  %v6387_v26 = vor.u32 %v7003_v15, %v6386_v14  ;;  %v6696_v30 = vld [vmem:[%s11336_s0 + $0x4] sm:$0xf]  ;;  %v6251_v37 = vor.u32 %v6969_v20, %v6250_v19 }
  0x16   :  { %2666 = vmatpush.bf16.msra.mxu2 %v6339_v58  ;;  %v6378_v25 = vld [vmem:[%s11335_s1 + $0x180] sm:$0xf]  ;;  %v7001_v27 = vld [vmem:[%s11335_s1 + $0x184] sm:$0xf0]  ;;  %v6626_v31 = vld [vmem:[%s11335_s1 + $0x370] sm:$0xf]  ;;  %v6315_v38 = vor.u32 %v6985_v24, %v6314_v23 }
  0x17   :  { %2835 = vmatpush.bf16.msra.mxu3 %v6403_v62  ;;  %v5162_v28 = vld [vmem:[%s11336_s0] sm:$0xf]  ;;  %v7063_v32 = vld [vmem:[%s11335_s1 + $0x374] sm:$0xf0]  ;;  %v5164_v34 = vld [vmem:[%s11336_s0 + $0x20] sm:$0xf0]  ;;  %v6379_v42 = vor.u32 %v7001_v27, %v6378_v25 }
  0x18   :  { %2329 = vmatpush.bf16.msra.mxu0 %v6203_v4  ;;  %v6700_v29 = vld [vmem:[%s11336_s0 + $0x1c] sm:$0xf0]  ;;  %v6690_v35 = vld [vmem:[%s11335_s1 + $0x3f0] sm:$0xf]  ;;  %v7079_v36 = vld [vmem:[%s11335_s1 + $0x3f4] sm:$0xf0]  ;;  %v6627_v44 = vor.u32 %v7063_v32, %v6626_v31  ;;  %v7343_v51 = vor.u32 %v6696_v30, %v5164_v34 }
  0x19   :  { %2498 = vmatpush.bf16.msra.mxu1 %v6267_v5  ;;  %v5170_v39 = vld [vmem:[%s11336_s0 + $0x8] sm:$0xf]  ;;  %v6697_v41 = vld [vmem:[%s11336_s0 + $0xc] sm:$0xf]  ;;  %v6498_v45 = vld [vmem:[%s11335_s1 + $0x270] sm:$0xf]  ;;  %v7335_v47 = vor.u32 %v6700_v29, %v5162_v28  ;;  %v6691_v48 = vor.u32 %v7079_v36, %v6690_v35 }
  0x1a   :  { %2667 = vmatpush.bf16.msra.mxu2 %v6331_v6  ;;  %v6701_v40 = vld [vmem:[%s11336_s0 + $0x24] sm:$0xf0]  ;;  %v5172_v43 = vld [vmem:[%s11336_s0 + $0x28] sm:$0xf0]  ;;  %v7031_v46 = vld [vmem:[%s11335_s1 + $0x274] sm:$0xf0] }
  0x1b   :  { %2836 = vmatpush.bf16.msra.mxu3 %v6395_v10  ;;  %11573 = vst [vmem:[#allocation2_spill] sm:$0xff] %v7335_v47  ;;  %v6562_v49 = vld [vmem:[%s11335_s1 + $0x2f0] sm:$0xf]  ;;  %v7047_v50 = vld [vmem:[%s11335_s1 + $0x2f4] sm:$0xf0]  ;;  %v7345_v52 = vor.u32 %v6701_v40, %v5170_v39  ;;  %v7347_v53 = vor.u32 %v6697_v41, %v5172_v43  ;;  %v6499_v54 = vor.u32 %v7031_v46, %v6498_v45 }
  0x1c   :  { %2330 = vmatpush.bf16.msra.mxu0 %v6195_v17  ;;  %11574 = vst [vmem:[#allocation3_spill] sm:$0xff] %v7343_v51  ;;  %v6563_v55 = vor.u32 %v7047_v50, %v6562_v49  ;;  %v5194_v56 = vld [vmem:[%s11336_s0 + $0x40] sm:$0xf]  ;;  %v6704_v58 = vld [vmem:[%s11336_s0 + $0x44] sm:$0xf] }
  0x1d   :  { %2499 = vmatpush.bf16.msra.mxu1 %v6259_v21  ;;  %11575 = vst [vmem:[#allocation4_spill] sm:$0xff] %v7345_v52  ;;  %v6708_v57 = vld [vmem:[%s11336_s0 + $0x5c] sm:$0xf0]  ;;  %v5196_v59 = vld [vmem:[%s11336_s0 + $0x60] sm:$0xf0] }
  0x1e   :  { %2668 = vmatpush.bf16.msra.mxu2 %v6323_v22  ;;  %11576 = vst [vmem:[#allocation5_spill] sm:$0xff] %v7347_v53  ;;  %v5202_v60 = vld [vmem:[%s11336_s0 + $0x48] sm:$0xf]  ;;  %v6705_v62 = vld [vmem:[%s11336_s0 + $0x4c] sm:$0xf]  ;;  %v7377_v0 = vor.u32 %v6708_v57, %v5194_v56  ;;  %v7379_v1 = vor.u32 %v6704_v58, %v5196_v59 }
  0x1f   :  { %2837 = vmatpush.bf16.msra.mxu3 %v6387_v26  ;;  %v6709_v61 = vld [vmem:[%s11336_s0 + $0x64] sm:$0xf0]  ;;  %v5204_v63 = vld [vmem:[%s11336_s0 + $0x68] sm:$0xf0]  ;;  %v5226_v4 = vld [vmem:[%s11336_s0 + $0x80] sm:$0xf] }
  0x20   :  { %2331 = vmatpush.bf16.msra.mxu0 %v6187_v33  ;;  %11577 = vst [vmem:[#allocation6_spill] sm:$0xff] %v7377_v0  ;;  %v7381_v2 = vor.u32 %v6709_v61, %v5202_v60  ;;  %v7383_v3 = vor.u32 %v6705_v62, %v5204_v63  ;;  %v6716_v5 = vld [vmem:[%s11336_s0 + $0x9c] sm:$0xf0]  ;;  %v6712_v6 = vld [vmem:[%s11336_s0 + $0x84] sm:$0xf] }
  0x21   :  { %2500 = vmatpush.bf16.msra.mxu1 %v6251_v37  ;;  %11578 = vst [vmem:[#allocation7_spill] sm:$0xff] %v7379_v1  ;;  %v5228_v7 = vld [vmem:[%s11336_s0 + $0xa0] sm:$0xf0]  ;;  %v5234_v8 = vld [vmem:[%s11336_s0 + $0x88] sm:$0xf]  ;;  %v7413_v12 = vor.u32 %v6716_v5, %v5226_v4 }
  0x22   :  { %2669 = vmatpush.bf16.msra.mxu2 %v6315_v38  ;;  %11579 = vst [vmem:[#allocation8_spill] sm:$0xff] %v7381_v2  ;;  %v6717_v9 = vld [vmem:[%s11336_s0 + $0xa4] sm:$0xf0]  ;;  %v6713_v10 = vld [vmem:[%s11336_s0 + $0x8c] sm:$0xf]  ;;  %v7415_v13 = vor.u32 %v6712_v6, %v5228_v7 }
  0x23   :  { %2838 = vmatpush.bf16.msra.mxu3 %v6379_v42  ;;  %2332 = vmatmul.bf16.vlgmr.msra.gmra.mxu0 %v7335_v47  ;;  %11580 = vst [vmem:[#allocation9_spill] sm:$0xff] %v7383_v3  ;;  %v5236_v11 = vld [vmem:[%s11336_s0 + $0xa8] sm:$0xf0]  ;;  %v7417_v14 = vor.u32 %v6717_v9, %v5234_v8  ;;  %v6618_v16 = vld [vmem:[%s11335_s1 + $0x360] sm:$0xf] }
  0x24   :  { %2501 = vmatmul.bf16.vlgmr.msra.gmra.mxu1 %v7343_v51  ;;  %3000 = vmatpush.bf16.msrb.mxu0 %v6499_v54  ;;  %11581 = vst [vmem:[#allocation10_spill] sm:$0xff] %v7413_v12  ;;  %v7419_v15 = vor.u32 %v6713_v10, %v5236_v11  ;;  %v7061_v17 = vld [vmem:[%s11335_s1 + $0x364] sm:$0xf0]  ;;  %v6490_v18 = vld [vmem:[%s11335_s1 + $0x260] sm:$0xf] }
  0x25   :  { %2670 = vmatmul.bf16.vlgmr.msra.gmra.mxu2 %v7345_v52  ;;  %3169 = vmatpush.bf16.msrb.mxu1 %v6563_v55  ;;  %11582 = vst [vmem:[#allocation11_spill] sm:$0xff] %v7415_v13  ;;  %v6619_v19 = vor.u32 %v7061_v17, %v6618_v16  ;;  %v7029_v20 = vld [vmem:[%s11335_s1 + $0x264] sm:$0xf0]  ;;  %v6682_v21 = vld [vmem:[%s11335_s1 + $0x3e0] sm:$0xf] }
  0x26   :  { %3338 = vmatpush.bf16.msrb.mxu2 %v6627_v44  ;;  %2839 = vmatmul.bf16.vlgmr.msra.gmra.mxu3 %v7347_v53  ;;  %11583 = vst [vmem:[#allocation12_spill] sm:$0xff] %v7417_v14  ;;  %v7077_v22 = vld [vmem:[%s11335_s1 + $0x3e4] sm:$0xf0]  ;;  %v6491_v23 = vor.u32 %v7029_v20, %v6490_v18  ;;  %v6554_v25 = vld [vmem:[%s11335_s1 + $0x2e0] sm:$0xf] }
  0x27   :  { %3507 = vmatpush.bf16.msrb.mxu3 %v6691_v48  ;;  %11584 = vst [vmem:[#allocation13_spill] sm:$0xff] %v7419_v15  ;;  %v6683_v24 = vor.u32 %v7077_v22, %v6682_v21  ;;  %v7045_v26 = vld [vmem:[%s11335_s1 + $0x2e4] sm:$0xf0]  ;;  %v5258_v28 = vld [vmem:[%s11336_s0 + $0xc0] sm:$0xf] }
  0x28   :  { %v6555_v27 = vor.u32 %v7045_v26, %v6554_v25  ;;  %3001 = vmatpush.bf16.msrb.mxu0 %v6491_v23  ;;  %v6724_v29 = vld [vmem:[%s11336_s0 + $0xdc] sm:$0xf0]  ;;  %v6720_v30 = vld [vmem:[%s11336_s0 + $0xc4] sm:$0xf]  ;;  %v5266_v32 = vld [vmem:[%s11336_s0 + $0xc8] sm:$0xf] }
  0x29   :  { %v5260_v31 = vld [vmem:[%s11336_s0 + $0xe0] sm:$0xf0]  ;;  %v6725_v33 = vld [vmem:[%s11336_s0 + $0xe4] sm:$0xf0]  ;;  %v6721_v34 = vld [vmem:[%s11336_s0 + $0xcc] sm:$0xf]  ;;  %v7473_v36 = vor.u32 %v6724_v29, %v5258_v28 }
  0x2a   :  { %3339 = vmatpush.bf16.msrb.mxu2 %v6619_v19  ;;  %3170 = vmatpush.bf16.msrb.mxu1 %v6555_v27  ;;  %v5268_v35 = vld [vmem:[%s11336_s0 + $0xe8] sm:$0xf0]  ;;  %v7475_v37 = vor.u32 %v6720_v30, %v5260_v31  ;;  %v7477_v38 = vor.u32 %v6725_v33, %v5266_v32  ;;  %v5290_v40 = vld [vmem:[%s11336_s0 + $0x100] sm:$0xf]  ;;  %v6728_v42 = vld [vmem:[%s11336_s0 + $0x104] sm:$0xf] }
  0x2b   :  { %3508 = vmatpush.bf16.msrb.mxu3 %v6683_v24  ;;  %11585 = vst [vmem:[#allocation14_spill] sm:$0xff] %v7473_v36  ;;  %v7479_v39 = vor.u32 %v6721_v34, %v5268_v35  ;;  %v6732_v41 = vld [vmem:[%s11336_s0 + $0x11c] sm:$0xf0]  ;;  %v5292_v43 = vld [vmem:[%s11336_s0 + $0x120] sm:$0xf0] }
  0x2c   :  { %11586 = vst [vmem:[#allocation15_spill] sm:$0xff] %v7475_v37  ;;  %v5298_v44 = vld [vmem:[%s11336_s0 + $0x108] sm:$0xf]  ;;  %v6729_v46 = vld [vmem:[%s11336_s0 + $0x10c] sm:$0xf]  ;;  %v7509_v49 = vor.u32 %v6732_v41, %v5290_v40  ;;  %v7511_v50 = vor.u32 %v6728_v42, %v5292_v43 }
  0x2d   :  { %11587 = vst [vmem:[#allocation16_spill] sm:$0xff] %v7477_v38  ;;  %v6733_v45 = vld [vmem:[%s11336_s0 + $0x124] sm:$0xf0]  ;;  %v5300_v48 = vld [vmem:[%s11336_s0 + $0x128] sm:$0xf0] }
  0x2e   :  { %11588 = vst [vmem:[#allocation17_spill] sm:$0xff] %v7479_v39  ;;  %v7513_v54 = vor.u32 %v6733_v45, %v5298_v44  ;;  %v7515_v55 = vor.u32 %v6729_v46, %v5300_v48  ;;  %v5322_v56 = vld [vmem:[%s11336_s0 + $0x140] sm:$0xf]  ;;  %v6736_v58 = vld [vmem:[%s11336_s0 + $0x144] sm:$0xf] }
  0x2f   :  { %11589 = vst [vmem:[#allocation18_spill] sm:$0xff] %v7509_v49  ;;  %v6740_v57 = vld [vmem:[%s11336_s0 + $0x15c] sm:$0xf0]  ;;  %v5324_v59 = vld [vmem:[%s11336_s0 + $0x160] sm:$0xf0] }
  0x30   :  { %11590 = vst [vmem:[#allocation19_spill] sm:$0xff] %v7511_v50  ;;  %v5330_v60 = vld [vmem:[%s11336_s0 + $0x148] sm:$0xf]  ;;  %v6737_v62 = vld [vmem:[%s11336_s0 + $0x14c] sm:$0xf]  ;;  %v7545_v4 = vor.u32 %v6740_v57, %v5322_v56  ;;  %v7547_v5 = vor.u32 %v6736_v58, %v5324_v59 }
  0x31   :  { %11591 = vst [vmem:[#allocation20_spill] sm:$0xff] %v7513_v54  ;;  %v6741_v61 = vld [vmem:[%s11336_s0 + $0x164] sm:$0xf0]  ;;  %v5332_v63 = vld [vmem:[%s11336_s0 + $0x168] sm:$0xf0] }
  0x32   :  { %11592 = vst [vmem:[#allocation21_spill] sm:$0xff] %v7515_v55  ;;  %v7549_v6 = vor.u32 %v6741_v61, %v5330_v60  ;;  %v7551_v7 = vor.u32 %v6737_v62, %v5332_v63  ;;  %v5354_v8 = vld [vmem:[%s11336_s0 + $0x180] sm:$0xf]  ;;  %v6744_v10 = vld [vmem:[%s11336_s0 + $0x184] sm:$0xf] }
  0x33   :  { %2337 = vmatmul.bf16.gmra.mxu0 %v7377_v0  ;;  %11593 = vst [vmem:[#allocation22_spill] sm:$0xff] %v7545_v4  ;;  %v6748_v9 = vld [vmem:[%s11336_s0 + $0x19c] sm:$0xf0]  ;;  %v5356_v11 = vld [vmem:[%s11336_s0 + $0x1a0] sm:$0xf0] }
  0x34   :  { %2506 = vmatmul.bf16.gmra.mxu1 %v7379_v1  ;;  %11594 = vst [vmem:[#allocation23_spill] sm:$0xff] %v7547_v5  ;;  %v5362_v16 = vld [vmem:[%s11336_s0 + $0x188] sm:$0xf]  ;;  %v6745_v18 = vld [vmem:[%s11336_s0 + $0x18c] sm:$0xf]  ;;  %v7581_v20 = vor.u32 %v6748_v9, %v5354_v8  ;;  %v7583_v21 = vor.u32 %v6744_v10, %v5356_v11 }
  0x35   :  { %2675 = vmatmul.bf16.gmra.mxu2 %v7381_v2  ;;  %11595 = vst [vmem:[#allocation24_spill] sm:$0xff] %v7549_v6  ;;  %v6749_v17 = vld [vmem:[%s11336_s0 + $0x1a4] sm:$0xf0]  ;;  %v5364_v19 = vld [vmem:[%s11336_s0 + $0x1a8] sm:$0xf0] }
  0x36   :  { %2844 = vmatmul.bf16.gmra.mxu3 %v7383_v3  ;;  %11596 = vst [vmem:[#allocation25_spill] sm:$0xff] %v7551_v7  ;;  %v7585_v22 = vor.u32 %v6749_v17, %v5362_v16  ;;  %v7587_v23 = vor.u32 %v6745_v18, %v5364_v19  ;;  %v6610_v24 = vld [vmem:[%s11335_s1 + $0x350] sm:$0xf]  ;;  %v7059_v25 = vld [vmem:[%s11335_s1 + $0x354] sm:$0xf0] }
  0x37   :  { %11597 = vst [vmem:[#allocation26_spill] sm:$0xff] %v7581_v20  ;;  %v6482_v26 = vld [vmem:[%s11335_s1 + $0x250] sm:$0xf]  ;;  %v6611_v27 = vor.u32 %v7059_v25, %v6610_v24  ;;  %v7027_v28 = vld [vmem:[%s11335_s1 + $0x254] sm:$0xf0] }
  0x38   :  { %11598 = vst [vmem:[#allocation27_spill] sm:$0xff] %v7583_v21  ;;  %v6674_v29 = vld [vmem:[%s11335_s1 + $0x3d0] sm:$0xf]  ;;  %v7075_v30 = vld [vmem:[%s11335_s1 + $0x3d4] sm:$0xf0]  ;;  %v6483_v31 = vor.u32 %v7027_v28, %v6482_v26 }
  0x39   :  { %11599 = vst [vmem:[#allocation28_spill] sm:$0xff] %v7585_v22  ;;  %v6675_v32 = vor.u32 %v7075_v30, %v6674_v29  ;;  %3340 = vmatpush.bf16.msrb.mxu2 %v6611_v27  ;;  %v6546_v33 = vld [vmem:[%s11335_s1 + $0x2d0] sm:$0xf]  ;;  %v7043_v34 = vld [vmem:[%s11335_s1 + $0x2d4] sm:$0xf0] }
  0x3a   :  { %11600 = vst [vmem:[#allocation29_spill] sm:$0xff] %v7587_v23  ;;  %3002 = vmatpush.bf16.msrb.mxu0 %v6483_v31  ;;  %v6547_v35 = vor.u32 %v7043_v34, %v6546_v33  ;;  %v5386_v40 = vld [vmem:[%s11336_s0 + $0x1c0] sm:$0xf]  ;;  %v6752_v42 = vld [vmem:[%s11336_s0 + $0x1c4] sm:$0xf] }
  0x3b   :  { %3509 = vmatpush.bf16.msrb.mxu3 %v6675_v32  ;;  %v6756_v41 = vld [vmem:[%s11336_s0 + $0x1dc] sm:$0xf0]  ;;  %v5388_v43 = vld [vmem:[%s11336_s0 + $0x1e0] sm:$0xf0]  ;;  %v5394_v44 = vld [vmem:[%s11336_s0 + $0x1c8] sm:$0xf] }
  0x3c   :  { %v6757_v45 = vld [vmem:[%s11336_s0 + $0x1e4] sm:$0xf0]  ;;  %3171 = vmatpush.bf16.msrb.mxu1 %v6547_v35  ;;  %v6753_v46 = vld [vmem:[%s11336_s0 + $0x1cc] sm:$0xf]  ;;  %v7641_v56 = vor.u32 %v6756_v41, %v5386_v40  ;;  %v7643_v57 = vor.u32 %v6752_v42, %v5388_v43  ;;  %v398_v60 = vld [vmem:[%s11337_s2] sm:$0x3] }
  0x3d   :  { %v5396_v48 = vld [vmem:[%s11336_s0 + $0x1e8] sm:$0xf0]  ;;  %v7645_v58 = vor.u32 %v6757_v45, %v5394_v44  ;;  %v7656_v61 = vperm.slane %v398_v60, 0  ;;  %v5418_v62 = vld [vmem:[%s11336_s0 + $0x200] sm:$0xf] }
  0x3e   :  { %11601 = vst [vmem:[#allocation30_spill] sm:$0xff] %v7641_v56  ;;  %v7647_v59 = vor.u32 %v6753_v46, %v5396_v48  ;;  %v6764_v63 = vld [vmem:[%s11336_s0 + $0x21c] sm:$0xf0]  ;;  %v6760_v8 = vld [vmem:[%s11336_s0 + $0x204] sm:$0xf] }
  0x3f   :  { %11602 = vst [vmem:[#allocation31_spill] sm:$0xff] %v7643_v57  ;;  %v5420_v9 = vld [vmem:[%s11336_s0 + $0x220] sm:$0xf0]  ;;  %v5426_v10 = vld [vmem:[%s11336_s0 + $0x208] sm:$0xf]  ;;  %v7682_v18 = vor.u32 %v6764_v63, %v5418_v62 }
  0x40   :  { %11603 = vst [vmem:[#allocation32_spill] sm:$0xff] %v7645_v58  ;;  %v6765_v11 = vld [vmem:[%s11336_s0 + $0x224] sm:$0xf0]  ;;  %v6761_v16 = vld [vmem:[%s11336_s0 + $0x20c] sm:$0xf]  ;;  %v7684_v24 = vor.u32 %v6760_v8, %v5420_v9 }
  0x41   :  { %11604 = vst [vmem:[#allocation33_spill] sm:$0xff] %v7647_v59  ;;  %v5428_v17 = vld [vmem:[%s11336_s0 + $0x228] sm:$0xf0]  ;;  %v7686_v25 = vor.u32 %v6765_v11, %v5426_v10  ;;  %v5450_v42 = vld [vmem:[%s11336_s0 + $0x240] sm:$0xf] }
  0x42   :  { %11605 = vst [vmem:[#allocation34_spill] sm:$0xff] %v7682_v18  ;;  %v7689_v28 = vor.u32 %v6761_v16, %v5428_v17  ;;  %v6772_v43 = vld [vmem:[%s11336_s0 + $0x25c] sm:$0xf0]  ;;  %v6768_v44 = vld [vmem:[%s11336_s0 + $0x244] sm:$0xf] }
  0x43   :  { %2342 = vmatmul.bf16.gmra.mxu0 %v7413_v12  ;;  %11606 = vst [vmem:[#allocation35_spill] sm:$0xff] %v7684_v24  ;;  %v5452_v45 = vld [vmem:[%s11336_s0 + $0x260] sm:$0xf0]  ;;  %v5458_v46 = vld [vmem:[%s11336_s0 + $0x248] sm:$0xf]  ;;  %v7722_v8 = vor.u32 %v6772_v43, %v5450_v42 }
  0x44   :  { %2511 = vmatmul.bf16.gmra.mxu1 %v7415_v13  ;;  %11607 = vst [vmem:[#allocation36_spill] sm:$0xff] %v7686_v25  ;;  %v6773_v48 = vld [vmem:[%s11336_s0 + $0x264] sm:$0xf0]  ;;  %v6769_v60 = vld [vmem:[%s11336_s0 + $0x24c] sm:$0xf]  ;;  %v7724_v16 = vor.u32 %v6768_v44, %v5452_v45 }
  0x45   :  { %2680 = vmatmul.bf16.gmra.mxu2 %v7417_v14  ;;  %11608 = vst [vmem:[#allocation37_spill] sm:$0xff] %v7689_v28  ;;  %v5460_v62 = vld [vmem:[%s11336_s0 + $0x268] sm:$0xf0]  ;;  %v7726_v17 = vor.u32 %v6773_v48, %v5458_v46  ;;  %v5482_v44 = vld [vmem:[%s11336_s0 + $0x280] sm:$0xf] }
  0x46   :  { %2849 = vmatmul.bf16.gmra.mxu3 %v7419_v15  ;;  %11609 = vst [vmem:[#allocation38_spill] sm:$0xff] %v7722_v8  ;;  %v6780_v45 = vld [vmem:[%s11336_s0 + $0x29c] sm:$0xf0]  ;;  %v6776_v46 = vld [vmem:[%s11336_s0 + $0x284] sm:$0xf] }
  0x47   :  { %11610 = vst [vmem:[#allocation39_spill] sm:$0xff] %v7724_v16  ;;  %v5484_v48 = vld [vmem:[%s11336_s0 + $0x2a0] sm:$0xf0] }
  0x48   :  { %11611 = vst [vmem:[#allocation40_spill] sm:$0xff] %v7726_v17 }
  0x53   :  { %2347 = vmatmul.bf16.gmra.mxu0 %v7473_v36 }
  0x54   :  { %2516 = vmatmul.bf16.gmra.mxu1 %v7475_v37 }
  0x55   :  { %2685 = vmatmul.bf16.gmra.mxu2 %v7477_v38 }
  0x56   :  { %2854 = vmatmul.bf16.gmra.mxu3 %v7479_v39 }
  0x63   :  { %2352 = vmatmul.bf16.gmra.mxu0 %v7509_v49 }
  0x64   :  { %2521 = vmatmul.bf16.gmra.mxu1 %v7511_v50 }
  0x65   :  { %2690 = vmatmul.bf16.gmra.mxu2 %v7513_v54 }
  0x66   :  { %2859 = vmatmul.bf16.gmra.mxu3 %v7515_v55 }
  0x73   :  { %2357 = vmatmul.bf16.gmra.mxu0 %v7545_v4 }
  0x74   :  { %2526 = vmatmul.bf16.gmra.mxu1 %v7547_v5 }
  0x75   :  { %2695 = vmatmul.bf16.gmra.mxu2 %v7549_v6 }
  0x76   :  { %2864 = vmatmul.bf16.gmra.mxu3 %v7551_v7 }
  0x83   :  { %2362 = vmatmul.bf16.gmra.mxu0 %v7581_v20 }
  0x84   :  { %2531 = vmatmul.bf16.gmra.mxu1 %v7583_v21 }
  0x85   :  { %2700 = vmatmul.bf16.gmra.mxu2 %v7585_v22 }
  0x86   :  { %2869 = vmatmul.bf16.gmra.mxu3 %v7587_v23 }
  0x93   :  { %2367 = vmatmul.bf16.gmra.mxu0 %v7641_v56 }
  0x94   :  { %2536 = vmatmul.bf16.gmra.mxu1 %v7643_v57 }
  0x95   :  { %2705 = vmatmul.bf16.gmra.mxu2 %v7645_v58 }
  0x96   :  { %2874 = vmatmul.bf16.gmra.mxu3 %v7647_v59 }
  0xa0   :  { %v2333_v19 = vpop.f32.mrf.mxu0 }
  0xa1   :  { %v2334_v26 = vadd.f32 %v2333_v19, %v7656_v61  ;;  %v2502_v27 = vpop.f32.mrf.mxu1 }
  0xa3   :  { %v2503_v29 = vadd.f32 %v2502_v27, %v2334_v26  ;;  %2372 = vmatmul.bf16.gmra.mxu0 %v7682_v18  ;;  %v7729_v27 = vor.u32 %v6769_v60, %v5460_v62  ;;  %v5490_v60 = vld [vmem:[%s11336_s0 + $0x288] sm:$0xf] }
  0xa4   :  { %2541 = vmatmul.bf16.gmra.mxu1 %v7684_v24  ;;  %v6781_v62 = vld [vmem:[%s11336_s0 + $0x2a4] sm:$0xf0] }
  0xa5   :  { %2710 = vmatmul.bf16.gmra.mxu2 %v7686_v25  ;;  %11612 = vst [vmem:[#allocation41_spill] sm:$0xff] %v7729_v27 }
  0xa6   :  { %2879 = vmatmul.bf16.gmra.mxu3 %v7689_v28 }
  0xa8   :  { %v2671_v30 = vpop.f32.mrf.mxu2  ;;  %v2335_v33 = vpop.f32.mrf.mxu0 }
  0xa9   :  { %v2672_v31 = vadd.f32 %v2671_v30, %v2503_v29  ;;  %v2840_v32 = vpop.f32.mrf.mxu3  ;;  %v2336_v34 = vadd.f32 %v2335_v33, %v7656_v61  ;;  %v2504_v35 = vpop.f32.mrf.mxu1 }
  0xab   :  { %v7696_v40 = vadd.f32 %v2840_v32, %v2672_v31  ;;  %v2505_v41 = vadd.f32 %v2504_v35, %v2336_v34 }
  0xb0   :  { %v2673_v63 = vpop.f32.mrf.mxu2  ;;  %v2338_v11 = vpop.f32.mrf.mxu0 }
  0xb1   :  { %v2674_v9 = vadd.f32 %v2673_v63, %v2505_v41  ;;  %v2842_v10 = vpop.f32.mrf.mxu3  ;;  %v2339_v19 = vadd.f32 %v2338_v11, %v7656_v61  ;;  %v2507_v26 = vpop.f32.mrf.mxu1  ;;  %v6777_v63 = vld [vmem:[%s11336_s0 + $0x28c] sm:$0xf]  ;;  %v7764_v11 = vor.u32 %v6780_v45, %v5482_v44  ;;  %v7057_v44 = vld [vmem:[%s11335_s1 + $0x344] sm:$0xf0]  ;;  %v6474_v45 = vld [vmem:[%s11335_s1 + $0x240] sm:$0xf] }
  0xb3   :  { %v7731_v29 = vadd.f32 %v2842_v10, %v2674_v9  ;;  %v2508_v30 = vadd.f32 %v2507_v26, %v2339_v19  ;;  %2377 = vmatmul.bf16.gmra.mxu0 %v7722_v8  ;;  %v5492_v9 = vld [vmem:[%s11336_s0 + $0x2a8] sm:$0xf0]  ;;  %11613 = vst [vmem:[#allocation42_spill] sm:$0xff] %v7764_v11 }
  0xb4   :  { %2546 = vmatmul.bf16.gmra.mxu1 %v7724_v16 }
  0xb5   :  { %2715 = vmatmul.bf16.gmra.mxu2 %v7726_v17 }
  0xb6   :  { %2884 = vmatmul.bf16.gmra.mxu3 %v7729_v27 }
  0xb8   :  { %v2676_v31 = vpop.f32.mrf.mxu2  ;;  %v2340_v34 = vpop.f32.mrf.mxu0 }
  0xb9   :  { %v2677_v32 = vadd.f32 %v2676_v31, %v2508_v30  ;;  %v2845_v33 = vpop.f32.mrf.mxu3  ;;  %v2341_v35 = vadd.f32 %v2340_v34, %v7656_v61  ;;  %v2509_v41 = vpop.f32.mrf.mxu1  ;;  %v7766_v31 = vor.u32 %v6776_v46, %v5484_v48  ;;  %v7025_v48 = vld [vmem:[%s11335_s1 + $0x244] sm:$0xf0] }
  0xbb   :  { %v7738_v42 = vadd.f32 %v2845_v33, %v2677_v32  ;;  %v2510_v43 = vadd.f32 %v2509_v41, %v2341_v35  ;;  %11614 = vst [vmem:[#allocation43_spill] sm:$0xff] %v7766_v31  ;;  %v7768_v32 = vor.u32 %v6781_v62, %v5490_v60  ;;  %v7771_v35 = vor.u32 %v6777_v63, %v5492_v9  ;;  %v6666_v60 = vld [vmem:[%s11335_s1 + $0x3c0] sm:$0xf]  ;;  %v7073_v62 = vld [vmem:[%s11335_s1 + $0x3c4] sm:$0xf0] }
  0xbc   :  { %v6475_v9 = vor.u32 %v7025_v48, %v6474_v45  ;;  %v7041_v45 = vld [vmem:[%s11335_s1 + $0x2c4] sm:$0xf0] }
  0xbd   :  { %11615 = vst [vmem:[#allocation44_spill] sm:$0xff] %v7768_v32 }
  0xbe   :  { %11616 = vst [vmem:[#allocation45_spill] sm:$0xff] %v7771_v35  ;;  %3003 = vmatpush.bf16.msrb.mxu0 %v6475_v9  ;;  %v5522_v9 = vld [vmem:[%s11336_s0 + $0x2c8] sm:$0xf] }
  0xc0   :  { %v2678_v10 = vpop.f32.mrf.mxu2  ;;  %v2343_v30 = vpop.f32.mrf.mxu0 }
  0xc1   :  { %v2679_v19 = vadd.f32 %v2678_v10, %v2510_v43  ;;  %v2847_v26 = vpop.f32.mrf.mxu3  ;;  %v2344_v33 = vadd.f32 %v2343_v30, %v7656_v61  ;;  %v2512_v34 = vpop.f32.mrf.mxu1  ;;  %v6602_v43 = vld [vmem:[%s11335_s1 + $0x340] sm:$0xf]  ;;  %v6667_v10 = vor.u32 %v7073_v62, %v6666_v60  ;;  %v6784_v62 = vld [vmem:[%s11336_s0 + $0x2c4] sm:$0xf] }
  0xc2   :  { %v6603_v46 = vor.u32 %v7057_v44, %v6602_v43  ;;  %v6538_v44 = vld [vmem:[%s11335_s1 + $0x2c0] sm:$0xf] }
  0xc3   :  { %v7773_v41 = vadd.f32 %v2847_v26, %v2679_v19  ;;  %v2513_v27 = vadd.f32 %v2512_v34, %v2344_v33  ;;  %2382 = vmatmul.bf16.gmra.mxu0 %v7764_v11  ;;  %3510 = vmatpush.bf16.msrb.mxu3 %v6667_v10  ;;  %v6788_v60 = vld [vmem:[%s11336_s0 + $0x2dc] sm:$0xf0]  ;;  %v6789_v10 = vld [vmem:[%s11336_s0 + $0x2e4] sm:$0xf0] }
  0xc4   :  { %2551 = vmatmul.bf16.gmra.mxu1 %v7766_v31  ;;  %3341 = vmatpush.bf16.msrb.mxu2 %v6603_v46  ;;  %v5514_v46 = vld [vmem:[%s11336_s0 + $0x2c0] sm:$0xf] }
  0xc5   :  { %2720 = vmatmul.bf16.gmra.mxu2 %v7768_v32  ;;  %v7834_v32 = vor.u32 %v6789_v10, %v5522_v9 }
  0xc6   :  { %2889 = vmatmul.bf16.gmra.mxu3 %v7771_v35 }
  0xc7   :  { %11619 = vst [vmem:[#allocation48_spill] sm:$0xff] %v7834_v32 }
  0xc8   :  { %v2681_v63 = vpop.f32.mrf.mxu2  ;;  %v2345_v30 = vpop.f32.mrf.mxu0 }
  0xc9   :  { %v2682_v19 = vadd.f32 %v2681_v63, %v2513_v27  ;;  %v2850_v26 = vpop.f32.mrf.mxu3  ;;  %v2346_v33 = vadd.f32 %v2345_v30, %v7656_v61  ;;  %v2514_v34 = vpop.f32.mrf.mxu1  ;;  %v6539_v27 = vor.u32 %v7041_v45, %v6538_v44  ;;  %v5516_v63 = vld [vmem:[%s11336_s0 + $0x2e0] sm:$0xf0] }
  0xca   :  { %v7832_v35 = vor.u32 %v6784_v62, %v5516_v63 }
  0xcb   :  { %v7798_v43 = vadd.f32 %v2850_v26, %v2682_v19  ;;  %v2515_v48 = vadd.f32 %v2514_v34, %v2346_v33  ;;  %3172 = vmatpush.bf16.msrb.mxu1 %v6539_v27  ;;  %v6785_v19 = vld [vmem:[%s11336_s0 + $0x2cc] sm:$0xf]  ;;  %v7830_v33 = vor.u32 %v6788_v60, %v5514_v46 }
  0xcc   :  { %v5524_v26 = vld [vmem:[%s11336_s0 + $0x2e8] sm:$0xf0]  ;;  %11618 = vst [vmem:[#allocation47_spill] sm:$0xff] %v7832_v35 }
  0xcd   :  { %11617 = vst [vmem:[#allocation46_spill] sm:$0xff] %v7830_v33  ;;  %v7837_v11 = vor.u32 %v6785_v19, %v5524_v26  ;;  %v6796_v26 = vld [vmem:[%s11336_s0 + $0x31c] sm:$0xf0] }
  0xcf   :  { %11620 = vst [vmem:[#allocation49_spill] sm:$0xff] %v7837_v11 }
  0xd0   :  { %v2683_v30 = vpop.f32.mrf.mxu2  ;;  %v2348_v45 = vpop.f32.mrf.mxu0 }
  0xd1   :  { %v2684_v34 = vadd.f32 %v2683_v30, %v2515_v48  ;;  %v2852_v44 = vpop.f32.mrf.mxu3  ;;  %v2349_v27 = vadd.f32 %v2348_v45, %v7656_v61  ;;  %v2517_v31 = vpop.f32.mrf.mxu1  ;;  %v5548_v30 = vld [vmem:[%s11336_s0 + $0x320] sm:$0xf0]  ;;  %v6793_v45 = vld [vmem:[%s11336_s0 + $0x30c] sm:$0xf] }
  0xd3   :  { %v7839_v17 = vadd.f32 %v2852_v44, %v2684_v34  ;;  %v2518_v16 = vadd.f32 %v2517_v31, %v2349_v27  ;;  %2387 = vmatmul.bf16.gmra.mxu0 %v7830_v33  ;;  %v5546_v31 = vld [vmem:[%s11336_s0 + $0x300] sm:$0xf]  ;;  %v5554_v34 = vld [vmem:[%s11336_s0 + $0x308] sm:$0xf]  ;;  %v5556_v27 = vld [vmem:[%s11336_s0 + $0x328] sm:$0xf0] }
  0xd4   :  { %2556 = vmatmul.bf16.gmra.mxu1 %v7832_v35  ;;  %v6797_v44 = vld [vmem:[%s11336_s0 + $0x324] sm:$0xf0]  ;;  %v7879_v33 = vor.u32 %v6793_v45, %v5556_v27  ;;  %v5580_v27 = vld [vmem:[%s11336_s0 + $0x360] sm:$0xf0] }
  0xd5   :  { %2725 = vmatmul.bf16.gmra.mxu2 %v7834_v32 }
  0xd6   :  { %2894 = vmatmul.bf16.gmra.mxu3 %v7837_v11  ;;  %v7876_v11 = vor.u32 %v6797_v44, %v5554_v34  ;;  %11624 = vst [vmem:[#allocation53_spill] sm:$0xff] %v7879_v33 }
  0xd8   :  { %v2686_v48 = vpop.f32.mrf.mxu2  ;;  %v2350_v62 = vpop.f32.mrf.mxu0  ;;  %11623 = vst [vmem:[#allocation52_spill] sm:$0xff] %v7876_v11 }
  0xd9   :  { %v2687_v46 = vadd.f32 %v2686_v48, %v2518_v16  ;;  %v2855_v60 = vpop.f32.mrf.mxu3  ;;  %v2351_v63 = vadd.f32 %v2350_v62, %v7656_v61  ;;  %v2519_v9 = vpop.f32.mrf.mxu1  ;;  %v6792_v16 = vld [vmem:[%s11336_s0 + $0x304] sm:$0xf] }
  0xdb   :  { %v7846_v10 = vadd.f32 %v2855_v60, %v2687_v46  ;;  %v2520_v19 = vadd.f32 %v2519_v9, %v2351_v63  ;;  %v7872_v46 = vor.u32 %v6796_v26, %v5546_v31  ;;  %v7874_v9 = vor.u32 %v6792_v16, %v5548_v30 }
  0xdd   :  { %11621 = vst [vmem:[#allocation50_spill] sm:$0xff] %v7872_v46 }
  0xde   :  { %11622 = vst [vmem:[#allocation51_spill] sm:$0xff] %v7874_v9 }
  0xe0   :  { %v2688_v48 = vpop.f32.mrf.mxu2  ;;  %v2353_v63 = vpop.f32.mrf.mxu0 }
  0xe1   :  { %v2689_v60 = vadd.f32 %v2688_v48, %v2520_v19  ;;  %v2857_v62 = vpop.f32.mrf.mxu3  ;;  %v2354_v32 = vadd.f32 %v2353_v63, %v7656_v61  ;;  %v2522_v35 = vpop.f32.mrf.mxu1  ;;  %v5586_v48 = vld [vmem:[%s11336_s0 + $0x348] sm:$0xf]  ;;  %v5588_v63 = vld [vmem:[%s11336_s0 + $0x368] sm:$0xf0] }
  0xe3   :  { %v7881_v8 = vadd.f32 %v2857_v62, %v2689_v60  ;;  %v2523_v28 = vadd.f32 %v2522_v35, %v2354_v32  ;;  %2392 = vmatmul.bf16.gmra.mxu0 %v7872_v46  ;;  %v5578_v32 = vld [vmem:[%s11336_s0 + $0x340] sm:$0xf]  ;;  %v6805_v60 = vld [vmem:[%s11336_s0 + $0x364] sm:$0xf0]  ;;  %v6801_v62 = vld [vmem:[%s11336_s0 + $0x34c] sm:$0xf] }
  0xe4   :  { %2561 = vmatmul.bf16.gmra.mxu1 %v7874_v9  ;;  %v6804_v35 = vld [vmem:[%s11336_s0 + $0x35c] sm:$0xf0]  ;;  %v7921_v46 = vor.u32 %v6801_v62, %v5588_v63  ;;  %v5612_v63 = vld [vmem:[%s11336_s0 + $0x3a0] sm:$0xf0] }
  0xe5   :  { %2730 = vmatmul.bf16.gmra.mxu2 %v7876_v11 }
  0xe6   :  { %2899 = vmatmul.bf16.gmra.mxu3 %v7879_v33  ;;  %v7918_v33 = vor.u32 %v6805_v60, %v5586_v48  ;;  %11628 = vst [vmem:[#allocation57_spill] sm:$0xff] %v7921_v46 }
  0xe8   :  { %v2691_v19 = vpop.f32.mrf.mxu2  ;;  %v2355_v16 = vpop.f32.mrf.mxu0  ;;  %11627 = vst [vmem:[#allocation56_spill] sm:$0xff] %v7918_v33 }
  0xe9   :  { %v2692_v31 = vadd.f32 %v2691_v19, %v2523_v28  ;;  %v2860_v26 = vpop.f32.mrf.mxu3  ;;  %v2356_v30 = vadd.f32 %v2355_v16, %v7656_v61  ;;  %v2524_v34 = vpop.f32.mrf.mxu1  ;;  %v6800_v28 = vld [vmem:[%s11336_s0 + $0x344] sm:$0xf] }
  0xeb   :  { %v7888_v44 = vadd.f32 %v2860_v26, %v2692_v31  ;;  %v2525_v45 = vadd.f32 %v2524_v34, %v2356_v30  ;;  %v7914_v31 = vor.u32 %v6804_v35, %v5578_v32  ;;  %v7916_v34 = vor.u32 %v6800_v28, %v5580_v27 }
  0xed   :  { %11625 = vst [vmem:[#allocation54_spill] sm:$0xff] %v7914_v31 }
  0xee   :  { %11626 = vst [vmem:[#allocation55_spill] sm:$0xff] %v7916_v34 }
  0xf0   :  { %v2693_v19 = vpop.f32.mrf.mxu2  ;;  %v2358_v30 = vpop.f32.mrf.mxu0 }
  0xf1   :  { %v2694_v26 = vadd.f32 %v2693_v19, %v2525_v45  ;;  %v2862_v16 = vpop.f32.mrf.mxu3  ;;  %v2359_v11 = vadd.f32 %v2358_v30, %v7656_v61  ;;  %v2527_v9 = vpop.f32.mrf.mxu1  ;;  %v5618_v19 = vld [vmem:[%s11336_s0 + $0x388] sm:$0xf]  ;;  %v5620_v30 = vld [vmem:[%s11336_s0 + $0x3a8] sm:$0xf0] }
  0xf3   :  { %v7923_v25 = vadd.f32 %v2862_v16, %v2694_v26  ;;  %v2528_v24 = vadd.f32 %v2527_v9, %v2359_v11  ;;  %2397 = vmatmul.bf16.gmra.mxu0 %v7914_v31  ;;  %v5610_v11 = vld [vmem:[%s11336_s0 + $0x380] sm:$0xf]  ;;  %v6813_v26 = vld [vmem:[%s11336_s0 + $0x3a4] sm:$0xf0]  ;;  %v6809_v16 = vld [vmem:[%s11336_s0 + $0x38c] sm:$0xf] }
  0xf4   :  { %2566 = vmatmul.bf16.gmra.mxu1 %v7916_v34  ;;  %v6812_v9 = vld [vmem:[%s11336_s0 + $0x39c] sm:$0xf0]  ;;  %v7963_v31 = vor.u32 %v6809_v16, %v5620_v30 }
  0xf5   :  { %2735 = vmatmul.bf16.gmra.mxu2 %v7918_v33 }
  0xf6   :  { %2904 = vmatmul.bf16.gmra.mxu3 %v7921_v46  ;;  %v7960_v46 = vor.u32 %v6813_v26, %v5618_v19  ;;  %11632 = vst [vmem:[#allocation61_spill] sm:$0xff] %v7963_v31 }
  0xf8   :  { %v2696_v45 = vpop.f32.mrf.mxu2  ;;  %v2360_v28 = vpop.f32.mrf.mxu0  ;;  %11631 = vst [vmem:[#allocation60_spill] sm:$0xff] %v7960_v46 }
  0xf9   :  { %v2697_v32 = vadd.f32 %v2696_v45, %v2528_v24  ;;  %v2865_v35 = vpop.f32.mrf.mxu3  ;;  %v2361_v27 = vadd.f32 %v2360_v28, %v7656_v61  ;;  %v2529_v48 = vpop.f32.mrf.mxu1  ;;  %v6808_v24 = vld [vmem:[%s11336_s0 + $0x384] sm:$0xf] }
  0xfb   :  { %v7930_v60 = vadd.f32 %v2865_v35, %v2697_v32  ;;  %v2530_v62 = vadd.f32 %v2529_v48, %v2361_v27  ;;  %v7956_v32 = vor.u32 %v6812_v9, %v5610_v11  ;;  %v7958_v48 = vor.u32 %v6808_v24, %v5612_v63  ;;  %v7055_v11 = vld [vmem:[%s11335_s1 + $0x334] sm:$0xf0]  ;;  %v6658_v24 = vld [vmem:[%s11335_s1 + $0x3b0] sm:$0xf] }
  0xfc   :  { %v7023_v9 = vld [vmem:[%s11335_s1 + $0x234] sm:$0xf0] }
  0xfd   :  { %11629 = vst [vmem:[#allocation58_spill] sm:$0xff] %v7956_v32  ;;  %v7071_v63 = vld [vmem:[%s11335_s1 + $0x3b4] sm:$0xf0] }
  0xfe   :  { %11630 = vst [vmem:[#allocation59_spill] sm:$0xff] %v7958_v48  ;;  %v6659_v16 = vor.u32 %v7071_v63, %v6658_v24  ;;  %v6820_v24 = vld [vmem:[%s11336_s0 + $0x3dc] sm:$0xf0]  ;;  %v6816_v63 = vld [vmem:[%s11336_s0 + $0x3c4] sm:$0xf] }
 0x100   :  { %v2698_v45 = vpop.f32.mrf.mxu2  ;;  %v2363_v27 = vpop.f32.mrf.mxu0  ;;  %3511 = vmatpush.bf16.msrb.mxu3 %v6659_v16  ;;  %v6821_v16 = vld [vmem:[%s11336_s0 + $0x3e4] sm:$0xf0] }
 0x101   :  { %v2699_v35 = vadd.f32 %v2698_v45, %v2530_v62  ;;  %v2867_v28 = vpop.f32.mrf.mxu3  ;;  %v2364_v33 = vadd.f32 %v2363_v27, %v7656_v61  ;;  %v2532_v34 = vpop.f32.mrf.mxu1  ;;  %v6594_v62 = vld [vmem:[%s11335_s1 + $0x330] sm:$0xf] }
 0x103   :  { %v7965_v18 = vadd.f32 %v2867_v28, %v2699_v35  ;;  %v2533_v59 = vadd.f32 %v2532_v34, %v2364_v33  ;;  %2402 = vmatmul.bf16.gmra.mxu0 %v7956_v32  ;;  %v6466_v33 = vld [vmem:[%s11335_s1 + $0x230] sm:$0xf]  ;;  %v6595_v34 = vor.u32 %v7055_v11, %v6594_v62 }
 0x104   :  { %2571 = vmatmul.bf16.gmra.mxu1 %v7958_v48  ;;  %v6467_v26 = vor.u32 %v7023_v9, %v6466_v33  ;;  %v6530_v11 = vld [vmem:[%s11335_s1 + $0x2b0] sm:$0xf]  ;;  %v7039_v33 = vld [vmem:[%s11335_s1 + $0x2b4] sm:$0xf0] }
 0x105   :  { %2740 = vmatmul.bf16.gmra.mxu2 %v7960_v46 }
 0x106   :  { %2909 = vmatmul.bf16.gmra.mxu3 %v7963_v31  ;;  %3342 = vmatpush.bf16.msrb.mxu2 %v6595_v34  ;;  %v5642_v34 = vld [vmem:[%s11336_s0 + $0x3c0] sm:$0xf] }
 0x107   :  { %3004 = vmatpush.bf16.msrb.mxu0 %v6467_v26  ;;  %v5650_v26 = vld [vmem:[%s11336_s0 + $0x3c8] sm:$0xf] }
 0x108   :  { %v2701_v19 = vpop.f32.mrf.mxu2  ;;  %v2365_v35 = vpop.f32.mrf.mxu0  ;;  %v8026_v46 = vor.u32 %v6821_v16, %v5650_v26 }
 0x109   :  { %v2702_v30 = vadd.f32 %v2701_v19, %v2533_v59  ;;  %v2870_v45 = vpop.f32.mrf.mxu3  ;;  %v2366_v28 = vadd.f32 %v2365_v35, %v7656_v61  ;;  %v2534_v27 = vpop.f32.mrf.mxu1  ;;  %v6531_v59 = vor.u32 %v7039_v33, %v6530_v11  ;;  %v5644_v19 = vld [vmem:[%s11336_s0 + $0x3e0] sm:$0xf0] }
 0x10a   :  { %v8024_v31 = vor.u32 %v6816_v63, %v5644_v19  ;;  %11635 = vst [vmem:[#allocation64_spill] sm:$0xff] %v8026_v46 }
 0x10b   :  { %v7990_v62 = vadd.f32 %v2870_v45, %v2702_v30  ;;  %v2535_v9 = vadd.f32 %v2534_v27, %v2366_v28  ;;  %3173 = vmatpush.bf16.msrb.mxu1 %v6531_v59  ;;  %v6817_v30 = vld [vmem:[%s11336_s0 + $0x3cc] sm:$0xf]  ;;  %v8022_v28 = vor.u32 %v6820_v24, %v5642_v34 }
 0x10c   :  { %v5652_v45 = vld [vmem:[%s11336_s0 + $0x3e8] sm:$0xf0]  ;;  %11634 = vst [vmem:[#allocation63_spill] sm:$0xff] %v8024_v31 }
 0x10d   :  { %11633 = vst [vmem:[#allocation62_spill] sm:$0xff] %v8022_v28  ;;  %v8029_v32 = vor.u32 %v6817_v30, %v5652_v45  ;;  %v6828_v45 = vld [vmem:[%s11336_s0 + $0x41c] sm:$0xf0] }
 0x10f   :  { %11636 = vst [vmem:[#allocation65_spill] sm:$0xff] %v8029_v32 }
 0x110   :  { %v2703_v35 = vpop.f32.mrf.mxu2  ;;  %v2368_v33 = vpop.f32.mrf.mxu0 }
 0x111   :  { %v2704_v27 = vadd.f32 %v2703_v35, %v2535_v9  ;;  %v2872_v11 = vpop.f32.mrf.mxu3  ;;  %v2369_v59 = vadd.f32 %v2368_v33, %v7656_v61  ;;  %v2537_v48 = vpop.f32.mrf.mxu1  ;;  %v5676_v35 = vld [vmem:[%s11336_s0 + $0x420] sm:$0xf0]  ;;  %v6825_v33 = vld [vmem:[%s11336_s0 + $0x40c] sm:$0xf] }
 0x113   :  { %v8031_v58 = vadd.f32 %v2872_v11, %v2704_v27  ;;  %v2538_v57 = vadd.f32 %v2537_v48, %v2369_v59  ;;  %2407 = vmatmul.bf16.gmra.mxu0 %v8022_v28  ;;  %v5674_v48 = vld [vmem:[%s11336_s0 + $0x400] sm:$0xf]  ;;  %v5682_v27 = vld [vmem:[%s11336_s0 + $0x408] sm:$0xf]  ;;  %v5684_v59 = vld [vmem:[%s11336_s0 + $0x428] sm:$0xf0] }
 0x114   :  { %2576 = vmatmul.bf16.gmra.mxu1 %v8024_v31  ;;  %v6829_v11 = vld [vmem:[%s11336_s0 + $0x424] sm:$0xf0]  ;;  %v8071_v28 = vor.u32 %v6825_v33, %v5684_v59  ;;  %v5708_v59 = vld [vmem:[%s11336_s0 + $0x460] sm:$0xf0] }
 0x115   :  { %2745 = vmatmul.bf16.gmra.mxu2 %v8026_v46 }
 0x116   :  { %2914 = vmatmul.bf16.gmra.mxu3 %v8029_v32  ;;  %v8068_v32 = vor.u32 %v6829_v11, %v5682_v27  ;;  %11640 = vst [vmem:[#allocation69_spill] sm:$0xff] %v8071_v28 }
 0x118   :  { %v2706_v9 = vpop.f32.mrf.mxu2  ;;  %v2370_v63 = vpop.f32.mrf.mxu0  ;;  %11639 = vst [vmem:[#allocation68_spill] sm:$0xff] %v8068_v32 }
 0x119   :  { %v2707_v34 = vadd.f32 %v2706_v9, %v2538_v57  ;;  %v2875_v24 = vpop.f32.mrf.mxu3  ;;  %v2371_v19 = vadd.f32 %v2370_v63, %v7656_v61  ;;  %v2539_v26 = vpop.f32.mrf.mxu1  ;;  %v6824_v57 = vld [vmem:[%s11336_s0 + $0x404] sm:$0xf] }
 0x11b   :  { %v8038_v16 = vadd.f32 %v2875_v24, %v2707_v34  ;;  %v2540_v30 = vadd.f32 %v2539_v26, %v2371_v19  ;;  %v8064_v34 = vor.u32 %v6828_v45, %v5674_v48  ;;  %v8066_v26 = vor.u32 %v6824_v57, %v5676_v35 }
 0x11d   :  { %11637 = vst [vmem:[#allocation66_spill] sm:$0xff] %v8064_v34 }
 0x11e   :  { %11638 = vst [vmem:[#allocation67_spill] sm:$0xff] %v8066_v26 }
 0x120   :  { %v2708_v9 = vpop.f32.mrf.mxu2  ;;  %v2373_v19 = vpop.f32.mrf.mxu0 }
 0x121   :  { %v2709_v24 = vadd.f32 %v2708_v9, %v2540_v30  ;;  %v2877_v63 = vpop.f32.mrf.mxu3  ;;  %v2374_v46 = vadd.f32 %v2373_v19, %v7656_v61  ;;  %v2542_v31 = vpop.f32.mrf.mxu1  ;;  %v5714_v9 = vld [vmem:[%s11336_s0 + $0x448] sm:$0xf]  ;;  %v5716_v19 = vld [vmem:[%s11336_s0 + $0x468] sm:$0xf0] }
 0x123   :  { %v8073_v56 = vadd.f32 %v2877_v63, %v2709_v24  ;;  %v2543_v23 = vadd.f32 %v2542_v31, %v2374_v46  ;;  %2412 = vmatmul.bf16.gmra.mxu0 %v8064_v34  ;;  %v5706_v46 = vld [vmem:[%s11336_s0 + $0x440] sm:$0xf]  ;;  %v6837_v24 = vld [vmem:[%s11336_s0 + $0x464] sm:$0xf0]  ;;  %v6833_v63 = vld [vmem:[%s11336_s0 + $0x44c] sm:$0xf] }
 0x124   :  { %2581 = vmatmul.bf16.gmra.mxu1 %v8066_v26  ;;  %v6836_v31 = vld [vmem:[%s11336_s0 + $0x45c] sm:$0xf0]  ;;  %v8113_v34 = vor.u32 %v6833_v63, %v5716_v19  ;;  %v5740_v19 = vld [vmem:[%s11336_s0 + $0x4a0] sm:$0xf0] }
 0x125   :  { %2750 = vmatmul.bf16.gmra.mxu2 %v8068_v32 }
 0x126   :  { %2919 = vmatmul.bf16.gmra.mxu3 %v8071_v28  ;;  %v8110_v28 = vor.u32 %v6837_v24, %v5714_v9  ;;  %11644 = vst [vmem:[#allocation73_spill] sm:$0xff] %v8113_v34 }
 0x128   :  { %v2711_v30 = vpop.f32.mrf.mxu2  ;;  %v2375_v57 = vpop.f32.mrf.mxu0  ;;  %11643 = vst [vmem:[#allocation72_spill] sm:$0xff] %v8110_v28 }
 0x129   :  { %v2712_v48 = vadd.f32 %v2711_v30, %v2543_v23  ;;  %v2880_v45 = vpop.f32.mrf.mxu3  ;;  %v2376_v35 = vadd.f32 %v2375_v57, %v7656_v61  ;;  %v2544_v27 = vpop.f32.mrf.mxu1  ;;  %v6832_v23 = vld [vmem:[%s11336_s0 + $0x444] sm:$0xf] }
 0x12b   :  { %v8080_v11 = vadd.f32 %v2880_v45, %v2712_v48  ;;  %v2545_v33 = vadd.f32 %v2544_v27, %v2376_v35  ;;  %v8106_v48 = vor.u32 %v6836_v31, %v5706_v46  ;;  %v8108_v27 = vor.u32 %v6832_v23, %v5708_v59 }
 0x12d   :  { %11641 = vst [vmem:[#allocation70_spill] sm:$0xff] %v8106_v48 }
 0x12e   :  { %11642 = vst [vmem:[#allocation71_spill] sm:$0xff] %v8108_v27 }
 0x130   :  { %v2713_v30 = vpop.f32.mrf.mxu2  ;;  %v2378_v35 = vpop.f32.mrf.mxu0 }
 0x131   :  { %v2714_v45 = vadd.f32 %v2713_v30, %v2545_v33  ;;  %v2882_v57 = vpop.f32.mrf.mxu3  ;;  %v2379_v32 = vadd.f32 %v2378_v35, %v7656_v61  ;;  %v2547_v26 = vpop.f32.mrf.mxu1  ;;  %v5746_v30 = vld [vmem:[%s11336_s0 + $0x488] sm:$0xf]  ;;  %v5748_v35 = vld [vmem:[%s11336_s0 + $0x4a8] sm:$0xf0] }
 0x133   :  { %v8115_v22 = vadd.f32 %v2882_v57, %v2714_v45  ;;  %v2548_v21 = vadd.f32 %v2547_v26, %v2379_v32  ;;  %2417 = vmatmul.bf16.gmra.mxu0 %v8106_v48  ;;  %v5738_v32 = vld [vmem:[%s11336_s0 + $0x480] sm:$0xf]  ;;  %v6845_v45 = vld [vmem:[%s11336_s0 + $0x4a4] sm:$0xf0]  ;;  %v6841_v57 = vld [vmem:[%s11336_s0 + $0x48c] sm:$0xf] }
 0x134   :  { %2586 = vmatmul.bf16.gmra.mxu1 %v8108_v27  ;;  %v6844_v26 = vld [vmem:[%s11336_s0 + $0x49c] sm:$0xf0]  ;;  %v8155_v48 = vor.u32 %v6841_v57, %v5748_v35 }
 0x135   :  { %2755 = vmatmul.bf16.gmra.mxu2 %v8110_v28 }
 0x136   :  { %2924 = vmatmul.bf16.gmra.mxu3 %v8113_v34  ;;  %v8152_v34 = vor.u32 %v6845_v45, %v5746_v30  ;;  %11648 = vst [vmem:[#allocation77_spill] sm:$0xff] %v8155_v48 }
 0x138   :  { %v2716_v33 = vpop.f32.mrf.mxu2  ;;  %v2380_v23 = vpop.f32.mrf.mxu0  ;;  %11647 = vst [vmem:[#allocation76_spill] sm:$0xff] %v8152_v34 }
 0x139   :  { %v2717_v46 = vadd.f32 %v2716_v33, %v2548_v21  ;;  %v2885_v31 = vpop.f32.mrf.mxu3  ;;  %v2381_v59 = vadd.f32 %v2380_v23, %v7656_v61  ;;  %v2549_v9 = vpop.f32.mrf.mxu1  ;;  %v6840_v21 = vld [vmem:[%s11336_s0 + $0x484] sm:$0xf] }
 0x13b   :  { %v8122_v24 = vadd.f32 %v2885_v31, %v2717_v46  ;;  %v2550_v63 = vadd.f32 %v2549_v9, %v2381_v59  ;;  %v8148_v46 = vor.u32 %v6844_v26, %v5738_v32  ;;  %v8150_v9 = vor.u32 %v6840_v21, %v5740_v19  ;;  %v7053_v32 = vld [vmem:[%s11335_s1 + $0x324] sm:$0xf0]  ;;  %v6650_v21 = vld [vmem:[%s11335_s1 + $0x3a0] sm:$0xf] }
 0x13c   :  { %v7021_v26 = vld [vmem:[%s11335_s1 + $0x224] sm:$0xf0] }
 0x13d   :  { %11645 = vst [vmem:[#allocation74_spill] sm:$0xff] %v8148_v46  ;;  %v7069_v19 = vld [vmem:[%s11335_s1 + $0x3a4] sm:$0xf0] }
 0x13e   :  { %11646 = vst [vmem:[#allocation75_spill] sm:$0xff] %v8150_v9  ;;  %v6651_v57 = vor.u32 %v7069_v19, %v6650_v21  ;;  %v6852_v21 = vld [vmem:[%s11336_s0 + $0x4dc] sm:$0xf0]  ;;  %v6848_v19 = vld [vmem:[%s11336_s0 + $0x4c4] sm:$0xf] }
 0x140   :  { %v2718_v33 = vpop.f32.mrf.mxu2  ;;  %v2383_v59 = vpop.f32.mrf.mxu0  ;;  %3512 = vmatpush.bf16.msrb.mxu3 %v6651_v57  ;;  %v6853_v57 = vld [vmem:[%s11336_s0 + $0x4e4] sm:$0xf0] }
 0x141   :  { %v2719_v31 = vadd.f32 %v2718_v33, %v2550_v63  ;;  %v2887_v23 = vpop.f32.mrf.mxu3  ;;  %v2384_v28 = vadd.f32 %v2383_v59, %v7656_v61  ;;  %v2552_v27 = vpop.f32.mrf.mxu1  ;;  %v6586_v63 = vld [vmem:[%s11335_s1 + $0x320] sm:$0xf] }
 0x143   :  { %v8157_v20 = vadd.f32 %v2887_v23, %v2719_v31  ;;  %v2553_v7 = vadd.f32 %v2552_v27, %v2384_v28  ;;  %2422 = vmatmul.bf16.gmra.mxu0 %v8148_v46  ;;  %v6458_v28 = vld [vmem:[%s11335_s1 + $0x220] sm:$0xf]  ;;  %v6587_v27 = vor.u32 %v7053_v32, %v6586_v63 }
 0x144   :  { %2591 = vmatmul.bf16.gmra.mxu1 %v8150_v9  ;;  %v6459_v45 = vor.u32 %v7021_v26, %v6458_v28  ;;  %v6522_v32 = vld [vmem:[%s11335_s1 + $0x2a0] sm:$0xf]  ;;  %v7037_v28 = vld [vmem:[%s11335_s1 + $0x2a4] sm:$0xf0] }
 0x145   :  { %2760 = vmatmul.bf16.gmra.mxu2 %v8152_v34 }
 0x146   :  { %2929 = vmatmul.bf16.gmra.mxu3 %v8155_v48  ;;  %3343 = vmatpush.bf16.msrb.mxu2 %v6587_v27  ;;  %v5770_v27 = vld [vmem:[%s11336_s0 + $0x4c0] sm:$0xf] }
 0x147   :  { %3005 = vmatpush.bf16.msrb.mxu0 %v6459_v45  ;;  %v5778_v45 = vld [vmem:[%s11336_s0 + $0x4c8] sm:$0xf] }
 0x148   :  { %v2721_v30 = vpop.f32.mrf.mxu2  ;;  %v2385_v31 = vpop.f32.mrf.mxu0  ;;  %v8218_v34 = vor.u32 %v6853_v57, %v5778_v45 }
 0x149   :  { %v2722_v35 = vadd.f32 %v2721_v30, %v2553_v7  ;;  %v2890_v33 = vpop.f32.mrf.mxu3  ;;  %v2386_v23 = vadd.f32 %v2385_v31, %v7656_v61  ;;  %v2554_v59 = vpop.f32.mrf.mxu1  ;;  %v6523_v7 = vor.u32 %v7037_v28, %v6522_v32  ;;  %v5772_v30 = vld [vmem:[%s11336_s0 + $0x4e0] sm:$0xf0] }
 0x14a   :  { %v8216_v48 = vor.u32 %v6848_v19, %v5772_v30  ;;  %11651 = vst [vmem:[#allocation80_spill] sm:$0xff] %v8218_v34 }
 0x14b   :  { %v8182_v63 = vadd.f32 %v2890_v33, %v2722_v35  ;;  %v2555_v26 = vadd.f32 %v2554_v59, %v2386_v23  ;;  %3174 = vmatpush.bf16.msrb.mxu1 %v6523_v7  ;;  %v6849_v35 = vld [vmem:[%s11336_s0 + $0x4cc] sm:$0xf]  ;;  %v8214_v23 = vor.u32 %v6852_v21, %v5770_v27 }
 0x14c   :  { %v5780_v33 = vld [vmem:[%s11336_s0 + $0x4e8] sm:$0xf0]  ;;  %11650 = vst [vmem:[#allocation79_spill] sm:$0xff] %v8216_v48 }
 0x14d   :  { %11649 = vst [vmem:[#allocation78_spill] sm:$0xff] %v8214_v23  ;;  %v8221_v46 = vor.u32 %v6849_v35, %v5780_v33  ;;  %v6860_v33 = vld [vmem:[%s11336_s0 + $0x51c] sm:$0xf0] }
 0x14f   :  { %11652 = vst [vmem:[#allocation81_spill] sm:$0xff] %v8221_v46 }
 0x150   :  { %v2723_v31 = vpop.f32.mrf.mxu2  ;;  %v2388_v28 = vpop.f32.mrf.mxu0 }
 0x151   :  { %v2724_v59 = vadd.f32 %v2723_v31, %v2555_v26  ;;  %v2892_v32 = vpop.f32.mrf.mxu3  ;;  %v2389_v7 = vadd.f32 %v2388_v28, %v7656_v61  ;;  %v2557_v9 = vpop.f32.mrf.mxu1  ;;  %v5804_v31 = vld [vmem:[%s11336_s0 + $0x520] sm:$0xf0]  ;;  %v6857_v28 = vld [vmem:[%s11336_s0 + $0x50c] sm:$0xf] }
 0x153   :  { %v8223_v6 = vadd.f32 %v2892_v32, %v2724_v59  ;;  %v2558_v5 = vadd.f32 %v2557_v9, %v2389_v7  ;;  %2427 = vmatmul.bf16.gmra.mxu0 %v8214_v23  ;;  %v5802_v9 = vld [vmem:[%s11336_s0 + $0x500] sm:$0xf]  ;;  %v5810_v59 = vld [vmem:[%s11336_s0 + $0x508] sm:$0xf]  ;;  %v5812_v7 = vld [vmem:[%s11336_s0 + $0x528] sm:$0xf0] }
 0x154   :  { %2596 = vmatmul.bf16.gmra.mxu1 %v8216_v48  ;;  %v6861_v32 = vld [vmem:[%s11336_s0 + $0x524] sm:$0xf0]  ;;  %v8263_v23 = vor.u32 %v6857_v28, %v5812_v7  ;;  %v5836_v7 = vld [vmem:[%s11336_s0 + $0x560] sm:$0xf0] }
 0x155   :  { %2765 = vmatmul.bf16.gmra.mxu2 %v8218_v34 }
 0x156   :  { %2934 = vmatmul.bf16.gmra.mxu3 %v8221_v46  ;;  %v8260_v46 = vor.u32 %v6861_v32, %v5810_v59  ;;  %11656 = vst [vmem:[#allocation85_spill] sm:$0xff] %v8263_v23 }
 0x158   :  { %v2726_v26 = vpop.f32.mrf.mxu2  ;;  %v2390_v19 = vpop.f32.mrf.mxu0  ;;  %11655 = vst [vmem:[#allocation84_spill] sm:$0xff] %v8260_v46 }
 0x159   :  { %v2727_v27 = vadd.f32 %v2726_v26, %v2558_v5  ;;  %v2895_v21 = vpop.f32.mrf.mxu3  ;;  %v2391_v30 = vadd.f32 %v2390_v19, %v7656_v61  ;;  %v2559_v45 = vpop.f32.mrf.mxu1  ;;  %v6856_v5 = vld [vmem:[%s11336_s0 + $0x504] sm:$0xf] }
 0x15b   :  { %v8230_v57 = vadd.f32 %v2895_v21, %v2727_v27  ;;  %v2560_v35 = vadd.f32 %v2559_v45, %v2391_v30  ;;  %v8256_v27 = vor.u32 %v6860_v33, %v5802_v9  ;;  %v8258_v45 = vor.u32 %v6856_v5, %v5804_v31 }
 0x15d   :  { %11653 = vst [vmem:[#allocation82_spill] sm:$0xff] %v8256_v27 }
 0x15e   :  { %11654 = vst [vmem:[#allocation83_spill] sm:$0xff] %v8258_v45 }
 0x160   :  { %v2728_v26 = vpop.f32.mrf.mxu2  ;;  %v2393_v30 = vpop.f32.mrf.mxu0 }
 0x161   :  { %v2729_v21 = vadd.f32 %v2728_v26, %v2560_v35  ;;  %v2897_v19 = vpop.f32.mrf.mxu3  ;;  %v2394_v34 = vadd.f32 %v2393_v30, %v7656_v61  ;;  %v2562_v48 = vpop.f32.mrf.mxu1  ;;  %v5842_v26 = vld [vmem:[%s11336_s0 + $0x548] sm:$0xf]  ;;  %v5844_v30 = vld [vmem:[%s11336_s0 + $0x568] sm:$0xf0] }
 0x163   :  { %v8265_v4 = vadd.f32 %v2897_v19, %v2729_v21  ;;  %v2563_v55 = vadd.f32 %v2562_v48, %v2394_v34  ;;  %2432 = vmatmul.bf16.gmra.mxu0 %v8256_v27  ;;  %v5834_v34 = vld [vmem:[%s11336_s0 + $0x540] sm:$0xf]  ;;  %v6869_v21 = vld [vmem:[%s11336_s0 + $0x564] sm:$0xf0]  ;;  %v6865_v19 = vld [vmem:[%s11336_s0 + $0x54c] sm:$0xf] }
 0x164   :  { %2601 = vmatmul.bf16.gmra.mxu1 %v8258_v45  ;;  %v6868_v48 = vld [vmem:[%s11336_s0 + $0x55c] sm:$0xf0]  ;;  %v8305_v27 = vor.u32 %v6865_v19, %v5844_v30  ;;  %v5868_v30 = vld [vmem:[%s11336_s0 + $0x5a0] sm:$0xf0] }
 0x165   :  { %2770 = vmatmul.bf16.gmra.mxu2 %v8260_v46 }
 0x166   :  { %2939 = vmatmul.bf16.gmra.mxu3 %v8263_v23  ;;  %v8302_v23 = vor.u32 %v6869_v21, %v5842_v26  ;;  %11660 = vst [vmem:[#allocation89_spill] sm:$0xff] %v8305_v27 }
 0x168   :  { %v2731_v35 = vpop.f32.mrf.mxu2  ;;  %v2395_v5 = vpop.f32.mrf.mxu0  ;;  %11659 = vst [vmem:[#allocation88_spill] sm:$0xff] %v8302_v23 }
 0x169   :  { %v2732_v9 = vadd.f32 %v2731_v35, %v2563_v55  ;;  %v2900_v33 = vpop.f32.mrf.mxu3  ;;  %v2396_v31 = vadd.f32 %v2395_v5, %v7656_v61  ;;  %v2564_v59 = vpop.f32.mrf.mxu1  ;;  %v6864_v55 = vld [vmem:[%s11336_s0 + $0x544] sm:$0xf] }
 0x16b   :  { %v8272_v32 = vadd.f32 %v2900_v33, %v2732_v9  ;;  %v2565_v28 = vadd.f32 %v2564_v59, %v2396_v31  ;;  %v8298_v9 = vor.u32 %v6868_v48, %v5834_v34  ;;  %v8300_v59 = vor.u32 %v6864_v55, %v5836_v7 }
 0x16d   :  { %11657 = vst [vmem:[#allocation86_spill] sm:$0xff] %v8298_v9 }
 0x16e   :  { %11658 = vst [vmem:[#allocation87_spill] sm:$0xff] %v8300_v59 }
 0x170   :  { %v2733_v35 = vpop.f32.mrf.mxu2  ;;  %v2398_v31 = vpop.f32.mrf.mxu0 }
 0x171   :  { %v2734_v33 = vadd.f32 %v2733_v35, %v2565_v28  ;;  %v2902_v5 = vpop.f32.mrf.mxu3  ;;  %v2399_v46 = vadd.f32 %v2398_v31, %v7656_v61  ;;  %v2567_v45 = vpop.f32.mrf.mxu1  ;;  %v5874_v35 = vld [vmem:[%s11336_s0 + $0x588] sm:$0xf]  ;;  %v5876_v31 = vld [vmem:[%s11336_s0 + $0x5a8] sm:$0xf0] }
 0x173   :  { %v8307_v54 = vadd.f32 %v2902_v5, %v2734_v33  ;;  %v2568_v50 = vadd.f32 %v2567_v45, %v2399_v46  ;;  %2437 = vmatmul.bf16.gmra.mxu0 %v8298_v9  ;;  %v5866_v46 = vld [vmem:[%s11336_s0 + $0x580] sm:$0xf]  ;;  %v6877_v33 = vld [vmem:[%s11336_s0 + $0x5a4] sm:$0xf0]  ;;  %v6873_v5 = vld [vmem:[%s11336_s0 + $0x58c] sm:$0xf] }
 0x174   :  { %2606 = vmatmul.bf16.gmra.mxu1 %v8300_v59  ;;  %v6876_v45 = vld [vmem:[%s11336_s0 + $0x59c] sm:$0xf0]  ;;  %v8347_v9 = vor.u32 %v6873_v5, %v5876_v31 }
 0x175   :  { %2775 = vmatmul.bf16.gmra.mxu2 %v8302_v23 }
 0x176   :  { %2944 = vmatmul.bf16.gmra.mxu3 %v8305_v27  ;;  %v8344_v27 = vor.u32 %v6877_v33, %v5874_v35  ;;  %11664 = vst [vmem:[#allocation93_spill] sm:$0xff] %v8347_v9 }
 0x178   :  { %v2736_v28 = vpop.f32.mrf.mxu2  ;;  %v2400_v55 = vpop.f32.mrf.mxu0  ;;  %11663 = vst [vmem:[#allocation92_spill] sm:$0xff] %v8344_v27 }
 0x179   :  { %v2737_v34 = vadd.f32 %v2736_v28, %v2568_v50  ;;  %v2905_v48 = vpop.f32.mrf.mxu3  ;;  %v2401_v7 = vadd.f32 %v2400_v55, %v7656_v61  ;;  %v2569_v26 = vpop.f32.mrf.mxu1  ;;  %v6872_v50 = vld [vmem:[%s11336_s0 + $0x584] sm:$0xf] }
 0x17b   :  { %v8314_v21 = vadd.f32 %v2905_v48, %v2737_v34  ;;  %v2570_v19 = vadd.f32 %v2569_v26, %v2401_v7  ;;  %v8340_v34 = vor.u32 %v6876_v45, %v5866_v46  ;;  %v8342_v26 = vor.u32 %v6872_v50, %v5868_v30  ;;  %v7051_v46 = vld [vmem:[%s11335_s1 + $0x314] sm:$0xf0]  ;;  %v6642_v50 = vld [vmem:[%s11335_s1 + $0x390] sm:$0xf] }
 0x17c   :  { %v7019_v45 = vld [vmem:[%s11335_s1 + $0x214] sm:$0xf0] }
 0x17d   :  { %11661 = vst [vmem:[#allocation90_spill] sm:$0xff] %v8340_v34  ;;  %v7067_v30 = vld [vmem:[%s11335_s1 + $0x394] sm:$0xf0] }
 0x17e   :  { %11662 = vst [vmem:[#allocation91_spill] sm:$0xff] %v8342_v26  ;;  %v6643_v5 = vor.u32 %v7067_v30, %v6642_v50  ;;  %v6884_v50 = vld [vmem:[%s11336_s0 + $0x5dc] sm:$0xf0]  ;;  %v6880_v30 = vld [vmem:[%s11336_s0 + $0x5c4] sm:$0xf] }
 0x180   :  { %v2738_v28 = vpop.f32.mrf.mxu2  ;;  %v2403_v7 = vpop.f32.mrf.mxu0  ;;  %3513 = vmatpush.bf16.msrb.mxu3 %v6643_v5  ;;  %v6885_v5 = vld [vmem:[%s11336_s0 + $0x5e4] sm:$0xf0] }
 0x181   :  { %v2739_v48 = vadd.f32 %v2738_v28, %v2570_v19  ;;  %v2907_v55 = vpop.f32.mrf.mxu3  ;;  %v2404_v23 = vadd.f32 %v2403_v7, %v7656_v61  ;;  %v2572_v59 = vpop.f32.mrf.mxu1  ;;  %v6578_v19 = vld [vmem:[%s11335_s1 + $0x310] sm:$0xf] }
 0x183   :  { %v8349_v49 = vadd.f32 %v2907_v55, %v2739_v48  ;;  %v2573_v39 = vadd.f32 %v2572_v59, %v2404_v23  ;;  %2442 = vmatmul.bf16.gmra.mxu0 %v8340_v34  ;;  %v6450_v23 = vld [vmem:[%s11335_s1 + $0x210] sm:$0xf]  ;;  %v6579_v59 = vor.u32 %v7051_v46, %v6578_v19 }
 0x184   :  { %2611 = vmatmul.bf16.gmra.mxu1 %v8342_v26  ;;  %v6451_v33 = vor.u32 %v7019_v45, %v6450_v23  ;;  %v6514_v46 = vld [vmem:[%s11335_s1 + $0x290] sm:$0xf]  ;;  %v7035_v23 = vld [vmem:[%s11335_s1 + $0x294] sm:$0xf0] }
 0x185   :  { %2780 = vmatmul.bf16.gmra.mxu2 %v8344_v27 }
 0x186   :  { %2949 = vmatmul.bf16.gmra.mxu3 %v8347_v9  ;;  %3344 = vmatpush.bf16.msrb.mxu2 %v6579_v59  ;;  %v5898_v59 = vld [vmem:[%s11336_s0 + $0x5c0] sm:$0xf] }
 0x187   :  { %3006 = vmatpush.bf16.msrb.mxu0 %v6451_v33  ;;  %v5906_v33 = vld [vmem:[%s11336_s0 + $0x5c8] sm:$0xf] }
 0x188   :  { %v2741_v35 = vpop.f32.mrf.mxu2  ;;  %v2405_v48 = vpop.f32.mrf.mxu0  ;;  %v8410_v27 = vor.u32 %v6885_v5, %v5906_v33 }
 0x189   :  { %v2742_v31 = vadd.f32 %v2741_v35, %v2573_v39  ;;  %v2910_v28 = vpop.f32.mrf.mxu3  ;;  %v2406_v55 = vadd.f32 %v2405_v48, %v7656_v61  ;;  %v2574_v7 = vpop.f32.mrf.mxu1  ;;  %v6515_v39 = vor.u32 %v7035_v23, %v6514_v46  ;;  %v5900_v35 = vld [vmem:[%s11336_s0 + $0x5e0] sm:$0xf0] }
 0x18a   :  { %v8408_v9 = vor.u32 %v6880_v30, %v5900_v35  ;;  %11667 = vst [vmem:[#allocation96_spill] sm:$0xff] %v8410_v27 }
 0x18b   :  { %v8374_v19 = vadd.f32 %v2910_v28, %v2742_v31  ;;  %v2575_v45 = vadd.f32 %v2574_v7, %v2406_v55  ;;  %3175 = vmatpush.bf16.msrb.mxu1 %v6515_v39  ;;  %v6881_v31 = vld [vmem:[%s11336_s0 + $0x5cc] sm:$0xf]  ;;  %v8406_v55 = vor.u32 %v6884_v50, %v5898_v59 }
 0x18c   :  { %v5908_v28 = vld [vmem:[%s11336_s0 + $0x5e8] sm:$0xf0]  ;;  %11666 = vst [vmem:[#allocation95_spill] sm:$0xff] %v8408_v9 }
 0x18d   :  { %11665 = vst [vmem:[#allocation94_spill] sm:$0xff] %v8406_v55  ;;  %v8413_v34 = vor.u32 %v6881_v31, %v5908_v28  ;;  %v6892_v28 = vld [vmem:[%s11336_s0 + $0x61c] sm:$0xf0] }
 0x18f   :  { %11668 = vst [vmem:[#allocation97_spill] sm:$0xff] %v8413_v34 }
 0x190   :  { %v2743_v48 = vpop.f32.mrf.mxu2  ;;  %v2408_v23 = vpop.f32.mrf.mxu0 }
 0x191   :  { %v2744_v7 = vadd.f32 %v2743_v48, %v2575_v45  ;;  %v2912_v46 = vpop.f32.mrf.mxu3  ;;  %v2409_v39 = vadd.f32 %v2408_v23, %v7656_v61  ;;  %v2577_v26 = vpop.f32.mrf.mxu1  ;;  %v5932_v48 = vld [vmem:[%s11336_s0 + $0x620] sm:$0xf0]  ;;  %v6889_v23 = vld [vmem:[%s11336_s0 + $0x60c] sm:$0xf] }
 0x193   :  { %v8415_v38 = vadd.f32 %v2912_v46, %v2744_v7  ;;  %v2578_v37 = vadd.f32 %v2577_v26, %v2409_v39  ;;  %2447 = vmatmul.bf16.gmra.mxu0 %v8406_v55  ;;  %v5930_v26 = vld [vmem:[%s11336_s0 + $0x600] sm:$0xf]  ;;  %v5938_v7 = vld [vmem:[%s11336_s0 + $0x608] sm:$0xf]  ;;  %v5940_v39 = vld [vmem:[%s11336_s0 + $0x628] sm:$0xf0] }
 0x194   :  { %2616 = vmatmul.bf16.gmra.mxu1 %v8408_v9  ;;  %v6893_v46 = vld [vmem:[%s11336_s0 + $0x624] sm:$0xf0]  ;;  %v8455_v55 = vor.u32 %v6889_v23, %v5940_v39  ;;  %v5964_v39 = vld [vmem:[%s11336_s0 + $0x660] sm:$0xf0] }
 0x195   :  { %2785 = vmatmul.bf16.gmra.mxu2 %v8410_v27 }
 0x196   :  { %2954 = vmatmul.bf16.gmra.mxu3 %v8413_v34  ;;  %v8452_v34 = vor.u32 %v6893_v46, %v5938_v7  ;;  %11672 = vst [vmem:[#allocation101_spill] sm:$0xff] %v8455_v55 }
 0x198   :  { %v2746_v45 = vpop.f32.mrf.mxu2  ;;  %v2410_v30 = vpop.f32.mrf.mxu0  ;;  %11671 = vst [vmem:[#allocation100_spill] sm:$0xff] %v8452_v34 }
 0x199   :  { %v2747_v59 = vadd.f32 %v2746_v45, %v2578_v37  ;;  %v2915_v50 = vpop.f32.mrf.mxu3  ;;  %v2411_v35 = vadd.f32 %v2410_v30, %v7656_v61  ;;  %v2579_v33 = vpop.f32.mrf.mxu1  ;;  %v6888_v37 = vld [vmem:[%s11336_s0 + $0x604] sm:$0xf] }
 0x19b   :  { %v8422_v5 = vadd.f32 %v2915_v50, %v2747_v59  ;;  %v2580_v31 = vadd.f32 %v2579_v33, %v2411_v35  ;;  %v8448_v59 = vor.u32 %v6892_v28, %v5930_v26  ;;  %v8450_v33 = vor.u32 %v6888_v37, %v5932_v48 }
 0x19d   :  { %11669 = vst [vmem:[#allocation98_spill] sm:$0xff] %v8448_v59 }
 0x19e   :  { %11670 = vst [vmem:[#allocation99_spill] sm:$0xff] %v8450_v33 }
 0x1a0   :  { %v2748_v45 = vpop.f32.mrf.mxu2  ;;  %v2413_v35 = vpop.f32.mrf.mxu0 }
 0x1a1   :  { %v2749_v50 = vadd.f32 %v2748_v45, %v2580_v31  ;;  %v2917_v30 = vpop.f32.mrf.mxu3  ;;  %v2414_v27 = vadd.f32 %v2413_v35, %v7656_v61  ;;  %v2582_v9 = vpop.f32.mrf.mxu1  ;;  %v5970_v45 = vld [vmem:[%s11336_s0 + $0x648] sm:$0xf]  ;;  %v5972_v35 = vld [vmem:[%s11336_s0 + $0x668] sm:$0xf0] }
 0x1a3   :  { %v8457_v36 = vadd.f32 %v2917_v30, %v2749_v50  ;;  %v2583_v15 = vadd.f32 %v2582_v9, %v2414_v27  ;;  %2452 = vmatmul.bf16.gmra.mxu0 %v8448_v59  ;;  %v5962_v27 = vld [vmem:[%s11336_s0 + $0x640] sm:$0xf]  ;;  %v6901_v50 = vld [vmem:[%s11336_s0 + $0x664] sm:$0xf0]  ;;  %v6897_v30 = vld [vmem:[%s11336_s0 + $0x64c] sm:$0xf] }
 0x1a4   :  { %2621 = vmatmul.bf16.gmra.mxu1 %v8450_v33  ;;  %v6900_v9 = vld [vmem:[%s11336_s0 + $0x65c] sm:$0xf0]  ;;  %v8497_v59 = vor.u32 %v6897_v30, %v5972_v35  ;;  %v5996_v35 = vld [vmem:[%s11336_s0 + $0x6a0] sm:$0xf0] }
 0x1a5   :  { %2790 = vmatmul.bf16.gmra.mxu2 %v8452_v34 }
 0x1a6   :  { %2959 = vmatmul.bf16.gmra.mxu3 %v8455_v55  ;;  %v8494_v55 = vor.u32 %v6901_v50, %v5970_v45  ;;  %11676 = vst [vmem:[#allocation105_spill] sm:$0xff] %v8497_v59 }
 0x1a8   :  { %v2751_v31 = vpop.f32.mrf.mxu2  ;;  %v2415_v37 = vpop.f32.mrf.mxu0  ;;  %11675 = vst [vmem:[#allocation104_spill] sm:$0xff] %v8494_v55 }
 0x1a9   :  { %v2752_v26 = vadd.f32 %v2751_v31, %v2583_v15  ;;  %v2920_v28 = vpop.f32.mrf.mxu3  ;;  %v2416_v48 = vadd.f32 %v2415_v37, %v7656_v61  ;;  %v2584_v7 = vpop.f32.mrf.mxu1  ;;  %v6896_v15 = vld [vmem:[%s11336_s0 + $0x644] sm:$0xf] }
 0x1ab   :  { %v8464_v46 = vadd.f32 %v2920_v28, %v2752_v26  ;;  %v2585_v23 = vadd.f32 %v2584_v7, %v2416_v48  ;;  %v8490_v26 = vor.u32 %v6900_v9, %v5962_v27  ;;  %v8492_v7 = vor.u32 %v6896_v15, %v5964_v39 }
 0x1ad   :  { %11673 = vst [vmem:[#allocation102_spill] sm:$0xff] %v8490_v26 }
 0x1ae   :  { %11674 = vst [vmem:[#allocation103_spill] sm:$0xff] %v8492_v7 }
 0x1b0   :  { %v2753_v31 = vpop.f32.mrf.mxu2  ;;  %v2418_v48 = vpop.f32.mrf.mxu0 }
 0x1b1   :  { %v2754_v28 = vadd.f32 %v2753_v31, %v2585_v23  ;;  %v2922_v37 = vpop.f32.mrf.mxu3  ;;  %v2419_v34 = vadd.f32 %v2418_v48, %v7656_v61  ;;  %v2587_v33 = vpop.f32.mrf.mxu1  ;;  %v6002_v31 = vld [vmem:[%s11336_s0 + $0x688] sm:$0xf]  ;;  %v6004_v48 = vld [vmem:[%s11336_s0 + $0x6a8] sm:$0xf0] }
 0x1b3   :  { %v8499_v14 = vadd.f32 %v2922_v37, %v2754_v28  ;;  %v2588_v13 = vadd.f32 %v2587_v33, %v2419_v34  ;;  %2457 = vmatmul.bf16.gmra.mxu0 %v8490_v26  ;;  %v5994_v34 = vld [vmem:[%s11336_s0 + $0x680] sm:$0xf]  ;;  %v6909_v28 = vld [vmem:[%s11336_s0 + $0x6a4] sm:$0xf0]  ;;  %v6905_v37 = vld [vmem:[%s11336_s0 + $0x68c] sm:$0xf] }
 0x1b4   :  { %2626 = vmatmul.bf16.gmra.mxu1 %v8492_v7  ;;  %v6908_v33 = vld [vmem:[%s11336_s0 + $0x69c] sm:$0xf0]  ;;  %v8539_v26 = vor.u32 %v6905_v37, %v6004_v48 }
 0x1b5   :  { %2795 = vmatmul.bf16.gmra.mxu2 %v8494_v55 }
 0x1b6   :  { %2964 = vmatmul.bf16.gmra.mxu3 %v8497_v59  ;;  %v8536_v59 = vor.u32 %v6909_v28, %v6002_v31  ;;  %11680 = vst [vmem:[#allocation109_spill] sm:$0xff] %v8539_v26 }
 0x1b8   :  { %v2756_v23 = vpop.f32.mrf.mxu2  ;;  %v2420_v15 = vpop.f32.mrf.mxu0  ;;  %11679 = vst [vmem:[#allocation108_spill] sm:$0xff] %v8536_v59 }
 0x1b9   :  { %v2757_v27 = vadd.f32 %v2756_v23, %v2588_v13  ;;  %v2925_v9 = vpop.f32.mrf.mxu3  ;;  %v2421_v39 = vadd.f32 %v2420_v15, %v7656_v61  ;;  %v2589_v45 = vpop.f32.mrf.mxu1  ;;  %v6904_v13 = vld [vmem:[%s11336_s0 + $0x684] sm:$0xf] }
 0x1bb   :  { %v8506_v50 = vadd.f32 %v2925_v9, %v2757_v27  ;;  %v2590_v30 = vadd.f32 %v2589_v45, %v2421_v39  ;;  %v8532_v27 = vor.u32 %v6908_v33, %v5994_v34  ;;  %v8534_v45 = vor.u32 %v6904_v13, %v5996_v35  ;;  %v7049_v34 = vld [vmem:[%s11335_s1 + $0x304] sm:$0xf0]  ;;  %v6634_v13 = vld [vmem:[%s11335_s1 + $0x380] sm:$0xf] }
 0x1bc   :  { %v7017_v33 = vld [vmem:[%s11335_s1 + $0x204] sm:$0xf0] }
 0x1bd   :  { %11677 = vst [vmem:[#allocation106_spill] sm:$0xff] %v8532_v27  ;;  %v7065_v35 = vld [vmem:[%s11335_s1 + $0x384] sm:$0xf0] }
 0x1be   :  { %11678 = vst [vmem:[#allocation107_spill] sm:$0xff] %v8534_v45  ;;  %v6635_v37 = vor.u32 %v7065_v35, %v6634_v13  ;;  %v6916_v13 = vld [vmem:[%s11336_s0 + $0x6dc] sm:$0xf0]  ;;  %v6912_v35 = vld [vmem:[%s11336_s0 + $0x6c4] sm:$0xf] }
 0x1c0   :  { %v2758_v23 = vpop.f32.mrf.mxu2  ;;  %v2423_v39 = vpop.f32.mrf.mxu0  ;;  %3514 = vmatpush.bf16.msrb.mxu3 %v6635_v37  ;;  %v6917_v37 = vld [vmem:[%s11336_s0 + $0x6e4] sm:$0xf0] }
 0x1c1   :  { %v2759_v9 = vadd.f32 %v2758_v23, %v2590_v30  ;;  %v2927_v15 = vpop.f32.mrf.mxu3  ;;  %v2424_v55 = vadd.f32 %v2423_v39, %v7656_v61  ;;  %v2592_v7 = vpop.f32.mrf.mxu1  ;;  %v6570_v30 = vld [vmem:[%s11335_s1 + $0x300] sm:$0xf] }
 0x1c3   :  { %v8541_v12 = vadd.f32 %v2927_v15, %v2759_v9  ;;  %v2593_v3 = vadd.f32 %v2592_v7, %v2424_v55  ;;  %2462 = vmatmul.bf16.gmra.mxu0 %v8532_v27  ;;  %v6442_v55 = vld [vmem:[%s11335_s1 + $0x200] sm:$0xf]  ;;  %v6571_v7 = vor.u32 %v7049_v34, %v6570_v30 }
 0x1c4   :  { %2631 = vmatmul.bf16.gmra.mxu1 %v8534_v45  ;;  %v6443_v28 = vor.u32 %v7017_v33, %v6442_v55  ;;  %v6506_v34 = vld [vmem:[%s11335_s1 + $0x280] sm:$0xf]  ;;  %v7033_v55 = vld [vmem:[%s11335_s1 + $0x284] sm:$0xf0] }
 0x1c5   :  { %2800 = vmatmul.bf16.gmra.mxu2 %v8536_v59 }
 0x1c6   :  { %2969 = vmatmul.bf16.gmra.mxu3 %v8539_v26  ;;  %3345 = vmatpush.bf16.msrb.mxu2 %v6571_v7  ;;  %v6026_v7 = vld [vmem:[%s11336_s0 + $0x6c0] sm:$0xf] }
 0x1c7   :  { %3007 = vmatpush.bf16.msrb.mxu0 %v6443_v28  ;;  %v6034_v28 = vld [vmem:[%s11336_s0 + $0x6c8] sm:$0xf] }
 0x1c8   :  { %v2761_v31 = vpop.f32.mrf.mxu2  ;;  %v2425_v9 = vpop.f32.mrf.mxu0  ;;  %v8602_v59 = vor.u32 %v6917_v37, %v6034_v28 }
 0x1c9   :  { %v2762_v48 = vadd.f32 %v2761_v31, %v2593_v3  ;;  %v2930_v23 = vpop.f32.mrf.mxu3  ;;  %v2426_v15 = vadd.f32 %v2425_v9, %v7656_v61  ;;  %v2594_v39 = vpop.f32.mrf.mxu1  ;;  %v6507_v3 = vor.u32 %v7033_v55, %v6506_v34  ;;  %v6028_v31 = vld [vmem:[%s11336_s0 + $0x6e0] sm:$0xf0] }
 0x1ca   :  { %v8600_v26 = vor.u32 %v6912_v35, %v6028_v31  ;;  %11683 = vst [vmem:[#allocation112_spill] sm:$0xff] %v8602_v59 }
 0x1cb   :  { %v8566_v30 = vadd.f32 %v2930_v23, %v2762_v48  ;;  %v2595_v33 = vadd.f32 %v2594_v39, %v2426_v15  ;;  %3176 = vmatpush.bf16.msrb.mxu1 %v6507_v3  ;;  %v6913_v48 = vld [vmem:[%s11336_s0 + $0x6cc] sm:$0xf]  ;;  %v8598_v15 = vor.u32 %v6916_v13, %v6026_v7 }
 0x1cc   :  { %v6036_v23 = vld [vmem:[%s11336_s0 + $0x6e8] sm:$0xf0]  ;;  %11682 = vst [vmem:[#allocation111_spill] sm:$0xff] %v8600_v26 }
 0x1cd   :  { %11681 = vst [vmem:[#allocation110_spill] sm:$0xff] %v8598_v15  ;;  %v8605_v27 = vor.u32 %v6913_v48, %v6036_v23  ;;  %v6924_v23 = vld [vmem:[%s11336_s0 + $0x71c] sm:$0xf0] }
 0x1cf   :  { %11684 = vst [vmem:[#allocation113_spill] sm:$0xff] %v8605_v27 }
 0x1d0   :  { %v2763_v9 = vpop.f32.mrf.mxu2  ;;  %v2428_v55 = vpop.f32.mrf.mxu0 }
 0x1d1   :  { %v2764_v39 = vadd.f32 %v2763_v9, %v2595_v33  ;;  %v2932_v34 = vpop.f32.mrf.mxu3  ;;  %v2429_v3 = vadd.f32 %v2428_v55, %v7656_v61  ;;  %v2597_v45 = vpop.f32.mrf.mxu1  ;;  %v6060_v9 = vld [vmem:[%s11336_s0 + $0x720] sm:$0xf0]  ;;  %v6921_v55 = vld [vmem:[%s11336_s0 + $0x70c] sm:$0xf] }
 0x1d3   :  { %v8607_v2 = vadd.f32 %v2932_v34, %v2764_v39  ;;  %v2598_v1 = vadd.f32 %v2597_v45, %v2429_v3  ;;  %2467 = vmatmul.bf16.gmra.mxu0 %v8598_v15  ;;  %v6058_v45 = vld [vmem:[%s11336_s0 + $0x700] sm:$0xf]  ;;  %v6066_v39 = vld [vmem:[%s11336_s0 + $0x708] sm:$0xf]  ;;  %v6068_v3 = vld [vmem:[%s11336_s0 + $0x728] sm:$0xf0] }
 0x1d4   :  { %2636 = vmatmul.bf16.gmra.mxu1 %v8600_v26  ;;  %v6925_v34 = vld [vmem:[%s11336_s0 + $0x724] sm:$0xf0]  ;;  %v8647_v15 = vor.u32 %v6921_v55, %v6068_v3  ;;  %v6092_v3 = vld [vmem:[%s11336_s0 + $0x760] sm:$0xf0] }
 0x1d5   :  { %2805 = vmatmul.bf16.gmra.mxu2 %v8602_v59 }
 0x1d6   :  { %2974 = vmatmul.bf16.gmra.mxu3 %v8605_v27  ;;  %v8644_v27 = vor.u32 %v6925_v34, %v6066_v39  ;;  %11688 = vst [vmem:[#allocation117_spill] sm:$0xff] %v8647_v15 }
 0x1d8   :  { %v2766_v33 = vpop.f32.mrf.mxu2  ;;  %v2430_v35 = vpop.f32.mrf.mxu0  ;;  %11687 = vst [vmem:[#allocation116_spill] sm:$0xff] %v8644_v27 }
 0x1d9   :  { %v2767_v7 = vadd.f32 %v2766_v33, %v2598_v1  ;;  %v2935_v13 = vpop.f32.mrf.mxu3  ;;  %v2431_v31 = vadd.f32 %v2430_v35, %v7656_v61  ;;  %v2599_v28 = vpop.f32.mrf.mxu1  ;;  %v6920_v1 = vld [vmem:[%s11336_s0 + $0x704] sm:$0xf] }
 0x1db   :  { %v8614_v37 = vadd.f32 %v2935_v13, %v2767_v7  ;;  %v2600_v48 = vadd.f32 %v2599_v28, %v2431_v31  ;;  %v8640_v7 = vor.u32 %v6924_v23, %v6058_v45  ;;  %v8642_v28 = vor.u32 %v6920_v1, %v6060_v9 }
 0x1dd   :  { %11685 = vst [vmem:[#allocation114_spill] sm:$0xff] %v8640_v7 }
 0x1de   :  { %11686 = vst [vmem:[#allocation115_spill] sm:$0xff] %v8642_v28 }
 0x1e0   :  { %v2768_v33 = vpop.f32.mrf.mxu2  ;;  %v2433_v31 = vpop.f32.mrf.mxu0 }
 0x1e1   :  { %v2769_v13 = vadd.f32 %v2768_v33, %v2600_v48  ;;  %v2937_v35 = vpop.f32.mrf.mxu3  ;;  %v2434_v59 = vadd.f32 %v2433_v31, %v7656_v61  ;;  %v2602_v26 = vpop.f32.mrf.mxu1  ;;  %v6098_v33 = vld [vmem:[%s11336_s0 + $0x748] sm:$0xf]  ;;  %v6100_v31 = vld [vmem:[%s11336_s0 + $0x768] sm:$0xf0] }
 0x1e3   :  { %v8649_v0 = vadd.f32 %v2937_v35, %v2769_v13  ;;  %v2603_v53 = vadd.f32 %v2602_v26, %v2434_v59  ;;  %2472 = vmatmul.bf16.gmra.mxu0 %v8640_v7  ;;  %v6090_v59 = vld [vmem:[%s11336_s0 + $0x740] sm:$0xf]  ;;  %v6933_v13 = vld [vmem:[%s11336_s0 + $0x764] sm:$0xf0]  ;;  %v6929_v35 = vld [vmem:[%s11336_s0 + $0x74c] sm:$0xf] }
 0x1e4   :  { %2641 = vmatmul.bf16.gmra.mxu1 %v8642_v28  ;;  %v6932_v26 = vld [vmem:[%s11336_s0 + $0x75c] sm:$0xf0]  ;;  %v8689_v7 = vor.u32 %v6929_v35, %v6100_v31  ;;  %v6124_v31 = vld [vmem:[%s11336_s0 + $0x7a0] sm:$0xf0] }
 0x1e5   :  { %2810 = vmatmul.bf16.gmra.mxu2 %v8644_v27 }
 0x1e6   :  { %2979 = vmatmul.bf16.gmra.mxu3 %v8647_v15  ;;  %v8686_v15 = vor.u32 %v6933_v13, %v6098_v33  ;;  %11692 = vst [vmem:[#allocation121_spill] sm:$0xff] %v8689_v7 }
 0x1e8   :  { %v2771_v48 = vpop.f32.mrf.mxu2  ;;  %v2435_v1 = vpop.f32.mrf.mxu0  ;;  %11691 = vst [vmem:[#allocation120_spill] sm:$0xff] %v8686_v15 }
 0x1e9   :  { %v2772_v45 = vadd.f32 %v2771_v48, %v2603_v53  ;;  %v2940_v23 = vpop.f32.mrf.mxu3  ;;  %v2436_v9 = vadd.f32 %v2435_v1, %v7656_v61  ;;  %v2604_v39 = vpop.f32.mrf.mxu1  ;;  %v6928_v53 = vld [vmem:[%s11336_s0 + $0x744] sm:$0xf] }
 0x1eb   :  { %v8656_v34 = vadd.f32 %v2940_v23, %v2772_v45  ;;  %v2605_v55 = vadd.f32 %v2604_v39, %v2436_v9  ;;  %v8682_v45 = vor.u32 %v6932_v26, %v6090_v59  ;;  %v8684_v39 = vor.u32 %v6928_v53, %v6092_v3 }
 0x1ed   :  { %11689 = vst [vmem:[#allocation118_spill] sm:$0xff] %v8682_v45 }
 0x1ee   :  { %11690 = vst [vmem:[#allocation119_spill] sm:$0xff] %v8684_v39 }
 0x1f0   :  { %v2773_v48 = vpop.f32.mrf.mxu2  ;;  %v2438_v9 = vpop.f32.mrf.mxu0 }
 0x1f1   :  { %v2774_v23 = vadd.f32 %v2773_v48, %v2605_v55  ;;  %v2942_v1 = vpop.f32.mrf.mxu3  ;;  %v2439_v27 = vadd.f32 %v2438_v9, %v7656_v61  ;;  %v2607_v28 = vpop.f32.mrf.mxu1  ;;  %v6130_v48 = vld [vmem:[%s11336_s0 + $0x788] sm:$0xf]  ;;  %v6132_v9 = vld [vmem:[%s11336_s0 + $0x7a8] sm:$0xf0] }
 0x1f3   :  { %v8691_v52 = vadd.f32 %v2942_v1, %v2774_v23  ;;  %v2608_v51 = vadd.f32 %v2607_v28, %v2439_v27  ;;  %2477 = vmatmul.bf16.gmra.mxu0 %v8682_v45  ;;  %v6122_v27 = vld [vmem:[%s11336_s0 + $0x780] sm:$0xf]  ;;  %v6941_v23 = vld [vmem:[%s11336_s0 + $0x7a4] sm:$0xf0]  ;;  %v6937_v1 = vld [vmem:[%s11336_s0 + $0x78c] sm:$0xf] }
 0x1f4   :  { %2646 = vmatmul.bf16.gmra.mxu1 %v8684_v39  ;;  %v6940_v28 = vld [vmem:[%s11336_s0 + $0x79c] sm:$0xf0]  ;;  %v8731_v45 = vor.u32 %v6937_v1, %v6132_v9 }
 0x1f5   :  { %11693 = vst [vmem:[#allocation122_spill] sm:$0xff] %v8691_v52  ;;  %2815 = vmatmul.bf16.gmra.mxu2 %v8686_v15 }
 0x1f6   :  { %2984 = vmatmul.bf16.gmra.mxu3 %v8689_v7  ;;  %v8728_v7 = vor.u32 %v6941_v23, %v6130_v48  ;;  %11698 = vst [vmem:[#allocation127_spill] sm:$0xff] %v8731_v45 }
 0x1f8   :  { %v2776_v55 = vpop.f32.mrf.mxu2  ;;  %v2440_v53 = vpop.f32.mrf.mxu0  ;;  %11697 = vst [vmem:[#allocation126_spill] sm:$0xff] %v8728_v7 }
 0x1f9   :  { %v2777_v59 = vadd.f32 %v2776_v55, %v2608_v51  ;;  %v2945_v26 = vpop.f32.mrf.mxu3  ;;  %v2441_v3 = vadd.f32 %v2440_v53, %v7656_v61  ;;  %v2609_v33 = vpop.f32.mrf.mxu1  ;;  %v6936_v51 = vld [vmem:[%s11336_s0 + $0x784] sm:$0xf] }
 0x1fb   :  { %v8698_v13 = vadd.f32 %v2945_v26, %v2777_v59  ;;  %v2610_v35 = vadd.f32 %v2609_v33, %v2441_v3  ;;  %v8724_v59 = vor.u32 %v6940_v28, %v6122_v27  ;;  %v8726_v33 = vor.u32 %v6936_v51, %v6124_v31  ;;  %v6372_v27 = vld [vmem:[%s11335_s1 + $0x178] sm:$0xf0]  ;;  %v7014_v51 = vld [vmem:[%s11335_s1 + $0x1f4] sm:$0xf] }
 0x1fc   :  { %v6244_v28 = vld [vmem:[%s11335_s1 + $0x78] sm:$0xf0] }
 0x1fd   :  { %11694 = vst [vmem:[#allocation123_spill] sm:$0xff] %v8698_v13  ;;  %v6436_v31 = vld [vmem:[%s11335_s1 + $0x1f8] sm:$0xf0] }
 0x1fe   :  { %11695 = vst [vmem:[#allocation124_spill] sm:$0xff] %v8724_v59  ;;  %v6439_v1 = vor.u32 %v7014_v51, %v6436_v31  ;;  %v6948_v51 = vld [vmem:[%s11336_s0 + $0x7dc] sm:$0xf0]  ;;  %v6944_v31 = vld [vmem:[%s11336_s0 + $0x7c4] sm:$0xf] }
 0x1ff   :  { %11696 = vst [vmem:[#allocation125_spill] sm:$0xff] %v8726_v33 }
 0x200   :  { %v2778_v55 = vpop.f32.mrf.mxu2  ;;  %v2443_v3 = vpop.f32.mrf.mxu0  ;;  %4183 = vmatpush.bf16.msra.mxu3 %v6439_v1  ;;  %v6949_v1 = vld [vmem:[%s11336_s0 + $0x7e4] sm:$0xf0] }
 0x201   :  { %v2779_v26 = vadd.f32 %v2778_v55, %v2610_v35  ;;  %v2947_v53 = vpop.f32.mrf.mxu3  ;;  %v2444_v15 = vadd.f32 %v2443_v3, %v7656_v61  ;;  %v2612_v39 = vpop.f32.mrf.mxu1  ;;  %v6998_v35 = vld [vmem:[%s11335_s1 + $0x174] sm:$0xf] }
 0x203   :  { %v8733_v47 = vadd.f32 %v2947_v53, %v2779_v26  ;;  %v2613_v13 = vadd.f32 %v2612_v39, %v2444_v15  ;;  %2482 = vmatmul.bf16.gmra.mxu0 %v8724_v59  ;;  %v6966_v15 = vld [vmem:[%s11335_s1 + $0x74] sm:$0xf]  ;;  %v6375_v39 = vor.u32 %v6998_v35, %v6372_v27 }
 0x204   :  { %2651 = vmatmul.bf16.gmra.mxu1 %v8726_v33  ;;  %v6247_v23 = vor.u32 %v6966_v15, %v6244_v28  ;;  %v6982_v27 = vld [vmem:[%s11335_s1 + $0xf4] sm:$0xf]  ;;  %v6308_v15 = vld [vmem:[%s11335_s1 + $0xf8] sm:$0xf0] }
 0x205   :  { %11699 = vst [vmem:[#allocation128_spill] sm:$0xff] %v8733_v47  ;;  %2820 = vmatmul.bf16.gmra.mxu2 %v8728_v7 }
 0x206   :  { %2989 = vmatmul.bf16.gmra.mxu3 %v8731_v45  ;;  %4014 = vmatpush.bf16.msra.mxu2 %v6375_v39  ;;  %v6154_v39 = vld [vmem:[%s11336_s0 + $0x7c0] sm:$0xf] }
 0x207   :  { %3676 = vmatpush.bf16.msra.mxu0 %v6247_v23  ;;  %v6162_v23 = vld [vmem:[%s11336_s0 + $0x7c8] sm:$0xf] }
 0x208   :  { %v2781_v48 = vpop.f32.mrf.mxu2  ;;  %v2445_v26 = vpop.f32.mrf.mxu0  ;;  %v8794_v7 = vor.u32 %v6949_v1, %v6162_v23 }
 0x209   :  { %v2782_v9 = vadd.f32 %v2781_v48, %v2613_v13  ;;  %v2950_v55 = vpop.f32.mrf.mxu3  ;;  %v2446_v53 = vadd.f32 %v2445_v26, %v7656_v61  ;;  %v2614_v3 = vpop.f32.mrf.mxu1  ;;  %v6311_v13 = vor.u32 %v6982_v27, %v6308_v15  ;;  %v6156_v48 = vld [vmem:[%s11336_s0 + $0x7e0] sm:$0xf0] }
 0x20a   :  { %v8792_v45 = vor.u32 %v6944_v31, %v6156_v48  ;;  %11703 = vst [vmem:[#allocation132_spill] sm:$0xff] %v8794_v7 }
 0x20b   :  { %v8758_v35 = vadd.f32 %v2950_v55, %v2782_v9  ;;  %v2615_v28 = vadd.f32 %v2614_v3, %v2446_v53  ;;  %3845 = vmatpush.bf16.msra.mxu1 %v6311_v13  ;;  %v6945_v9 = vld [vmem:[%s11336_s0 + $0x7cc] sm:$0xf]  ;;  %v8790_v53 = vor.u32 %v6948_v51, %v6154_v39 }
 0x20c   :  { %v6164_v55 = vld [vmem:[%s11336_s0 + $0x7e8] sm:$0xf0]  ;;  %11702 = vst [vmem:[#allocation131_spill] sm:$0xff] %v8792_v45 }
 0x20d   :  { %11700 = vst [vmem:[#allocation129_spill] sm:$0xff] %v8758_v35  ;;  %v8797_v59 = vor.u32 %v6945_v9, %v6164_v55  ;;  %v6702_v55 = vld [vmem:[%s11336_s0 + $0x2c] sm:$0xf0] }
 0x20e   :  { %11701 = vst [vmem:[#allocation130_spill] sm:$0xff] %v8790_v53 }
 0x20f   :  { %11704 = vst [vmem:[#allocation133_spill] sm:$0xff] %v8797_v59 }
 0x210   :  { %v2783_v26 = vpop.f32.mrf.mxu2  ;;  %v2448_v15 = vpop.f32.mrf.mxu0 }
 0x211   :  { %v2784_v3 = vadd.f32 %v2783_v26, %v2615_v28  ;;  %v2952_v27 = vpop.f32.mrf.mxu3  ;;  %v2449_v13 = vadd.f32 %v2448_v15, %v7656_v61  ;;  %v2617_v33 = vpop.f32.mrf.mxu1  ;;  %v5180_v26 = vld [vmem:[%s11336_s0 + $0x30] sm:$0xf0]  ;;  %v6699_v15 = vld [vmem:[%s11336_s0 + $0x1c] sm:$0xf] }
 0x213   :  { %v8799_v35 = vadd.f32 %v2952_v27, %v2784_v3  ;;  %v2618_v47 = vadd.f32 %v2617_v33, %v2449_v13  ;;  %2487 = vmatmul.bf16.gmra.mxu0 %v8790_v53  ;;  %v5178_v33 = vld [vmem:[%s11336_s0 + $0x10] sm:$0xf]  ;;  %v5186_v3 = vld [vmem:[%s11336_s0 + $0x18] sm:$0xf]  ;;  %v5188_v13 = vld [vmem:[%s11336_s0 + $0x38] sm:$0xf0] }
 0x214   :  { %2656 = vmatmul.bf16.gmra.mxu1 %v8792_v45  ;;  %v6703_v27 = vld [vmem:[%s11336_s0 + $0x34] sm:$0xf0]  ;;  %v8839_v53 = vor.u32 %v6699_v15, %v5188_v13  ;;  %v5212_v13 = vld [vmem:[%s11336_s0 + $0x70] sm:$0xf0] }
 0x215   :  { %11705 = vst [vmem:[#allocation134_spill] sm:$0xff] %v8799_v35  ;;  %2825 = vmatmul.bf16.gmra.mxu2 %v8794_v7 }
 0x216   :  { %2994 = vmatmul.bf16.gmra.mxu3 %v8797_v59  ;;  %v8836_v59 = vor.u32 %v6703_v27, %v5186_v3  ;;  %11710 = vst [vmem:[#allocation139_spill] sm:$0xff] %v8839_v53 }
 0x218   :  { %v2786_v28 = vpop.f32.mrf.mxu2  ;;  %v2450_v31 = vpop.f32.mrf.mxu0  ;;  %11709 = vst [vmem:[#allocation138_spill] sm:$0xff] %v8836_v59 }
 0x219   :  { %v2787_v39 = vadd.f32 %v2786_v28, %v2618_v47  ;;  %v2955_v51 = vpop.f32.mrf.mxu3  ;;  %v2451_v48 = vadd.f32 %v2450_v31, %v7656_v61  ;;  %v2619_v23 = vpop.f32.mrf.mxu1  ;;  %v6698_v47 = vld [vmem:[%s11336_s0 + $0x14] sm:$0xf] }
 0x21b   :  { %v8806_v1 = vadd.f32 %v2955_v51, %v2787_v39  ;;  %v2620_v9 = vadd.f32 %v2619_v23, %v2451_v48  ;;  %v8832_v39 = vor.u32 %v6702_v55, %v5178_v33  ;;  %v8834_v23 = vor.u32 %v6698_v47, %v5180_v26 }
 0x21d   :  { %11706 = vst [vmem:[#allocation135_spill] sm:$0xff] %v8806_v1 }
 0x21e   :  { %11707 = vst [vmem:[#allocation136_spill] sm:$0xff] %v8832_v39 }
 0x21f   :  { %11708 = vst [vmem:[#allocation137_spill] sm:$0xff] %v8834_v23 }
 0x220   :  { %v2788_v28 = vpop.f32.mrf.mxu2  ;;  %v2453_v48 = vpop.f32.mrf.mxu0 }
 0x221   :  { %v2789_v51 = vadd.f32 %v2788_v28, %v2620_v9  ;;  %v2957_v31 = vpop.f32.mrf.mxu3  ;;  %v2454_v7 = vadd.f32 %v2453_v48, %v7656_v61  ;;  %v2622_v45 = vpop.f32.mrf.mxu1  ;;  %v5218_v28 = vld [vmem:[%s11336_s0 + $0x58] sm:$0xf]  ;;  %v5220_v48 = vld [vmem:[%s11336_s0 + $0x78] sm:$0xf0] }
 0x223   :  { %v8841_v1 = vadd.f32 %v2957_v31, %v2789_v51  ;;  %v2623_v35 = vadd.f32 %v2622_v45, %v2454_v7  ;;  %3008 = vmatmul.bf16.vlgmr.msrb.gmra.mxu0 %v8832_v39  ;;  %v5210_v7 = vld [vmem:[%s11336_s0 + $0x50] sm:$0xf]  ;;  %v6711_v51 = vld [vmem:[%s11336_s0 + $0x74] sm:$0xf0]  ;;  %v6707_v31 = vld [vmem:[%s11336_s0 + $0x5c] sm:$0xf] }
 0x224   :  { %3177 = vmatmul.bf16.vlgmr.msrb.gmra.mxu1 %v8834_v23  ;;  %v6710_v45 = vld [vmem:[%s11336_s0 + $0x6c] sm:$0xf0]  ;;  %v8881_v39 = vor.u32 %v6707_v31, %v5220_v48  ;;  %v5244_v48 = vld [vmem:[%s11336_s0 + $0xb0] sm:$0xf0] }
 0x225   :  { %11711 = vst [vmem:[#allocation140_spill] sm:$0xff] %v8841_v1  ;;  %3346 = vmatmul.bf16.vlgmr.msrb.gmra.mxu2 %v8836_v59 }
 0x226   :  { %3515 = vmatmul.bf16.vlgmr.msrb.gmra.mxu3 %v8839_v53  ;;  %v8878_v53 = vor.u32 %v6711_v51, %v5218_v28  ;;  %11716 = vst [vmem:[#allocation145_spill] sm:$0xff] %v8881_v39 }
 0x228   :  { %v2791_v9 = vpop.f32.mrf.mxu2  ;;  %v2455_v47 = vpop.f32.mrf.mxu0  ;;  %11715 = vst [vmem:[#allocation144_spill] sm:$0xff] %v8878_v53 }
 0x229   :  { %v2792_v33 = vadd.f32 %v2791_v9, %v2623_v35  ;;  %v2960_v55 = vpop.f32.mrf.mxu3  ;;  %v2456_v26 = vadd.f32 %v2455_v47, %v7656_v61  ;;  %v2624_v3 = vpop.f32.mrf.mxu1  ;;  %v6706_v35 = vld [vmem:[%s11336_s0 + $0x54] sm:$0xf] }
 0x22b   :  { %v8848_v27 = vadd.f32 %v2960_v55, %v2792_v33  ;;  %v2625_v15 = vadd.f32 %v2624_v3, %v2456_v26  ;;  %v8874_v33 = vor.u32 %v6710_v45, %v5210_v7  ;;  %v8876_v3 = vor.u32 %v6706_v35, %v5212_v13 }
 0x22d   :  { %11712 = vst [vmem:[#allocation141_spill] sm:$0xff] %v8848_v27 }
 0x22e   :  { %11713 = vst [vmem:[#allocation142_spill] sm:$0xff] %v8874_v33 }
 0x22f   :  { %11714 = vst [vmem:[#allocation143_spill] sm:$0xff] %v8876_v3 }
 0x230   :  { %v2793_v9 = vpop.f32.mrf.mxu2  ;;  %v2458_v26 = vpop.f32.mrf.mxu0 }
 0x231   :  { %v2794_v55 = vadd.f32 %v2793_v9, %v2625_v15  ;;  %v2962_v47 = vpop.f32.mrf.mxu3  ;;  %v2459_v59 = vadd.f32 %v2458_v26, %v7656_v61  ;;  %v2627_v23 = vpop.f32.mrf.mxu1  ;;  %v5250_v9 = vld [vmem:[%s11336_s0 + $0x98] sm:$0xf]  ;;  %v5252_v26 = vld [vmem:[%s11336_s0 + $0xb8] sm:$0xf0] }
 0x233   :  { %v8883_v27 = vadd.f32 %v2962_v47, %v2794_v55  ;;  %v2628_v1 = vadd.f32 %v2627_v23, %v2459_v59  ;;  %3013 = vmatmul.bf16.gmra.mxu0 %v8874_v33  ;;  %v5242_v59 = vld [vmem:[%s11336_s0 + $0x90] sm:$0xf]  ;;  %v6719_v55 = vld [vmem:[%s11336_s0 + $0xb4] sm:$0xf0]  ;;  %v6715_v47 = vld [vmem:[%s11336_s0 + $0x9c] sm:$0xf] }
 0x234   :  { %3182 = vmatmul.bf16.gmra.mxu1 %v8876_v3  ;;  %v6718_v23 = vld [vmem:[%s11336_s0 + $0xac] sm:$0xf0]  ;;  %v8923_v33 = vor.u32 %v6715_v47, %v5252_v26 }
 0x235   :  { %11717 = vst [vmem:[#allocation146_spill] sm:$0xff] %v8883_v27  ;;  %3351 = vmatmul.bf16.gmra.mxu2 %v8878_v53 }
 0x236   :  { %3520 = vmatmul.bf16.gmra.mxu3 %v8881_v39  ;;  %v8920_v39 = vor.u32 %v6719_v55, %v5250_v9  ;;  %11722 = vst [vmem:[#allocation151_spill] sm:$0xff] %v8923_v33 }
 0x238   :  { %v2796_v15 = vpop.f32.mrf.mxu2  ;;  %v2460_v35 = vpop.f32.mrf.mxu0  ;;  %11721 = vst [vmem:[#allocation150_spill] sm:$0xff] %v8920_v39 }
 0x239   :  { %v2797_v7 = vadd.f32 %v2796_v15, %v2628_v1  ;;  %v2965_v45 = vpop.f32.mrf.mxu3  ;;  %v2461_v13 = vadd.f32 %v2460_v35, %v7656_v61  ;;  %v2629_v28 = vpop.f32.mrf.mxu1  ;;  %v6714_v1 = vld [vmem:[%s11336_s0 + $0x94] sm:$0xf] }
 0x23b   :  { %v8890_v51 = vadd.f32 %v2965_v45, %v2797_v7  ;;  %v2630_v31 = vadd.f32 %v2629_v28, %v2461_v13  ;;  %v8916_v7 = vor.u32 %v6718_v23, %v5242_v59  ;;  %v8918_v28 = vor.u32 %v6714_v1, %v5244_v48  ;;  %v6364_v59 = vld [vmem:[%s11335_s1 + $0x168] sm:$0xf0]  ;;  %v7012_v1 = vld [vmem:[%s11335_s1 + $0x1e4] sm:$0xf] }
 0x23c   :  { %v6236_v23 = vld [vmem:[%s11335_s1 + $0x68] sm:$0xf0] }
 0x23d   :  { %11718 = vst [vmem:[#allocation147_spill] sm:$0xff] %v8890_v51  ;;  %v6428_v48 = vld [vmem:[%s11335_s1 + $0x1e8] sm:$0xf0] }
 0x23e   :  { %11719 = vst [vmem:[#allocation148_spill] sm:$0xff] %v8916_v7  ;;  %v6431_v47 = vor.u32 %v7012_v1, %v6428_v48  ;;  %v6726_v1 = vld [vmem:[%s11336_s0 + $0xec] sm:$0xf0]  ;;  %v6722_v48 = vld [vmem:[%s11336_s0 + $0xd4] sm:$0xf] }
 0x23f   :  { %11720 = vst [vmem:[#allocation149_spill] sm:$0xff] %v8918_v28 }
 0x240   :  { %v2798_v15 = vpop.f32.mrf.mxu2  ;;  %v2463_v13 = vpop.f32.mrf.mxu0  ;;  %4184 = vmatpush.bf16.msra.mxu3 %v6431_v47  ;;  %v6727_v47 = vld [vmem:[%s11336_s0 + $0xf4] sm:$0xf0] }
 0x241   :  { %v2799_v45 = vadd.f32 %v2798_v15, %v2630_v31  ;;  %v2967_v35 = vpop.f32.mrf.mxu3  ;;  %v2464_v53 = vadd.f32 %v2463_v13, %v7656_v61  ;;  %v2632_v3 = vpop.f32.mrf.mxu1  ;;  %v6996_v31 = vld [vmem:[%s11335_s1 + $0x164] sm:$0xf] }
 0x243   :  { %v8925_v51 = vadd.f32 %v2967_v35, %v2799_v45  ;;  %v2633_v27 = vadd.f32 %v2632_v3, %v2464_v53  ;;  %3018 = vmatmul.bf16.gmra.mxu0 %v8916_v7  ;;  %v6964_v53 = vld [vmem:[%s11335_s1 + $0x64] sm:$0xf]  ;;  %v6367_v3 = vor.u32 %v6996_v31, %v6364_v59 }
 0x244   :  { %3187 = vmatmul.bf16.gmra.mxu1 %v8918_v28  ;;  %v6239_v55 = vor.u32 %v6964_v53, %v6236_v23  ;;  %v6980_v59 = vld [vmem:[%s11335_s1 + $0xe4] sm:$0xf]  ;;  %v6300_v53 = vld [vmem:[%s11335_s1 + $0xe8] sm:$0xf0] }
 0x245   :  { %11723 = vst [vmem:[#allocation152_spill] sm:$0xff] %v8925_v51  ;;  %3356 = vmatmul.bf16.gmra.mxu2 %v8920_v39 }
 0x246   :  { %3525 = vmatmul.bf16.gmra.mxu3 %v8923_v33  ;;  %4015 = vmatpush.bf16.msra.mxu2 %v6367_v3  ;;  %v5274_v3 = vld [vmem:[%s11336_s0 + $0xd0] sm:$0xf] }
 0x247   :  { %3677 = vmatpush.bf16.msra.mxu0 %v6239_v55  ;;  %v5282_v55 = vld [vmem:[%s11336_s0 + $0xd8] sm:$0xf] }
 0x248   :  { %v2801_v9 = vpop.f32.mrf.mxu2  ;;  %v2465_v45 = vpop.f32.mrf.mxu0  ;;  %v8986_v39 = vor.u32 %v6727_v47, %v5282_v55 }
 0x249   :  { %v2802_v26 = vadd.f32 %v2801_v9, %v2633_v27  ;;  %v2970_v15 = vpop.f32.mrf.mxu3  ;;  %v2466_v35 = vadd.f32 %v2465_v45, %v7656_v61  ;;  %v2634_v13 = vpop.f32.mrf.mxu1  ;;  %v6303_v27 = vor.u32 %v6980_v59, %v6300_v53  ;;  %v5276_v9 = vld [vmem:[%s11336_s0 + $0xf0] sm:$0xf0] }
 0x24a   :  { %v8984_v33 = vor.u32 %v6722_v48, %v5276_v9  ;;  %11727 = vst [vmem:[#allocation156_spill] sm:$0xff] %v8986_v39 }
 0x24b   :  { %v8950_v31 = vadd.f32 %v2970_v15, %v2802_v26  ;;  %v2635_v23 = vadd.f32 %v2634_v13, %v2466_v35  ;;  %3846 = vmatpush.bf16.msra.mxu1 %v6303_v27  ;;  %v6723_v26 = vld [vmem:[%s11336_s0 + $0xdc] sm:$0xf]  ;;  %v8982_v35 = vor.u32 %v6726_v1, %v5274_v3 }
 0x24c   :  { %v5284_v15 = vld [vmem:[%s11336_s0 + $0xf8] sm:$0xf0]  ;;  %11726 = vst [vmem:[#allocation155_spill] sm:$0xff] %v8984_v33 }
 0x24d   :  { %11724 = vst [vmem:[#allocation153_spill] sm:$0xff] %v8950_v31  ;;  %v8989_v7 = vor.u32 %v6723_v26, %v5284_v15  ;;  %v6734_v15 = vld [vmem:[%s11336_s0 + $0x12c] sm:$0xf0] }
 0x24e   :  { %11725 = vst [vmem:[#allocation154_spill] sm:$0xff] %v8982_v35 }
 0x24f   :  { %11728 = vst [vmem:[#allocation157_spill] sm:$0xff] %v8989_v7 }
 0x250   :  { %v2803_v45 = vpop.f32.mrf.mxu2  ;;  %v2468_v53 = vpop.f32.mrf.mxu0 }
 0x251   :  { %v2804_v13 = vadd.f32 %v2803_v45, %v2635_v23  ;;  %v2972_v59 = vpop.f32.mrf.mxu3  ;;  %v2469_v27 = vadd.f32 %v2468_v53, %v7656_v61  ;;  %v2637_v28 = vpop.f32.mrf.mxu1  ;;  %v5308_v45 = vld [vmem:[%s11336_s0 + $0x130] sm:$0xf0]  ;;  %v6731_v53 = vld [vmem:[%s11336_s0 + $0x11c] sm:$0xf] }
 0x253   :  { %v8991_v31 = vadd.f32 %v2972_v59, %v2804_v13  ;;  %v2638_v51 = vadd.f32 %v2637_v28, %v2469_v27  ;;  %3023 = vmatmul.bf16.gmra.mxu0 %v8982_v35  ;;  %v5306_v28 = vld [vmem:[%s11336_s0 + $0x110] sm:$0xf]  ;;  %v5314_v13 = vld [vmem:[%s11336_s0 + $0x118] sm:$0xf]  ;;  %v5316_v27 = vld [vmem:[%s11336_s0 + $0x138] sm:$0xf0] }
 0x254   :  { %3192 = vmatmul.bf16.gmra.mxu1 %v8984_v33  ;;  %v6735_v59 = vld [vmem:[%s11336_s0 + $0x134] sm:$0xf0]  ;;  %v9031_v35 = vor.u32 %v6731_v53, %v5316_v27  ;;  %v5340_v27 = vld [vmem:[%s11336_s0 + $0x170] sm:$0xf0] }
 0x255   :  { %11729 = vst [vmem:[#allocation158_spill] sm:$0xff] %v8991_v31  ;;  %3361 = vmatmul.bf16.gmra.mxu2 %v8986_v39 }
 0x256   :  { %3530 = vmatmul.bf16.gmra.mxu3 %v8989_v7  ;;  %v9028_v7 = vor.u32 %v6735_v59, %v5314_v13  ;;  %11734 = vst [vmem:[#allocation163_spill] sm:$0xff] %v9031_v35 }
 0x258   :  { %v2806_v23 = vpop.f32.mrf.mxu2  ;;  %v2470_v48 = vpop.f32.mrf.mxu0  ;;  %11733 = vst [vmem:[#allocation162_spill] sm:$0xff] %v9028_v7 }
 0x259   :  { %v2807_v3 = vadd.f32 %v2806_v23, %v2638_v51  ;;  %v2975_v1 = vpop.f32.mrf.mxu3  ;;  %v2471_v9 = vadd.f32 %v2470_v48, %v7656_v61  ;;  %v2639_v55 = vpop.f32.mrf.mxu1  ;;  %v6730_v51 = vld [vmem:[%s11336_s0 + $0x114] sm:$0xf] }
 0x25b   :  { %v8998_v47 = vadd.f32 %v2975_v1, %v2807_v3  ;;  %v2640_v26 = vadd.f32 %v2639_v55, %v2471_v9  ;;  %v9024_v3 = vor.u32 %v6734_v15, %v5306_v28  ;;  %v9026_v55 = vor.u32 %v6730_v51, %v5308_v45 }
 0x25d   :  { %11730 = vst [vmem:[#allocation159_spill] sm:$0xff] %v8998_v47 }
 0x25e   :  { %11731 = vst [vmem:[#allocation160_spill] sm:$0xff] %v9024_v3 }
 0x25f   :  { %11732 = vst [vmem:[#allocation161_spill] sm:$0xff] %v9026_v55 }
 0x260   :  { %v2808_v23 = vpop.f32.mrf.mxu2  ;;  %v2473_v9 = vpop.f32.mrf.mxu0 }
 0x261   :  { %v2809_v1 = vadd.f32 %v2808_v23, %v2640_v26  ;;  %v2977_v48 = vpop.f32.mrf.mxu3  ;;  %v2474_v39 = vadd.f32 %v2473_v9, %v7656_v61  ;;  %v2642_v33 = vpop.f32.mrf.mxu1  ;;  %v5346_v23 = vld [vmem:[%s11336_s0 + $0x158] sm:$0xf]  ;;  %v5348_v9 = vld [vmem:[%s11336_s0 + $0x178] sm:$0xf0] }
 0x263   :  { %v9033_v47 = vadd.f32 %v2977_v48, %v2809_v1  ;;  %v2643_v31 = vadd.f32 %v2642_v33, %v2474_v39  ;;  %3028 = vmatmul.bf16.gmra.mxu0 %v9024_v3  ;;  %v5338_v39 = vld [vmem:[%s11336_s0 + $0x150] sm:$0xf]  ;;  %v6743_v1 = vld [vmem:[%s11336_s0 + $0x174] sm:$0xf0]  ;;  %v6739_v48 = vld [vmem:[%s11336_s0 + $0x15c] sm:$0xf] }
 0x264   :  { %3197 = vmatmul.bf16.gmra.mxu1 %v9026_v55  ;;  %v6742_v33 = vld [vmem:[%s11336_s0 + $0x16c] sm:$0xf0]  ;;  %v9073_v3 = vor.u32 %v6739_v48, %v5348_v9  ;;  %v5372_v9 = vld [vmem:[%s11336_s0 + $0x1b0] sm:$0xf0] }
 0x265   :  { %11735 = vst [vmem:[#allocation164_spill] sm:$0xff] %v9033_v47  ;;  %3366 = vmatmul.bf16.gmra.mxu2 %v9028_v7 }
 0x266   :  { %3535 = vmatmul.bf16.gmra.mxu3 %v9031_v35  ;;  %v9070_v35 = vor.u32 %v6743_v1, %v5346_v23  ;;  %11740 = vst [vmem:[#allocation169_spill] sm:$0xff] %v9073_v3 }
 0x268   :  { %v2811_v26 = vpop.f32.mrf.mxu2  ;;  %v2475_v51 = vpop.f32.mrf.mxu0  ;;  %11739 = vst [vmem:[#allocation168_spill] sm:$0xff] %v9070_v35 }
 0x269   :  { %v2812_v28 = vadd.f32 %v2811_v26, %v2643_v31  ;;  %v2980_v15 = vpop.f32.mrf.mxu3  ;;  %v2476_v45 = vadd.f32 %v2475_v51, %v7656_v61  ;;  %v2644_v13 = vpop.f32.mrf.mxu1  ;;  %v6738_v31 = vld [vmem:[%s11336_s0 + $0x154] sm:$0xf] }
 0x26b   :  { %v9040_v59 = vadd.f32 %v2980_v15, %v2812_v28  ;;  %v2645_v53 = vadd.f32 %v2644_v13, %v2476_v45  ;;  %v9066_v28 = vor.u32 %v6742_v33, %v5338_v39  ;;  %v9068_v13 = vor.u32 %v6738_v31, %v5340_v27 }
 0x26d   :  { %11736 = vst [vmem:[#allocation165_spill] sm:$0xff] %v9040_v59 }
 0x26e   :  { %11737 = vst [vmem:[#allocation166_spill] sm:$0xff] %v9066_v28 }
 0x26f   :  { %11738 = vst [vmem:[#allocation167_spill] sm:$0xff] %v9068_v13 }
 0x270   :  { %v2813_v26 = vpop.f32.mrf.mxu2  ;;  %v2478_v45 = vpop.f32.mrf.mxu0 }
 0x271   :  { %v2814_v15 = vadd.f32 %v2813_v26, %v2645_v53  ;;  %v2982_v51 = vpop.f32.mrf.mxu3  ;;  %v2479_v7 = vadd.f32 %v2478_v45, %v7656_v61  ;;  %v2647_v55 = vpop.f32.mrf.mxu1  ;;  %v5378_v26 = vld [vmem:[%s11336_s0 + $0x198] sm:$0xf]  ;;  %v5380_v45 = vld [vmem:[%s11336_s0 + $0x1b8] sm:$0xf0] }
 0x273   :  { %v9075_v59 = vadd.f32 %v2982_v51, %v2814_v15  ;;  %v2648_v47 = vadd.f32 %v2647_v55, %v2479_v7  ;;  %3033 = vmatmul.bf16.gmra.mxu0 %v9066_v28  ;;  %v5370_v7 = vld [vmem:[%s11336_s0 + $0x190] sm:$0xf]  ;;  %v6751_v15 = vld [vmem:[%s11336_s0 + $0x1b4] sm:$0xf0]  ;;  %v6747_v51 = vld [vmem:[%s11336_s0 + $0x19c] sm:$0xf] }
 0x274   :  { %3202 = vmatmul.bf16.gmra.mxu1 %v9068_v13  ;;  %v6750_v55 = vld [vmem:[%s11336_s0 + $0x1ac] sm:$0xf0]  ;;  %v9115_v28 = vor.u32 %v6747_v51, %v5380_v45 }
 0x275   :  { %11741 = vst [vmem:[#allocation170_spill] sm:$0xff] %v9075_v59  ;;  %3371 = vmatmul.bf16.gmra.mxu2 %v9070_v35 }
 0x276   :  { %3540 = vmatmul.bf16.gmra.mxu3 %v9073_v3  ;;  %v9112_v3 = vor.u32 %v6751_v15, %v5378_v26  ;;  %11746 = vst [vmem:[#allocation175_spill] sm:$0xff] %v9115_v28 }
 0x278   :  { %v2816_v53 = vpop.f32.mrf.mxu2  ;;  %v2480_v31 = vpop.f32.mrf.mxu0  ;;  %11745 = vst [vmem:[#allocation174_spill] sm:$0xff] %v9112_v3 }
 0x279   :  { %v2817_v39 = vadd.f32 %v2816_v53, %v2648_v47  ;;  %v2985_v33 = vpop.f32.mrf.mxu3  ;;  %v2481_v27 = vadd.f32 %v2480_v31, %v7656_v61  ;;  %v2649_v23 = vpop.f32.mrf.mxu1  ;;  %v6746_v47 = vld [vmem:[%s11336_s0 + $0x194] sm:$0xf] }
 0x27b   :  { %v9082_v1 = vadd.f32 %v2985_v33, %v2817_v39  ;;  %v2650_v48 = vadd.f32 %v2649_v23, %v2481_v27  ;;  %v9108_v39 = vor.u32 %v6750_v55, %v5370_v7  ;;  %v9110_v23 = vor.u32 %v6746_v47, %v5372_v9  ;;  %v6356_v7 = vld [vmem:[%s11335_s1 + $0x158] sm:$0xf0]  ;;  %v7010_v47 = vld [vmem:[%s11335_s1 + $0x1d4] sm:$0xf] }
 0x27c   :  { %v6228_v55 = vld [vmem:[%s11335_s1 + $0x58] sm:$0xf0] }
 0x27d   :  { %11742 = vst [vmem:[#allocation171_spill] sm:$0xff] %v9082_v1  ;;  %v6420_v9 = vld [vmem:[%s11335_s1 + $0x1d8] sm:$0xf0] }
 0x27e   :  { %11743 = vst [vmem:[#allocation172_spill] sm:$0xff] %v9108_v39  ;;  %v6423_v51 = vor.u32 %v7010_v47, %v6420_v9  ;;  %v5404_v47 = vld [vmem:[%s11336_s0 + $0x1f0] sm:$0xf0]  ;;  %v5410_v9 = vld [vmem:[%s11336_s0 + $0x1d8] sm:$0xf] }
 0x27f   :  { %11744 = vst [vmem:[#allocation173_spill] sm:$0xff] %v9110_v23 }
 0x280   :  { %v2818_v53 = vpop.f32.mrf.mxu2  ;;  %v2483_v27 = vpop.f32.mrf.mxu0  ;;  %4185 = vmatpush.bf16.msra.mxu3 %v6423_v51  ;;  %v6755_v51 = vld [vmem:[%s11336_s0 + $0x1dc] sm:$0xf] }
 0x281   :  { %v2819_v33 = vadd.f32 %v2818_v53, %v2650_v48  ;;  %v2987_v31 = vpop.f32.mrf.mxu3  ;;  %v2484_v35 = vadd.f32 %v2483_v27, %v7656_v61  ;;  %v2652_v13 = vpop.f32.mrf.mxu1  ;;  %v6994_v48 = vld [vmem:[%s11335_s1 + $0x154] sm:$0xf] }
 0x283   :  { %v9117_v1 = vadd.f32 %v2987_v31, %v2819_v33  ;;  %v2653_v59 = vadd.f32 %v2652_v13, %v2484_v35  ;;  %3038 = vmatmul.bf16.gmra.mxu0 %v9108_v39  ;;  %v6962_v35 = vld [vmem:[%s11335_s1 + $0x54] sm:$0xf]  ;;  %v6359_v13 = vor.u32 %v6994_v48, %v6356_v7 }
 0x284   :  { %3207 = vmatmul.bf16.gmra.mxu1 %v9110_v23  ;;  %v6231_v15 = vor.u32 %v6962_v35, %v6228_v55  ;;  %v6758_v35 = vld [vmem:[%s11336_s0 + $0x1ec] sm:$0xf0]  ;;  %v6292_v55 = vld [vmem:[%s11335_s1 + $0xd8] sm:$0xf0] }
 0x285   :  { %11747 = vst [vmem:[#allocation176_spill] sm:$0xff] %v9117_v1  ;;  %3376 = vmatmul.bf16.gmra.mxu2 %v9112_v3 }
 0x286   :  { %3545 = vmatmul.bf16.gmra.mxu3 %v9115_v28  ;;  %4016 = vmatpush.bf16.msra.mxu2 %v6359_v13  ;;  %v5402_v28 = vld [vmem:[%s11336_s0 + $0x1d0] sm:$0xf]  ;;  %v6978_v13 = vld [vmem:[%s11335_s1 + $0xd4] sm:$0xf] }
 0x287   :  { %3678 = vmatpush.bf16.msra.mxu0 %v6231_v15  ;;  %v6295_v15 = vor.u32 %v6978_v13, %v6292_v55 }
 0x288   :  { %v2821_v26 = vpop.f32.mrf.mxu2  ;;  %v2485_v33 = vpop.f32.mrf.mxu0 }
 0x289   :  { %v2822_v45 = vadd.f32 %v2821_v26, %v2653_v59  ;;  %v2990_v53 = vpop.f32.mrf.mxu3  ;;  %v2486_v31 = vadd.f32 %v2485_v33, %v7656_v61  ;;  %v2654_v27 = vpop.f32.mrf.mxu1  ;;  %v6754_v59 = vld [vmem:[%s11336_s0 + $0x1d4] sm:$0xf]  ;;  %v6759_v26 = vld [vmem:[%s11336_s0 + $0x1f4] sm:$0xf0]  ;;  %v9174_v33 = vor.u32 %v6758_v35, %v5402_v28  ;;  %3847 = vmatpush.bf16.msra.mxu1 %v6295_v15  ;;  %v5434_v15 = vld [vmem:[%s11336_s0 + $0x210] sm:$0xf] }
 0x28a   :  { %v9176_v23 = vor.u32 %v6754_v59, %v5404_v47  ;;  %v9178_v39 = vor.u32 %v6759_v26, %v5410_v9 }
 0x28b   :  { %v9142_v48 = vadd.f32 %v2990_v53, %v2822_v45  ;;  %v2655_v7 = vadd.f32 %v2654_v27, %v2486_v31  ;;  %v5412_v45 = vld [vmem:[%s11336_s0 + $0x1f8] sm:$0xf0] }
 0x28c   :  { %11749 = vst [vmem:[#allocation178_spill] sm:$0xff] %v9176_v23 }
 0x28d   :  { %11748 = vst [vmem:[#allocation177_spill] sm:$0xff] %v9142_v48  ;;  %v9181_v48 = vor.u32 %v6755_v51, %v5412_v45  ;;  %v6766_v51 = vld [vmem:[%s11336_s0 + $0x22c] sm:$0xf0]  ;;  %v5442_v45 = vld [vmem:[%s11336_s0 + $0x218] sm:$0xf] }
 0x28e   :  { %11750 = vst [vmem:[#allocation179_spill] sm:$0xff] %v9178_v39 }
 0x28f   :  { %11751 = vst [vmem:[#allocation180_spill] sm:$0xff] %v9181_v48 }
 0x290   :  { %v2823_v53 = vpop.f32.mrf.mxu2  ;;  %v2488_v3 = vpop.f32.mrf.mxu0 }
 0x291   :  { %v2824_v31 = vadd.f32 %v2823_v53, %v2655_v7  ;;  %v2992_v27 = vpop.f32.mrf.mxu3  ;;  %v2489_v13 = vadd.f32 %v2488_v3, %v7656_v61  ;;  %v2657_v55 = vpop.f32.mrf.mxu1  ;;  %v6767_v53 = vld [vmem:[%s11336_s0 + $0x234] sm:$0xf0] }
 0x293   :  { %v9183_v1 = vadd.f32 %v2992_v27, %v2824_v31  ;;  %v2658_v52 = vadd.f32 %v2657_v55, %v2489_v13  ;;  %3043 = vmatmul.bf16.gmra.mxu0 %v9174_v33  ;;  %v6763_v31 = vld [vmem:[%s11336_s0 + $0x21c] sm:$0xf]  ;;  %v9216_v55 = vor.u32 %v6766_v51, %v5434_v15 }
 0x294   :  { %3212 = vmatmul.bf16.gmra.mxu1 %v9176_v23  ;;  %v5444_v27 = vld [vmem:[%s11336_s0 + $0x238] sm:$0xf0] }
 0x295   :  { %3381 = vmatmul.bf16.gmra.mxu2 %v9178_v39 }
 0x296   :  { %3550 = vmatmul.bf16.gmra.mxu3 %v9181_v48  ;;  %v9222_v48 = vor.u32 %v6763_v31, %v5444_v27  ;;  %v6770_v27 = vld [vmem:[%s11336_s0 + $0x254] sm:$0xf] }
 0x298   :  { %v2826_v28 = vpop.f32.mrf.mxu2  ;;  %v2490_v59 = vpop.f32.mrf.mxu0  ;;  %11754 = vst [vmem:[#allocation183_spill] sm:$0xff] %v9222_v48 }
 0x299   :  { %v2827_v7 = vadd.f32 %v2826_v28, %v2658_v52  ;;  %v2995_v35 = vpop.f32.mrf.mxu3  ;;  %v2491_v3 = vadd.f32 %v2490_v59, %v7656_v61  ;;  %v2659_v47 = vpop.f32.mrf.mxu1  ;;  %v6762_v52 = vld [vmem:[%s11336_s0 + $0x214] sm:$0xf] }
 0x29a   :  { %v5436_v61 = vld [vmem:[%s11336_s0 + $0x230] sm:$0xf0] }
 0x29b   :  { %v9190_v9 = vadd.f32 %v2995_v35, %v2827_v7  ;;  %v2660_v26 = vadd.f32 %v2659_v47, %v2491_v3  ;;  %v9218_v59 = vor.u32 %v6762_v52, %v5436_v61  ;;  %v9220_v3 = vor.u32 %v6767_v53, %v5442_v45 }
 0x29d   :  { %11752 = vst [vmem:[#allocation181_spill] sm:$0xff] %v9218_v59 }
 0x29e   :  { %11753 = vst [vmem:[#allocation182_spill] sm:$0xff] %v9220_v3 }
 0x2a0   :  { %v2828_v13 = vpop.f32.mrf.mxu2  ;;  %v3009_v35 = vpop.f32.mrf.mxu0 }
 0x2a1   :  { %v2829_v28 = vadd.f32 %v2828_v13, %v2660_v26  ;;  %v2997_v7 = vpop.f32.mrf.mxu3  ;;  %v3178_v47 = vpop.f32.mrf.mxu1  ;;  %v3010_v23 = vadd.f32 %v3009_v35, %v7696_v40  ;;  %v5466_v40 = vld [vmem:[%s11336_s0 + $0x250] sm:$0xf]  ;;  %v5474_v13 = vld [vmem:[%s11336_s0 + $0x258] sm:$0xf]  ;;  %v6771_v35 = vld [vmem:[%s11336_s0 + $0x25c] sm:$0xf] }
 0x2a3   :  { %v9224_v39 = vadd.f32 %v2997_v7, %v2829_v28  ;;  %3048 = vmatmul.bf16.gmra.mxu0 %v9216_v55  ;;  %v3179_v26 = vadd.f32 %v3178_v47, %v3010_v23  ;;  %v6774_v23 = vld [vmem:[%s11336_s0 + $0x26c] sm:$0xf0]  ;;  %v6775_v28 = vld [vmem:[%s11336_s0 + $0x274] sm:$0xf0]  ;;  %v5476_v47 = vld [vmem:[%s11336_s0 + $0x278] sm:$0xf0] }
 0x2a4   :  { %3217 = vmatmul.bf16.gmra.mxu1 %v9218_v59 }
 0x2a5   :  { %3386 = vmatmul.bf16.gmra.mxu2 %v9220_v3 }
 0x2a6   :  { %3555 = vmatmul.bf16.gmra.mxu3 %v9222_v48  ;;  %v9263_v48 = vor.u32 %v6775_v28, %v5474_v13 }
 0x2a8   :  { %v3347_v15 = vpop.f32.mrf.mxu2  ;;  %v3011_v61 = vpop.f32.mrf.mxu0  ;;  %11755 = vst [vmem:[#allocation184_spill] sm:$0xff] %v9263_v48 }
 0x2a9   :  { %v3348_v51 = vadd.f32 %v3347_v15, %v3179_v26  ;;  %v3516_v52 = vpop.f32.mrf.mxu3  ;;  %v3180_v45 = vpop.f32.mrf.mxu1  ;;  %v3012_v31 = vadd.f32 %v3011_v61, %v7731_v29  ;;  %v5468_v29 = vld [vmem:[%s11336_s0 + $0x270] sm:$0xf0]  ;;  %v9259_v15 = vor.u32 %v6774_v23, %v5466_v40 }
 0x2ab   :  { %v3517_v53 = vadd.f32 %v3516_v52, %v3348_v51  ;;  %v3181_v7 = vadd.f32 %v3180_v45, %v3012_v31  ;;  %v9265_v45 = vor.u32 %v6771_v35, %v5476_v47  ;;  %v5498_v35 = vld [vmem:[%s11336_s0 + $0x290] sm:$0xf]  ;;  %v5506_v47 = vld [vmem:[%s11336_s0 + $0x298] sm:$0xf] }
 0x2ad   :  { %5028 = vst [vmem:[%s11338_s3] sm:$0xff] %v3517_v53  ;;  %v9261_v53 = vor.u32 %v6770_v27, %v5468_v29 }
 0x2ae   :  { %11756 = vst [vmem:[#allocation185_spill] sm:$0xff] %v9265_v45 }
 0x2b0   :  { %v3349_v26 = vpop.f32.mrf.mxu2  ;;  %v3014_v61 = vpop.f32.mrf.mxu0 }
 0x2b1   :  { %v3350_v51 = vadd.f32 %v3349_v26, %v3181_v7  ;;  %v3518_v52 = vpop.f32.mrf.mxu3  ;;  %v3183_v3 = vpop.f32.mrf.mxu1  ;;  %v3015_v59 = vadd.f32 %v3014_v61, %v7738_v42  ;;  %v6783_v26 = vld [vmem:[%s11336_s0 + $0x2b4] sm:$0xf0]  ;;  %v5508_v61 = vld [vmem:[%s11336_s0 + $0x2b8] sm:$0xf0] }
 0x2b3   :  { %v3519_v31 = vadd.f32 %v3518_v52, %v3350_v51  ;;  %3053 = vmatmul.bf16.gmra.mxu0 %v9259_v15  ;;  %v3184_v40 = vadd.f32 %v3183_v3, %v3015_v59  ;;  %v6782_v59 = vld [vmem:[%s11336_s0 + $0x2ac] sm:$0xf0]  ;;  %v6778_v3 = vld [vmem:[%s11336_s0 + $0x294] sm:$0xf]  ;;  %v6779_v52 = vld [vmem:[%s11336_s0 + $0x29c] sm:$0xf] }
 0x2b4   :  { %3222 = vmatmul.bf16.gmra.mxu1 %v9261_v53 }
 0x2b5   :  { %5030 = vst [vmem:[%s11338_s3 + $0x10] sm:$0xff] %v3519_v31  ;;  %3391 = vmatmul.bf16.gmra.mxu2 %v9263_v48 }
 0x2b6   :  { %3560 = vmatmul.bf16.gmra.mxu3 %v9265_v45 }
 0x2b8   :  { %v3352_v23 = vpop.f32.mrf.mxu2  ;;  %v3016_v13 = vpop.f32.mrf.mxu0 }
 0x2b9   :  { %v3353_v27 = vadd.f32 %v3352_v23, %v3184_v40  ;;  %v3521_v29 = vpop.f32.mrf.mxu3  ;;  %v3185_v28 = vpop.f32.mrf.mxu1  ;;  %v3017_v42 = vadd.f32 %v3016_v13, %v7773_v41  ;;  %v5500_v41 = vld [vmem:[%s11336_s0 + $0x2b0] sm:$0xf0]  ;;  %v9303_v40 = vor.u32 %v6782_v59, %v5498_v35  ;;  %v6992_v35 = vld [vmem:[%s11335_s1 + $0x144] sm:$0xf] }
 0x2ba   :  { %v9305_v13 = vor.u32 %v6778_v3, %v5500_v41  ;;  %v6960_v59 = vld [vmem:[%s11335_s1 + $0x44] sm:$0xf] }
 0x2bb   :  { %v3522_v7 = vadd.f32 %v3521_v29, %v3353_v27  ;;  %v3186_v51 = vadd.f32 %v3185_v28, %v3017_v42  ;;  %v9309_v28 = vor.u32 %v6779_v52, %v5508_v61 }
 0x2bc   :  { %11757 = vst [vmem:[#allocation186_spill] sm:$0xff] %v9305_v13 }
 0x2bd   :  { %5032 = vst [vmem:[%s11338_s3 + $0x20] sm:$0xff] %v3522_v7  ;;  %v9307_v7 = vor.u32 %v6783_v26, %v5506_v47  ;;  %v6220_v47 = vld [vmem:[%s11335_s1 + $0x48] sm:$0xf0]  ;;  %v7008_v26 = vld [vmem:[%s11335_s1 + $0x1c4] sm:$0xf] }
 0x2be   :  { %11759 = vst [vmem:[#allocation188_spill] sm:$0xff] %v9309_v28  ;;  %v6223_v61 = vor.u32 %v6960_v59, %v6220_v47  ;;  %v6786_v59 = vld [vmem:[%s11336_s0 + $0x2d4] sm:$0xf]  ;;  %v5538_v47 = vld [vmem:[%s11336_s0 + $0x2d8] sm:$0xf] }
 0x2bf   :  { %11758 = vst [vmem:[#allocation187_spill] sm:$0xff] %v9307_v7 }
 0x2c0   :  { %v3354_v31 = vpop.f32.mrf.mxu2  ;;  %v3019_v29 = vpop.f32.mrf.mxu0  ;;  %3679 = vmatpush.bf16.msra.mxu0 %v6223_v61  ;;  %v6787_v61 = vld [vmem:[%s11336_s0 + $0x2dc] sm:$0xf] }
 0x2c1   :  { %v3355_v23 = vadd.f32 %v3354_v31, %v3186_v51  ;;  %v3523_v27 = vpop.f32.mrf.mxu3  ;;  %v3188_v45 = vpop.f32.mrf.mxu1  ;;  %v3020_v48 = vadd.f32 %v3019_v29, %v7798_v43  ;;  %v6348_v43 = vld [vmem:[%s11335_s1 + $0x148] sm:$0xf0] }
 0x2c2   :  { %v6351_v41 = vor.u32 %v6992_v35, %v6348_v43  ;;  %v6412_v51 = vld [vmem:[%s11335_s1 + $0x1c8] sm:$0xf0]  ;;  %v5530_v35 = vld [vmem:[%s11336_s0 + $0x2d0] sm:$0xf] }
 0x2c3   :  { %v3524_v42 = vadd.f32 %v3523_v27, %v3355_v23  ;;  %3058 = vmatmul.bf16.gmra.mxu0 %v9303_v40  ;;  %v3189_v3 = vadd.f32 %v3188_v45, %v3020_v48  ;;  %v6415_v31 = vor.u32 %v7008_v26, %v6412_v51  ;;  %v6790_v43 = vld [vmem:[%s11336_s0 + $0x2ec] sm:$0xf0]  ;;  %v6791_v26 = vld [vmem:[%s11336_s0 + $0x2f4] sm:$0xf0] }
 0x2c4   :  { %3227 = vmatmul.bf16.gmra.mxu1 %v9305_v13  ;;  %4017 = vmatpush.bf16.msra.mxu2 %v6351_v41  ;;  %v5532_v41 = vld [vmem:[%s11336_s0 + $0x2f0] sm:$0xf0]  ;;  %v9375_v13 = vor.u32 %v6791_v26, %v5538_v47 }
 0x2c5   :  { %5034 = vst [vmem:[%s11338_s3 + $0x30] sm:$0xff] %v3524_v42  ;;  %3396 = vmatmul.bf16.gmra.mxu2 %v9307_v7  ;;  %4186 = vmatpush.bf16.msra.mxu3 %v6415_v31  ;;  %v5540_v31 = vld [vmem:[%s11336_s0 + $0x2f8] sm:$0xf0]  ;;  %v9373_v7 = vor.u32 %v6786_v59, %v5532_v41 }
 0x2c6   :  { %3565 = vmatmul.bf16.gmra.mxu3 %v9309_v28 }
 0x2c8   :  { %v3357_v52 = vpop.f32.mrf.mxu2  ;;  %v3021_v29 = vpop.f32.mrf.mxu0 }
 0x2c9   :  { %v3358_v23 = vadd.f32 %v3357_v52, %v3189_v3  ;;  %v3526_v27 = vpop.f32.mrf.mxu3  ;;  %v3190_v48 = vpop.f32.mrf.mxu1  ;;  %v3022_v42 = vadd.f32 %v3021_v29, %v7839_v17  ;;  %v6976_v17 = vld [vmem:[%s11335_s1 + $0xc4] sm:$0xf]  ;;  %v6284_v3 = vld [vmem:[%s11335_s1 + $0xc8] sm:$0xf0] }
 0x2ca   :  { %v6287_v51 = vor.u32 %v6976_v17, %v6284_v3 }
 0x2cb   :  { %v3527_v45 = vadd.f32 %v3526_v27, %v3358_v23  ;;  %v3191_v52 = vadd.f32 %v3190_v48, %v3022_v42  ;;  %v9371_v27 = vor.u32 %v6790_v43, %v5530_v35  ;;  %v9377_v42 = vor.u32 %v6787_v61, %v5540_v31  ;;  %v6794_v61 = vld [vmem:[%s11336_s0 + $0x314] sm:$0xf]  ;;  %v5570_v31 = vld [vmem:[%s11336_s0 + $0x318] sm:$0xf] }
 0x2cc   :  { %3848 = vmatpush.bf16.msra.mxu1 %v6287_v51 }
 0x2cd   :  { %5036 = vst [vmem:[%s11338_s3 + $0x40] sm:$0xff] %v3527_v45 }
 0x2ce   :  { %11760 = vst [vmem:[#allocation189_spill] sm:$0xff] %v9377_v42 }
 0x2d0   :  { %v3359_v23 = vpop.f32.mrf.mxu2  ;;  %v3024_v28 = vpop.f32.mrf.mxu0 }
 0x2d1   :  { %v3360_v29 = vadd.f32 %v3359_v23, %v3191_v52  ;;  %v3528_v45 = vpop.f32.mrf.mxu3  ;;  %v3193_v48 = vpop.f32.mrf.mxu1  ;;  %v3025_v3 = vadd.f32 %v3024_v28, %v7846_v10  ;;  %v5562_v28 = vld [vmem:[%s11336_s0 + $0x310] sm:$0xf]  ;;  %v6799_v23 = vld [vmem:[%s11336_s0 + $0x334] sm:$0xf0] }
 0x2d2   :  { %v6798_v52 = vld [vmem:[%s11336_s0 + $0x32c] sm:$0xf0] }
 0x2d3   :  { %v3529_v17 = vadd.f32 %v3528_v45, %v3360_v29  ;;  %3063 = vmatmul.bf16.gmra.mxu0 %v9371_v27  ;;  %v3194_v35 = vadd.f32 %v3193_v48, %v3025_v3  ;;  %v6795_v45 = vld [vmem:[%s11336_s0 + $0x31c] sm:$0xf]  ;;  %v9415_v3 = vor.u32 %v6798_v52, %v5562_v28 }
 0x2d4   :  { %3232 = vmatmul.bf16.gmra.mxu1 %v9373_v7  ;;  %v5572_v48 = vld [vmem:[%s11336_s0 + $0x338] sm:$0xf0] }
 0x2d5   :  { %5038 = vst [vmem:[%s11338_s3 + $0x50] sm:$0xff] %v3529_v17  ;;  %3401 = vmatmul.bf16.gmra.mxu2 %v9375_v13 }
 0x2d6   :  { %3570 = vmatmul.bf16.gmra.mxu3 %v9377_v42 }
 0x2d8   :  { %v3362_v43 = vpop.f32.mrf.mxu2  ;;  %v3026_v47 = vpop.f32.mrf.mxu0 }
 0x2d9   :  { %v3363_v59 = vadd.f32 %v3362_v43, %v3194_v35  ;;  %v3531_v41 = vpop.f32.mrf.mxu3  ;;  %v3195_v26 = vpop.f32.mrf.mxu1  ;;  %v3027_v10 = vadd.f32 %v3026_v47, %v7881_v8  ;;  %v5564_v8 = vld [vmem:[%s11336_s0 + $0x330] sm:$0xf0]  ;;  %v9419_v47 = vor.u32 %v6799_v23, %v5570_v31 }
 0x2db   :  { %v3532_v51 = vadd.f32 %v3531_v41, %v3363_v59  ;;  %v3196_v29 = vadd.f32 %v3195_v26, %v3027_v10  ;;  %v9417_v41 = vor.u32 %v6794_v61, %v5564_v8  ;;  %11761 = vst [vmem:[#allocation190_spill] sm:$0xff] %v9419_v47  ;;  %v9421_v26 = vor.u32 %v6795_v45, %v5572_v48  ;;  %v5594_v45 = vld [vmem:[%s11336_s0 + $0x350] sm:$0xf]  ;;  %v6802_v48 = vld [vmem:[%s11336_s0 + $0x354] sm:$0xf] }
 0x2dd   :  { %5040 = vst [vmem:[%s11338_s3 + $0x60] sm:$0xff] %v3532_v51 }
 0x2de   :  { %11762 = vst [vmem:[#allocation191_spill] sm:$0xff] %v9421_v26 }
 0x2e0   :  { %v3364_v17 = vpop.f32.mrf.mxu2  ;;  %v3029_v59 = vpop.f32.mrf.mxu0 }
 0x2e1   :  { %v3365_v35 = vadd.f32 %v3364_v17, %v3196_v29  ;;  %v3533_v43 = vpop.f32.mrf.mxu3  ;;  %v3198_v51 = vpop.f32.mrf.mxu1  ;;  %v3030_v42 = vadd.f32 %v3029_v59, %v7888_v44  ;;  %v5602_v17 = vld [vmem:[%s11336_s0 + $0x358] sm:$0xf]  ;;  %v6803_v59 = vld [vmem:[%s11336_s0 + $0x35c] sm:$0xf] }
 0x2e3   :  { %v3534_v10 = vadd.f32 %v3533_v43, %v3365_v35  ;;  %3068 = vmatmul.bf16.gmra.mxu0 %v9415_v3  ;;  %v3199_v28 = vadd.f32 %v3198_v51, %v3030_v42  ;;  %v6806_v42 = vld [vmem:[%s11336_s0 + $0x36c] sm:$0xf0]  ;;  %v6807_v35 = vld [vmem:[%s11336_s0 + $0x374] sm:$0xf0]  ;;  %v5604_v51 = vld [vmem:[%s11336_s0 + $0x378] sm:$0xf0] }
 0x2e4   :  { %3237 = vmatmul.bf16.gmra.mxu1 %v9417_v41 }
 0x2e5   :  { %5042 = vst [vmem:[%s11338_s3 + $0x70] sm:$0xff] %v3534_v10  ;;  %3406 = vmatmul.bf16.gmra.mxu2 %v9419_v47 }
 0x2e6   :  { %3575 = vmatmul.bf16.gmra.mxu3 %v9421_v26 }
 0x2e8   :  { %v3367_v52 = vpop.f32.mrf.mxu2  ;;  %v3031_v31 = vpop.f32.mrf.mxu0 }
 0x2e9   :  { %v3368_v61 = vadd.f32 %v3367_v52, %v3199_v28  ;;  %v3536_v8 = vpop.f32.mrf.mxu3  ;;  %v3200_v23 = vpop.f32.mrf.mxu1  ;;  %v3032_v44 = vadd.f32 %v3031_v31, %v7923_v25  ;;  %v5596_v25 = vld [vmem:[%s11336_s0 + $0x370] sm:$0xf0]  ;;  %v9459_v28 = vor.u32 %v6806_v42, %v5594_v45 }
 0x2ea   :  { %v9461_v31 = vor.u32 %v6802_v48, %v5596_v25 }
 0x2eb   :  { %v3537_v29 = vadd.f32 %v3536_v8, %v3368_v61  ;;  %v3201_v43 = vadd.f32 %v3200_v23, %v3032_v44  ;;  %v9465_v23 = vor.u32 %v6803_v59, %v5604_v51  ;;  %v5626_v59 = vld [vmem:[%s11336_s0 + $0x390] sm:$0xf]  ;;  %v5634_v51 = vld [vmem:[%s11336_s0 + $0x398] sm:$0xf] }
 0x2ed   :  { %5044 = vst [vmem:[%s11338_s3 + $0x80] sm:$0xff] %v3537_v29  ;;  %v9463_v29 = vor.u32 %v6807_v35, %v5602_v17 }
 0x2ee   :  { %11764 = vst [vmem:[#allocation193_spill] sm:$0xff] %v9465_v23 }
 0x2ef   :  { %11763 = vst [vmem:[#allocation192_spill] sm:$0xff] %v9463_v29 }
 0x2f0   :  { %v3369_v10 = vpop.f32.mrf.mxu2  ;;  %v3034_v8 = vpop.f32.mrf.mxu0 }
 0x2f1   :  { %v3370_v52 = vadd.f32 %v3369_v10, %v3201_v43  ;;  %v3538_v61 = vpop.f32.mrf.mxu3  ;;  %v3203_v26 = vpop.f32.mrf.mxu1  ;;  %v3035_v47 = vadd.f32 %v3034_v8, %v7930_v60  ;;  %v6815_v10 = vld [vmem:[%s11336_s0 + $0x3b4] sm:$0xf0]  ;;  %v5636_v8 = vld [vmem:[%s11336_s0 + $0x3b8] sm:$0xf0] }
 0x2f3   :  { %v3539_v44 = vadd.f32 %v3538_v61, %v3370_v52  ;;  %3073 = vmatmul.bf16.gmra.mxu0 %v9459_v28  ;;  %v3204_v45 = vadd.f32 %v3203_v26, %v3035_v47  ;;  %v6814_v47 = vld [vmem:[%s11336_s0 + $0x3ac] sm:$0xf0]  ;;  %v6810_v26 = vld [vmem:[%s11336_s0 + $0x394] sm:$0xf]  ;;  %v6811_v61 = vld [vmem:[%s11336_s0 + $0x39c] sm:$0xf] }
 0x2f4   :  { %3242 = vmatmul.bf16.gmra.mxu1 %v9461_v31 }
 0x2f5   :  { %5046 = vst [vmem:[%s11338_s3 + $0x90] sm:$0xff] %v3539_v44  ;;  %3411 = vmatmul.bf16.gmra.mxu2 %v9463_v29 }
 0x2f6   :  { %3580 = vmatmul.bf16.gmra.mxu3 %v9465_v23 }
 0x2f8   :  { %v3372_v42 = vpop.f32.mrf.mxu2  ;;  %v3036_v17 = vpop.f32.mrf.mxu0 }
 0x2f9   :  { %v3373_v48 = vadd.f32 %v3372_v42, %v3204_v45  ;;  %v3541_v25 = vpop.f32.mrf.mxu3  ;;  %v3205_v35 = vpop.f32.mrf.mxu1  ;;  %v3037_v60 = vadd.f32 %v3036_v17, %v7965_v18  ;;  %v5628_v18 = vld [vmem:[%s11336_s0 + $0x3b0] sm:$0xf0]  ;;  %v9503_v45 = vor.u32 %v6814_v47, %v5626_v59 }
 0x2fa   :  { %v9505_v17 = vor.u32 %v6810_v26, %v5628_v18  ;;  %v6990_v59 = vld [vmem:[%s11335_s1 + $0x134] sm:$0xf] }
 0x2fb   :  { %v3542_v43 = vadd.f32 %v3541_v25, %v3373_v48  ;;  %v3206_v52 = vadd.f32 %v3205_v35, %v3037_v60  ;;  %v9509_v35 = vor.u32 %v6811_v61, %v5636_v8  ;;  %v6958_v47 = vld [vmem:[%s11335_s1 + $0x34] sm:$0xf] }
 0x2fc   :  { %11765 = vst [vmem:[#allocation194_spill] sm:$0xff] %v9505_v17 }
 0x2fd   :  { %5048 = vst [vmem:[%s11338_s3 + $0xa0] sm:$0xff] %v3542_v43  ;;  %v9507_v43 = vor.u32 %v6815_v10, %v5634_v51  ;;  %v6212_v51 = vld [vmem:[%s11335_s1 + $0x38] sm:$0xf0]  ;;  %v7006_v10 = vld [vmem:[%s11335_s1 + $0x1b4] sm:$0xf] }
 0x2fe   :  { %11767 = vst [vmem:[#allocation196_spill] sm:$0xff] %v9509_v35  ;;  %v6215_v8 = vor.u32 %v6958_v47, %v6212_v51  ;;  %v6818_v47 = vld [vmem:[%s11336_s0 + $0x3d4] sm:$0xf]  ;;  %v5666_v51 = vld [vmem:[%s11336_s0 + $0x3d8] sm:$0xf] }
 0x2ff   :  { %11766 = vst [vmem:[#allocation195_spill] sm:$0xff] %v9507_v43 }
 0x300   :  { %v3374_v44 = vpop.f32.mrf.mxu2  ;;  %v3039_v25 = vpop.f32.mrf.mxu0  ;;  %3680 = vmatpush.bf16.msra.mxu0 %v6215_v8  ;;  %v6819_v8 = vld [vmem:[%s11336_s0 + $0x3dc] sm:$0xf] }
 0x301   :  { %v3375_v42 = vadd.f32 %v3374_v44, %v3206_v52  ;;  %v3543_v48 = vpop.f32.mrf.mxu3  ;;  %v3208_v23 = vpop.f32.mrf.mxu1  ;;  %v3040_v29 = vadd.f32 %v3039_v25, %v7990_v62  ;;  %v6340_v62 = vld [vmem:[%s11335_s1 + $0x138] sm:$0xf0] }
 0x302   :  { %v6343_v18 = vor.u32 %v6990_v59, %v6340_v62  ;;  %v6404_v52 = vld [vmem:[%s11335_s1 + $0x1b8] sm:$0xf0]  ;;  %v5658_v59 = vld [vmem:[%s11336_s0 + $0x3d0] sm:$0xf] }
 0x303   :  { %v3544_v60 = vadd.f32 %v3543_v48, %v3375_v42  ;;  %3078 = vmatmul.bf16.gmra.mxu0 %v9503_v45  ;;  %v3209_v26 = vadd.f32 %v3208_v23, %v3040_v29  ;;  %v6407_v44 = vor.u32 %v7006_v10, %v6404_v52  ;;  %v6822_v62 = vld [vmem:[%s11336_s0 + $0x3ec] sm:$0xf0]  ;;  %v6823_v10 = vld [vmem:[%s11336_s0 + $0x3f4] sm:$0xf0] }
 0x304   :  { %3247 = vmatmul.bf16.gmra.mxu1 %v9505_v17  ;;  %4018 = vmatpush.bf16.msra.mxu2 %v6343_v18  ;;  %v5660_v18 = vld [vmem:[%s11336_s0 + $0x3f0] sm:$0xf0]  ;;  %v9575_v17 = vor.u32 %v6823_v10, %v5666_v51 }
 0x305   :  { %5050 = vst [vmem:[%s11338_s3 + $0xb0] sm:$0xff] %v3544_v60  ;;  %3416 = vmatmul.bf16.gmra.mxu2 %v9507_v43  ;;  %4187 = vmatpush.bf16.msra.mxu3 %v6407_v44  ;;  %v5668_v44 = vld [vmem:[%s11336_s0 + $0x3f8] sm:$0xf0]  ;;  %v9573_v43 = vor.u32 %v6818_v47, %v5660_v18 }
 0x306   :  { %3585 = vmatmul.bf16.gmra.mxu3 %v9509_v35 }
 0x308   :  { %v3377_v61 = vpop.f32.mrf.mxu2  ;;  %v3041_v25 = vpop.f32.mrf.mxu0 }
 0x309   :  { %v3378_v42 = vadd.f32 %v3377_v61, %v3209_v26  ;;  %v3546_v48 = vpop.f32.mrf.mxu3  ;;  %v3210_v29 = vpop.f32.mrf.mxu1  ;;  %v3042_v60 = vadd.f32 %v3041_v25, %v8031_v58  ;;  %v6974_v58 = vld [vmem:[%s11335_s1 + $0xb4] sm:$0xf]  ;;  %v6276_v26 = vld [vmem:[%s11335_s1 + $0xb8] sm:$0xf0] }
 0x30a   :  { %v6279_v52 = vor.u32 %v6974_v58, %v6276_v26 }
 0x30b   :  { %v3547_v23 = vadd.f32 %v3546_v48, %v3378_v42  ;;  %v3211_v61 = vadd.f32 %v3210_v29, %v3042_v60  ;;  %v9571_v48 = vor.u32 %v6822_v62, %v5658_v59  ;;  %v9577_v60 = vor.u32 %v6819_v8, %v5668_v44  ;;  %v6826_v8 = vld [vmem:[%s11336_s0 + $0x414] sm:$0xf]  ;;  %v5698_v44 = vld [vmem:[%s11336_s0 + $0x418] sm:$0xf] }
 0x30c   :  { %3849 = vmatpush.bf16.msra.mxu1 %v6279_v52 }
 0x30d   :  { %5052 = vst [vmem:[%s11338_s3 + $0xc0] sm:$0xff] %v3547_v23 }
 0x30e   :  { %11768 = vst [vmem:[#allocation197_spill] sm:$0xff] %v9577_v60 }
 0x310   :  { %v3379_v42 = vpop.f32.mrf.mxu2  ;;  %v3044_v35 = vpop.f32.mrf.mxu0 }
 0x311   :  { %v3380_v25 = vadd.f32 %v3379_v42, %v3211_v61  ;;  %v3548_v23 = vpop.f32.mrf.mxu3  ;;  %v3213_v29 = vpop.f32.mrf.mxu1  ;;  %v3045_v26 = vadd.f32 %v3044_v35, %v8038_v16  ;;  %v5690_v35 = vld [vmem:[%s11336_s0 + $0x410] sm:$0xf]  ;;  %v6831_v42 = vld [vmem:[%s11336_s0 + $0x434] sm:$0xf0] }
 0x312   :  { %v6830_v61 = vld [vmem:[%s11336_s0 + $0x42c] sm:$0xf0] }
 0x313   :  { %v3549_v58 = vadd.f32 %v3548_v23, %v3380_v25  ;;  %3083 = vmatmul.bf16.gmra.mxu0 %v9571_v48  ;;  %v3214_v59 = vadd.f32 %v3213_v29, %v3045_v26  ;;  %v6827_v23 = vld [vmem:[%s11336_s0 + $0x41c] sm:$0xf]  ;;  %v9615_v26 = vor.u32 %v6830_v61, %v5690_v35 }
 0x314   :  { %3252 = vmatmul.bf16.gmra.mxu1 %v9573_v43  ;;  %v5700_v29 = vld [vmem:[%s11336_s0 + $0x438] sm:$0xf0] }
 0x315   :  { %5054 = vst [vmem:[%s11338_s3 + $0xd0] sm:$0xff] %v3549_v58  ;;  %3421 = vmatmul.bf16.gmra.mxu2 %v9575_v17 }
 0x316   :  { %3590 = vmatmul.bf16.gmra.mxu3 %v9577_v60 }
 0x318   :  { %v3382_v62 = vpop.f32.mrf.mxu2  ;;  %v3046_v51 = vpop.f32.mrf.mxu0 }
 0x319   :  { %v3383_v47 = vadd.f32 %v3382_v62, %v3214_v59  ;;  %v3551_v18 = vpop.f32.mrf.mxu3  ;;  %v3215_v10 = vpop.f32.mrf.mxu1  ;;  %v3047_v16 = vadd.f32 %v3046_v51, %v8073_v56  ;;  %v5692_v56 = vld [vmem:[%s11336_s0 + $0x430] sm:$0xf0]  ;;  %v9619_v51 = vor.u32 %v6831_v42, %v5698_v44 }
 0x31b   :  { %v3552_v52 = vadd.f32 %v3551_v18, %v3383_v47  ;;  %v3216_v25 = vadd.f32 %v3215_v10, %v3047_v16  ;;  %v9617_v18 = vor.u32 %v6826_v8, %v5692_v56  ;;  %11769 = vst [vmem:[#allocation198_spill] sm:$0xff] %v9619_v51  ;;  %v9621_v10 = vor.u32 %v6827_v23, %v5700_v29  ;;  %v5722_v23 = vld [vmem:[%s11336_s0 + $0x450] sm:$0xf]  ;;  %v6834_v29 = vld [vmem:[%s11336_s0 + $0x454] sm:$0xf] }
 0x31d   :  { %5056 = vst [vmem:[%s11338_s3 + $0xe0] sm:$0xff] %v3552_v52 }
 0x31e   :  { %11770 = vst [vmem:[#allocation199_spill] sm:$0xff] %v9621_v10 }
 0x320   :  { %v3384_v58 = vpop.f32.mrf.mxu2  ;;  %v3049_v47 = vpop.f32.mrf.mxu0 }
 0x321   :  { %v3385_v59 = vadd.f32 %v3384_v58, %v3216_v25  ;;  %v3553_v62 = vpop.f32.mrf.mxu3  ;;  %v3218_v52 = vpop.f32.mrf.mxu1  ;;  %v3050_v60 = vadd.f32 %v3049_v47, %v8080_v11  ;;  %v5730_v58 = vld [vmem:[%s11336_s0 + $0x458] sm:$0xf]  ;;  %v6835_v47 = vld [vmem:[%s11336_s0 + $0x45c] sm:$0xf] }
 0x323   :  { %v3554_v16 = vadd.f32 %v3553_v62, %v3385_v59  ;;  %3088 = vmatmul.bf16.gmra.mxu0 %v9615_v26  ;;  %v3219_v35 = vadd.f32 %v3218_v52, %v3050_v60  ;;  %v6838_v60 = vld [vmem:[%s11336_s0 + $0x46c] sm:$0xf0]  ;;  %v6839_v59 = vld [vmem:[%s11336_s0 + $0x474] sm:$0xf0]  ;;  %v5732_v52 = vld [vmem:[%s11336_s0 + $0x478] sm:$0xf0] }
 0x324   :  { %3257 = vmatmul.bf16.gmra.mxu1 %v9617_v18 }
 0x325   :  { %5058 = vst [vmem:[%s11338_s3 + $0xf0] sm:$0xff] %v3554_v16  ;;  %3426 = vmatmul.bf16.gmra.mxu2 %v9619_v51 }
 0x326   :  { %3595 = vmatmul.bf16.gmra.mxu3 %v9621_v10 }
 0x328   :  { %v3387_v61 = vpop.f32.mrf.mxu2  ;;  %v3051_v44 = vpop.f32.mrf.mxu0 }
 0x329   :  { %v3388_v8 = vadd.f32 %v3387_v61, %v3219_v35  ;;  %v3556_v56 = vpop.f32.mrf.mxu3  ;;  %v3220_v42 = vpop.f32.mrf.mxu1  ;;  %v3052_v11 = vadd.f32 %v3051_v44, %v8115_v22  ;;  %v5724_v22 = vld [vmem:[%s11336_s0 + $0x470] sm:$0xf0]  ;;  %v9659_v35 = vor.u32 %v6838_v60, %v5722_v23 }
 0x32a   :  { %v9661_v44 = vor.u32 %v6834_v29, %v5724_v22 }
 0x32b   :  { %v3557_v25 = vadd.f32 %v3556_v56, %v3388_v8  ;;  %v3221_v62 = vadd.f32 %v3220_v42, %v3052_v11  ;;  %v9665_v42 = vor.u32 %v6835_v47, %v5732_v52  ;;  %v5754_v47 = vld [vmem:[%s11336_s0 + $0x490] sm:$0xf]  ;;  %v5762_v52 = vld [vmem:[%s11336_s0 + $0x498] sm:$0xf] }
 0x32d   :  { %5060 = vst [vmem:[%s11338_s3 + $0x100] sm:$0xff] %v3557_v25  ;;  %v9663_v25 = vor.u32 %v6839_v59, %v5730_v58 }
 0x32e   :  { %11772 = vst [vmem:[#allocation201_spill] sm:$0xff] %v9665_v42 }
 0x32f   :  { %11771 = vst [vmem:[#allocation200_spill] sm:$0xff] %v9663_v25 }
 0x330   :  { %v3389_v16 = vpop.f32.mrf.mxu2  ;;  %v3054_v56 = vpop.f32.mrf.mxu0 }
 0x331   :  { %v3390_v61 = vadd.f32 %v3389_v16, %v3221_v62  ;;  %v3558_v8 = vpop.f32.mrf.mxu3  ;;  %v3223_v10 = vpop.f32.mrf.mxu1  ;;  %v3055_v51 = vadd.f32 %v3054_v56, %v8122_v24  ;;  %v6847_v16 = vld [vmem:[%s11336_s0 + $0x4b4] sm:$0xf0]  ;;  %v5764_v56 = vld [vmem:[%s11336_s0 + $0x4b8] sm:$0xf0] }
 0x333   :  { %v3559_v11 = vadd.f32 %v3558_v8, %v3390_v61  ;;  %3093 = vmatmul.bf16.gmra.mxu0 %v9659_v35  ;;  %v3224_v23 = vadd.f32 %v3223_v10, %v3055_v51  ;;  %v6846_v51 = vld [vmem:[%s11336_s0 + $0x4ac] sm:$0xf0]  ;;  %v6842_v10 = vld [vmem:[%s11336_s0 + $0x494] sm:$0xf]  ;;  %v6843_v8 = vld [vmem:[%s11336_s0 + $0x49c] sm:$0xf] }
 0x334   :  { %3262 = vmatmul.bf16.gmra.mxu1 %v9661_v44 }
 0x335   :  { %5062 = vst [vmem:[%s11338_s3 + $0x110] sm:$0xff] %v3559_v11  ;;  %3431 = vmatmul.bf16.gmra.mxu2 %v9663_v25 }
 0x336   :  { %3600 = vmatmul.bf16.gmra.mxu3 %v9665_v42 }
 0x338   :  { %v3392_v60 = vpop.f32.mrf.mxu2  ;;  %v3056_v58 = vpop.f32.mrf.mxu0 }
 0x339   :  { %v3393_v29 = vadd.f32 %v3392_v60, %v3224_v23  ;;  %v3561_v22 = vpop.f32.mrf.mxu3  ;;  %v3225_v59 = vpop.f32.mrf.mxu1  ;;  %v3057_v24 = vadd.f32 %v3056_v58, %v8157_v20  ;;  %v5756_v20 = vld [vmem:[%s11336_s0 + $0x4b0] sm:$0xf0]  ;;  %v9703_v23 = vor.u32 %v6846_v51, %v5754_v47  ;;  %v6988_v47 = vld [vmem:[%s11335_s1 + $0x124] sm:$0xf] }
 0x33a   :  { %v9705_v58 = vor.u32 %v6842_v10, %v5756_v20  ;;  %v6956_v51 = vld [vmem:[%s11335_s1 + $0x24] sm:$0xf] }
 0x33b   :  { %v3562_v62 = vadd.f32 %v3561_v22, %v3393_v29  ;;  %v3226_v61 = vadd.f32 %v3225_v59, %v3057_v24  ;;  %v9709_v59 = vor.u32 %v6843_v8, %v5764_v56 }
 0x33c   :  { %11773 = vst [vmem:[#allocation202_spill] sm:$0xff] %v9705_v58 }
 0x33d   :  { %5064 = vst [vmem:[%s11338_s3 + $0x120] sm:$0xff] %v3562_v62  ;;  %v9707_v62 = vor.u32 %v6847_v16, %v5762_v52  ;;  %v6204_v52 = vld [vmem:[%s11335_s1 + $0x28] sm:$0xf0]  ;;  %v7004_v16 = vld [vmem:[%s11335_s1 + $0x1a4] sm:$0xf] }
 0x33e   :  { %11775 = vst [vmem:[#allocation204_spill] sm:$0xff] %v9709_v59  ;;  %v6207_v56 = vor.u32 %v6956_v51, %v6204_v52  ;;  %v6850_v51 = vld [vmem:[%s11336_s0 + $0x4d4] sm:$0xf]  ;;  %v5794_v52 = vld [vmem:[%s11336_s0 + $0x4d8] sm:$0xf] }
 0x33f   :  { %11774 = vst [vmem:[#allocation203_spill] sm:$0xff] %v9707_v62 }
 0x340   :  { %v3394_v11 = vpop.f32.mrf.mxu2  ;;  %v3059_v22 = vpop.f32.mrf.mxu0  ;;  %3681 = vmatpush.bf16.msra.mxu0 %v6207_v56  ;;  %v6851_v56 = vld [vmem:[%s11336_s0 + $0x4dc] sm:$0xf] }
 0x341   :  { %v3395_v60 = vadd.f32 %v3394_v11, %v3226_v61  ;;  %v3563_v29 = vpop.f32.mrf.mxu3  ;;  %v3228_v42 = vpop.f32.mrf.mxu1  ;;  %v3060_v25 = vadd.f32 %v3059_v22, %v8182_v63  ;;  %v6332_v63 = vld [vmem:[%s11335_s1 + $0x128] sm:$0xf0] }
 0x342   :  { %v6335_v20 = vor.u32 %v6988_v47, %v6332_v63  ;;  %v6396_v61 = vld [vmem:[%s11335_s1 + $0x1a8] sm:$0xf0]  ;;  %v5786_v47 = vld [vmem:[%s11336_s0 + $0x4d0] sm:$0xf] }
 0x343   :  { %v3564_v24 = vadd.f32 %v3563_v29, %v3395_v60  ;;  %3098 = vmatmul.bf16.gmra.mxu0 %v9703_v23  ;;  %v3229_v10 = vadd.f32 %v3228_v42, %v3060_v25  ;;  %v6399_v11 = vor.u32 %v7004_v16, %v6396_v61  ;;  %v6854_v63 = vld [vmem:[%s11336_s0 + $0x4ec] sm:$0xf0]  ;;  %v6855_v16 = vld [vmem:[%s11336_s0 + $0x4f4] sm:$0xf0] }
 0x344   :  { %3267 = vmatmul.bf16.gmra.mxu1 %v9705_v58  ;;  %4019 = vmatpush.bf16.msra.mxu2 %v6335_v20  ;;  %v5788_v20 = vld [vmem:[%s11336_s0 + $0x4f0] sm:$0xf0]  ;;  %v9775_v58 = vor.u32 %v6855_v16, %v5794_v52 }
 0x345   :  { %5066 = vst [vmem:[%s11338_s3 + $0x130] sm:$0xff] %v3564_v24  ;;  %3436 = vmatmul.bf16.gmra.mxu2 %v9707_v62  ;;  %4188 = vmatpush.bf16.msra.mxu3 %v6399_v11  ;;  %v5796_v11 = vld [vmem:[%s11336_s0 + $0x4f8] sm:$0xf0]  ;;  %v9773_v62 = vor.u32 %v6850_v51, %v5788_v20 }
 0x346   :  { %3605 = vmatmul.bf16.gmra.mxu3 %v9709_v59  ;;  %11777 = vst [vmem:[#allocation206_spill] sm:$0xff] %v9775_v58 }
 0x347   :  { %11776 = vst [vmem:[#allocation205_spill] sm:$0xff] %v9773_v62 }
 0x348   :  { %v3397_v8 = vpop.f32.mrf.mxu2  ;;  %v3061_v22 = vpop.f32.mrf.mxu0 }
 0x349   :  { %v3398_v60 = vadd.f32 %v3397_v8, %v3229_v10  ;;  %v3566_v29 = vpop.f32.mrf.mxu3  ;;  %v3230_v25 = vpop.f32.mrf.mxu1  ;;  %v3062_v24 = vadd.f32 %v3061_v22, %v8223_v6  ;;  %v6972_v6 = vld [vmem:[%s11335_s1 + $0xa4] sm:$0xf]  ;;  %v6268_v10 = vld [vmem:[%s11335_s1 + $0xa8] sm:$0xf0] }
 0x34a   :  { %v6271_v61 = vor.u32 %v6972_v6, %v6268_v10 }
 0x34b   :  { %v3567_v42 = vadd.f32 %v3566_v29, %v3398_v60  ;;  %v3231_v8 = vadd.f32 %v3230_v25, %v3062_v24  ;;  %v9771_v29 = vor.u32 %v6854_v63, %v5786_v47  ;;  %v9777_v24 = vor.u32 %v6851_v56, %v5796_v11  ;;  %v6858_v56 = vld [vmem:[%s11336_s0 + $0x514] sm:$0xf]  ;;  %v5826_v11 = vld [vmem:[%s11336_s0 + $0x518] sm:$0xf] }
 0x34c   :  { %3850 = vmatpush.bf16.msra.mxu1 %v6271_v61 }
 0x34d   :  { %5068 = vst [vmem:[%s11338_s3 + $0x140] sm:$0xff] %v3567_v42 }
 0x34e   :  { %11778 = vst [vmem:[#allocation207_spill] sm:$0xff] %v9777_v24 }
 0x350   :  { %v3399_v60 = vpop.f32.mrf.mxu2  ;;  %v3064_v59 = vpop.f32.mrf.mxu0 }
 0x351   :  { %v3400_v22 = vadd.f32 %v3399_v60, %v3231_v8  ;;  %v3568_v42 = vpop.f32.mrf.mxu3  ;;  %v3233_v25 = vpop.f32.mrf.mxu1  ;;  %v3065_v10 = vadd.f32 %v3064_v59, %v8230_v57  ;;  %v5818_v59 = vld [vmem:[%s11336_s0 + $0x510] sm:$0xf]  ;;  %v6863_v60 = vld [vmem:[%s11336_s0 + $0x534] sm:$0xf0] }
 0x352   :  { %v6862_v8 = vld [vmem:[%s11336_s0 + $0x52c] sm:$0xf0] }
 0x353   :  { %v3569_v6 = vadd.f32 %v3568_v42, %v3400_v22  ;;  %3103 = vmatmul.bf16.gmra.mxu0 %v9771_v29  ;;  %v3234_v47 = vadd.f32 %v3233_v25, %v3065_v10  ;;  %v6859_v42 = vld [vmem:[%s11336_s0 + $0x51c] sm:$0xf]  ;;  %v9815_v10 = vor.u32 %v6862_v8, %v5818_v59 }
 0x354   :  { %3272 = vmatmul.bf16.gmra.mxu1 %v9773_v62  ;;  %v5828_v25 = vld [vmem:[%s11336_s0 + $0x538] sm:$0xf0]  ;;  %v11934_v62 = vld [vmem:[#allocation86_spill] sm:$0xff] }
 0x355   :  { %5070 = vst [vmem:[%s11338_s3 + $0x150] sm:$0xff] %v3569_v6  ;;  %3441 = vmatmul.bf16.gmra.mxu2 %v9775_v58  ;;  %v11928_v58 = vld [vmem:[#allocation82_spill] sm:$0xff] }
 0x356   :  { %3610 = vmatmul.bf16.gmra.mxu3 %v9777_v24  ;;  %11779 = vst [vmem:[#allocation208_spill] sm:$0xff] %v9815_v10 }
 0x358   :  { %v3402_v63 = vpop.f32.mrf.mxu2  ;;  %v3066_v52 = vpop.f32.mrf.mxu0 }
 0x359   :  { %v3403_v51 = vadd.f32 %v3402_v63, %v3234_v47  ;;  %v3571_v20 = vpop.f32.mrf.mxu3  ;;  %v3235_v16 = vpop.f32.mrf.mxu1  ;;  %v3067_v57 = vadd.f32 %v3066_v52, %v8265_v4  ;;  %v5820_v4 = vld [vmem:[%s11336_s0 + $0x530] sm:$0xf0]  ;;  %v9819_v52 = vor.u32 %v6863_v60, %v5826_v11 }
 0x35b   :  { %v3572_v61 = vadd.f32 %v3571_v20, %v3403_v51  ;;  %v3236_v22 = vadd.f32 %v3235_v16, %v3067_v57  ;;  %v9817_v20 = vor.u32 %v6858_v56, %v5820_v4  ;;  %11781 = vst [vmem:[#allocation210_spill] sm:$0xff] %v9819_v52  ;;  %v9821_v16 = vor.u32 %v6859_v42, %v5828_v25  ;;  %v5850_v42 = vld [vmem:[%s11336_s0 + $0x550] sm:$0xf]  ;;  %v6866_v25 = vld [vmem:[%s11336_s0 + $0x554] sm:$0xf] }
 0x35d   :  { %5072 = vst [vmem:[%s11338_s3 + $0x160] sm:$0xff] %v3572_v61 }
 0x35e   :  { %11780 = vst [vmem:[#allocation209_spill] sm:$0xff] %v9817_v20 }
 0x35f   :  { %11782 = vst [vmem:[#allocation211_spill] sm:$0xff] %v9821_v16 }
 0x360   :  { %v3404_v6 = vpop.f32.mrf.mxu2  ;;  %v3069_v51 = vpop.f32.mrf.mxu0 }
 0x361   :  { %v3405_v47 = vadd.f32 %v3404_v6, %v3236_v22  ;;  %v3573_v63 = vpop.f32.mrf.mxu3  ;;  %v3238_v61 = vpop.f32.mrf.mxu1  ;;  %v3070_v24 = vadd.f32 %v3069_v51, %v8272_v32  ;;  %v5858_v6 = vld [vmem:[%s11336_s0 + $0x558] sm:$0xf]  ;;  %v6867_v51 = vld [vmem:[%s11336_s0 + $0x55c] sm:$0xf] }
 0x363   :  { %v3574_v57 = vadd.f32 %v3573_v63, %v3405_v47  ;;  %3108 = vmatmul.bf16.gmra.mxu0 %v9815_v10  ;;  %v3239_v59 = vadd.f32 %v3238_v61, %v3070_v24  ;;  %v6870_v24 = vld [vmem:[%s11336_s0 + $0x56c] sm:$0xf0]  ;;  %v6871_v47 = vld [vmem:[%s11336_s0 + $0x574] sm:$0xf0]  ;;  %v5860_v61 = vld [vmem:[%s11336_s0 + $0x578] sm:$0xf0] }
 0x364   :  { %3277 = vmatmul.bf16.gmra.mxu1 %v9817_v20  ;;  %v11925_v20 = vld [vmem:[#allocation80_spill] sm:$0xff]  ;;  %v11926_v10 = vld [vmem:[#allocation81_spill] sm:$0xff] }
 0x365   :  { %5074 = vst [vmem:[%s11338_s3 + $0x170] sm:$0xff] %v3574_v57  ;;  %3446 = vmatmul.bf16.gmra.mxu2 %v9819_v52 }
 0x366   :  { %3615 = vmatmul.bf16.gmra.mxu3 %v9821_v16 }
 0x368   :  { %v3407_v8 = vpop.f32.mrf.mxu2  ;;  %v3071_v11 = vpop.f32.mrf.mxu0 }
 0x369   :  { %v3408_v56 = vadd.f32 %v3407_v8, %v3239_v59  ;;  %v3576_v4 = vpop.f32.mrf.mxu3  ;;  %v3240_v60 = vpop.f32.mrf.mxu1  ;;  %v3072_v32 = vadd.f32 %v3071_v11, %v8307_v54  ;;  %v5852_v54 = vld [vmem:[%s11336_s0 + $0x570] sm:$0xf0]  ;;  %v9859_v59 = vor.u32 %v6870_v24, %v5850_v42 }
 0x36a   :  { %v9861_v11 = vor.u32 %v6866_v25, %v5852_v54 }
 0x36b   :  { %v3577_v22 = vadd.f32 %v3576_v4, %v3408_v56  ;;  %v3241_v63 = vadd.f32 %v3240_v60, %v3072_v32  ;;  %11783 = vst [vmem:[#allocation212_spill] sm:$0xff] %v9859_v59  ;;  %v9865_v60 = vor.u32 %v6867_v51, %v5860_v61  ;;  %v5882_v51 = vld [vmem:[%s11336_s0 + $0x590] sm:$0xf]  ;;  %v5890_v61 = vld [vmem:[%s11336_s0 + $0x598] sm:$0xf] }
 0x36c   :  { %11784 = vst [vmem:[#allocation213_spill] sm:$0xff] %v9861_v11 }
 0x36d   :  { %5076 = vst [vmem:[%s11338_s3 + $0x180] sm:$0xff] %v3577_v22  ;;  %v9863_v22 = vor.u32 %v6871_v47, %v5858_v6 }
 0x36e   :  { %11786 = vst [vmem:[#allocation215_spill] sm:$0xff] %v9865_v60 }
 0x36f   :  { %11785 = vst [vmem:[#allocation214_spill] sm:$0xff] %v9863_v22 }
 0x370   :  { %v3409_v57 = vpop.f32.mrf.mxu2  ;;  %v3074_v4 = vpop.f32.mrf.mxu0 }
 0x371   :  { %v3410_v8 = vadd.f32 %v3409_v57, %v3241_v63  ;;  %v3578_v56 = vpop.f32.mrf.mxu3  ;;  %v3243_v16 = vpop.f32.mrf.mxu1  ;;  %v3075_v52 = vadd.f32 %v3074_v4, %v8314_v21  ;;  %v6879_v57 = vld [vmem:[%s11336_s0 + $0x5b4] sm:$0xf0]  ;;  %v5892_v4 = vld [vmem:[%s11336_s0 + $0x5b8] sm:$0xf0] }
 0x373   :  { %v3579_v32 = vadd.f32 %v3578_v56, %v3410_v8  ;;  %3113 = vmatmul.bf16.gmra.mxu0 %v9859_v59  ;;  %v3244_v42 = vadd.f32 %v3243_v16, %v3075_v52  ;;  %v6878_v52 = vld [vmem:[%s11336_s0 + $0x5ac] sm:$0xf0]  ;;  %v6874_v16 = vld [vmem:[%s11336_s0 + $0x594] sm:$0xf]  ;;  %v6875_v56 = vld [vmem:[%s11336_s0 + $0x59c] sm:$0xf] }
 0x374   :  { %3282 = vmatmul.bf16.gmra.mxu1 %v9861_v11  ;;  %v11919_v11 = vld [vmem:[#allocation74_spill] sm:$0xff]  ;;  %v11924_v59 = vld [vmem:[#allocation79_spill] sm:$0xff] }
 0x375   :  { %5078 = vst [vmem:[%s11338_s3 + $0x190] sm:$0xff] %v3579_v32  ;;  %3451 = vmatmul.bf16.gmra.mxu2 %v9863_v22 }
 0x376   :  { %3620 = vmatmul.bf16.gmra.mxu3 %v9865_v60 }
 0x378   :  { %v3412_v24 = vpop.f32.mrf.mxu2  ;;  %v3076_v6 = vpop.f32.mrf.mxu0 }
 0x379   :  { %v3413_v25 = vadd.f32 %v3412_v24, %v3244_v42  ;;  %v3581_v54 = vpop.f32.mrf.mxu3  ;;  %v3245_v47 = vpop.f32.mrf.mxu1  ;;  %v3077_v21 = vadd.f32 %v3076_v6, %v8349_v49  ;;  %v5884_v49 = vld [vmem:[%s11336_s0 + $0x5b0] sm:$0xf0]  ;;  %v9903_v42 = vor.u32 %v6878_v52, %v5882_v51 }
 0x37a   :  { %v9905_v6 = vor.u32 %v6874_v16, %v5884_v49  ;;  %v6986_v51 = vld [vmem:[%s11335_s1 + $0x114] sm:$0xf] }
 0x37b   :  { %v3582_v63 = vadd.f32 %v3581_v54, %v3413_v25  ;;  %v3246_v8 = vadd.f32 %v3245_v47, %v3077_v21  ;;  %11787 = vst [vmem:[#allocation216_spill] sm:$0xff] %v9903_v42  ;;  %v9909_v47 = vor.u32 %v6875_v56, %v5892_v4  ;;  %v6954_v52 = vld [vmem:[%s11335_s1 + $0x14] sm:$0xf] }
 0x37c   :  { %11788 = vst [vmem:[#allocation217_spill] sm:$0xff] %v9905_v6 }
 0x37d   :  { %5080 = vst [vmem:[%s11338_s3 + $0x1a0] sm:$0xff] %v3582_v63  ;;  %v9907_v63 = vor.u32 %v6879_v57, %v5890_v61  ;;  %v6196_v61 = vld [vmem:[%s11335_s1 + $0x18] sm:$0xf0]  ;;  %v7002_v57 = vld [vmem:[%s11335_s1 + $0x194] sm:$0xf] }
 0x37e   :  { %11790 = vst [vmem:[#allocation219_spill] sm:$0xff] %v9909_v47  ;;  %v6199_v4 = vor.u32 %v6954_v52, %v6196_v61  ;;  %v6882_v52 = vld [vmem:[%s11336_s0 + $0x5d4] sm:$0xf]  ;;  %v5922_v61 = vld [vmem:[%s11336_s0 + $0x5d8] sm:$0xf] }
 0x37f   :  { %11789 = vst [vmem:[#allocation218_spill] sm:$0xff] %v9907_v63 }
 0x380   :  { %v3414_v32 = vpop.f32.mrf.mxu2  ;;  %v3079_v54 = vpop.f32.mrf.mxu0  ;;  %3682 = vmatpush.bf16.msra.mxu0 %v6199_v4  ;;  %v6883_v4 = vld [vmem:[%s11336_s0 + $0x5dc] sm:$0xf] }
 0x381   :  { %v3415_v24 = vadd.f32 %v3414_v32, %v3246_v8  ;;  %v3583_v25 = vpop.f32.mrf.mxu3  ;;  %v3248_v60 = vpop.f32.mrf.mxu1  ;;  %v3080_v22 = vadd.f32 %v3079_v54, %v8374_v19  ;;  %v6324_v19 = vld [vmem:[%s11335_s1 + $0x118] sm:$0xf0] }
 0x382   :  { %v6327_v49 = vor.u32 %v6986_v51, %v6324_v19  ;;  %v6388_v8 = vld [vmem:[%s11335_s1 + $0x198] sm:$0xf0]  ;;  %v5914_v51 = vld [vmem:[%s11336_s0 + $0x5d0] sm:$0xf] }
 0x383   :  { %v3584_v21 = vadd.f32 %v3583_v25, %v3415_v24  ;;  %3118 = vmatmul.bf16.gmra.mxu0 %v9903_v42  ;;  %v3249_v16 = vadd.f32 %v3248_v60, %v3080_v22  ;;  %v6391_v32 = vor.u32 %v7002_v57, %v6388_v8  ;;  %v6886_v19 = vld [vmem:[%s11336_s0 + $0x5ec] sm:$0xf0]  ;;  %v6887_v57 = vld [vmem:[%s11336_s0 + $0x5f4] sm:$0xf0] }
 0x384   :  { %3287 = vmatmul.bf16.gmra.mxu1 %v9905_v6  ;;  %4020 = vmatpush.bf16.msra.mxu2 %v6327_v49  ;;  %v5916_v49 = vld [vmem:[%s11336_s0 + $0x5f0] sm:$0xf0]  ;;  %v9975_v6 = vor.u32 %v6887_v57, %v5922_v61 }
 0x385   :  { %5082 = vst [vmem:[%s11338_s3 + $0x1b0] sm:$0xff] %v3584_v21  ;;  %3456 = vmatmul.bf16.gmra.mxu2 %v9907_v63  ;;  %4189 = vmatpush.bf16.msra.mxu3 %v6391_v32  ;;  %v5924_v32 = vld [vmem:[%s11336_s0 + $0x5f8] sm:$0xf0]  ;;  %v9973_v63 = vor.u32 %v6882_v52, %v5916_v49 }
 0x386   :  { %3625 = vmatmul.bf16.gmra.mxu3 %v9909_v47  ;;  %11793 = vst [vmem:[#allocation222_spill] sm:$0xff] %v9975_v6 }
 0x387   :  { %11792 = vst [vmem:[#allocation221_spill] sm:$0xff] %v9973_v63 }
 0x388   :  { %v3417_v56 = vpop.f32.mrf.mxu2  ;;  %v3081_v54 = vpop.f32.mrf.mxu0 }
 0x389   :  { %v3418_v24 = vadd.f32 %v3417_v56, %v3249_v16  ;;  %v3586_v25 = vpop.f32.mrf.mxu3  ;;  %v3250_v22 = vpop.f32.mrf.mxu1  ;;  %v3082_v21 = vadd.f32 %v3081_v54, %v8415_v38  ;;  %v6970_v38 = vld [vmem:[%s11335_s1 + $0x94] sm:$0xf]  ;;  %v6260_v16 = vld [vmem:[%s11335_s1 + $0x98] sm:$0xf0] }
 0x38a   :  { %v6263_v8 = vor.u32 %v6970_v38, %v6260_v16 }
 0x38b   :  { %v3587_v60 = vadd.f32 %v3586_v25, %v3418_v24  ;;  %v3251_v56 = vadd.f32 %v3250_v22, %v3082_v21  ;;  %v9971_v25 = vor.u32 %v6886_v19, %v5914_v51  ;;  %v9977_v21 = vor.u32 %v6883_v4, %v5924_v32  ;;  %v6890_v4 = vld [vmem:[%s11336_s0 + $0x614] sm:$0xf]  ;;  %v5954_v32 = vld [vmem:[%s11336_s0 + $0x618] sm:$0xf] }
 0x38c   :  { %3851 = vmatpush.bf16.msra.mxu1 %v6263_v8 }
 0x38d   :  { %5084 = vst [vmem:[%s11338_s3 + $0x1c0] sm:$0xff] %v3587_v60 }
 0x38e   :  { %11791 = vst [vmem:[#allocation220_spill] sm:$0xff] %v9971_v25 }
 0x38f   :  { %11794 = vst [vmem:[#allocation223_spill] sm:$0xff] %v9977_v21 }
 0x390   :  { %v3419_v24 = vpop.f32.mrf.mxu2  ;;  %v3084_v47 = vpop.f32.mrf.mxu0 }
 0x391   :  { %v3420_v54 = vadd.f32 %v3419_v24, %v3251_v56  ;;  %v3588_v60 = vpop.f32.mrf.mxu3  ;;  %v3253_v22 = vpop.f32.mrf.mxu1  ;;  %v3085_v16 = vadd.f32 %v3084_v47, %v8422_v5  ;;  %v5946_v47 = vld [vmem:[%s11336_s0 + $0x610] sm:$0xf]  ;;  %v6895_v24 = vld [vmem:[%s11336_s0 + $0x634] sm:$0xf0] }
 0x392   :  { %v6894_v56 = vld [vmem:[%s11336_s0 + $0x62c] sm:$0xf0] }
 0x393   :  { %v3589_v38 = vadd.f32 %v3588_v60, %v3420_v54  ;;  %3123 = vmatmul.bf16.gmra.mxu0 %v9971_v25  ;;  %v3254_v51 = vadd.f32 %v3253_v22, %v3085_v16  ;;  %v6891_v60 = vld [vmem:[%s11336_s0 + $0x61c] sm:$0xf]  ;;  %v10015_v16 = vor.u32 %v6894_v56, %v5946_v47  ;;  %v11915_v25 = vld [vmem:[#allocation70_spill] sm:$0xff] }
 0x394   :  { %3292 = vmatmul.bf16.gmra.mxu1 %v9973_v63  ;;  %v5956_v22 = vld [vmem:[%s11336_s0 + $0x638] sm:$0xf0] }
 0x395   :  { %5086 = vst [vmem:[%s11338_s3 + $0x1d0] sm:$0xff] %v3589_v38  ;;  %3461 = vmatmul.bf16.gmra.mxu2 %v9975_v6  ;;  %v11911_v6 = vld [vmem:[#allocation66_spill] sm:$0xff] }
 0x396   :  { %3630 = vmatmul.bf16.gmra.mxu3 %v9977_v21  ;;  %11795 = vst [vmem:[#allocation224_spill] sm:$0xff] %v10015_v16 }
 0x398   :  { %v3422_v19 = vpop.f32.mrf.mxu2  ;;  %v3086_v61 = vpop.f32.mrf.mxu0 }
 0x399   :  { %v3423_v52 = vadd.f32 %v3422_v19, %v3254_v51  ;;  %v3591_v49 = vpop.f32.mrf.mxu3  ;;  %v3255_v57 = vpop.f32.mrf.mxu1  ;;  %v3087_v5 = vadd.f32 %v3086_v61, %v8457_v36  ;;  %v5948_v36 = vld [vmem:[%s11336_s0 + $0x630] sm:$0xf0]  ;;  %v10019_v61 = vor.u32 %v6895_v24, %v5954_v32 }
 0x39b   :  { %v3592_v8 = vadd.f32 %v3591_v49, %v3423_v52  ;;  %v3256_v54 = vadd.f32 %v3255_v57, %v3087_v5  ;;  %v10017_v49 = vor.u32 %v6890_v4, %v5948_v36  ;;  %11797 = vst [vmem:[#allocation226_spill] sm:$0xff] %v10019_v61  ;;  %v10021_v57 = vor.u32 %v6891_v60, %v5956_v22  ;;  %v5978_v60 = vld [vmem:[%s11336_s0 + $0x650] sm:$0xf]  ;;  %v6898_v22 = vld [vmem:[%s11336_s0 + $0x654] sm:$0xf] }
 0x39d   :  { %5088 = vst [vmem:[%s11338_s3 + $0x1e0] sm:$0xff] %v3592_v8 }
 0x39e   :  { %11796 = vst [vmem:[#allocation225_spill] sm:$0xff] %v10017_v49 }
 0x39f   :  { %11798 = vst [vmem:[#allocation227_spill] sm:$0xff] %v10021_v57 }
 0x3a0   :  { %v3424_v38 = vpop.f32.mrf.mxu2  ;;  %v3089_v52 = vpop.f32.mrf.mxu0 }
 0x3a1   :  { %v3425_v51 = vadd.f32 %v3424_v38, %v3256_v54  ;;  %v3593_v19 = vpop.f32.mrf.mxu3  ;;  %v3258_v8 = vpop.f32.mrf.mxu1  ;;  %v3090_v21 = vadd.f32 %v3089_v52, %v8464_v46  ;;  %v5986_v38 = vld [vmem:[%s11336_s0 + $0x658] sm:$0xf]  ;;  %v6899_v52 = vld [vmem:[%s11336_s0 + $0x65c] sm:$0xf] }
 0x3a3   :  { %v3594_v5 = vadd.f32 %v3593_v19, %v3425_v51  ;;  %3128 = vmatmul.bf16.gmra.mxu0 %v10015_v16  ;;  %v3259_v47 = vadd.f32 %v3258_v8, %v3090_v21  ;;  %v6902_v21 = vld [vmem:[%s11336_s0 + $0x66c] sm:$0xf0]  ;;  %v6903_v51 = vld [vmem:[%s11336_s0 + $0x674] sm:$0xf0]  ;;  %v5988_v8 = vld [vmem:[%s11336_s0 + $0x678] sm:$0xf0] }
 0x3a4   :  { %3297 = vmatmul.bf16.gmra.mxu1 %v10017_v49  ;;  %v11909_v49 = vld [vmem:[#allocation64_spill] sm:$0xff]  ;;  %v11910_v16 = vld [vmem:[#allocation65_spill] sm:$0xff] }
 0x3a5   :  { %5090 = vst [vmem:[%s11338_s3 + $0x1f0] sm:$0xff] %v3594_v5  ;;  %3466 = vmatmul.bf16.gmra.mxu2 %v10019_v61 }
 0x3a6   :  { %3635 = vmatmul.bf16.gmra.mxu3 %v10021_v57 }
 0x3a8   :  { %v3427_v56 = vpop.f32.mrf.mxu2  ;;  %v3091_v32 = vpop.f32.mrf.mxu0 }
 0x3a9   :  { %v3428_v4 = vadd.f32 %v3427_v56, %v3259_v47  ;;  %v3596_v36 = vpop.f32.mrf.mxu3  ;;  %v3260_v24 = vpop.f32.mrf.mxu1  ;;  %v3092_v46 = vadd.f32 %v3091_v32, %v8499_v14  ;;  %v5980_v14 = vld [vmem:[%s11336_s0 + $0x670] sm:$0xf0]  ;;  %v10059_v47 = vor.u32 %v6902_v21, %v5978_v60 }
 0x3aa   :  { %v10061_v32 = vor.u32 %v6898_v22, %v5980_v14 }
 0x3ab   :  { %v3597_v54 = vadd.f32 %v3596_v36, %v3428_v4  ;;  %v3261_v19 = vadd.f32 %v3260_v24, %v3092_v46  ;;  %11799 = vst [vmem:[#allocation228_spill] sm:$0xff] %v10059_v47  ;;  %v10065_v24 = vor.u32 %v6899_v52, %v5988_v8  ;;  %v6010_v52 = vld [vmem:[%s11336_s0 + $0x690] sm:$0xf]  ;;  %v6018_v8 = vld [vmem:[%s11336_s0 + $0x698] sm:$0xf] }
 0x3ac   :  { %11800 = vst [vmem:[#allocation229_spill] sm:$0xff] %v10061_v32 }
 0x3ad   :  { %5092 = vst [vmem:[%s11338_s3 + $0x200] sm:$0xff] %v3597_v54  ;;  %v10063_v54 = vor.u32 %v6903_v51, %v5986_v38 }
 0x3ae   :  { %11802 = vst [vmem:[#allocation231_spill] sm:$0xff] %v10065_v24 }
 0x3af   :  { %11801 = vst [vmem:[#allocation230_spill] sm:$0xff] %v10063_v54 }
 0x3b0   :  { %v3429_v5 = vpop.f32.mrf.mxu2  ;;  %v3094_v36 = vpop.f32.mrf.mxu0 }
 0x3b1   :  { %v3430_v56 = vadd.f32 %v3429_v5, %v3261_v19  ;;  %v3598_v4 = vpop.f32.mrf.mxu3  ;;  %v3263_v57 = vpop.f32.mrf.mxu1  ;;  %v3095_v61 = vadd.f32 %v3094_v36, %v8506_v50  ;;  %v6911_v5 = vld [vmem:[%s11336_s0 + $0x6b4] sm:$0xf0]  ;;  %v6020_v36 = vld [vmem:[%s11336_s0 + $0x6b8] sm:$0xf0] }
 0x3b3   :  { %v3599_v46 = vadd.f32 %v3598_v4, %v3430_v56  ;;  %3133 = vmatmul.bf16.gmra.mxu0 %v10059_v47  ;;  %v3264_v60 = vadd.f32 %v3263_v57, %v3095_v61  ;;  %v6910_v61 = vld [vmem:[%s11336_s0 + $0x6ac] sm:$0xf0]  ;;  %v6906_v57 = vld [vmem:[%s11336_s0 + $0x694] sm:$0xf]  ;;  %v6907_v4 = vld [vmem:[%s11336_s0 + $0x69c] sm:$0xf] }
 0x3b4   :  { %3302 = vmatmul.bf16.gmra.mxu1 %v10061_v32  ;;  %v11903_v32 = vld [vmem:[#allocation58_spill] sm:$0xff]  ;;  %v11908_v47 = vld [vmem:[#allocation63_spill] sm:$0xff] }
 0x3b5   :  { %5094 = vst [vmem:[%s11338_s3 + $0x210] sm:$0xff] %v3599_v46  ;;  %3471 = vmatmul.bf16.gmra.mxu2 %v10063_v54 }
 0x3b6   :  { %3640 = vmatmul.bf16.gmra.mxu3 %v10065_v24 }
 0x3b8   :  { %v3432_v21 = vpop.f32.mrf.mxu2  ;;  %v3096_v38 = vpop.f32.mrf.mxu0 }
 0x3b9   :  { %v3433_v22 = vadd.f32 %v3432_v21, %v3264_v60  ;;  %v3601_v14 = vpop.f32.mrf.mxu3  ;;  %v3265_v51 = vpop.f32.mrf.mxu1  ;;  %v3097_v50 = vadd.f32 %v3096_v38, %v8541_v12  ;;  %v6012_v12 = vld [vmem:[%s11336_s0 + $0x6b0] sm:$0xf0]  ;;  %v10103_v60 = vor.u32 %v6910_v61, %v6010_v52  ;;  %v6984_v52 = vld [vmem:[%s11335_s1 + $0x104] sm:$0xf] }
 0x3ba   :  { %v10105_v38 = vor.u32 %v6906_v57, %v6012_v12  ;;  %v6952_v61 = vld [vmem:[%s11335_s1 + $0x4] sm:$0xf] }
 0x3bb   :  { %v3602_v19 = vadd.f32 %v3601_v14, %v3433_v22  ;;  %v3266_v56 = vadd.f32 %v3265_v51, %v3097_v50  ;;  %11803 = vst [vmem:[#allocation232_spill] sm:$0xff] %v10103_v60  ;;  %v10109_v51 = vor.u32 %v6907_v4, %v6020_v36 }
 0x3bc   :  { %11804 = vst [vmem:[#allocation233_spill] sm:$0xff] %v10105_v38 }
 0x3bd   :  { %5096 = vst [vmem:[%s11338_s3 + $0x220] sm:$0xff] %v3602_v19  ;;  %v10107_v19 = vor.u32 %v6911_v5, %v6018_v8  ;;  %v6188_v8 = vld [vmem:[%s11335_s1 + $0x8] sm:$0xf0]  ;;  %v7000_v5 = vld [vmem:[%s11335_s1 + $0x184] sm:$0xf] }
 0x3be   :  { %11806 = vst [vmem:[#allocation235_spill] sm:$0xff] %v10109_v51  ;;  %v6191_v36 = vor.u32 %v6952_v61, %v6188_v8  ;;  %v6914_v61 = vld [vmem:[%s11336_s0 + $0x6d4] sm:$0xf]  ;;  %v6050_v8 = vld [vmem:[%s11336_s0 + $0x6d8] sm:$0xf] }
 0x3bf   :  { %11805 = vst [vmem:[#allocation234_spill] sm:$0xff] %v10107_v19 }
 0x3c0   :  { %v3434_v46 = vpop.f32.mrf.mxu2  ;;  %v3099_v14 = vpop.f32.mrf.mxu0  ;;  %3683 = vmatpush.bf16.msra.mxu0 %v6191_v36  ;;  %v6915_v36 = vld [vmem:[%s11336_s0 + $0x6dc] sm:$0xf] }
 0x3c1   :  { %v3435_v21 = vadd.f32 %v3434_v46, %v3266_v56  ;;  %v3603_v22 = vpop.f32.mrf.mxu3  ;;  %v3268_v24 = vpop.f32.mrf.mxu1  ;;  %v3100_v54 = vadd.f32 %v3099_v14, %v8566_v30  ;;  %v6316_v30 = vld [vmem:[%s11335_s1 + $0x108] sm:$0xf0] }
 0x3c2   :  { %v6319_v12 = vor.u32 %v6984_v52, %v6316_v30  ;;  %v6380_v56 = vld [vmem:[%s11335_s1 + $0x188] sm:$0xf0]  ;;  %v6042_v52 = vld [vmem:[%s11336_s0 + $0x6d0] sm:$0xf] }
 0x3c3   :  { %v3604_v50 = vadd.f32 %v3603_v22, %v3435_v21  ;;  %3138 = vmatmul.bf16.gmra.mxu0 %v10103_v60  ;;  %v3269_v57 = vadd.f32 %v3268_v24, %v3100_v54  ;;  %v6383_v46 = vor.u32 %v7000_v5, %v6380_v56  ;;  %v6918_v30 = vld [vmem:[%s11336_s0 + $0x6ec] sm:$0xf0]  ;;  %v6919_v5 = vld [vmem:[%s11336_s0 + $0x6f4] sm:$0xf0] }
 0x3c4   :  { %3307 = vmatmul.bf16.gmra.mxu1 %v10105_v38  ;;  %4021 = vmatpush.bf16.msra.mxu2 %v6319_v12  ;;  %v6044_v12 = vld [vmem:[%s11336_s0 + $0x6f0] sm:$0xf0]  ;;  %v10175_v38 = vor.u32 %v6919_v5, %v6050_v8 }
 0x3c5   :  { %5098 = vst [vmem:[%s11338_s3 + $0x230] sm:$0xff] %v3604_v50  ;;  %3476 = vmatmul.bf16.gmra.mxu2 %v10107_v19  ;;  %4190 = vmatpush.bf16.msra.mxu3 %v6383_v46  ;;  %v6052_v46 = vld [vmem:[%s11336_s0 + $0x6f8] sm:$0xf0]  ;;  %v10173_v19 = vor.u32 %v6914_v61, %v6044_v12 }
 0x3c6   :  { %3645 = vmatmul.bf16.gmra.mxu3 %v10109_v51  ;;  %11809 = vst [vmem:[#allocation238_spill] sm:$0xff] %v10175_v38 }
 0x3c7   :  { %11808 = vst [vmem:[#allocation237_spill] sm:$0xff] %v10173_v19 }
 0x3c8   :  { %v3437_v4 = vpop.f32.mrf.mxu2  ;;  %v3101_v14 = vpop.f32.mrf.mxu0 }
 0x3c9   :  { %v3438_v21 = vadd.f32 %v3437_v4, %v3269_v57  ;;  %v3606_v22 = vpop.f32.mrf.mxu3  ;;  %v3270_v54 = vpop.f32.mrf.mxu1  ;;  %v3102_v50 = vadd.f32 %v3101_v14, %v8607_v2  ;;  %v6968_v2 = vld [vmem:[%s11335_s1 + $0x84] sm:$0xf]  ;;  %v6252_v57 = vld [vmem:[%s11335_s1 + $0x88] sm:$0xf0] }
 0x3ca   :  { %v6255_v56 = vor.u32 %v6968_v2, %v6252_v57 }
 0x3cb   :  { %v3607_v24 = vadd.f32 %v3606_v22, %v3438_v21  ;;  %v3271_v4 = vadd.f32 %v3270_v54, %v3102_v50  ;;  %v10171_v22 = vor.u32 %v6918_v30, %v6042_v52  ;;  %v10177_v50 = vor.u32 %v6915_v36, %v6052_v46  ;;  %v6922_v36 = vld [vmem:[%s11336_s0 + $0x714] sm:$0xf]  ;;  %v6082_v46 = vld [vmem:[%s11336_s0 + $0x718] sm:$0xf] }
 0x3cc   :  { %3852 = vmatpush.bf16.msra.mxu1 %v6255_v56 }
 0x3cd   :  { %5100 = vst [vmem:[%s11338_s3 + $0x240] sm:$0xff] %v3607_v24 }
 0x3ce   :  { %11807 = vst [vmem:[#allocation236_spill] sm:$0xff] %v10171_v22 }
 0x3cf   :  { %11810 = vst [vmem:[#allocation239_spill] sm:$0xff] %v10177_v50 }
 0x3d0   :  { %v3439_v21 = vpop.f32.mrf.mxu2  ;;  %v3104_v51 = vpop.f32.mrf.mxu0 }
 0x3d1   :  { %v3440_v14 = vadd.f32 %v3439_v21, %v3271_v4  ;;  %v3608_v24 = vpop.f32.mrf.mxu3  ;;  %v3273_v54 = vpop.f32.mrf.mxu1  ;;  %v3105_v57 = vadd.f32 %v3104_v51, %v8614_v37  ;;  %v6074_v51 = vld [vmem:[%s11336_s0 + $0x710] sm:$0xf]  ;;  %v6927_v21 = vld [vmem:[%s11336_s0 + $0x734] sm:$0xf0] }
 0x3d2   :  { %v6926_v4 = vld [vmem:[%s11336_s0 + $0x72c] sm:$0xf0] }
 0x3d3   :  { %v3609_v2 = vadd.f32 %v3608_v24, %v3440_v14  ;;  %3143 = vmatmul.bf16.gmra.mxu0 %v10171_v22  ;;  %v3274_v52 = vadd.f32 %v3273_v54, %v3105_v57  ;;  %v6923_v24 = vld [vmem:[%s11336_s0 + $0x71c] sm:$0xf]  ;;  %v10215_v57 = vor.u32 %v6926_v4, %v6074_v51  ;;  %v11899_v22 = vld [vmem:[#allocation54_spill] sm:$0xff] }
 0x3d4   :  { %3312 = vmatmul.bf16.gmra.mxu1 %v10173_v19  ;;  %v6084_v54 = vld [vmem:[%s11336_s0 + $0x738] sm:$0xf0] }
 0x3d5   :  { %5102 = vst [vmem:[%s11338_s3 + $0x250] sm:$0xff] %v3609_v2  ;;  %3481 = vmatmul.bf16.gmra.mxu2 %v10175_v38 }
 0x3d6   :  { %3650 = vmatmul.bf16.gmra.mxu3 %v10177_v50  ;;  %11811 = vst [vmem:[#allocation240_spill] sm:$0xff] %v10215_v57 }
 0x3d8   :  { %v3442_v30 = vpop.f32.mrf.mxu2  ;;  %v3106_v8 = vpop.f32.mrf.mxu0 }
 0x3d9   :  { %v3443_v61 = vadd.f32 %v3442_v30, %v3274_v52  ;;  %v3611_v12 = vpop.f32.mrf.mxu3  ;;  %v3275_v5 = vpop.f32.mrf.mxu1  ;;  %v3107_v37 = vadd.f32 %v3106_v8, %v8649_v0  ;;  %v6076_v0 = vld [vmem:[%s11336_s0 + $0x730] sm:$0xf0]  ;;  %v10219_v8 = vor.u32 %v6927_v21, %v6082_v46 }
 0x3db   :  { %v3612_v56 = vadd.f32 %v3611_v12, %v3443_v61  ;;  %v3276_v14 = vadd.f32 %v3275_v5, %v3107_v37  ;;  %v10217_v12 = vor.u32 %v6922_v36, %v6076_v0  ;;  %11813 = vst [vmem:[#allocation242_spill] sm:$0xff] %v10219_v8  ;;  %v10221_v5 = vor.u32 %v6923_v24, %v6084_v54  ;;  %v6106_v54 = vld [vmem:[%s11336_s0 + $0x750] sm:$0xf] }
 0x3dd   :  { %5104 = vst [vmem:[%s11338_s3 + $0x260] sm:$0xff] %v3612_v56 }
 0x3de   :  { %11812 = vst [vmem:[#allocation241_spill] sm:$0xff] %v10217_v12 }
 0x3df   :  { %11814 = vst [vmem:[#allocation243_spill] sm:$0xff] %v10221_v5 }
 0x3e0   :  { %v3444_v2 = vpop.f32.mrf.mxu2  ;;  %v3109_v61 = vpop.f32.mrf.mxu0 }
 0x3e1   :  { %v3445_v52 = vadd.f32 %v3444_v2, %v3276_v14  ;;  %v3613_v30 = vpop.f32.mrf.mxu3  ;;  %v3278_v56 = vpop.f32.mrf.mxu1  ;;  %v3110_v50 = vadd.f32 %v3109_v61, %v8656_v34  ;;  %v11815_v34 = vld [vmem:[#allocation122_spill] sm:$0xff]  ;;  %v6930_v2 = vld [vmem:[%s11336_s0 + $0x754] sm:$0xf]  ;;  %v6935_v61 = vld [vmem:[%s11336_s0 + $0x774] sm:$0xf0] }
 0x3e3   :  { %v3614_v37 = vadd.f32 %v3613_v30, %v3445_v52  ;;  %3148 = vmatmul.bf16.gmra.mxu0 %v10215_v57  ;;  %v3279_v51 = vadd.f32 %v3278_v56, %v3110_v50  ;;  %v6934_v50 = vld [vmem:[%s11336_s0 + $0x76c] sm:$0xf0]  ;;  %v6108_v52 = vld [vmem:[%s11336_s0 + $0x770] sm:$0xf0]  ;;  %v6114_v30 = vld [vmem:[%s11336_s0 + $0x758] sm:$0xf] }
 0x3e4   :  { %3317 = vmatmul.bf16.gmra.mxu1 %v10217_v12  ;;  %v11820_v12 = vld [vmem:[#allocation123_spill] sm:$0xff] }
 0x3e5   :  { %5106 = vst [vmem:[%s11338_s3 + $0x270] sm:$0xff] %v3614_v37  ;;  %3486 = vmatmul.bf16.gmra.mxu2 %v10219_v8  ;;  %v6931_v37 = vld [vmem:[%s11336_s0 + $0x75c] sm:$0xf] }
 0x3e6   :  { %3655 = vmatmul.bf16.gmra.mxu3 %v10221_v5  ;;  %v10263_v5 = vor.u32 %v6935_v61, %v6114_v30 }
 0x3e8   :  { %v3447_v4 = vpop.f32.mrf.mxu2  ;;  %v3111_v46 = vpop.f32.mrf.mxu0  ;;  %11818 = vst [vmem:[#allocation245_spill] sm:$0xff] %v10263_v5 }
 0x3e9   :  { %v3448_v36 = vadd.f32 %v3447_v4, %v3279_v51  ;;  %v3616_v0 = vpop.f32.mrf.mxu3  ;;  %v3280_v21 = vpop.f32.mrf.mxu1  ;;  %v3112_v24 = vadd.f32 %v3111_v46, %v11815_v34  ;;  %v6116_v51 = vld [vmem:[%s11336_s0 + $0x778] sm:$0xf0]  ;;  %v10261_v34 = vor.u32 %v6930_v2, %v6108_v52 }
 0x3eb   :  { %v3617_v14 = vadd.f32 %v3616_v0, %v3448_v36  ;;  %v3281_v56 = vadd.f32 %v3280_v21, %v3112_v24  ;;  %v10259_v36 = vor.u32 %v6934_v50, %v6106_v54  ;;  %11817 = vst [vmem:[#allocation244_spill] sm:$0xff] %v10261_v34  ;;  %v10265_v21 = vor.u32 %v6931_v37, %v6116_v51  ;;  %v6138_v51 = vld [vmem:[%s11336_s0 + $0x790] sm:$0xf] }
 0x3ed   :  { %5108 = vst [vmem:[%s11338_s3 + $0x280] sm:$0xff] %v3617_v14 }
 0x3ee   :  { %11816 = vst [vmem:[#allocation122_spill] sm:$0xff] %v10259_v36 }
 0x3ef   :  { %11819 = vst [vmem:[#allocation246_spill] sm:$0xff] %v10265_v21 }
 0x3f0   :  { %v3449_v4 = vpop.f32.mrf.mxu2  ;;  %v3114_v14 = vpop.f32.mrf.mxu0 }
 0x3f1   :  { %v3450_v0 = vadd.f32 %v3449_v4, %v3281_v56  ;;  %v3618_v46 = vpop.f32.mrf.mxu3  ;;  %v3283_v8 = vpop.f32.mrf.mxu1  ;;  %v3115_v57 = vadd.f32 %v3114_v14, %v11820_v12  ;;  %v11821_v12 = vld [vmem:[#allocation128_spill] sm:$0xff] }
 0x3f2   :  { %v6140_v4 = vld [vmem:[%s11336_s0 + $0x7b0] sm:$0xf0] }
 0x3f3   :  { %v3619_v24 = vadd.f32 %v3618_v46, %v3450_v0  ;;  %3153 = vmatmul.bf16.gmra.mxu0 %v10259_v36  ;;  %v3284_v54 = vadd.f32 %v3283_v8, %v3115_v57  ;;  %v6942_v57 = vld [vmem:[%s11336_s0 + $0x7ac] sm:$0xf0]  ;;  %v6938_v8 = vld [vmem:[%s11336_s0 + $0x794] sm:$0xf]  ;;  %v6146_v0 = vld [vmem:[%s11336_s0 + $0x798] sm:$0xf] }
 0x3f4   :  { %3322 = vmatmul.bf16.gmra.mxu1 %v10261_v34  ;;  %v6943_v46 = vld [vmem:[%s11336_s0 + $0x7b4] sm:$0xf0] }
 0x3f5   :  { %5110 = vst [vmem:[%s11338_s3 + $0x290] sm:$0xff] %v3619_v24  ;;  %3491 = vmatmul.bf16.gmra.mxu2 %v10263_v5  ;;  %v6939_v24 = vld [vmem:[%s11336_s0 + $0x79c] sm:$0xf] }
 0x3f6   :  { %3660 = vmatmul.bf16.gmra.mxu3 %v10265_v21  ;;  %v10307_v21 = vor.u32 %v6943_v46, %v6146_v0  ;;  %v11826_v34 = vld [vmem:[#allocation129_spill] sm:$0xff]  ;;  %v7078_v46 = vld [vmem:[%s11335_s1 + $0x3f4] sm:$0xf] }
 0x3f7   :  { %v6500_v0 = vld [vmem:[%s11335_s1 + $0x278] sm:$0xf0] }
 0x3f8   :  { %v3452_v50 = vpop.f32.mrf.mxu2  ;;  %v3116_v30 = vpop.f32.mrf.mxu0  ;;  %11824 = vst [vmem:[#allocation247_spill] sm:$0xff] %v10307_v21 }
 0x3f9   :  { %v3453_v2 = vadd.f32 %v3452_v50, %v3284_v54  ;;  %v3621_v52 = vpop.f32.mrf.mxu3  ;;  %v3285_v61 = vpop.f32.mrf.mxu1  ;;  %v3117_v37 = vadd.f32 %v3116_v30, %v11821_v12  ;;  %v6148_v54 = vld [vmem:[%s11336_s0 + $0x7b8] sm:$0xf0]  ;;  %v10305_v12 = vor.u32 %v6938_v8, %v6140_v4 }
 0x3fb   :  { %v3622_v56 = vadd.f32 %v3621_v52, %v3453_v2  ;;  %v3286_v14 = vadd.f32 %v3285_v61, %v3117_v37  ;;  %v10303_v2 = vor.u32 %v6942_v57, %v6138_v51  ;;  %11823 = vst [vmem:[#allocation128_spill] sm:$0xff] %v10305_v12  ;;  %v10309_v61 = vor.u32 %v6939_v24, %v6148_v54  ;;  %v7062_v51 = vld [vmem:[%s11335_s1 + $0x374] sm:$0xf] }
 0x3fc   :  { %v7030_v57 = vld [vmem:[%s11335_s1 + $0x274] sm:$0xf] }
 0x3fd   :  { %5112 = vst [vmem:[%s11338_s3 + $0x2a0] sm:$0xff] %v3622_v56  ;;  %v6503_v54 = vor.u32 %v7030_v57, %v6500_v0  ;;  %v6946_v57 = vld [vmem:[%s11336_s0 + $0x7d4] sm:$0xf] }
 0x3fe   :  { %11822 = vst [vmem:[#allocation123_spill] sm:$0xff] %v10303_v2  ;;  %v6172_v0 = vld [vmem:[%s11336_s0 + $0x7f0] sm:$0xf0] }
 0x3ff   :  { %11825 = vst [vmem:[#allocation248_spill] sm:$0xff] %v10309_v61  ;;  %4352 = vmatpush.bf16.msrb.mxu0 %v6503_v54 }
 0x400   :  { %v3454_v50 = vpop.f32.mrf.mxu2  ;;  %v3119_v56 = vpop.f32.mrf.mxu0 }
 0x401   :  { %v3455_v52 = vadd.f32 %v3454_v50, %v3286_v14  ;;  %v3623_v30 = vpop.f32.mrf.mxu3  ;;  %v3288_v5 = vpop.f32.mrf.mxu1  ;;  %v3120_v36 = vadd.f32 %v3119_v56, %v11826_v34  ;;  %v6628_v34 = vld [vmem:[%s11335_s1 + $0x378] sm:$0xf0] }
 0x402   :  { %v6631_v4 = vor.u32 %v7062_v51, %v6628_v34  ;;  %v6692_v14 = vld [vmem:[%s11335_s1 + $0x3f8] sm:$0xf0]  ;;  %v6170_v34 = vld [vmem:[%s11336_s0 + $0x7d0] sm:$0xf] }
 0x403   :  { %v3624_v37 = vadd.f32 %v3623_v30, %v3455_v52  ;;  %3158 = vmatmul.bf16.gmra.mxu0 %v10303_v2  ;;  %v3289_v8 = vadd.f32 %v3288_v5, %v3120_v36  ;;  %v6695_v50 = vor.u32 %v7078_v46, %v6692_v14  ;;  %v6178_v46 = vld [vmem:[%s11336_s0 + $0x7d8] sm:$0xf] }
 0x404   :  { %3327 = vmatmul.bf16.gmra.mxu1 %v10305_v12  ;;  %4690 = vmatpush.bf16.msrb.mxu2 %v6631_v4  ;;  %v6564_v4 = vld [vmem:[%s11335_s1 + $0x2f8] sm:$0xf0]  ;;  %v6951_v14 = vld [vmem:[%s11336_s0 + $0x7f4] sm:$0xf0]  ;;  %v10373_v12 = vor.u32 %v6946_v57, %v6172_v0 }
 0x405   :  { %5114 = vst [vmem:[%s11338_s3 + $0x2b0] sm:$0xff] %v3624_v37  ;;  %3496 = vmatmul.bf16.gmra.mxu2 %v10307_v21  ;;  %4859 = vmatpush.bf16.msrb.mxu3 %v6695_v50  ;;  %v11827_v37 = vld [vmem:[#allocation134_spill] sm:$0xff]  ;;  %v6947_v50 = vld [vmem:[%s11336_s0 + $0x7dc] sm:$0xf]  ;;  %v10375_v2 = vor.u32 %v6951_v14, %v6178_v46 }
 0x406   :  { %3665 = vmatmul.bf16.gmra.mxu3 %v10309_v61  ;;  %v6950_v61 = vld [vmem:[%s11336_s0 + $0x7ec] sm:$0xf0]  ;;  %11829 = vst [vmem:[#allocation134_spill] sm:$0xff] %v10373_v12 }
 0x407   :  { %11830 = vst [vmem:[#allocation249_spill] sm:$0xff] %v10375_v2 }
 0x408   :  { %v3457_v24 = vpop.f32.mrf.mxu2  ;;  %v3121_v56 = vpop.f32.mrf.mxu0 }
 0x409   :  { %v3458_v52 = vadd.f32 %v3457_v24, %v3289_v8  ;;  %v3626_v30 = vpop.f32.mrf.mxu3  ;;  %v3290_v5 = vpop.f32.mrf.mxu1  ;;  %v3122_v51 = vadd.f32 %v3121_v56, %v11827_v37  ;;  %v7046_v8 = vld [vmem:[%s11335_s1 + $0x2f4] sm:$0xf]  ;;  %v10371_v56 = vor.u32 %v6950_v61, %v6170_v34 }
 0x40a   :  { %v6567_v24 = vor.u32 %v7046_v8, %v6564_v4  ;;  %v11832_v4 = vld [vmem:[#allocation135_spill] sm:$0xff] }
 0x40b   :  { %v3627_v36 = vadd.f32 %v3626_v30, %v3458_v52  ;;  %v3291_v54 = vadd.f32 %v3290_v5, %v3122_v51  ;;  %v6180_v52 = vld [vmem:[%s11336_s0 + $0x7f8] sm:$0xf0]  ;;  %11828 = vst [vmem:[#allocation129_spill] sm:$0xff] %v10371_v56 }
 0x40c   :  { %4521 = vmatpush.bf16.msrb.mxu1 %v6567_v24  ;;  %v10377_v51 = vor.u32 %v6947_v50, %v6180_v52 }
 0x40d   :  { %5116 = vst [vmem:[%s11338_s3 + $0x2c0] sm:$0xff] %v3627_v36 }
 0x40e   :  { %11831 = vst [vmem:[#allocation250_spill] sm:$0xff] %v10377_v51 }
 0x410   :  { %v3459_v30 = vpop.f32.mrf.mxu2  ;;  %v3124_v21 = vpop.f32.mrf.mxu0 }
 0x411   :  { %v3460_v36 = vadd.f32 %v3459_v30, %v3291_v54  ;;  %v3628_v37 = vpop.f32.mrf.mxu3  ;;  %v3293_v5 = vpop.f32.mrf.mxu1  ;;  %v3125_v38 = vadd.f32 %v3124_v21, %v11832_v4  ;;  %v11833_v21 = vld [vmem:[#allocation140_spill] sm:$0xff] }
 0x413   :  { %v3629_v8 = vadd.f32 %v3628_v37, %v3460_v36  ;;  %3163 = vmatmul.bf16.gmra.mxu0 %v10371_v56  ;;  %v3294_v61 = vadd.f32 %v3293_v5, %v3125_v38  ;;  %v11834_v38 = vld [vmem:[#allocation141_spill] sm:$0xff]  ;;  %v11895_v56 = vld [vmem:[#allocation50_spill] sm:$0xff] }
 0x414   :  { %3332 = vmatmul.bf16.gmra.mxu1 %v10373_v12  ;;  %v11894_v12 = vld [vmem:[#allocation49_spill] sm:$0xff] }
 0x415   :  { %5118 = vst [vmem:[%s11338_s3 + $0x2d0] sm:$0xff] %v3629_v8  ;;  %3501 = vmatmul.bf16.gmra.mxu2 %v10375_v2  ;;  %v11893_v2 = vld [vmem:[#allocation48_spill] sm:$0xff] }
 0x416   :  { %3670 = vmatmul.bf16.gmra.mxu3 %v10377_v51  ;;  %v11892_v51 = vld [vmem:[#allocation47_spill] sm:$0xff] }
 0x418   :  { %v3462_v34 = vpop.f32.mrf.mxu2  ;;  %v3126_v46 = vpop.f32.mrf.mxu0 }
 0x419   :  { %v3463_v57 = vadd.f32 %v3462_v34, %v3294_v61  ;;  %v3631_v0 = vpop.f32.mrf.mxu3  ;;  %v3295_v14 = vpop.f32.mrf.mxu1  ;;  %v3127_v54 = vadd.f32 %v3126_v46, %v11833_v21  ;;  %v11835_v61 = vld [vmem:[#allocation2_spill] sm:$0xff]  ;;  %v11836_v34 = vld [vmem:[#allocation3_spill] sm:$0xff] }
 0x41b   :  { %v3632_v24 = vadd.f32 %v3631_v0, %v3463_v57  ;;  %v3296_v50 = vadd.f32 %v3295_v14, %v3127_v54  ;;  %v11837_v57 = vld [vmem:[#allocation4_spill] sm:$0xff]  ;;  %v11838_v0 = vld [vmem:[#allocation5_spill] sm:$0xff] }
 0x41d   :  { %5120 = vst [vmem:[%s11338_s3 + $0x2e0] sm:$0xff] %v3632_v24 }
 0x420   :  { %v3464_v52 = vpop.f32.mrf.mxu2  ;;  %v3129_v37 = vpop.f32.mrf.mxu0 }
 0x421   :  { %v3465_v30 = vadd.f32 %v3464_v52, %v3296_v50  ;;  %v3633_v36 = vpop.f32.mrf.mxu3  ;;  %v3298_v8 = vpop.f32.mrf.mxu1  ;;  %v3130_v5 = vadd.f32 %v3129_v37, %v11834_v38 }
 0x423   :  { %v3634_v4 = vadd.f32 %v3633_v36, %v3465_v30  ;;  %3684 = vmatmul.bf16.vlgmr.msra.gmra.mxu0 %v11835_v61  ;;  %v3299_v46 = vadd.f32 %v3298_v8, %v3130_v5  ;;  %v11839_v30 = vld [vmem:[#allocation146_spill] sm:$0xff]  ;;  %v11840_v8 = vld [vmem:[#allocation147_spill] sm:$0xff] }
 0x424   :  { %3853 = vmatmul.bf16.vlgmr.msra.gmra.mxu1 %v11836_v34 }
 0x425   :  { %5122 = vst [vmem:[%s11338_s3 + $0x2f0] sm:$0xff] %v3634_v4  ;;  %4022 = vmatmul.bf16.vlgmr.msra.gmra.mxu2 %v11837_v57 }
 0x426   :  { %4191 = vmatmul.bf16.vlgmr.msra.gmra.mxu3 %v11838_v0 }
 0x428   :  { %v3467_v14 = vpop.f32.mrf.mxu2  ;;  %v3131_v54 = vpop.f32.mrf.mxu0 }
 0x429   :  { %v3468_v24 = vadd.f32 %v3467_v14, %v3299_v46  ;;  %v3636_v21 = vpop.f32.mrf.mxu3  ;;  %v3300_v50 = vpop.f32.mrf.mxu1  ;;  %v3132_v36 = vadd.f32 %v3131_v54, %v11839_v30  ;;  %v11841_v46 = vld [vmem:[#allocation6_spill] sm:$0xff]  ;;  %v11842_v14 = vld [vmem:[#allocation7_spill] sm:$0xff] }
 0x42b   :  { %v3637_v52 = vadd.f32 %v3636_v21, %v3468_v24  ;;  %v3301_v37 = vadd.f32 %v3300_v50, %v3132_v36  ;;  %v11843_v24 = vld [vmem:[#allocation8_spill] sm:$0xff]  ;;  %v11844_v21 = vld [vmem:[#allocation9_spill] sm:$0xff] }
 0x42d   :  { %5124 = vst [vmem:[%s11338_s3 + $0x300] sm:$0xff] %v3637_v52 }
 0x430   :  { %v3469_v4 = vpop.f32.mrf.mxu2  ;;  %v3134_v34 = vpop.f32.mrf.mxu0 }
 0x431   :  { %v3470_v38 = vadd.f32 %v3469_v4, %v3301_v37  ;;  %v3638_v61 = vpop.f32.mrf.mxu3  ;;  %v3303_v57 = vpop.f32.mrf.mxu1  ;;  %v3135_v5 = vadd.f32 %v3134_v34, %v11840_v8 }
 0x433   :  { %v3639_v0 = vadd.f32 %v3638_v61, %v3470_v38  ;;  %3689 = vmatmul.bf16.gmra.mxu0 %v11841_v46  ;;  %v3304_v54 = vadd.f32 %v3303_v57, %v3135_v5  ;;  %v11845_v38 = vld [vmem:[#allocation152_spill] sm:$0xff]  ;;  %v11846_v57 = vld [vmem:[#allocation153_spill] sm:$0xff] }
 0x434   :  { %3858 = vmatmul.bf16.gmra.mxu1 %v11842_v14 }
 0x435   :  { %5126 = vst [vmem:[%s11338_s3 + $0x310] sm:$0xff] %v3639_v0  ;;  %4027 = vmatmul.bf16.gmra.mxu2 %v11843_v24 }
 0x436   :  { %4196 = vmatmul.bf16.gmra.mxu3 %v11844_v21 }
 0x438   :  { %v3472_v50 = vpop.f32.mrf.mxu2  ;;  %v3136_v36 = vpop.f32.mrf.mxu0 }
 0x439   :  { %v3473_v52 = vadd.f32 %v3472_v50, %v3304_v54  ;;  %v3641_v30 = vpop.f32.mrf.mxu3  ;;  %v3305_v37 = vpop.f32.mrf.mxu1  ;;  %v3137_v61 = vadd.f32 %v3136_v36, %v11845_v38  ;;  %v11847_v54 = vld [vmem:[#allocation10_spill] sm:$0xff]  ;;  %v11848_v50 = vld [vmem:[#allocation11_spill] sm:$0xff] }
 0x43a   :  { %v7060_v36 = vld [vmem:[%s11335_s1 + $0x364] sm:$0xf] }
 0x43b   :  { %v3642_v4 = vadd.f32 %v3641_v30, %v3473_v52  ;;  %v3306_v34 = vadd.f32 %v3305_v37, %v3137_v61  ;;  %v11849_v52 = vld [vmem:[#allocation12_spill] sm:$0xff]  ;;  %v11850_v30 = vld [vmem:[#allocation13_spill] sm:$0xff]  ;;  %v6620_v37 = vld [vmem:[%s11335_s1 + $0x368] sm:$0xf0] }
 0x43c   :  { %v6623_v61 = vor.u32 %v7060_v36, %v6620_v37  ;;  %v7044_v36 = vld [vmem:[%s11335_s1 + $0x2e4] sm:$0xf]  ;;  %v6556_v37 = vld [vmem:[%s11335_s1 + $0x2e8] sm:$0xf0] }
 0x43d   :  { %5128 = vst [vmem:[%s11338_s3 + $0x320] sm:$0xff] %v3642_v4  ;;  %v7028_v4 = vld [vmem:[%s11335_s1 + $0x264] sm:$0xf] }
 0x43e   :  { %4691 = vmatpush.bf16.msrb.mxu2 %v6623_v61 }
 0x440   :  { %v3474_v0 = vpop.f32.mrf.mxu2  ;;  %v3139_v14 = vpop.f32.mrf.mxu0 }
 0x441   :  { %v3475_v8 = vadd.f32 %v3474_v0, %v3306_v34  ;;  %v3643_v46 = vpop.f32.mrf.mxu3  ;;  %v3308_v24 = vpop.f32.mrf.mxu1  ;;  %v3140_v5 = vadd.f32 %v3139_v14, %v11846_v57  ;;  %v6492_v34 = vld [vmem:[%s11335_s1 + $0x268] sm:$0xf0]  ;;  %v7076_v0 = vld [vmem:[%s11335_s1 + $0x3e4] sm:$0xf] }
 0x442   :  { %v6495_v14 = vor.u32 %v7028_v4, %v6492_v34  ;;  %v6559_v4 = vor.u32 %v7044_v36, %v6556_v37 }
 0x443   :  { %v3644_v21 = vadd.f32 %v3643_v46, %v3475_v8  ;;  %3694 = vmatmul.bf16.gmra.mxu0 %v11847_v54  ;;  %v3309_v38 = vadd.f32 %v3308_v24, %v3140_v5  ;;  %v6684_v8 = vld [vmem:[%s11335_s1 + $0x3e8] sm:$0xf0] }
 0x444   :  { %3863 = vmatmul.bf16.gmra.mxu1 %v11848_v50  ;;  %4353 = vmatpush.bf16.msrb.mxu0 %v6495_v14 }
 0x445   :  { %5130 = vst [vmem:[%s11338_s3 + $0x330] sm:$0xff] %v3644_v21  ;;  %4032 = vmatmul.bf16.gmra.mxu2 %v11849_v52  ;;  %v6687_v21 = vor.u32 %v7076_v0, %v6684_v8  ;;  %v11851_v52 = vld [vmem:[#allocation158_spill] sm:$0xff]  ;;  %4522 = vmatpush.bf16.msrb.mxu1 %v6559_v4 }
 0x446   :  { %4201 = vmatmul.bf16.gmra.mxu3 %v11850_v30 }
 0x447   :  { %4860 = vmatpush.bf16.msrb.mxu3 %v6687_v21  ;;  %v11852_v21 = vld [vmem:[#allocation159_spill] sm:$0xff] }
 0x448   :  { %v3477_v46 = vpop.f32.mrf.mxu2  ;;  %v3141_v50 = vpop.f32.mrf.mxu0 }
 0x449   :  { %v3478_v57 = vadd.f32 %v3477_v46, %v3309_v38  ;;  %v3646_v54 = vpop.f32.mrf.mxu3  ;;  %v3310_v24 = vpop.f32.mrf.mxu1  ;;  %v3142_v30 = vadd.f32 %v3141_v50, %v11851_v52  ;;  %v11854_v50 = vld [vmem:[#allocation15_spill] sm:$0xff] }
 0x44b   :  { %v3647_v5 = vadd.f32 %v3646_v54, %v3478_v57  ;;  %v3311_v38 = vadd.f32 %v3310_v24, %v3142_v30  ;;  %v11853_v54 = vld [vmem:[#allocation14_spill] sm:$0xff]  ;;  %v11856_v24 = vld [vmem:[#allocation17_spill] sm:$0xff] }
 0x44d   :  { %5132 = vst [vmem:[%s11338_s3 + $0x340] sm:$0xff] %v3647_v5  ;;  %v11855_v5 = vld [vmem:[#allocation16_spill] sm:$0xff] }
 0x450   :  { %v3479_v61 = vpop.f32.mrf.mxu2  ;;  %v3144_v8 = vpop.f32.mrf.mxu0 }
 0x451   :  { %v3480_v34 = vadd.f32 %v3479_v61, %v3311_v38  ;;  %v3648_v0 = vpop.f32.mrf.mxu3  ;;  %v3313_v46 = vpop.f32.mrf.mxu1  ;;  %v3145_v57 = vadd.f32 %v3144_v8, %v11852_v21 }
 0x453   :  { %v3649_v14 = vadd.f32 %v3648_v0, %v3480_v34  ;;  %3699 = vmatmul.bf16.gmra.mxu0 %v11853_v54  ;;  %v3314_v52 = vadd.f32 %v3313_v46, %v3145_v57  ;;  %v11857_v34 = vld [vmem:[#allocation164_spill] sm:$0xff]  ;;  %v11858_v46 = vld [vmem:[#allocation165_spill] sm:$0xff] }
 0x454   :  { %3868 = vmatmul.bf16.gmra.mxu1 %v11854_v50 }
 0x455   :  { %5134 = vst [vmem:[%s11338_s3 + $0x350] sm:$0xff] %v3649_v14  ;;  %4037 = vmatmul.bf16.gmra.mxu2 %v11855_v5 }
 0x456   :  { %4206 = vmatmul.bf16.gmra.mxu3 %v11856_v24 }
 0x458   :  { %v3482_v30 = vpop.f32.mrf.mxu2  ;;  %v3146_v4 = vpop.f32.mrf.mxu0 }
 0x459   :  { %v3483_v36 = vadd.f32 %v3482_v30, %v3314_v52  ;;  %v3651_v37 = vpop.f32.mrf.mxu3  ;;  %v3315_v38 = vpop.f32.mrf.mxu1  ;;  %v3147_v0 = vadd.f32 %v3146_v4, %v11857_v34  ;;  %v11859_v52 = vld [vmem:[#allocation18_spill] sm:$0xff]  ;;  %v11860_v30 = vld [vmem:[#allocation19_spill] sm:$0xff] }
 0x45b   :  { %v3652_v61 = vadd.f32 %v3651_v37, %v3483_v36  ;;  %v3316_v8 = vadd.f32 %v3315_v38, %v3147_v0  ;;  %v11861_v36 = vld [vmem:[#allocation20_spill] sm:$0xff]  ;;  %v11862_v37 = vld [vmem:[#allocation21_spill] sm:$0xff] }
 0x45d   :  { %5136 = vst [vmem:[%s11338_s3 + $0x360] sm:$0xff] %v3652_v61 }
 0x460   :  { %v3484_v14 = vpop.f32.mrf.mxu2  ;;  %v3149_v50 = vpop.f32.mrf.mxu0 }
 0x461   :  { %v3485_v21 = vadd.f32 %v3484_v14, %v3316_v8  ;;  %v3653_v54 = vpop.f32.mrf.mxu3  ;;  %v3318_v5 = vpop.f32.mrf.mxu1  ;;  %v3150_v57 = vadd.f32 %v3149_v50, %v11858_v46 }
 0x463   :  { %v3654_v24 = vadd.f32 %v3653_v54, %v3485_v21  ;;  %3704 = vmatmul.bf16.gmra.mxu0 %v11859_v52  ;;  %v3319_v4 = vadd.f32 %v3318_v5, %v3150_v57  ;;  %v11863_v21 = vld [vmem:[#allocation170_spill] sm:$0xff]  ;;  %v11864_v5 = vld [vmem:[#allocation171_spill] sm:$0xff] }
 0x464   :  { %3873 = vmatmul.bf16.gmra.mxu1 %v11860_v30 }
 0x465   :  { %5138 = vst [vmem:[%s11338_s3 + $0x370] sm:$0xff] %v3654_v24  ;;  %4042 = vmatmul.bf16.gmra.mxu2 %v11861_v36 }
 0x466   :  { %4211 = vmatmul.bf16.gmra.mxu3 %v11862_v37 }
 0x468   :  { %v3487_v38 = vpop.f32.mrf.mxu2  ;;  %v3151_v0 = vpop.f32.mrf.mxu0 }
 0x469   :  { %v3488_v61 = vadd.f32 %v3487_v38, %v3319_v4  ;;  %v3656_v34 = vpop.f32.mrf.mxu3  ;;  %v3320_v8 = vpop.f32.mrf.mxu1  ;;  %v3152_v54 = vadd.f32 %v3151_v0, %v11863_v21  ;;  %v11865_v4 = vld [vmem:[#allocation22_spill] sm:$0xff]  ;;  %v11866_v38 = vld [vmem:[#allocation23_spill] sm:$0xff] }
 0x46b   :  { %v3657_v14 = vadd.f32 %v3656_v34, %v3488_v61  ;;  %v3321_v50 = vadd.f32 %v3320_v8, %v3152_v54  ;;  %v11867_v61 = vld [vmem:[#allocation24_spill] sm:$0xff]  ;;  %v11868_v34 = vld [vmem:[#allocation25_spill] sm:$0xff] }
 0x46d   :  { %5140 = vst [vmem:[%s11338_s3 + $0x380] sm:$0xff] %v3657_v14 }
 0x470   :  { %v3489_v24 = vpop.f32.mrf.mxu2  ;;  %v3154_v30 = vpop.f32.mrf.mxu0 }
 0x471   :  { %v3490_v46 = vadd.f32 %v3489_v24, %v3321_v50  ;;  %v3658_v52 = vpop.f32.mrf.mxu3  ;;  %v3323_v36 = vpop.f32.mrf.mxu1  ;;  %v3155_v57 = vadd.f32 %v3154_v30, %v11864_v5 }
 0x473   :  { %v3659_v37 = vadd.f32 %v3658_v52, %v3490_v46  ;;  %3709 = vmatmul.bf16.gmra.mxu0 %v11865_v4  ;;  %v3324_v0 = vadd.f32 %v3323_v36, %v3155_v57  ;;  %v11869_v46 = vld [vmem:[#allocation176_spill] sm:$0xff]  ;;  %v11870_v36 = vld [vmem:[#allocation177_spill] sm:$0xff] }
 0x474   :  { %3878 = vmatmul.bf16.gmra.mxu1 %v11866_v38 }
 0x475   :  { %5142 = vst [vmem:[%s11338_s3 + $0x390] sm:$0xff] %v3659_v37  ;;  %4047 = vmatmul.bf16.gmra.mxu2 %v11867_v61 }
 0x476   :  { %4216 = vmatmul.bf16.gmra.mxu3 %v11868_v34 }
 0x478   :  { %v3492_v8 = vpop.f32.mrf.mxu2  ;;  %v3156_v54 = vpop.f32.mrf.mxu0 }
 0x479   :  { %v3493_v14 = vadd.f32 %v3492_v8, %v3324_v0  ;;  %v3661_v21 = vpop.f32.mrf.mxu3  ;;  %v3325_v50 = vpop.f32.mrf.mxu1  ;;  %v3157_v52 = vadd.f32 %v3156_v54, %v11869_v46  ;;  %v11871_v0 = vld [vmem:[#allocation26_spill] sm:$0xff]  ;;  %v11872_v8 = vld [vmem:[#allocation27_spill] sm:$0xff]  ;;  %v7058_v54 = vld [vmem:[%s11335_s1 + $0x354] sm:$0xf] }
 0x47b   :  { %v3662_v24 = vadd.f32 %v3661_v21, %v3493_v14  ;;  %v3326_v30 = vadd.f32 %v3325_v50, %v3157_v52  ;;  %v11873_v14 = vld [vmem:[#allocation28_spill] sm:$0xff]  ;;  %v11874_v21 = vld [vmem:[#allocation29_spill] sm:$0xff] }
 0x47c   :  { %v6612_v50 = vld [vmem:[%s11335_s1 + $0x358] sm:$0xf0] }
 0x47d   :  { %5144 = vst [vmem:[%s11338_s3 + $0x3a0] sm:$0xff] %v3662_v24  ;;  %v7026_v24 = vld [vmem:[%s11335_s1 + $0x254] sm:$0xf]  ;;  %v6615_v52 = vor.u32 %v7058_v54, %v6612_v50  ;;  %v6548_v54 = vld [vmem:[%s11335_s1 + $0x2d8] sm:$0xf0] }
 0x47f   :  { %4692 = vmatpush.bf16.msrb.mxu2 %v6615_v52 }
 0x480   :  { %v3494_v37 = vpop.f32.mrf.mxu2  ;;  %v3159_v38 = vpop.f32.mrf.mxu0 }
 0x481   :  { %v3495_v5 = vadd.f32 %v3494_v37, %v3326_v30  ;;  %v3663_v4 = vpop.f32.mrf.mxu3  ;;  %v3328_v61 = vpop.f32.mrf.mxu1  ;;  %v3160_v57 = vadd.f32 %v3159_v38, %v11870_v36  ;;  %v6484_v30 = vld [vmem:[%s11335_s1 + $0x258] sm:$0xf0]  ;;  %v7074_v37 = vld [vmem:[%s11335_s1 + $0x3d4] sm:$0xf] }
 0x482   :  { %v6487_v38 = vor.u32 %v7026_v24, %v6484_v30 }
 0x483   :  { %v3664_v34 = vadd.f32 %v3663_v4, %v3495_v5  ;;  %3714 = vmatmul.bf16.gmra.mxu0 %v11871_v0  ;;  %v3329_v46 = vadd.f32 %v3328_v61, %v3160_v57  ;;  %v6676_v5 = vld [vmem:[%s11335_s1 + $0x3d8] sm:$0xf0] }
 0x484   :  { %3883 = vmatmul.bf16.gmra.mxu1 %v11872_v8  ;;  %4354 = vmatpush.bf16.msrb.mxu0 %v6487_v38  ;;  %v11875_v38 = vld [vmem:[#allocation30_spill] sm:$0xff] }
 0x485   :  { %5146 = vst [vmem:[%s11338_s3 + $0x3b0] sm:$0xff] %v3664_v34  ;;  %4052 = vmatmul.bf16.gmra.mxu2 %v11873_v14  ;;  %v6679_v34 = vor.u32 %v7074_v37, %v6676_v5 }
 0x486   :  { %4221 = vmatmul.bf16.gmra.mxu3 %v11874_v21  ;;  %v7042_v21 = vld [vmem:[%s11335_s1 + $0x2d4] sm:$0xf] }
 0x487   :  { %4861 = vmatpush.bf16.msrb.mxu3 %v6679_v34  ;;  %v6551_v50 = vor.u32 %v7042_v21, %v6548_v54  ;;  %v11876_v34 = vld [vmem:[#allocation31_spill] sm:$0xff] }
 0x488   :  { %v3497_v4 = vpop.f32.mrf.mxu2  ;;  %v3161_v8 = vpop.f32.mrf.mxu0 }
 0x489   :  { %v3498_v36 = vadd.f32 %v3497_v4, %v3329_v46  ;;  %v3666_v0 = vpop.f32.mrf.mxu3  ;;  %v3330_v61 = vpop.f32.mrf.mxu1  ;;  %v3162_v14 = vadd.f32 %v3161_v8, %v9183_v1  ;;  %4523 = vmatpush.bf16.msrb.mxu1 %v6551_v50 }
 0x48b   :  { %v3667_v57 = vadd.f32 %v3666_v0, %v3498_v36  ;;  %v3331_v24 = vadd.f32 %v3330_v61, %v3162_v14  ;;  %v11877_v36 = vld [vmem:[#allocation32_spill] sm:$0xff]  ;;  %v11878_v0 = vld [vmem:[#allocation33_spill] sm:$0xff] }
 0x48d   :  { %5148 = vst [vmem:[%s11338_s3 + $0x3c0] sm:$0xff] %v3667_v57 }
 0x490   :  { %v3499_v46 = vpop.f32.mrf.mxu2  ;;  %v3164_v37 = vpop.f32.mrf.mxu0 }
 0x491   :  { %v3500_v52 = vadd.f32 %v3499_v46, %v3331_v24  ;;  %v3668_v30 = vpop.f32.mrf.mxu3  ;;  %v3333_v1 = vpop.f32.mrf.mxu1  ;;  %v3165_v4 = vadd.f32 %v3164_v37, %v9190_v9  ;;  %v7080_v24 = vld [vmem:[%s11337_s2] sm:$0x3] }
 0x492   :  { %v10538_v46 = vperm.slane %v7080_v24, 1 }
 0x493   :  { %v3669_v5 = vadd.f32 %v3668_v30, %v3500_v52  ;;  %3719 = vmatmul.bf16.gmra.mxu0 %v11875_v38  ;;  %v3334_v8 = vadd.f32 %v3333_v1, %v3165_v4 }
 0x494   :  { %3888 = vmatmul.bf16.gmra.mxu1 %v11876_v34 }
 0x495   :  { %5150 = vst [vmem:[%s11338_s3 + $0x3d0] sm:$0xff] %v3669_v5  ;;  %4057 = vmatmul.bf16.gmra.mxu2 %v11877_v36  ;;  %v11879_v36 = vld [vmem:[#allocation34_spill] sm:$0xff] }
 0x496   :  { %4226 = vmatmul.bf16.gmra.mxu3 %v11878_v0  ;;  %v11880_v0 = vld [vmem:[#allocation35_spill] sm:$0xff] }
 0x498   :  { %v3502_v61 = vpop.f32.mrf.mxu2  ;;  %v3166_v21 = vpop.f32.mrf.mxu0 }
 0x499   :  { %v3503_v57 = vadd.f32 %v3502_v61, %v3334_v8  ;;  %v3671_v14 = vpop.f32.mrf.mxu3  ;;  %v3335_v54 = vpop.f32.mrf.mxu1  ;;  %v3167_v9 = vadd.f32 %v3166_v21, %v9224_v39  ;;  %v11881_v8 = vld [vmem:[#allocation36_spill] sm:$0xff]  ;;  %v11882_v61 = vld [vmem:[#allocation37_spill] sm:$0xff] }
 0x49b   :  { %v3672_v50 = vadd.f32 %v3671_v14, %v3503_v57  ;;  %v3336_v52 = vadd.f32 %v3335_v54, %v3167_v9 }
 0x49d   :  { %5152 = vst [vmem:[%s11338_s3 + $0x3e0] sm:$0xff] %v3672_v50 }
 0x4a0   :  { %v3504_v30 = vpop.f32.mrf.mxu2  ;;  %v3685_v5 = vpop.f32.mrf.mxu0 }
 0x4a1   :  { %v3505_v37 = vadd.f32 %v3504_v30, %v3336_v52  ;;  %v3673_v1 = vpop.f32.mrf.mxu3  ;;  %v3686_v4 = vadd.f32 %v3685_v5, %v10538_v46  ;;  %v3854_v38 = vpop.f32.mrf.mxu1 }
 0x4a3   :  { %v3674_v34 = vadd.f32 %v3673_v1, %v3505_v37  ;;  %v3855_v39 = vadd.f32 %v3854_v38, %v3686_v4  ;;  %3724 = vmatmul.bf16.gmra.mxu0 %v11879_v36 }
 0x4a4   :  { %3893 = vmatmul.bf16.gmra.mxu1 %v11880_v0  ;;  %v11883_v0 = vld [vmem:[#allocation38_spill] sm:$0xff] }
 0x4a5   :  { %5154 = vst [vmem:[%s11338_s3 + $0x3f0] sm:$0xff] %v3674_v34  ;;  %4062 = vmatmul.bf16.gmra.mxu2 %v11881_v8  ;;  %v11885_v8 = vld [vmem:[#allocation40_spill] sm:$0xff] }
 0x4a6   :  { %4231 = vmatmul.bf16.gmra.mxu3 %v11882_v61  ;;  %v11886_v61 = vld [vmem:[#allocation41_spill] sm:$0xff] }
 0x4a8   :  { %v4023_v57 = vpop.f32.mrf.mxu2  ;;  %v3687_v54 = vpop.f32.mrf.mxu0 }
 0x4a9   :  { %v4024_v14 = vadd.f32 %v4023_v57, %v3855_v39  ;;  %v4192_v21 = vpop.f32.mrf.mxu3  ;;  %v3688_v50 = vadd.f32 %v3687_v54, %v10538_v46  ;;  %v3856_v9 = vpop.f32.mrf.mxu1  ;;  %v11884_v39 = vld [vmem:[#allocation39_spill] sm:$0xff] }
 0x4ab   :  { %v10549_v24 = vadd.f32 %v4192_v21, %v4024_v14  ;;  %v3857_v52 = vadd.f32 %v3856_v9, %v3688_v50 }
 0x4b0   :  { %v4025_v30 = vpop.f32.mrf.mxu2  ;;  %v3690_v5 = vpop.f32.mrf.mxu0 }
 0x4b1   :  { %v4026_v37 = vadd.f32 %v4025_v30, %v3857_v52  ;;  %v4194_v1 = vpop.f32.mrf.mxu3  ;;  %v3691_v4 = vadd.f32 %v3690_v5, %v10538_v46  ;;  %v3859_v38 = vpop.f32.mrf.mxu1 }
 0x4b3   :  { %v10552_v34 = vadd.f32 %v4194_v1, %v4026_v37  ;;  %v3860_v36 = vadd.f32 %v3859_v38, %v3691_v4  ;;  %3729 = vmatmul.bf16.gmra.mxu0 %v11883_v0 }
 0x4b4   :  { %3898 = vmatmul.bf16.gmra.mxu1 %v11884_v39 }
 0x4b5   :  { %4067 = vmatmul.bf16.gmra.mxu2 %v11885_v8 }
 0x4b6   :  { %4236 = vmatmul.bf16.gmra.mxu3 %v11886_v61  ;;  %v11887_v61 = vld [vmem:[#allocation42_spill] sm:$0xff] }
 0x4b8   :  { %v4028_v57 = vpop.f32.mrf.mxu2  ;;  %v3692_v54 = vpop.f32.mrf.mxu0 }
 0x4b9   :  { %v4029_v14 = vadd.f32 %v4028_v57, %v3860_v36  ;;  %v4197_v21 = vpop.f32.mrf.mxu3  ;;  %v3693_v50 = vadd.f32 %v3692_v54, %v10538_v46  ;;  %v3861_v9 = vpop.f32.mrf.mxu1  ;;  %v11888_v36 = vld [vmem:[#allocation43_spill] sm:$0xff]  ;;  %v11889_v57 = vld [vmem:[#allocation44_spill] sm:$0xff]  ;;  %v11890_v54 = vld [vmem:[#allocation45_spill] sm:$0xff] }
 0x4bb   :  { %v10559_v52 = vadd.f32 %v4197_v21, %v4029_v14  ;;  %v3862_v30 = vadd.f32 %v3861_v9, %v3693_v50  ;;  %v7056_v14 = vld [vmem:[%s11335_s1 + $0x344] sm:$0xf]  ;;  %v6604_v21 = vld [vmem:[%s11335_s1 + $0x348] sm:$0xf0] }
 0x4bc   :  { %v7024_v50 = vld [vmem:[%s11335_s1 + $0x244] sm:$0xf]  ;;  %v6607_v9 = vor.u32 %v7056_v14, %v6604_v21 }
 0x4bd   :  { %v7040_v21 = vld [vmem:[%s11335_s1 + $0x2c4] sm:$0xf] }
 0x4be   :  { %4693 = vmatpush.bf16.msrb.mxu2 %v6607_v9 }
 0x4c0   :  { %v4030_v37 = vpop.f32.mrf.mxu2  ;;  %v3695_v4 = vpop.f32.mrf.mxu0 }
 0x4c1   :  { %v4031_v1 = vadd.f32 %v4030_v37, %v3862_v30  ;;  %v4199_v5 = vpop.f32.mrf.mxu3  ;;  %v3696_v38 = vadd.f32 %v3695_v4, %v10538_v46  ;;  %v3864_v0 = vpop.f32.mrf.mxu1  ;;  %v6476_v30 = vld [vmem:[%s11335_s1 + $0x248] sm:$0xf0]  ;;  %v7072_v37 = vld [vmem:[%s11335_s1 + $0x3c4] sm:$0xf] }
 0x4c2   :  { %v6479_v4 = vor.u32 %v7024_v50, %v6476_v30  ;;  %v6540_v50 = vld [vmem:[%s11335_s1 + $0x2c8] sm:$0xf0] }
 0x4c3   :  { %v10562_v39 = vadd.f32 %v4199_v5, %v4031_v1  ;;  %v3865_v8 = vadd.f32 %v3864_v0, %v3696_v38  ;;  %3734 = vmatmul.bf16.gmra.mxu0 %v11887_v61  ;;  %v6668_v1 = vld [vmem:[%s11335_s1 + $0x3c8] sm:$0xf0] }
 0x4c4   :  { %3903 = vmatmul.bf16.gmra.mxu1 %v11888_v36  ;;  %v6671_v38 = vor.u32 %v7072_v37, %v6668_v1  ;;  %4355 = vmatpush.bf16.msrb.mxu0 %v6479_v4 }
 0x4c5   :  { %4072 = vmatmul.bf16.gmra.mxu2 %v11889_v57 }
 0x4c6   :  { %4241 = vmatmul.bf16.gmra.mxu3 %v11890_v54 }
 0x4c7   :  { %4862 = vmatpush.bf16.msrb.mxu3 %v6671_v38 }
 0x4c8   :  { %v4033_v5 = vpop.f32.mrf.mxu2  ;;  %v3697_v36 = vpop.f32.mrf.mxu0 }
 0x4c9   :  { %v4034_v0 = vadd.f32 %v4033_v5, %v3865_v8  ;;  %v4202_v61 = vpop.f32.mrf.mxu3  ;;  %v3698_v57 = vadd.f32 %v3697_v36, %v10538_v46  ;;  %v3866_v54 = vpop.f32.mrf.mxu1  ;;  %v6543_v8 = vor.u32 %v7040_v21, %v6540_v50  ;;  %v11891_v36 = vld [vmem:[#allocation46_spill] sm:$0xff] }
 0x4cb   :  { %v10587_v14 = vadd.f32 %v4202_v61, %v4034_v0  ;;  %v3867_v30 = vadd.f32 %v3866_v54, %v3698_v57  ;;  %4524 = vmatpush.bf16.msrb.mxu1 %v6543_v8 }
 0x4d0   :  { %v4035_v37 = vpop.f32.mrf.mxu2  ;;  %v3700_v5 = vpop.f32.mrf.mxu0 }
 0x4d1   :  { %v4036_v9 = vadd.f32 %v4035_v37, %v3867_v30  ;;  %v4204_v1 = vpop.f32.mrf.mxu3  ;;  %v3701_v4 = vadd.f32 %v3700_v5, %v10538_v46  ;;  %v3869_v38 = vpop.f32.mrf.mxu1 }
 0x4d3   :  { %v10596_v0 = vadd.f32 %v4204_v1, %v4036_v9  ;;  %v3870_v61 = vadd.f32 %v3869_v38, %v3701_v4  ;;  %3739 = vmatmul.bf16.gmra.mxu0 %v11891_v36 }
 0x4d4   :  { %3908 = vmatmul.bf16.gmra.mxu1 %v11892_v51 }
 0x4d5   :  { %4077 = vmatmul.bf16.gmra.mxu2 %v11893_v2 }
 0x4d6   :  { %4246 = vmatmul.bf16.gmra.mxu3 %v11894_v12 }
 0x4d8   :  { %v4038_v57 = vpop.f32.mrf.mxu2  ;;  %v3702_v50 = vpop.f32.mrf.mxu0 }
 0x4d9   :  { %v4039_v54 = vadd.f32 %v4038_v57, %v3870_v61  ;;  %v4207_v21 = vpop.f32.mrf.mxu3  ;;  %v3703_v30 = vadd.f32 %v3702_v50, %v10538_v46  ;;  %v3871_v8 = vpop.f32.mrf.mxu1  ;;  %v11896_v61 = vld [vmem:[#allocation51_spill] sm:$0xff]  ;;  %v11897_v57 = vld [vmem:[#allocation52_spill] sm:$0xff]  ;;  %v11898_v50 = vld [vmem:[#allocation53_spill] sm:$0xff] }
 0x4db   :  { %v10603_v37 = vadd.f32 %v4207_v21, %v4039_v54  ;;  %v3872_v9 = vadd.f32 %v3871_v8, %v3703_v30 }
 0x4e0   :  { %v4040_v1 = vpop.f32.mrf.mxu2  ;;  %v3705_v38 = vpop.f32.mrf.mxu0 }
 0x4e1   :  { %v4041_v5 = vadd.f32 %v4040_v1, %v3872_v9  ;;  %v4209_v4 = vpop.f32.mrf.mxu3  ;;  %v3706_v51 = vadd.f32 %v3705_v38, %v10538_v46  ;;  %v3874_v36 = vpop.f32.mrf.mxu1 }
 0x4e3   :  { %v10606_v2 = vadd.f32 %v4209_v4, %v4041_v5  ;;  %v3875_v12 = vadd.f32 %v3874_v36, %v3706_v51  ;;  %3744 = vmatmul.bf16.gmra.mxu0 %v11895_v56 }
 0x4e4   :  { %3913 = vmatmul.bf16.gmra.mxu1 %v11896_v61 }
 0x4e5   :  { %4082 = vmatmul.bf16.gmra.mxu2 %v11897_v57 }
 0x4e6   :  { %4251 = vmatmul.bf16.gmra.mxu3 %v11898_v50 }
 0x4e8   :  { %v4043_v54 = vpop.f32.mrf.mxu2  ;;  %v3707_v8 = vpop.f32.mrf.mxu0 }
 0x4e9   :  { %v4044_v21 = vadd.f32 %v4043_v54, %v3875_v12  ;;  %v4212_v30 = vpop.f32.mrf.mxu3  ;;  %v3708_v9 = vadd.f32 %v3707_v8, %v10538_v46  ;;  %v3876_v1 = vpop.f32.mrf.mxu1  ;;  %v11900_v12 = vld [vmem:[#allocation55_spill] sm:$0xff]  ;;  %v11901_v54 = vld [vmem:[#allocation56_spill] sm:$0xff]  ;;  %v11902_v8 = vld [vmem:[#allocation57_spill] sm:$0xff] }
 0x4eb   :  { %v10613_v38 = vadd.f32 %v4212_v30, %v4044_v21  ;;  %v3877_v5 = vadd.f32 %v3876_v1, %v3708_v9 }
 0x4f0   :  { %v4045_v4 = vpop.f32.mrf.mxu2  ;;  %v3710_v56 = vpop.f32.mrf.mxu0 }
 0x4f1   :  { %v4046_v51 = vadd.f32 %v4045_v4, %v3877_v5  ;;  %v4214_v36 = vpop.f32.mrf.mxu3  ;;  %v3711_v61 = vadd.f32 %v3710_v56, %v10538_v46  ;;  %v3879_v19 = vpop.f32.mrf.mxu1 }
 0x4f3   :  { %v10616_v57 = vadd.f32 %v4214_v36, %v4046_v51  ;;  %v3880_v50 = vadd.f32 %v3879_v19, %v3711_v61  ;;  %3749 = vmatmul.bf16.gmra.mxu0 %v11899_v22 }
 0x4f4   :  { %3918 = vmatmul.bf16.gmra.mxu1 %v11900_v12 }
 0x4f5   :  { %4087 = vmatmul.bf16.gmra.mxu2 %v11901_v54 }
 0x4f6   :  { %4256 = vmatmul.bf16.gmra.mxu3 %v11902_v8 }
 0x4f8   :  { %v4048_v21 = vpop.f32.mrf.mxu2  ;;  %v3712_v1 = vpop.f32.mrf.mxu0 }
 0x4f9   :  { %v4049_v30 = vadd.f32 %v4048_v21, %v3880_v50  ;;  %v4217_v9 = vpop.f32.mrf.mxu3  ;;  %v3713_v5 = vadd.f32 %v3712_v1, %v10538_v46  ;;  %v3881_v4 = vpop.f32.mrf.mxu1  ;;  %v11904_v50 = vld [vmem:[#allocation59_spill] sm:$0xff]  ;;  %v11905_v21 = vld [vmem:[#allocation60_spill] sm:$0xff]  ;;  %v11906_v1 = vld [vmem:[#allocation61_spill] sm:$0xff] }
 0x4fb   :  { %v10623_v56 = vadd.f32 %v4217_v9, %v4049_v30  ;;  %v3882_v51 = vadd.f32 %v3881_v4, %v3713_v5  ;;  %v7054_v30 = vld [vmem:[%s11335_s1 + $0x334] sm:$0xf]  ;;  %v6596_v9 = vld [vmem:[%s11335_s1 + $0x338] sm:$0xf0] }
 0x4fc   :  { %v6599_v5 = vor.u32 %v7054_v30, %v6596_v9  ;;  %v7070_v4 = vld [vmem:[%s11335_s1 + $0x3b4] sm:$0xf] }
 0x4fd   :  { %v7038_v9 = vld [vmem:[%s11335_s1 + $0x2b4] sm:$0xf] }
 0x4fe   :  { %4694 = vmatpush.bf16.msrb.mxu2 %v6599_v5 }
 0x500   :  { %v4050_v36 = vpop.f32.mrf.mxu2  ;;  %v3715_v22 = vpop.f32.mrf.mxu0 }
 0x501   :  { %v4051_v19 = vadd.f32 %v4050_v36, %v3882_v51  ;;  %v4219_v61 = vpop.f32.mrf.mxu3  ;;  %v3716_v12 = vadd.f32 %v3715_v22, %v10538_v46  ;;  %v3884_v60 = vpop.f32.mrf.mxu1  ;;  %v6660_v51 = vld [vmem:[%s11335_s1 + $0x3b8] sm:$0xf0] }
 0x503   :  { %v10626_v54 = vadd.f32 %v4219_v61, %v4051_v19  ;;  %v3885_v8 = vadd.f32 %v3884_v60, %v3716_v12  ;;  %3754 = vmatmul.bf16.gmra.mxu0 %v11903_v32  ;;  %v7022_v60 = vld [vmem:[%s11335_s1 + $0x234] sm:$0xf]  ;;  %v6468_v32 = vld [vmem:[%s11335_s1 + $0x238] sm:$0xf0]  ;;  %v6663_v61 = vor.u32 %v7070_v4, %v6660_v51 }
 0x504   :  { %3923 = vmatmul.bf16.gmra.mxu1 %v11904_v50  ;;  %v6471_v19 = vor.u32 %v7022_v60, %v6468_v32  ;;  %v6532_v60 = vld [vmem:[%s11335_s1 + $0x2b8] sm:$0xf0] }
 0x505   :  { %4092 = vmatmul.bf16.gmra.mxu2 %v11905_v21  ;;  %4863 = vmatpush.bf16.msrb.mxu3 %v6663_v61 }
 0x506   :  { %4261 = vmatmul.bf16.gmra.mxu3 %v11906_v1  ;;  %4356 = vmatpush.bf16.msrb.mxu0 %v6471_v19 }
 0x508   :  { %v4053_v36 = vpop.f32.mrf.mxu2  ;;  %v3717_v50 = vpop.f32.mrf.mxu0 }
 0x509   :  { %v4054_v22 = vadd.f32 %v4053_v36, %v3885_v8  ;;  %v4222_v12 = vpop.f32.mrf.mxu3  ;;  %v3718_v21 = vadd.f32 %v3717_v50, %v10538_v46  ;;  %v3886_v1 = vpop.f32.mrf.mxu1  ;;  %v6535_v8 = vor.u32 %v7038_v9, %v6532_v60  ;;  %v11907_v50 = vld [vmem:[#allocation62_spill] sm:$0xff] }
 0x50b   :  { %v10651_v30 = vadd.f32 %v4222_v12, %v4054_v22  ;;  %v3887_v32 = vadd.f32 %v3886_v1, %v3718_v21  ;;  %4525 = vmatpush.bf16.msrb.mxu1 %v6535_v8 }
 0x510   :  { %v4055_v4 = vpop.f32.mrf.mxu2  ;;  %v3720_v36 = vpop.f32.mrf.mxu0 }
 0x511   :  { %v4056_v5 = vadd.f32 %v4055_v4, %v3887_v32  ;;  %v4224_v51 = vpop.f32.mrf.mxu3  ;;  %v3721_v19 = vadd.f32 %v3720_v36, %v10538_v46  ;;  %v3889_v61 = vpop.f32.mrf.mxu1 }
 0x513   :  { %v10660_v22 = vadd.f32 %v4224_v51, %v4056_v5  ;;  %v3890_v12 = vadd.f32 %v3889_v61, %v3721_v19  ;;  %3759 = vmatmul.bf16.gmra.mxu0 %v11907_v50 }
 0x514   :  { %3928 = vmatmul.bf16.gmra.mxu1 %v11908_v47 }
 0x515   :  { %4097 = vmatmul.bf16.gmra.mxu2 %v11909_v49 }
 0x516   :  { %4266 = vmatmul.bf16.gmra.mxu3 %v11910_v16 }
 0x518   :  { %v4058_v21 = vpop.f32.mrf.mxu2  ;;  %v3722_v60 = vpop.f32.mrf.mxu0 }
 0x519   :  { %v4059_v1 = vadd.f32 %v4058_v21, %v3890_v12  ;;  %v4227_v9 = vpop.f32.mrf.mxu3  ;;  %v3723_v32 = vadd.f32 %v3722_v60, %v10538_v46  ;;  %v3891_v8 = vpop.f32.mrf.mxu1  ;;  %v11912_v12 = vld [vmem:[#allocation67_spill] sm:$0xff]  ;;  %v11913_v21 = vld [vmem:[#allocation68_spill] sm:$0xff]  ;;  %v11914_v60 = vld [vmem:[#allocation69_spill] sm:$0xff] }
 0x51b   :  { %v10667_v4 = vadd.f32 %v4227_v9, %v4059_v1  ;;  %v3892_v5 = vadd.f32 %v3891_v8, %v3723_v32 }
 0x520   :  { %v4060_v51 = vpop.f32.mrf.mxu2  ;;  %v3725_v61 = vpop.f32.mrf.mxu0 }
 0x521   :  { %v4061_v36 = vadd.f32 %v4060_v51, %v3892_v5  ;;  %v4229_v19 = vpop.f32.mrf.mxu3  ;;  %v3726_v47 = vadd.f32 %v3725_v61, %v10538_v46  ;;  %v3894_v50 = vpop.f32.mrf.mxu1 }
 0x523   :  { %v10670_v49 = vadd.f32 %v4229_v19, %v4061_v36  ;;  %v3895_v16 = vadd.f32 %v3894_v50, %v3726_v47  ;;  %3764 = vmatmul.bf16.gmra.mxu0 %v11911_v6 }
 0x524   :  { %3933 = vmatmul.bf16.gmra.mxu1 %v11912_v12 }
 0x525   :  { %4102 = vmatmul.bf16.gmra.mxu2 %v11913_v21 }
 0x526   :  { %4271 = vmatmul.bf16.gmra.mxu3 %v11914_v60 }
 0x528   :  { %v4063_v1 = vpop.f32.mrf.mxu2  ;;  %v3727_v8 = vpop.f32.mrf.mxu0 }
 0x529   :  { %v4064_v9 = vadd.f32 %v4063_v1, %v3895_v16  ;;  %v4232_v32 = vpop.f32.mrf.mxu3  ;;  %v3728_v5 = vadd.f32 %v3727_v8, %v10538_v46  ;;  %v3896_v51 = vpop.f32.mrf.mxu1  ;;  %v11916_v16 = vld [vmem:[#allocation71_spill] sm:$0xff]  ;;  %v11917_v1 = vld [vmem:[#allocation72_spill] sm:$0xff]  ;;  %v11918_v8 = vld [vmem:[#allocation73_spill] sm:$0xff] }
 0x52b   :  { %v10677_v61 = vadd.f32 %v4232_v32, %v4064_v9  ;;  %v3897_v36 = vadd.f32 %v3896_v51, %v3728_v5 }
 0x530   :  { %v4065_v19 = vpop.f32.mrf.mxu2  ;;  %v3730_v6 = vpop.f32.mrf.mxu0 }
 0x531   :  { %v4066_v47 = vadd.f32 %v4065_v19, %v3897_v36  ;;  %v4234_v50 = vpop.f32.mrf.mxu3  ;;  %v3731_v12 = vadd.f32 %v3730_v6, %v10538_v46  ;;  %v3899_v63 = vpop.f32.mrf.mxu1 }
 0x533   :  { %v10680_v21 = vadd.f32 %v4234_v50, %v4066_v47  ;;  %v3900_v60 = vadd.f32 %v3899_v63, %v3731_v12  ;;  %3769 = vmatmul.bf16.gmra.mxu0 %v11915_v25 }
 0x534   :  { %3938 = vmatmul.bf16.gmra.mxu1 %v11916_v16 }
 0x535   :  { %4107 = vmatmul.bf16.gmra.mxu2 %v11917_v1 }
 0x536   :  { %4276 = vmatmul.bf16.gmra.mxu3 %v11918_v8 }
 0x538   :  { %v4068_v9 = vpop.f32.mrf.mxu2  ;;  %v3732_v51 = vpop.f32.mrf.mxu0 }
 0x539   :  { %v4069_v32 = vadd.f32 %v4068_v9, %v3900_v60  ;;  %v4237_v5 = vpop.f32.mrf.mxu3  ;;  %v3733_v36 = vadd.f32 %v3732_v51, %v10538_v46  ;;  %v3901_v19 = vpop.f32.mrf.mxu1  ;;  %v11920_v60 = vld [vmem:[#allocation75_spill] sm:$0xff]  ;;  %v11921_v9 = vld [vmem:[#allocation76_spill] sm:$0xff]  ;;  %v11922_v51 = vld [vmem:[#allocation77_spill] sm:$0xff] }
 0x53b   :  { %v10687_v6 = vadd.f32 %v4237_v5, %v4069_v32  ;;  %v3902_v47 = vadd.f32 %v3901_v19, %v3733_v36  ;;  %v7052_v32 = vld [vmem:[%s11335_s1 + $0x324] sm:$0xf]  ;;  %v6588_v5 = vld [vmem:[%s11335_s1 + $0x328] sm:$0xf0] }
 0x53c   :  { %v6591_v36 = vor.u32 %v7052_v32, %v6588_v5  ;;  %v7068_v19 = vld [vmem:[%s11335_s1 + $0x3a4] sm:$0xf] }
 0x53d   :  { %v7036_v5 = vld [vmem:[%s11335_s1 + $0x2a4] sm:$0xf] }
 0x53e   :  { %4695 = vmatpush.bf16.msrb.mxu2 %v6591_v36 }
 0x540   :  { %v4070_v50 = vpop.f32.mrf.mxu2  ;;  %v3735_v25 = vpop.f32.mrf.mxu0 }
 0x541   :  { %v4071_v63 = vadd.f32 %v4070_v50, %v3902_v47  ;;  %v4239_v12 = vpop.f32.mrf.mxu3  ;;  %v3736_v16 = vadd.f32 %v3735_v25, %v10538_v46  ;;  %v3904_v42 = vpop.f32.mrf.mxu1  ;;  %v6652_v47 = vld [vmem:[%s11335_s1 + $0x3a8] sm:$0xf0] }
 0x543   :  { %v10690_v1 = vadd.f32 %v4239_v12, %v4071_v63  ;;  %v3905_v8 = vadd.f32 %v3904_v42, %v3736_v16  ;;  %3774 = vmatmul.bf16.gmra.mxu0 %v11919_v11  ;;  %v7020_v42 = vld [vmem:[%s11335_s1 + $0x224] sm:$0xf]  ;;  %v6460_v11 = vld [vmem:[%s11335_s1 + $0x228] sm:$0xf0]  ;;  %v6655_v12 = vor.u32 %v7068_v19, %v6652_v47 }
 0x544   :  { %3943 = vmatmul.bf16.gmra.mxu1 %v11920_v60  ;;  %v6463_v63 = vor.u32 %v7020_v42, %v6460_v11  ;;  %v6524_v42 = vld [vmem:[%s11335_s1 + $0x2a8] sm:$0xf0] }
 0x545   :  { %4112 = vmatmul.bf16.gmra.mxu2 %v11921_v9  ;;  %4864 = vmatpush.bf16.msrb.mxu3 %v6655_v12 }
 0x546   :  { %4281 = vmatmul.bf16.gmra.mxu3 %v11922_v51  ;;  %4357 = vmatpush.bf16.msrb.mxu0 %v6463_v63 }
 0x548   :  { %v4073_v50 = vpop.f32.mrf.mxu2  ;;  %v3737_v60 = vpop.f32.mrf.mxu0 }
 0x549   :  { %v4074_v25 = vadd.f32 %v4073_v50, %v3905_v8  ;;  %v4242_v16 = vpop.f32.mrf.mxu3  ;;  %v3738_v9 = vadd.f32 %v3737_v60, %v10538_v46  ;;  %v3906_v51 = vpop.f32.mrf.mxu1  ;;  %v6527_v8 = vor.u32 %v7036_v5, %v6524_v42  ;;  %v11923_v60 = vld [vmem:[#allocation78_spill] sm:$0xff] }
 0x54b   :  { %v10715_v32 = vadd.f32 %v4242_v16, %v4074_v25  ;;  %v3907_v11 = vadd.f32 %v3906_v51, %v3738_v9  ;;  %4526 = vmatpush.bf16.msrb.mxu1 %v6527_v8 }
 0x550   :  { %v4075_v19 = vpop.f32.mrf.mxu2  ;;  %v3740_v50 = vpop.f32.mrf.mxu0 }
 0x551   :  { %v4076_v36 = vadd.f32 %v4075_v19, %v3907_v11  ;;  %v4244_v47 = vpop.f32.mrf.mxu3  ;;  %v3741_v63 = vadd.f32 %v3740_v50, %v10538_v46  ;;  %v3909_v12 = vpop.f32.mrf.mxu1 }
 0x553   :  { %v10724_v25 = vadd.f32 %v4244_v47, %v4076_v36  ;;  %v3910_v16 = vadd.f32 %v3909_v12, %v3741_v63  ;;  %3779 = vmatmul.bf16.gmra.mxu0 %v11923_v60 }
 0x554   :  { %3948 = vmatmul.bf16.gmra.mxu1 %v11924_v59 }
 0x555   :  { %4117 = vmatmul.bf16.gmra.mxu2 %v11925_v20 }
 0x556   :  { %4286 = vmatmul.bf16.gmra.mxu3 %v11926_v10 }
 0x558   :  { %v4078_v9 = vpop.f32.mrf.mxu2  ;;  %v3742_v42 = vpop.f32.mrf.mxu0 }
 0x559   :  { %v4079_v51 = vadd.f32 %v4078_v9, %v3910_v16  ;;  %v4247_v5 = vpop.f32.mrf.mxu3  ;;  %v3743_v11 = vadd.f32 %v3742_v42, %v10538_v46  ;;  %v3911_v8 = vpop.f32.mrf.mxu1  ;;  %v11929_v16 = vld [vmem:[#allocation83_spill] sm:$0xff]  ;;  %v11930_v9 = vld [vmem:[#allocation84_spill] sm:$0xff]  ;;  %v11931_v42 = vld [vmem:[#allocation85_spill] sm:$0xff] }
 0x55b   :  { %v10731_v19 = vadd.f32 %v4247_v5, %v4079_v51  ;;  %v3912_v36 = vadd.f32 %v3911_v8, %v3743_v11 }
 0x560   :  { %v4080_v47 = vpop.f32.mrf.mxu2  ;;  %v3745_v12 = vpop.f32.mrf.mxu0 }
 0x561   :  { %v4081_v50 = vadd.f32 %v4080_v47, %v3912_v36  ;;  %v4249_v63 = vpop.f32.mrf.mxu3  ;;  %v3746_v59 = vadd.f32 %v3745_v12, %v10538_v46  ;;  %v3914_v60 = vpop.f32.mrf.mxu1 }
 0x563   :  { %v10734_v20 = vadd.f32 %v4249_v63, %v4081_v50  ;;  %v3915_v10 = vadd.f32 %v3914_v60, %v3746_v59  ;;  %3784 = vmatmul.bf16.gmra.mxu0 %v11928_v58 }
 0x564   :  { %3953 = vmatmul.bf16.gmra.mxu1 %v11929_v16 }
 0x565   :  { %11927 = vst [vmem:[#allocation135_spill] sm:$0xff] %v10734_v20  ;;  %4122 = vmatmul.bf16.gmra.mxu2 %v11930_v9 }
 0x566   :  { %4291 = vmatmul.bf16.gmra.mxu3 %v11931_v42 }
 0x568   :  { %v4083_v51 = vpop.f32.mrf.mxu2  ;;  %v3747_v8 = vpop.f32.mrf.mxu0 }
 0x569   :  { %v4084_v5 = vadd.f32 %v4083_v51, %v3915_v10  ;;  %v4252_v11 = vpop.f32.mrf.mxu3  ;;  %v3748_v36 = vadd.f32 %v3747_v8, %v10538_v46  ;;  %v3916_v47 = vpop.f32.mrf.mxu1  ;;  %v11935_v10 = vld [vmem:[#allocation87_spill] sm:$0xff]  ;;  %v11936_v51 = vld [vmem:[#allocation88_spill] sm:$0xff]  ;;  %v11937_v8 = vld [vmem:[#allocation89_spill] sm:$0xff] }
 0x56b   :  { %v10741_v12 = vadd.f32 %v4252_v11, %v4084_v5  ;;  %v3917_v50 = vadd.f32 %v3916_v47, %v3748_v36 }
 0x56d   :  { %11932 = vst [vmem:[#allocation140_spill] sm:$0xff] %v10741_v12  ;;  %v11940_v12 = vld [vmem:[#allocation90_spill] sm:$0xff] }
 0x570   :  { %v4085_v63 = vpop.f32.mrf.mxu2  ;;  %v3750_v58 = vpop.f32.mrf.mxu0 }
 0x571   :  { %v4086_v59 = vadd.f32 %v4085_v63, %v3917_v50  ;;  %v4254_v60 = vpop.f32.mrf.mxu3  ;;  %v3751_v16 = vadd.f32 %v3750_v58, %v10538_v46  ;;  %v3919_v20 = vpop.f32.mrf.mxu1 }
 0x573   :  { %v10744_v9 = vadd.f32 %v4254_v60, %v4086_v59  ;;  %v3920_v42 = vadd.f32 %v3919_v20, %v3751_v16  ;;  %3789 = vmatmul.bf16.gmra.mxu0 %v11934_v62 }
 0x574   :  { %3958 = vmatmul.bf16.gmra.mxu1 %v11935_v10 }
 0x575   :  { %11933 = vst [vmem:[#allocation141_spill] sm:$0xff] %v10744_v9  ;;  %4127 = vmatmul.bf16.gmra.mxu2 %v11936_v51 }
 0x576   :  { %4296 = vmatmul.bf16.gmra.mxu3 %v11937_v8 }
 0x578   :  { %v4088_v5 = vpop.f32.mrf.mxu2  ;;  %v3752_v47 = vpop.f32.mrf.mxu0 }
 0x579   :  { %v4089_v11 = vadd.f32 %v4088_v5, %v3920_v42  ;;  %v4257_v36 = vpop.f32.mrf.mxu3  ;;  %v3753_v50 = vadd.f32 %v3752_v47, %v10538_v46  ;;  %v3921_v63 = vpop.f32.mrf.mxu1  ;;  %v11941_v42 = vld [vmem:[#allocation91_spill] sm:$0xff]  ;;  %v11942_v5 = vld [vmem:[#allocation92_spill] sm:$0xff]  ;;  %v11943_v47 = vld [vmem:[#allocation93_spill] sm:$0xff] }
 0x57b   :  { %v10751_v58 = vadd.f32 %v4257_v36, %v4089_v11  ;;  %v3922_v59 = vadd.f32 %v3921_v63, %v3753_v50  ;;  %v7050_v11 = vld [vmem:[%s11335_s1 + $0x314] sm:$0xf]  ;;  %v6580_v36 = vld [vmem:[%s11335_s1 + $0x318] sm:$0xf0] }
 0x57c   :  { %v6583_v50 = vor.u32 %v7050_v11, %v6580_v36  ;;  %v7066_v63 = vld [vmem:[%s11335_s1 + $0x394] sm:$0xf] }
 0x57d   :  { %11938 = vst [vmem:[#allocation2_spill] sm:$0xff] %v10751_v58  ;;  %v7034_v36 = vld [vmem:[%s11335_s1 + $0x294] sm:$0xf]  ;;  %v11949_v58 = vld [vmem:[#allocation97_spill] sm:$0xff] }
 0x57e   :  { %4696 = vmatpush.bf16.msrb.mxu2 %v6583_v50 }
 0x580   :  { %v4090_v60 = vpop.f32.mrf.mxu2  ;;  %v3755_v62 = vpop.f32.mrf.mxu0 }
 0x581   :  { %v4091_v20 = vadd.f32 %v4090_v60, %v3922_v59  ;;  %v4259_v16 = vpop.f32.mrf.mxu3  ;;  %v3756_v10 = vadd.f32 %v3755_v62, %v10538_v46  ;;  %v3924_v9 = vpop.f32.mrf.mxu1  ;;  %v6644_v59 = vld [vmem:[%s11335_s1 + $0x398] sm:$0xf0] }
 0x583   :  { %v10754_v51 = vadd.f32 %v4259_v16, %v4091_v20  ;;  %v3925_v8 = vadd.f32 %v3924_v9, %v3756_v10  ;;  %3794 = vmatmul.bf16.gmra.mxu0 %v11940_v12  ;;  %v7018_v9 = vld [vmem:[%s11335_s1 + $0x214] sm:$0xf]  ;;  %v6452_v12 = vld [vmem:[%s11335_s1 + $0x218] sm:$0xf0]  ;;  %v6647_v16 = vor.u32 %v7066_v63, %v6644_v59 }
 0x584   :  { %3963 = vmatmul.bf16.gmra.mxu1 %v11941_v42  ;;  %v6455_v20 = vor.u32 %v7018_v9, %v6452_v12  ;;  %v6516_v9 = vld [vmem:[%s11335_s1 + $0x298] sm:$0xf0] }
 0x585   :  { %11939 = vst [vmem:[#allocation3_spill] sm:$0xff] %v10754_v51  ;;  %4132 = vmatmul.bf16.gmra.mxu2 %v11942_v5  ;;  %4865 = vmatpush.bf16.msrb.mxu3 %v6647_v16  ;;  %v11948_v51 = vld [vmem:[#allocation96_spill] sm:$0xff] }
 0x586   :  { %4301 = vmatmul.bf16.gmra.mxu3 %v11943_v47  ;;  %4358 = vmatpush.bf16.msrb.mxu0 %v6455_v20 }
 0x588   :  { %v4093_v60 = vpop.f32.mrf.mxu2  ;;  %v3757_v42 = vpop.f32.mrf.mxu0 }
 0x589   :  { %v4094_v62 = vadd.f32 %v4093_v60, %v3925_v8  ;;  %v4262_v10 = vpop.f32.mrf.mxu3  ;;  %v3758_v5 = vadd.f32 %v3757_v42, %v10538_v46  ;;  %v3926_v47 = vpop.f32.mrf.mxu1  ;;  %v6519_v8 = vor.u32 %v7034_v36, %v6516_v9  ;;  %v11946_v42 = vld [vmem:[#allocation94_spill] sm:$0xff] }
 0x58b   :  { %v10779_v11 = vadd.f32 %v4262_v10, %v4094_v62  ;;  %v3927_v12 = vadd.f32 %v3926_v47, %v3758_v5  ;;  %4527 = vmatpush.bf16.msrb.mxu1 %v6519_v8 }
 0x58d   :  { %11944 = vst [vmem:[#allocation4_spill] sm:$0xff] %v10779_v11  ;;  %v11947_v11 = vld [vmem:[#allocation95_spill] sm:$0xff] }
 0x590   :  { %v4095_v63 = vpop.f32.mrf.mxu2  ;;  %v3760_v60 = vpop.f32.mrf.mxu0 }
 0x591   :  { %v4096_v50 = vadd.f32 %v4095_v63, %v3927_v12  ;;  %v4264_v59 = vpop.f32.mrf.mxu3  ;;  %v3761_v20 = vadd.f32 %v3760_v60, %v10538_v46  ;;  %v3929_v16 = vpop.f32.mrf.mxu1 }
 0x593   :  { %v10788_v62 = vadd.f32 %v4264_v59, %v4096_v50  ;;  %v3930_v10 = vadd.f32 %v3929_v16, %v3761_v20  ;;  %3799 = vmatmul.bf16.gmra.mxu0 %v11946_v42 }
 0x594   :  { %3968 = vmatmul.bf16.gmra.mxu1 %v11947_v11 }
 0x595   :  { %11945 = vst [vmem:[#allocation5_spill] sm:$0xff] %v10788_v62  ;;  %4137 = vmatmul.bf16.gmra.mxu2 %v11948_v51  ;;  %v11952_v62 = vld [vmem:[#allocation98_spill] sm:$0xff] }
 0x596   :  { %4306 = vmatmul.bf16.gmra.mxu3 %v11949_v58 }
 0x598   :  { %v4098_v5 = vpop.f32.mrf.mxu2  ;;  %v3762_v9 = vpop.f32.mrf.mxu0 }
 0x599   :  { %v4099_v47 = vadd.f32 %v4098_v5, %v3930_v10  ;;  %v4267_v36 = vpop.f32.mrf.mxu3  ;;  %v3763_v12 = vadd.f32 %v3762_v9, %v10538_v46  ;;  %v3931_v8 = vpop.f32.mrf.mxu1  ;;  %v11953_v10 = vld [vmem:[#allocation99_spill] sm:$0xff]  ;;  %v11954_v5 = vld [vmem:[#allocation100_spill] sm:$0xff]  ;;  %v11955_v9 = vld [vmem:[#allocation101_spill] sm:$0xff] }
 0x59b   :  { %v10795_v63 = vadd.f32 %v4267_v36, %v4099_v47  ;;  %v3932_v50 = vadd.f32 %v3931_v8, %v3763_v12 }
 0x59d   :  { %11950 = vst [vmem:[#allocation146_spill] sm:$0xff] %v10795_v63  ;;  %v11958_v63 = vld [vmem:[#allocation102_spill] sm:$0xff] }
 0x5a0   :  { %v4100_v59 = vpop.f32.mrf.mxu2  ;;  %v3765_v16 = vpop.f32.mrf.mxu0 }
 0x5a1   :  { %v4101_v60 = vadd.f32 %v4100_v59, %v3932_v50  ;;  %v4269_v20 = vpop.f32.mrf.mxu3  ;;  %v3766_v11 = vadd.f32 %v3765_v16, %v10538_v46  ;;  %v3934_v42 = vpop.f32.mrf.mxu1 }
 0x5a3   :  { %v10798_v51 = vadd.f32 %v4269_v20, %v4101_v60  ;;  %v3935_v58 = vadd.f32 %v3934_v42, %v3766_v11  ;;  %3804 = vmatmul.bf16.gmra.mxu0 %v11952_v62 }
 0x5a4   :  { %3973 = vmatmul.bf16.gmra.mxu1 %v11953_v10 }
 0x5a5   :  { %11951 = vst [vmem:[#allocation147_spill] sm:$0xff] %v10798_v51  ;;  %4142 = vmatmul.bf16.gmra.mxu2 %v11954_v5 }
 0x5a6   :  { %4311 = vmatmul.bf16.gmra.mxu3 %v11955_v9 }
 0x5a8   :  { %v4103_v47 = vpop.f32.mrf.mxu2  ;;  %v3767_v8 = vpop.f32.mrf.mxu0 }
 0x5a9   :  { %v4104_v36 = vadd.f32 %v4103_v47, %v3935_v58  ;;  %v4272_v12 = vpop.f32.mrf.mxu3  ;;  %v3768_v50 = vadd.f32 %v3767_v8, %v10538_v46  ;;  %v3936_v59 = vpop.f32.mrf.mxu1  ;;  %v11959_v58 = vld [vmem:[#allocation103_spill] sm:$0xff]  ;;  %v11960_v47 = vld [vmem:[#allocation104_spill] sm:$0xff]  ;;  %v11961_v8 = vld [vmem:[#allocation105_spill] sm:$0xff] }
 0x5ab   :  { %v10805_v16 = vadd.f32 %v4272_v12, %v4104_v36  ;;  %v3937_v60 = vadd.f32 %v3936_v59, %v3768_v50 }
 0x5ad   :  { %11956 = vst [vmem:[#allocation6_spill] sm:$0xff] %v10805_v16  ;;  %v11964_v16 = vld [vmem:[#allocation106_spill] sm:$0xff] }
 0x5b0   :  { %v4105_v20 = vpop.f32.mrf.mxu2  ;;  %v3770_v62 = vpop.f32.mrf.mxu0 }
 0x5b1   :  { %v4106_v11 = vadd.f32 %v4105_v20, %v3937_v60  ;;  %v4274_v42 = vpop.f32.mrf.mxu3  ;;  %v3771_v10 = vadd.f32 %v3770_v62, %v10538_v46  ;;  %v3939_v51 = vpop.f32.mrf.mxu1 }
 0x5b3   :  { %v10808_v5 = vadd.f32 %v4274_v42, %v4106_v11  ;;  %v3940_v9 = vadd.f32 %v3939_v51, %v3771_v10  ;;  %3809 = vmatmul.bf16.gmra.mxu0 %v11958_v63 }
 0x5b4   :  { %3978 = vmatmul.bf16.gmra.mxu1 %v11959_v58 }
 0x5b5   :  { %11957 = vst [vmem:[#allocation7_spill] sm:$0xff] %v10808_v5  ;;  %4147 = vmatmul.bf16.gmra.mxu2 %v11960_v47 }
 0x5b6   :  { %4316 = vmatmul.bf16.gmra.mxu3 %v11961_v8 }
 0x5b8   :  { %v4108_v36 = vpop.f32.mrf.mxu2  ;;  %v3772_v59 = vpop.f32.mrf.mxu0 }
 0x5b9   :  { %v4109_v12 = vadd.f32 %v4108_v36, %v3940_v9  ;;  %v4277_v50 = vpop.f32.mrf.mxu3  ;;  %v3773_v60 = vadd.f32 %v3772_v59, %v10538_v46  ;;  %v3941_v20 = vpop.f32.mrf.mxu1  ;;  %v11965_v9 = vld [vmem:[#allocation107_spill] sm:$0xff]  ;;  %v11966_v36 = vld [vmem:[#allocation108_spill] sm:$0xff]  ;;  %v11967_v59 = vld [vmem:[#allocation109_spill] sm:$0xff] }
 0x5bb   :  { %v10815_v62 = vadd.f32 %v4277_v50, %v4109_v12  ;;  %v3942_v11 = vadd.f32 %v3941_v20, %v3773_v60  ;;  %v7048_v12 = vld [vmem:[%s11335_s1 + $0x304] sm:$0xf]  ;;  %v6572_v50 = vld [vmem:[%s11335_s1 + $0x308] sm:$0xf0] }
 0x5bc   :  { %v6575_v60 = vor.u32 %v7048_v12, %v6572_v50  ;;  %v7064_v20 = vld [vmem:[%s11335_s1 + $0x384] sm:$0xf] }
 0x5bd   :  { %11962 = vst [vmem:[#allocation8_spill] sm:$0xff] %v10815_v62  ;;  %v7032_v50 = vld [vmem:[%s11335_s1 + $0x284] sm:$0xf]  ;;  %v11973_v62 = vld [vmem:[#allocation113_spill] sm:$0xff] }
 0x5be   :  { %4697 = vmatpush.bf16.msrb.mxu2 %v6575_v60 }
 0x5c0   :  { %v4110_v42 = vpop.f32.mrf.mxu2  ;;  %v3775_v63 = vpop.f32.mrf.mxu0 }
 0x5c1   :  { %v4111_v51 = vadd.f32 %v4110_v42, %v3942_v11  ;;  %v4279_v10 = vpop.f32.mrf.mxu3  ;;  %v3776_v58 = vadd.f32 %v3775_v63, %v10538_v46  ;;  %v3944_v5 = vpop.f32.mrf.mxu1  ;;  %v6636_v11 = vld [vmem:[%s11335_s1 + $0x388] sm:$0xf0] }
 0x5c3   :  { %v10818_v47 = vadd.f32 %v4279_v10, %v4111_v51  ;;  %v3945_v8 = vadd.f32 %v3944_v5, %v3776_v58  ;;  %3814 = vmatmul.bf16.gmra.mxu0 %v11964_v16  ;;  %v7016_v5 = vld [vmem:[%s11335_s1 + $0x204] sm:$0xf]  ;;  %v6444_v16 = vld [vmem:[%s11335_s1 + $0x208] sm:$0xf0]  ;;  %v6639_v10 = vor.u32 %v7064_v20, %v6636_v11 }
 0x5c4   :  { %3983 = vmatmul.bf16.gmra.mxu1 %v11965_v9  ;;  %v6447_v51 = vor.u32 %v7016_v5, %v6444_v16  ;;  %v6508_v5 = vld [vmem:[%s11335_s1 + $0x288] sm:$0xf0] }
 0x5c5   :  { %11963 = vst [vmem:[#allocation9_spill] sm:$0xff] %v10818_v47  ;;  %4152 = vmatmul.bf16.gmra.mxu2 %v11966_v36  ;;  %4866 = vmatpush.bf16.msrb.mxu3 %v6639_v10  ;;  %v11972_v47 = vld [vmem:[#allocation112_spill] sm:$0xff] }
 0x5c6   :  { %4321 = vmatmul.bf16.gmra.mxu3 %v11967_v59  ;;  %4359 = vmatpush.bf16.msrb.mxu0 %v6447_v51 }
 0x5c8   :  { %v4113_v42 = vpop.f32.mrf.mxu2  ;;  %v3777_v9 = vpop.f32.mrf.mxu0 }
 0x5c9   :  { %v4114_v63 = vadd.f32 %v4113_v42, %v3945_v8  ;;  %v4282_v58 = vpop.f32.mrf.mxu3  ;;  %v3778_v36 = vadd.f32 %v3777_v9, %v10538_v46  ;;  %v3946_v59 = vpop.f32.mrf.mxu1  ;;  %v6511_v8 = vor.u32 %v7032_v50, %v6508_v5  ;;  %v11970_v9 = vld [vmem:[#allocation110_spill] sm:$0xff] }
 0x5cb   :  { %v10843_v12 = vadd.f32 %v4282_v58, %v4114_v63  ;;  %v3947_v16 = vadd.f32 %v3946_v59, %v3778_v36  ;;  %4528 = vmatpush.bf16.msrb.mxu1 %v6511_v8 }
 0x5cd   :  { %11968 = vst [vmem:[#allocation152_spill] sm:$0xff] %v10843_v12  ;;  %v11971_v12 = vld [vmem:[#allocation111_spill] sm:$0xff] }
 0x5d0   :  { %v4115_v20 = vpop.f32.mrf.mxu2  ;;  %v3780_v42 = vpop.f32.mrf.mxu0 }
 0x5d1   :  { %v4116_v60 = vadd.f32 %v4115_v20, %v3947_v16  ;;  %v4284_v11 = vpop.f32.mrf.mxu3  ;;  %v3781_v51 = vadd.f32 %v3780_v42, %v10538_v46  ;;  %v3949_v10 = vpop.f32.mrf.mxu1 }
 0x5d3   :  { %v10852_v63 = vadd.f32 %v4284_v11, %v4116_v60  ;;  %v3950_v58 = vadd.f32 %v3949_v10, %v3781_v51  ;;  %3819 = vmatmul.bf16.gmra.mxu0 %v11970_v9 }
 0x5d4   :  { %3988 = vmatmul.bf16.gmra.mxu1 %v11971_v12 }
 0x5d5   :  { %11969 = vst [vmem:[#allocation153_spill] sm:$0xff] %v10852_v63  ;;  %4157 = vmatmul.bf16.gmra.mxu2 %v11972_v47  ;;  %v11976_v63 = vld [vmem:[#allocation114_spill] sm:$0xff] }
 0x5d6   :  { %4326 = vmatmul.bf16.gmra.mxu3 %v11973_v62 }
 0x5d8   :  { %v4118_v36 = vpop.f32.mrf.mxu2  ;;  %v3782_v5 = vpop.f32.mrf.mxu0 }
 0x5d9   :  { %v4119_v59 = vadd.f32 %v4118_v36, %v3950_v58  ;;  %v4287_v50 = vpop.f32.mrf.mxu3  ;;  %v3783_v16 = vadd.f32 %v3782_v5, %v10538_v46  ;;  %v3951_v8 = vpop.f32.mrf.mxu1  ;;  %v11977_v58 = vld [vmem:[#allocation115_spill] sm:$0xff]  ;;  %v11978_v36 = vld [vmem:[#allocation116_spill] sm:$0xff]  ;;  %v11979_v5 = vld [vmem:[#allocation117_spill] sm:$0xff] }
 0x5db   :  { %v10859_v20 = vadd.f32 %v4287_v50, %v4119_v59  ;;  %v3952_v60 = vadd.f32 %v3951_v8, %v3783_v16 }
 0x5dd   :  { %11974 = vst [vmem:[#allocation10_spill] sm:$0xff] %v10859_v20  ;;  %v11982_v20 = vld [vmem:[#allocation118_spill] sm:$0xff] }
 0x5e0   :  { %v4120_v11 = vpop.f32.mrf.mxu2  ;;  %v3785_v10 = vpop.f32.mrf.mxu0 }
 0x5e1   :  { %v4121_v42 = vadd.f32 %v4120_v11, %v3952_v60  ;;  %v4289_v51 = vpop.f32.mrf.mxu3  ;;  %v3786_v12 = vadd.f32 %v3785_v10, %v10538_v46  ;;  %v3954_v9 = vpop.f32.mrf.mxu1 }
 0x5e3   :  { %v10862_v47 = vadd.f32 %v4289_v51, %v4121_v42  ;;  %v3955_v62 = vadd.f32 %v3954_v9, %v3786_v12  ;;  %3824 = vmatmul.bf16.gmra.mxu0 %v11976_v63 }
 0x5e4   :  { %3993 = vmatmul.bf16.gmra.mxu1 %v11977_v58 }
 0x5e5   :  { %11975 = vst [vmem:[#allocation11_spill] sm:$0xff] %v10862_v47  ;;  %4162 = vmatmul.bf16.gmra.mxu2 %v11978_v36 }
 0x5e6   :  { %4331 = vmatmul.bf16.gmra.mxu3 %v11979_v5 }
 0x5e8   :  { %v4123_v59 = vpop.f32.mrf.mxu2  ;;  %v3787_v8 = vpop.f32.mrf.mxu0 }
 0x5e9   :  { %v4124_v50 = vadd.f32 %v4123_v59, %v3955_v62  ;;  %v4292_v16 = vpop.f32.mrf.mxu3  ;;  %v3788_v60 = vadd.f32 %v3787_v8, %v10538_v46  ;;  %v3956_v11 = vpop.f32.mrf.mxu1  ;;  %v11983_v62 = vld [vmem:[#allocation119_spill] sm:$0xff]  ;;  %v11984_v59 = vld [vmem:[#allocation120_spill] sm:$0xff]  ;;  %v11985_v8 = vld [vmem:[#allocation121_spill] sm:$0xff] }
 0x5eb   :  { %v10869_v10 = vadd.f32 %v4292_v16, %v4124_v50  ;;  %v3957_v42 = vadd.f32 %v3956_v11, %v3788_v60 }
 0x5ed   :  { %11980 = vst [vmem:[#allocation12_spill] sm:$0xff] %v10869_v10  ;;  %v11988_v10 = vld [vmem:[#allocation124_spill] sm:$0xff] }
 0x5f0   :  { %v4125_v51 = vpop.f32.mrf.mxu2  ;;  %v3790_v63 = vpop.f32.mrf.mxu0 }
 0x5f1   :  { %v4126_v12 = vadd.f32 %v4125_v51, %v3957_v42  ;;  %v4294_v9 = vpop.f32.mrf.mxu3  ;;  %v3791_v58 = vadd.f32 %v3790_v63, %v10538_v46  ;;  %v3959_v47 = vpop.f32.mrf.mxu1 }
 0x5f3   :  { %v10872_v36 = vadd.f32 %v4294_v9, %v4126_v12  ;;  %v3960_v5 = vadd.f32 %v3959_v47, %v3791_v58  ;;  %3829 = vmatmul.bf16.gmra.mxu0 %v11982_v20 }
 0x5f4   :  { %3998 = vmatmul.bf16.gmra.mxu1 %v11983_v62 }
 0x5f5   :  { %11981 = vst [vmem:[#allocation13_spill] sm:$0xff] %v10872_v36  ;;  %4167 = vmatmul.bf16.gmra.mxu2 %v11984_v59 }
 0x5f6   :  { %4336 = vmatmul.bf16.gmra.mxu3 %v11985_v8 }
 0x5f8   :  { %v4128_v50 = vpop.f32.mrf.mxu2  ;;  %v3792_v11 = vpop.f32.mrf.mxu0 }
 0x5f9   :  { %v4129_v16 = vadd.f32 %v4128_v50, %v3960_v5  ;;  %v4297_v60 = vpop.f32.mrf.mxu3  ;;  %v3793_v42 = vadd.f32 %v3792_v11, %v10538_v46  ;;  %v3961_v51 = vpop.f32.mrf.mxu1  ;;  %v11989_v5 = vld [vmem:[#allocation125_spill] sm:$0xff]  ;;  %v11990_v50 = vld [vmem:[#allocation126_spill] sm:$0xff]  ;;  %v11991_v11 = vld [vmem:[#allocation127_spill] sm:$0xff] }
 0x5fb   :  { %v10879_v63 = vadd.f32 %v4297_v60, %v4129_v16  ;;  %v3962_v12 = vadd.f32 %v3961_v51, %v3793_v42 }
 0x5fd   :  { %11986 = vst [vmem:[#allocation158_spill] sm:$0xff] %v10879_v63  ;;  %v11994_v63 = vld [vmem:[#allocation130_spill] sm:$0xff] }
 0x600   :  { %v4130_v9 = vpop.f32.mrf.mxu2  ;;  %v3795_v20 = vpop.f32.mrf.mxu0 }
 0x601   :  { %v4131_v47 = vadd.f32 %v4130_v9, %v3962_v12  ;;  %v4299_v58 = vpop.f32.mrf.mxu3  ;;  %v3796_v62 = vadd.f32 %v3795_v20, %v10538_v46  ;;  %v3964_v36 = vpop.f32.mrf.mxu1 }
 0x603   :  { %v10882_v59 = vadd.f32 %v4299_v58, %v4131_v47  ;;  %v3965_v8 = vadd.f32 %v3964_v36, %v3796_v62  ;;  %3834 = vmatmul.bf16.gmra.mxu0 %v11988_v10 }
 0x604   :  { %4003 = vmatmul.bf16.gmra.mxu1 %v11989_v5 }
 0x605   :  { %11987 = vst [vmem:[#allocation159_spill] sm:$0xff] %v10882_v59  ;;  %4172 = vmatmul.bf16.gmra.mxu2 %v11990_v50 }
 0x606   :  { %4341 = vmatmul.bf16.gmra.mxu3 %v11991_v11 }
 0x608   :  { %v4133_v16 = vpop.f32.mrf.mxu2  ;;  %v3797_v51 = vpop.f32.mrf.mxu0 }
 0x609   :  { %v4134_v60 = vadd.f32 %v4133_v16, %v3965_v8  ;;  %v4302_v42 = vpop.f32.mrf.mxu3  ;;  %v3798_v12 = vadd.f32 %v3797_v51, %v10538_v46  ;;  %v3966_v9 = vpop.f32.mrf.mxu1  ;;  %v11995_v8 = vld [vmem:[#allocation131_spill] sm:$0xff]  ;;  %v11996_v16 = vld [vmem:[#allocation132_spill] sm:$0xff]  ;;  %v11997_v51 = vld [vmem:[#allocation133_spill] sm:$0xff] }
 0x60b   :  { %v10889_v20 = vadd.f32 %v4302_v42, %v4134_v60  ;;  %v3967_v47 = vadd.f32 %v3966_v9, %v3798_v12 }
 0x60d   :  { %11992 = vst [vmem:[#allocation14_spill] sm:$0xff] %v10889_v20  ;;  %v12000_v20 = vld [vmem:[#allocation136_spill] sm:$0xff] }
 0x610   :  { %v4135_v58 = vpop.f32.mrf.mxu2  ;;  %v3800_v10 = vpop.f32.mrf.mxu0 }
 0x611   :  { %v4136_v36 = vadd.f32 %v4135_v58, %v3967_v47  ;;  %v4304_v62 = vpop.f32.mrf.mxu3  ;;  %v3801_v5 = vadd.f32 %v3800_v10, %v10538_v46  ;;  %v3969_v59 = vpop.f32.mrf.mxu1 }
 0x613   :  { %v10892_v50 = vadd.f32 %v4304_v62, %v4136_v36  ;;  %v3970_v11 = vadd.f32 %v3969_v59, %v3801_v5  ;;  %3839 = vmatmul.bf16.gmra.mxu0 %v11994_v63 }
 0x614   :  { %4008 = vmatmul.bf16.gmra.mxu1 %v11995_v8 }
 0x615   :  { %11993 = vst [vmem:[#allocation15_spill] sm:$0xff] %v10892_v50  ;;  %4177 = vmatmul.bf16.gmra.mxu2 %v11996_v16 }
 0x616   :  { %4346 = vmatmul.bf16.gmra.mxu3 %v11997_v51 }
 0x618   :  { %v4138_v60 = vpop.f32.mrf.mxu2  ;;  %v3802_v9 = vpop.f32.mrf.mxu0 }
 0x619   :  { %v4139_v42 = vadd.f32 %v4138_v60, %v3970_v11  ;;  %v4307_v12 = vpop.f32.mrf.mxu3  ;;  %v3803_v47 = vadd.f32 %v3802_v9, %v10538_v46  ;;  %v3971_v58 = vpop.f32.mrf.mxu1  ;;  %v12001_v11 = vld [vmem:[#allocation137_spill] sm:$0xff]  ;;  %v12002_v60 = vld [vmem:[#allocation138_spill] sm:$0xff]  ;;  %v12003_v9 = vld [vmem:[#allocation139_spill] sm:$0xff] }
 0x61b   :  { %v10899_v10 = vadd.f32 %v4307_v12, %v4139_v42  ;;  %v3972_v36 = vadd.f32 %v3971_v58, %v3803_v47 }
 0x61d   :  { %11998 = vst [vmem:[#allocation16_spill] sm:$0xff] %v10899_v10  ;;  %v12006_v10 = vld [vmem:[#allocation142_spill] sm:$0xff] }
 0x620   :  { %v4140_v62 = vpop.f32.mrf.mxu2  ;;  %v3805_v63 = vpop.f32.mrf.mxu0 }
 0x621   :  { %v4141_v59 = vadd.f32 %v4140_v62, %v3972_v36  ;;  %v4309_v5 = vpop.f32.mrf.mxu3  ;;  %v3806_v8 = vadd.f32 %v3805_v63, %v10538_v46  ;;  %v3974_v50 = vpop.f32.mrf.mxu1 }
 0x623   :  { %v10902_v16 = vadd.f32 %v4309_v5, %v4141_v59  ;;  %v3975_v51 = vadd.f32 %v3974_v50, %v3806_v8  ;;  %4360 = vmatmul.bf16.vlgmr.msrb.gmra.mxu0 %v12000_v20 }
 0x624   :  { %4529 = vmatmul.bf16.vlgmr.msrb.gmra.mxu1 %v12001_v11 }
 0x625   :  { %11999 = vst [vmem:[#allocation17_spill] sm:$0xff] %v10902_v16  ;;  %4698 = vmatmul.bf16.vlgmr.msrb.gmra.mxu2 %v12002_v60 }
 0x626   :  { %4867 = vmatmul.bf16.vlgmr.msrb.gmra.mxu3 %v12003_v9 }
 0x628   :  { %v4143_v42 = vpop.f32.mrf.mxu2  ;;  %v3807_v58 = vpop.f32.mrf.mxu0 }
 0x629   :  { %v4144_v12 = vadd.f32 %v4143_v42, %v3975_v51  ;;  %v4312_v47 = vpop.f32.mrf.mxu3  ;;  %v3808_v36 = vadd.f32 %v3807_v58, %v10538_v46  ;;  %v3976_v62 = vpop.f32.mrf.mxu1  ;;  %v12007_v51 = vld [vmem:[#allocation143_spill] sm:$0xff]  ;;  %v12008_v42 = vld [vmem:[#allocation144_spill] sm:$0xff]  ;;  %v12009_v58 = vld [vmem:[#allocation145_spill] sm:$0xff] }
 0x62b   :  { %v10909_v63 = vadd.f32 %v4312_v47, %v4144_v12  ;;  %v3977_v59 = vadd.f32 %v3976_v62, %v3808_v36 }
 0x62d   :  { %12004 = vst [vmem:[#allocation164_spill] sm:$0xff] %v10909_v63  ;;  %v12012_v63 = vld [vmem:[#allocation148_spill] sm:$0xff] }
 0x630   :  { %v4145_v5 = vpop.f32.mrf.mxu2  ;;  %v3810_v20 = vpop.f32.mrf.mxu0 }
 0x631   :  { %v4146_v50 = vadd.f32 %v4145_v5, %v3977_v59  ;;  %v4314_v8 = vpop.f32.mrf.mxu3  ;;  %v3811_v11 = vadd.f32 %v3810_v20, %v10538_v46  ;;  %v3979_v16 = vpop.f32.mrf.mxu1 }
 0x633   :  { %v10912_v60 = vadd.f32 %v4314_v8, %v4146_v50  ;;  %v3980_v9 = vadd.f32 %v3979_v16, %v3811_v11  ;;  %4365 = vmatmul.bf16.gmra.mxu0 %v12006_v10 }
 0x634   :  { %4534 = vmatmul.bf16.gmra.mxu1 %v12007_v51 }
 0x635   :  { %12005 = vst [vmem:[#allocation165_spill] sm:$0xff] %v10912_v60  ;;  %4703 = vmatmul.bf16.gmra.mxu2 %v12008_v42 }
 0x636   :  { %4872 = vmatmul.bf16.gmra.mxu3 %v12009_v58 }
 0x638   :  { %v4148_v12 = vpop.f32.mrf.mxu2  ;;  %v3812_v62 = vpop.f32.mrf.mxu0 }
 0x639   :  { %v4149_v47 = vadd.f32 %v4148_v12, %v3980_v9  ;;  %v4317_v36 = vpop.f32.mrf.mxu3  ;;  %v3813_v59 = vadd.f32 %v3812_v62, %v10538_v46  ;;  %v3981_v5 = vpop.f32.mrf.mxu1  ;;  %v12013_v9 = vld [vmem:[#allocation149_spill] sm:$0xff]  ;;  %v12014_v12 = vld [vmem:[#allocation150_spill] sm:$0xff]  ;;  %v12015_v62 = vld [vmem:[#allocation151_spill] sm:$0xff] }
 0x63b   :  { %v10919_v20 = vadd.f32 %v4317_v36, %v4149_v47  ;;  %v3982_v50 = vadd.f32 %v3981_v5, %v3813_v59 }
 0x63d   :  { %12010 = vst [vmem:[#allocation18_spill] sm:$0xff] %v10919_v20  ;;  %v12018_v20 = vld [vmem:[#allocation154_spill] sm:$0xff] }
 0x640   :  { %v4150_v8 = vpop.f32.mrf.mxu2  ;;  %v3815_v10 = vpop.f32.mrf.mxu0 }
 0x641   :  { %v4151_v16 = vadd.f32 %v4150_v8, %v3982_v50  ;;  %v4319_v11 = vpop.f32.mrf.mxu3  ;;  %v3816_v51 = vadd.f32 %v3815_v10, %v10538_v46  ;;  %v3984_v60 = vpop.f32.mrf.mxu1 }
 0x643   :  { %v10922_v42 = vadd.f32 %v4319_v11, %v4151_v16  ;;  %v3985_v58 = vadd.f32 %v3984_v60, %v3816_v51  ;;  %4370 = vmatmul.bf16.gmra.mxu0 %v12012_v63 }
 0x644   :  { %4539 = vmatmul.bf16.gmra.mxu1 %v12013_v9 }
 0x645   :  { %12011 = vst [vmem:[#allocation19_spill] sm:$0xff] %v10922_v42  ;;  %4708 = vmatmul.bf16.gmra.mxu2 %v12014_v12 }
 0x646   :  { %4877 = vmatmul.bf16.gmra.mxu3 %v12015_v62 }
 0x648   :  { %v4153_v47 = vpop.f32.mrf.mxu2  ;;  %v3817_v5 = vpop.f32.mrf.mxu0 }
 0x649   :  { %v4154_v36 = vadd.f32 %v4153_v47, %v3985_v58  ;;  %v4322_v59 = vpop.f32.mrf.mxu3  ;;  %v3818_v50 = vadd.f32 %v3817_v5, %v10538_v46  ;;  %v3986_v8 = vpop.f32.mrf.mxu1  ;;  %v12019_v58 = vld [vmem:[#allocation155_spill] sm:$0xff]  ;;  %v12020_v47 = vld [vmem:[#allocation156_spill] sm:$0xff]  ;;  %v12021_v5 = vld [vmem:[#allocation157_spill] sm:$0xff] }
 0x64b   :  { %v10929_v10 = vadd.f32 %v4322_v59, %v4154_v36  ;;  %v3987_v16 = vadd.f32 %v3986_v8, %v3818_v50 }
 0x64d   :  { %12016 = vst [vmem:[#allocation20_spill] sm:$0xff] %v10929_v10  ;;  %v12024_v10 = vld [vmem:[#allocation160_spill] sm:$0xff] }
 0x650   :  { %v4155_v11 = vpop.f32.mrf.mxu2  ;;  %v3820_v63 = vpop.f32.mrf.mxu0 }
 0x651   :  { %v4156_v60 = vadd.f32 %v4155_v11, %v3987_v16  ;;  %v4324_v51 = vpop.f32.mrf.mxu3  ;;  %v3821_v9 = vadd.f32 %v3820_v63, %v10538_v46  ;;  %v3989_v42 = vpop.f32.mrf.mxu1 }
 0x653   :  { %v10932_v12 = vadd.f32 %v4324_v51, %v4156_v60  ;;  %v3990_v62 = vadd.f32 %v3989_v42, %v3821_v9  ;;  %4375 = vmatmul.bf16.gmra.mxu0 %v12018_v20 }
 0x654   :  { %4544 = vmatmul.bf16.gmra.mxu1 %v12019_v58 }
 0x655   :  { %12017 = vst [vmem:[#allocation21_spill] sm:$0xff] %v10932_v12  ;;  %4713 = vmatmul.bf16.gmra.mxu2 %v12020_v47 }
 0x656   :  { %4882 = vmatmul.bf16.gmra.mxu3 %v12021_v5 }
 0x658   :  { %v4158_v36 = vpop.f32.mrf.mxu2  ;;  %v3822_v8 = vpop.f32.mrf.mxu0 }
 0x659   :  { %v4159_v59 = vadd.f32 %v4158_v36, %v3990_v62  ;;  %v4327_v50 = vpop.f32.mrf.mxu3  ;;  %v3823_v16 = vadd.f32 %v3822_v8, %v10538_v46  ;;  %v3991_v11 = vpop.f32.mrf.mxu1  ;;  %v12025_v62 = vld [vmem:[#allocation161_spill] sm:$0xff]  ;;  %v12026_v36 = vld [vmem:[#allocation162_spill] sm:$0xff]  ;;  %v12027_v8 = vld [vmem:[#allocation163_spill] sm:$0xff] }
 0x65b   :  { %v10939_v63 = vadd.f32 %v4327_v50, %v4159_v59  ;;  %v3992_v60 = vadd.f32 %v3991_v11, %v3823_v16 }
 0x65d   :  { %12022 = vst [vmem:[#allocation170_spill] sm:$0xff] %v10939_v63  ;;  %v12030_v63 = vld [vmem:[#allocation166_spill] sm:$0xff] }
 0x660   :  { %v4160_v51 = vpop.f32.mrf.mxu2  ;;  %v3825_v20 = vpop.f32.mrf.mxu0 }
 0x661   :  { %v4161_v42 = vadd.f32 %v4160_v51, %v3992_v60  ;;  %v4329_v9 = vpop.f32.mrf.mxu3  ;;  %v3826_v58 = vadd.f32 %v3825_v20, %v10538_v46  ;;  %v3994_v12 = vpop.f32.mrf.mxu1 }
 0x663   :  { %v10942_v47 = vadd.f32 %v4329_v9, %v4161_v42  ;;  %v3995_v5 = vadd.f32 %v3994_v12, %v3826_v58  ;;  %4380 = vmatmul.bf16.gmra.mxu0 %v12024_v10 }
 0x664   :  { %4549 = vmatmul.bf16.gmra.mxu1 %v12025_v62 }
 0x665   :  { %12023 = vst [vmem:[#allocation171_spill] sm:$0xff] %v10942_v47  ;;  %4718 = vmatmul.bf16.gmra.mxu2 %v12026_v36 }
 0x666   :  { %4887 = vmatmul.bf16.gmra.mxu3 %v12027_v8 }
 0x668   :  { %v4163_v59 = vpop.f32.mrf.mxu2  ;;  %v3827_v11 = vpop.f32.mrf.mxu0 }
 0x669   :  { %v4164_v50 = vadd.f32 %v4163_v59, %v3995_v5  ;;  %v4332_v16 = vpop.f32.mrf.mxu3  ;;  %v3828_v60 = vadd.f32 %v3827_v11, %v10538_v46  ;;  %v3996_v51 = vpop.f32.mrf.mxu1  ;;  %v12031_v5 = vld [vmem:[#allocation167_spill] sm:$0xff]  ;;  %v12032_v59 = vld [vmem:[#allocation168_spill] sm:$0xff]  ;;  %v12033_v11 = vld [vmem:[#allocation169_spill] sm:$0xff] }
 0x66b   :  { %v10949_v20 = vadd.f32 %v4332_v16, %v4164_v50  ;;  %v3997_v42 = vadd.f32 %v3996_v51, %v3828_v60 }
 0x66d   :  { %12028 = vst [vmem:[#allocation22_spill] sm:$0xff] %v10949_v20  ;;  %v12035_v20 = vld [vmem:[#allocation172_spill] sm:$0xff] }
 0x670   :  { %v4165_v9 = vpop.f32.mrf.mxu2  ;;  %v3830_v10 = vpop.f32.mrf.mxu0 }
 0x671   :  { %v4166_v12 = vadd.f32 %v4165_v9, %v3997_v42  ;;  %v4334_v58 = vpop.f32.mrf.mxu3  ;;  %v3831_v62 = vadd.f32 %v3830_v10, %v10538_v46  ;;  %v3999_v47 = vpop.f32.mrf.mxu1 }
 0x673   :  { %v10952_v36 = vadd.f32 %v4334_v58, %v4166_v12  ;;  %v4000_v8 = vadd.f32 %v3999_v47, %v3831_v62  ;;  %4385 = vmatmul.bf16.gmra.mxu0 %v12030_v63 }
 0x674   :  { %4554 = vmatmul.bf16.gmra.mxu1 %v12031_v5 }
 0x675   :  { %12029 = vst [vmem:[#allocation23_spill] sm:$0xff] %v10952_v36  ;;  %4723 = vmatmul.bf16.gmra.mxu2 %v12032_v59 }
 0x676   :  { %4892 = vmatmul.bf16.gmra.mxu3 %v12033_v11 }
 0x678   :  { %v4168_v50 = vpop.f32.mrf.mxu2  ;;  %v3832_v51 = vpop.f32.mrf.mxu0 }
 0x679   :  { %v4169_v16 = vadd.f32 %v4168_v50, %v4000_v8  ;;  %v4337_v60 = vpop.f32.mrf.mxu3  ;;  %v3833_v42 = vadd.f32 %v3832_v51, %v10538_v46  ;;  %v4001_v9 = vpop.f32.mrf.mxu1  ;;  %v12036_v8 = vld [vmem:[#allocation173_spill] sm:$0xff]  ;;  %v12037_v50 = vld [vmem:[#allocation174_spill] sm:$0xff]  ;;  %v12038_v51 = vld [vmem:[#allocation175_spill] sm:$0xff] }
 0x67b   :  { %v10959_v10 = vadd.f32 %v4337_v60, %v4169_v16  ;;  %v4002_v12 = vadd.f32 %v4001_v9, %v3833_v42 }
 0x680   :  { %v4170_v58 = vpop.f32.mrf.mxu2  ;;  %v3835_v63 = vpop.f32.mrf.mxu0 }
 0x681   :  { %v4171_v47 = vadd.f32 %v4170_v58, %v4002_v12  ;;  %v4339_v62 = vpop.f32.mrf.mxu3  ;;  %v3836_v5 = vadd.f32 %v3835_v63, %v10538_v46  ;;  %v4004_v36 = vpop.f32.mrf.mxu1 }
 0x683   :  { %v10962_v59 = vadd.f32 %v4339_v62, %v4171_v47  ;;  %v4005_v11 = vadd.f32 %v4004_v36, %v3836_v5  ;;  %4390 = vmatmul.bf16.gmra.mxu0 %v12035_v20 }
 0x684   :  { %4559 = vmatmul.bf16.gmra.mxu1 %v12036_v8 }
 0x685   :  { %12034 = vst [vmem:[#allocation24_spill] sm:$0xff] %v10962_v59  ;;  %4728 = vmatmul.bf16.gmra.mxu2 %v12037_v50 }
 0x686   :  { %4897 = vmatmul.bf16.gmra.mxu3 %v12038_v51 }
 0x688   :  { %v4173_v16 = vpop.f32.mrf.mxu2  ;;  %v3837_v9 = vpop.f32.mrf.mxu0 }
 0x689   :  { %v4174_v60 = vadd.f32 %v4173_v16, %v4005_v11  ;;  %v4342_v42 = vpop.f32.mrf.mxu3  ;;  %v3838_v12 = vadd.f32 %v3837_v9, %v10538_v46  ;;  %v4006_v58 = vpop.f32.mrf.mxu1  ;;  %v12040_v11 = vld [vmem:[#allocation178_spill] sm:$0xff]  ;;  %v12041_v16 = vld [vmem:[#allocation179_spill] sm:$0xff]  ;;  %v12042_v9 = vld [vmem:[#allocation180_spill] sm:$0xff] }
 0x68b   :  { %v10969_v63 = vadd.f32 %v4342_v42, %v4174_v60  ;;  %v4007_v47 = vadd.f32 %v4006_v58, %v3838_v12 }
 0x690   :  { %v4175_v62 = vpop.f32.mrf.mxu2  ;;  %v3840_v20 = vpop.f32.mrf.mxu0 }
 0x691   :  { %v4176_v36 = vadd.f32 %v4175_v62, %v4007_v47  ;;  %v4344_v5 = vpop.f32.mrf.mxu3  ;;  %v3841_v8 = vadd.f32 %v3840_v20, %v10538_v46  ;;  %v4009_v59 = vpop.f32.mrf.mxu1 }
 0x693   :  { %v10972_v50 = vadd.f32 %v4344_v5, %v4176_v36  ;;  %v4010_v51 = vadd.f32 %v4009_v59, %v3841_v8  ;;  %4395 = vmatmul.bf16.gmra.mxu0 %v9174_v33 }
 0x694   :  { %4564 = vmatmul.bf16.gmra.mxu1 %v12040_v11 }
 0x695   :  { %12039 = vst [vmem:[#allocation25_spill] sm:$0xff] %v10972_v50  ;;  %4733 = vmatmul.bf16.gmra.mxu2 %v12041_v16 }
 0x696   :  { %4902 = vmatmul.bf16.gmra.mxu3 %v12042_v9  ;;  %v12044_v9 = vld [vmem:[#allocation182_spill] sm:$0xff] }
 0x698   :  { %v4178_v60 = vpop.f32.mrf.mxu2  ;;  %v3842_v58 = vpop.f32.mrf.mxu0 }
 0x699   :  { %v4179_v42 = vadd.f32 %v4178_v60, %v4010_v51  ;;  %v4347_v12 = vpop.f32.mrf.mxu3  ;;  %v3843_v47 = vadd.f32 %v3842_v58, %v10538_v46  ;;  %v4011_v62 = vpop.f32.mrf.mxu1  ;;  %v12043_v51 = vld [vmem:[#allocation181_spill] sm:$0xff]  ;;  %v12045_v46 = vld [vmem:[#allocation183_spill] sm:$0xff] }
 0x69b   :  { %v10979_v20 = vadd.f32 %v4347_v12, %v4179_v42  ;;  %v4012_v36 = vadd.f32 %v4011_v62, %v3843_v47 }
 0x6a0   :  { %v4180_v5 = vpop.f32.mrf.mxu2  ;;  %v4361_v33 = vpop.f32.mrf.mxu0 }
 0x6a1   :  { %v4181_v59 = vadd.f32 %v4180_v5, %v4012_v36  ;;  %v4349_v8 = vpop.f32.mrf.mxu3  ;;  %v4530_v50 = vpop.f32.mrf.mxu1  ;;  %v4362_v16 = vadd.f32 %v4361_v33, %v10549_v24 }
 0x6a3   :  { %v10981_v11 = vadd.f32 %v4349_v8, %v4181_v59  ;;  %4400 = vmatmul.bf16.gmra.mxu0 %v9216_v55  ;;  %v4531_v60 = vadd.f32 %v4530_v50, %v4362_v16  ;;  %v12047_v16 = vld [vmem:[#allocation185_spill] sm:$0xff] }
 0x6a4   :  { %4569 = vmatmul.bf16.gmra.mxu1 %v12043_v51 }
 0x6a5   :  { %4738 = vmatmul.bf16.gmra.mxu2 %v12044_v9 }
 0x6a6   :  { %4907 = vmatmul.bf16.gmra.mxu3 %v12045_v46 }
 0x6a8   :  { %v4699_v42 = vpop.f32.mrf.mxu2  ;;  %v4363_v47 = vpop.f32.mrf.mxu0 }
 0x6a9   :  { %v4700_v12 = vadd.f32 %v4699_v42, %v4531_v60  ;;  %v4868_v58 = vpop.f32.mrf.mxu3  ;;  %v4532_v62 = vpop.f32.mrf.mxu1  ;;  %v4364_v5 = vadd.f32 %v4363_v47, %v10552_v34  ;;  %v12046_v34 = vld [vmem:[#allocation184_spill] sm:$0xff] }
 0x6ab   :  { %v4869_v36 = vadd.f32 %v4868_v58, %v4700_v12  ;;  %v4533_v55 = vadd.f32 %v4532_v62, %v4364_v5 }
 0x6ad   :  { %5029 = vst [vmem:[%s11338_s3 + $0x8] sm:$0xff] %v4869_v36 }
 0x6b0   :  { %v4701_v24 = vpop.f32.mrf.mxu2  ;;  %v4366_v33 = vpop.f32.mrf.mxu0 }
 0x6b1   :  { %v4702_v59 = vadd.f32 %v4701_v24, %v4533_v55  ;;  %v4870_v8 = vpop.f32.mrf.mxu3  ;;  %v4535_v51 = vpop.f32.mrf.mxu1  ;;  %v4367_v50 = vadd.f32 %v4366_v33, %v10559_v52  ;;  %v12049_v33 = vld [vmem:[#allocation187_spill] sm:$0xff] }
 0x6b3   :  { %v4871_v9 = vadd.f32 %v4870_v8, %v4702_v59  ;;  %4405 = vmatmul.bf16.gmra.mxu0 %v9259_v15  ;;  %v4536_v46 = vadd.f32 %v4535_v51, %v4367_v50  ;;  %v12050_v51 = vld [vmem:[#allocation188_spill] sm:$0xff] }
 0x6b4   :  { %4574 = vmatmul.bf16.gmra.mxu1 %v9261_v53 }
 0x6b5   :  { %5031 = vst [vmem:[%s11338_s3 + $0x18] sm:$0xff] %v4871_v9  ;;  %4743 = vmatmul.bf16.gmra.mxu2 %v12046_v34 }
 0x6b6   :  { %4912 = vmatmul.bf16.gmra.mxu3 %v12047_v16 }
 0x6b8   :  { %v4704_v60 = vpop.f32.mrf.mxu2  ;;  %v4368_v58 = vpop.f32.mrf.mxu0 }
 0x6b9   :  { %v4705_v42 = vadd.f32 %v4704_v60, %v4536_v46  ;;  %v4873_v12 = vpop.f32.mrf.mxu3  ;;  %v4537_v47 = vpop.f32.mrf.mxu1  ;;  %v4369_v52 = vadd.f32 %v4368_v58, %v10562_v39  ;;  %v12048_v39 = vld [vmem:[#allocation186_spill] sm:$0xff] }
 0x6bb   :  { %v4874_v62 = vadd.f32 %v4873_v12, %v4705_v42  ;;  %v4538_v15 = vadd.f32 %v4537_v47, %v4369_v52 }
 0x6bd   :  { %5033 = vst [vmem:[%s11338_s3 + $0x28] sm:$0xff] %v4874_v62 }
 0x6c0   :  { %v4706_v36 = vpop.f32.mrf.mxu2  ;;  %v4371_v55 = vpop.f32.mrf.mxu0 }
 0x6c1   :  { %v4707_v53 = vadd.f32 %v4706_v36, %v4538_v15  ;;  %v4875_v5 = vpop.f32.mrf.mxu3  ;;  %v4540_v24 = vpop.f32.mrf.mxu1  ;;  %v4372_v8 = vadd.f32 %v4371_v55, %v10587_v14 }
 0x6c3   :  { %v4876_v59 = vadd.f32 %v4875_v5, %v4707_v53  ;;  %4410 = vmatmul.bf16.gmra.mxu0 %v9303_v40  ;;  %v4541_v9 = vadd.f32 %v4540_v24, %v4372_v8 }
 0x6c4   :  { %4579 = vmatmul.bf16.gmra.mxu1 %v12048_v39 }
 0x6c5   :  { %5035 = vst [vmem:[%s11338_s3 + $0x38] sm:$0xff] %v4876_v59  ;;  %4748 = vmatmul.bf16.gmra.mxu2 %v12049_v33 }
 0x6c6   :  { %4917 = vmatmul.bf16.gmra.mxu3 %v12050_v51 }
 0x6c8   :  { %v4709_v50 = vpop.f32.mrf.mxu2  ;;  %v4373_v46 = vpop.f32.mrf.mxu0 }
 0x6c9   :  { %v4710_v34 = vadd.f32 %v4709_v50, %v4541_v9  ;;  %v4878_v16 = vpop.f32.mrf.mxu3  ;;  %v4542_v60 = vpop.f32.mrf.mxu1  ;;  %v4374_v14 = vadd.f32 %v4373_v46, %v10596_v0  ;;  %v12051_v0 = vld [vmem:[#allocation189_spill] sm:$0xff] }
 0x6cb   :  { %v4879_v42 = vadd.f32 %v4878_v16, %v4710_v34  ;;  %v4543_v40 = vadd.f32 %v4542_v60, %v4374_v14  ;;  %v12053_v16 = vld [vmem:[#allocation191_spill] sm:$0xff] }
 0x6cd   :  { %5037 = vst [vmem:[%s11338_s3 + $0x48] sm:$0xff] %v4879_v42 }
 0x6d0   :  { %v4711_v12 = vpop.f32.mrf.mxu2  ;;  %v4376_v62 = vpop.f32.mrf.mxu0 }
 0x6d1   :  { %v4712_v58 = vadd.f32 %v4711_v12, %v4543_v40  ;;  %v4880_v47 = vpop.f32.mrf.mxu3  ;;  %v4545_v52 = vpop.f32.mrf.mxu1  ;;  %v4377_v36 = vadd.f32 %v4376_v62, %v10603_v37 }
 0x6d3   :  { %v4881_v15 = vadd.f32 %v4880_v47, %v4712_v58  ;;  %4415 = vmatmul.bf16.gmra.mxu0 %v9371_v27  ;;  %v4546_v53 = vadd.f32 %v4545_v52, %v4377_v36 }
 0x6d4   :  { %4584 = vmatmul.bf16.gmra.mxu1 %v9373_v7 }
 0x6d5   :  { %5039 = vst [vmem:[%s11338_s3 + $0x58] sm:$0xff] %v4881_v15  ;;  %4753 = vmatmul.bf16.gmra.mxu2 %v9375_v13 }
 0x6d6   :  { %4922 = vmatmul.bf16.gmra.mxu3 %v12051_v0 }
 0x6d8   :  { %v4714_v5 = vpop.f32.mrf.mxu2  ;;  %v4378_v59 = vpop.f32.mrf.mxu0 }
 0x6d9   :  { %v4715_v55 = vadd.f32 %v4714_v5, %v4546_v53  ;;  %v4883_v24 = vpop.f32.mrf.mxu3  ;;  %v4547_v8 = vpop.f32.mrf.mxu1  ;;  %v4379_v37 = vadd.f32 %v4378_v59, %v10606_v2  ;;  %v12052_v2 = vld [vmem:[#allocation190_spill] sm:$0xff]  ;;  %v12055_v53 = vld [vmem:[#allocation193_spill] sm:$0xff] }
 0x6db   :  { %v4884_v39 = vadd.f32 %v4883_v24, %v4715_v55  ;;  %v4548_v27 = vadd.f32 %v4547_v8, %v4379_v37 }
 0x6dd   :  { %5041 = vst [vmem:[%s11338_s3 + $0x68] sm:$0xff] %v4884_v39 }
 0x6e0   :  { %v4716_v33 = vpop.f32.mrf.mxu2  ;;  %v4381_v13 = vpop.f32.mrf.mxu0 }
 0x6e1   :  { %v4717_v7 = vadd.f32 %v4716_v33, %v4548_v27  ;;  %v4885_v51 = vpop.f32.mrf.mxu3  ;;  %v4550_v9 = vpop.f32.mrf.mxu1  ;;  %v4382_v34 = vadd.f32 %v4381_v13, %v10613_v38 }
 0x6e3   :  { %v4886_v50 = vadd.f32 %v4885_v51, %v4717_v7  ;;  %4420 = vmatmul.bf16.gmra.mxu0 %v9415_v3  ;;  %v4551_v46 = vadd.f32 %v4550_v9, %v4382_v34  ;;  %v12058_v34 = vld [vmem:[#allocation196_spill] sm:$0xff] }
 0x6e4   :  { %4589 = vmatmul.bf16.gmra.mxu1 %v9417_v41 }
 0x6e5   :  { %5043 = vst [vmem:[%s11338_s3 + $0x78] sm:$0xff] %v4886_v50  ;;  %4758 = vmatmul.bf16.gmra.mxu2 %v12052_v2  ;;  %v12057_v50 = vld [vmem:[#allocation195_spill] sm:$0xff] }
 0x6e6   :  { %4927 = vmatmul.bf16.gmra.mxu3 %v12053_v16 }
 0x6e8   :  { %v4719_v60 = vpop.f32.mrf.mxu2  ;;  %v4383_v40 = vpop.f32.mrf.mxu0 }
 0x6e9   :  { %v4720_v42 = vadd.f32 %v4719_v60, %v4551_v46  ;;  %v4888_v14 = vpop.f32.mrf.mxu3  ;;  %v4552_v12 = vpop.f32.mrf.mxu1  ;;  %v4384_v38 = vadd.f32 %v4383_v40, %v10616_v57  ;;  %v12054_v57 = vld [vmem:[#allocation192_spill] sm:$0xff] }
 0x6eb   :  { %v4889_v58 = vadd.f32 %v4888_v14, %v4720_v42  ;;  %v4553_v3 = vadd.f32 %v4552_v12, %v4384_v38 }
 0x6ed   :  { %5045 = vst [vmem:[%s11338_s3 + $0x88] sm:$0xff] %v4889_v58 }
 0x6f0   :  { %v4721_v47 = vpop.f32.mrf.mxu2  ;;  %v4386_v52 = vpop.f32.mrf.mxu0 }
 0x6f1   :  { %v4722_v41 = vadd.f32 %v4721_v47, %v4553_v3  ;;  %v4890_v62 = vpop.f32.mrf.mxu3  ;;  %v4555_v15 = vpop.f32.mrf.mxu1  ;;  %v4387_v0 = vadd.f32 %v4386_v52, %v10623_v56 }
 0x6f3   :  { %v4891_v36 = vadd.f32 %v4890_v62, %v4722_v41  ;;  %4425 = vmatmul.bf16.gmra.mxu0 %v9459_v28  ;;  %v4556_v5 = vadd.f32 %v4555_v15, %v4387_v0 }
 0x6f4   :  { %4594 = vmatmul.bf16.gmra.mxu1 %v9461_v31 }
 0x6f5   :  { %5047 = vst [vmem:[%s11338_s3 + $0x98] sm:$0xff] %v4891_v36  ;;  %4763 = vmatmul.bf16.gmra.mxu2 %v12054_v57 }
 0x6f6   :  { %4932 = vmatmul.bf16.gmra.mxu3 %v12055_v53 }
 0x6f8   :  { %v4724_v55 = vpop.f32.mrf.mxu2  ;;  %v4388_v8 = vpop.f32.mrf.mxu0 }
 0x6f9   :  { %v4725_v24 = vadd.f32 %v4724_v55, %v4556_v5  ;;  %v4893_v59 = vpop.f32.mrf.mxu3  ;;  %v4557_v39 = vpop.f32.mrf.mxu1  ;;  %v4389_v56 = vadd.f32 %v4388_v8, %v10626_v54  ;;  %v12056_v54 = vld [vmem:[#allocation194_spill] sm:$0xff] }
 0x6fb   :  { %v4894_v37 = vadd.f32 %v4893_v59, %v4725_v24  ;;  %v4558_v28 = vadd.f32 %v4557_v39, %v4389_v56 }
 0x6fd   :  { %5049 = vst [vmem:[%s11338_s3 + $0xa8] sm:$0xff] %v4894_v37  ;;  %v12061_v37 = vld [vmem:[#allocation199_spill] sm:$0xff] }
 0x700   :  { %v4726_v27 = vpop.f32.mrf.mxu2  ;;  %v4391_v7 = vpop.f32.mrf.mxu0 }
 0x701   :  { %v4727_v31 = vadd.f32 %v4726_v27, %v4558_v28  ;;  %v4895_v33 = vpop.f32.mrf.mxu3  ;;  %v4560_v51 = vpop.f32.mrf.mxu1  ;;  %v4392_v9 = vadd.f32 %v4391_v7, %v10651_v30 }
 0x703   :  { %v4896_v13 = vadd.f32 %v4895_v33, %v4727_v31  ;;  %4430 = vmatmul.bf16.gmra.mxu0 %v9503_v45  ;;  %v4561_v2 = vadd.f32 %v4560_v51, %v4392_v9 }
 0x704   :  { %4599 = vmatmul.bf16.gmra.mxu1 %v12056_v54 }
 0x705   :  { %5051 = vst [vmem:[%s11338_s3 + $0xb8] sm:$0xff] %v4896_v13  ;;  %4768 = vmatmul.bf16.gmra.mxu2 %v12057_v50 }
 0x706   :  { %4937 = vmatmul.bf16.gmra.mxu3 %v12058_v34 }
 0x708   :  { %v4729_v16 = vpop.f32.mrf.mxu2  ;;  %v4393_v42 = vpop.f32.mrf.mxu0 }
 0x709   :  { %v4730_v46 = vadd.f32 %v4729_v16, %v4561_v2  ;;  %v4898_v60 = vpop.f32.mrf.mxu3  ;;  %v4562_v14 = vpop.f32.mrf.mxu1  ;;  %v4394_v30 = vadd.f32 %v4393_v42, %v10660_v22  ;;  %v12059_v22 = vld [vmem:[#allocation197_spill] sm:$0xff] }
 0x70a   :  { %v12063_v16 = vld [vmem:[#allocation201_spill] sm:$0xff] }
 0x70b   :  { %v4899_v40 = vadd.f32 %v4898_v60, %v4730_v46  ;;  %v4563_v45 = vadd.f32 %v4562_v14, %v4394_v30 }
 0x70d   :  { %5053 = vst [vmem:[%s11338_s3 + $0xc8] sm:$0xff] %v4899_v40 }
 0x710   :  { %v4731_v12 = vpop.f32.mrf.mxu2  ;;  %v4396_v3 = vpop.f32.mrf.mxu0 }
 0x711   :  { %v4732_v58 = vadd.f32 %v4731_v12, %v4563_v45  ;;  %v4900_v38 = vpop.f32.mrf.mxu3  ;;  %v4565_v47 = vpop.f32.mrf.mxu1  ;;  %v4397_v62 = vadd.f32 %v4396_v3, %v10667_v4 }
 0x713   :  { %v4901_v41 = vadd.f32 %v4900_v38, %v4732_v58  ;;  %4435 = vmatmul.bf16.gmra.mxu0 %v9571_v48  ;;  %v4566_v52 = vadd.f32 %v4565_v47, %v4397_v62  ;;  %v12065_v62 = vld [vmem:[#allocation203_spill] sm:$0xff] }
 0x714   :  { %4604 = vmatmul.bf16.gmra.mxu1 %v9573_v43 }
 0x715   :  { %5055 = vst [vmem:[%s11338_s3 + $0xd8] sm:$0xff] %v4901_v41  ;;  %4773 = vmatmul.bf16.gmra.mxu2 %v9575_v17 }
 0x716   :  { %4942 = vmatmul.bf16.gmra.mxu3 %v12059_v22  ;;  %v12066_v22 = vld [vmem:[#allocation204_spill] sm:$0xff] }
 0x718   :  { %v4734_v15 = vpop.f32.mrf.mxu2  ;;  %v4398_v57 = vpop.f32.mrf.mxu0 }
 0x719   :  { %v4735_v36 = vadd.f32 %v4734_v15, %v4566_v52  ;;  %v4903_v0 = vpop.f32.mrf.mxu3  ;;  %v4567_v53 = vpop.f32.mrf.mxu1  ;;  %v4399_v4 = vadd.f32 %v4398_v57, %v10670_v49  ;;  %v12060_v49 = vld [vmem:[#allocation198_spill] sm:$0xff] }
 0x71b   :  { %v4904_v5 = vadd.f32 %v4903_v0, %v4735_v36  ;;  %v4568_v48 = vadd.f32 %v4567_v53, %v4399_v4 }
 0x71d   :  { %5057 = vst [vmem:[%s11338_s3 + $0xe8] sm:$0xff] %v4904_v5 }
 0x720   :  { %v4736_v55 = vpop.f32.mrf.mxu2  ;;  %v4401_v17 = vpop.f32.mrf.mxu0 }
 0x721   :  { %v4737_v43 = vadd.f32 %v4736_v55, %v4568_v48  ;;  %v4905_v24 = vpop.f32.mrf.mxu3  ;;  %v4570_v59 = vpop.f32.mrf.mxu1  ;;  %v4402_v39 = vadd.f32 %v4401_v17, %v10677_v61 }
 0x723   :  { %v4906_v8 = vadd.f32 %v4905_v24, %v4737_v43  ;;  %4440 = vmatmul.bf16.gmra.mxu0 %v9615_v26  ;;  %v4571_v56 = vadd.f32 %v4570_v59, %v4402_v39  ;;  %v12069_v39 = vld [vmem:[#allocation207_spill] sm:$0xff] }
 0x724   :  { %4609 = vmatmul.bf16.gmra.mxu1 %v9617_v18 }
 0x725   :  { %5059 = vst [vmem:[%s11338_s3 + $0xf8] sm:$0xff] %v4906_v8  ;;  %4778 = vmatmul.bf16.gmra.mxu2 %v12060_v49  ;;  %v12068_v8 = vld [vmem:[#allocation206_spill] sm:$0xff] }
 0x726   :  { %4947 = vmatmul.bf16.gmra.mxu3 %v12061_v37 }
 0x728   :  { %v4739_v28 = vpop.f32.mrf.mxu2  ;;  %v4403_v33 = vpop.f32.mrf.mxu0 }
 0x729   :  { %v4740_v27 = vadd.f32 %v4739_v28, %v4571_v56  ;;  %v4908_v31 = vpop.f32.mrf.mxu3  ;;  %v4572_v7 = vpop.f32.mrf.mxu1  ;;  %v4404_v61 = vadd.f32 %v4403_v33, %v10680_v21  ;;  %v12062_v21 = vld [vmem:[#allocation200_spill] sm:$0xff] }
 0x72b   :  { %v4909_v51 = vadd.f32 %v4908_v31, %v4740_v27  ;;  %v4573_v26 = vadd.f32 %v4572_v7, %v4404_v61 }
 0x72d   :  { %5061 = vst [vmem:[%s11338_s3 + $0x108] sm:$0xff] %v4909_v51 }
 0x730   :  { %v4741_v13 = vpop.f32.mrf.mxu2  ;;  %v4406_v54 = vpop.f32.mrf.mxu0 }
 0x731   :  { %v4742_v18 = vadd.f32 %v4741_v13, %v4573_v26  ;;  %v4910_v9 = vpop.f32.mrf.mxu3  ;;  %v4575_v50 = vpop.f32.mrf.mxu1  ;;  %v4407_v2 = vadd.f32 %v4406_v54, %v10687_v6  ;;  %v12071_v54 = vld [vmem:[#allocation140_spill] sm:$0xff] }
 0x733   :  { %v4911_v34 = vadd.f32 %v4910_v9, %v4742_v18  ;;  %4445 = vmatmul.bf16.gmra.mxu0 %v9659_v35  ;;  %v4576_v46 = vadd.f32 %v4575_v50, %v4407_v2  ;;  %v12073_v2 = vld [vmem:[#allocation209_spill] sm:$0xff] }
 0x734   :  { %4614 = vmatmul.bf16.gmra.mxu1 %v9661_v44 }
 0x735   :  { %5063 = vst [vmem:[%s11338_s3 + $0x118] sm:$0xff] %v4911_v34  ;;  %4783 = vmatmul.bf16.gmra.mxu2 %v12062_v21  ;;  %v12072_v34 = vld [vmem:[#allocation208_spill] sm:$0xff]  ;;  %v12074_v21 = vld [vmem:[#allocation210_spill] sm:$0xff] }
 0x736   :  { %4952 = vmatmul.bf16.gmra.mxu3 %v12063_v16  ;;  %v12075_v16 = vld [vmem:[#allocation211_spill] sm:$0xff] }
 0x738   :  { %v4744_v60 = vpop.f32.mrf.mxu2  ;;  %v4408_v40 = vpop.f32.mrf.mxu0 }
 0x739   :  { %v4745_v42 = vadd.f32 %v4744_v60, %v4576_v46  ;;  %v4913_v14 = vpop.f32.mrf.mxu3  ;;  %v4577_v30 = vpop.f32.mrf.mxu1  ;;  %v4409_v6 = vadd.f32 %v4408_v40, %v10690_v1  ;;  %v12064_v1 = vld [vmem:[#allocation202_spill] sm:$0xff] }
 0x73b   :  { %v4914_v45 = vadd.f32 %v4913_v14, %v4745_v42  ;;  %v4578_v35 = vadd.f32 %v4577_v30, %v4409_v6  ;;  %v12076_v6 = vld [vmem:[#allocation141_spill] sm:$0xff] }
 0x73d   :  { %5065 = vst [vmem:[%s11338_s3 + $0x128] sm:$0xff] %v4914_v45 }
 0x740   :  { %v4746_v12 = vpop.f32.mrf.mxu2  ;;  %v4411_v38 = vpop.f32.mrf.mxu0 }
 0x741   :  { %v4747_v44 = vadd.f32 %v4746_v12, %v4578_v35  ;;  %v4915_v58 = vpop.f32.mrf.mxu3  ;;  %v4580_v3 = vpop.f32.mrf.mxu1  ;;  %v4412_v41 = vadd.f32 %v4411_v38, %v10715_v32 }
 0x743   :  { %v4916_v47 = vadd.f32 %v4915_v58, %v4747_v44  ;;  %4450 = vmatmul.bf16.gmra.mxu0 %v9703_v23  ;;  %v4581_v52 = vadd.f32 %v4580_v3, %v4412_v41 }
 0x744   :  { %4619 = vmatmul.bf16.gmra.mxu1 %v12064_v1  ;;  %v12077_v1 = vld [vmem:[#allocation2_spill] sm:$0xff] }
 0x745   :  { %5067 = vst [vmem:[%s11338_s3 + $0x138] sm:$0xff] %v4916_v47  ;;  %4788 = vmatmul.bf16.gmra.mxu2 %v12065_v62 }
 0x746   :  { %4957 = vmatmul.bf16.gmra.mxu3 %v12066_v22  ;;  %v12078_v22 = vld [vmem:[#allocation212_spill] sm:$0xff] }
 0x748   :  { %v4749_v15 = vpop.f32.mrf.mxu2  ;;  %v4413_v57 = vpop.f32.mrf.mxu0 }
 0x749   :  { %v4750_v36 = vadd.f32 %v4749_v15, %v4581_v52  ;;  %v4918_v0 = vpop.f32.mrf.mxu3  ;;  %v4582_v53 = vpop.f32.mrf.mxu1  ;;  %v4414_v32 = vadd.f32 %v4413_v57, %v10724_v25  ;;  %v12067_v25 = vld [vmem:[#allocation205_spill] sm:$0xff]  ;;  %v12080_v15 = vld [vmem:[#allocation214_spill] sm:$0xff] }
 0x74a   :  { %v12079_v52 = vld [vmem:[#allocation213_spill] sm:$0xff] }
 0x74b   :  { %v4919_v5 = vadd.f32 %v4918_v0, %v4750_v36  ;;  %v4583_v23 = vadd.f32 %v4582_v53, %v4414_v32  ;;  %v12081_v36 = vld [vmem:[#allocation215_spill] sm:$0xff] }
 0x74d   :  { %5069 = vst [vmem:[%s11338_s3 + $0x148] sm:$0xff] %v4919_v5 }
 0x750   :  { %v4751_v4 = vpop.f32.mrf.mxu2  ;;  %v4416_v43 = vpop.f32.mrf.mxu0 }
 0x751   :  { %v4752_v48 = vadd.f32 %v4751_v4, %v4583_v23  ;;  %v4920_v55 = vpop.f32.mrf.mxu3  ;;  %v4585_v24 = vpop.f32.mrf.mxu1  ;;  %v4417_v59 = vadd.f32 %v4416_v43, %v10731_v19  ;;  %v12070_v19 = vld [vmem:[#allocation135_spill] sm:$0xff] }
 0x753   :  { %v4921_v17 = vadd.f32 %v4920_v55, %v4752_v48  ;;  %4455 = vmatmul.bf16.gmra.mxu0 %v9771_v29  ;;  %v4586_v49 = vadd.f32 %v4585_v24, %v4417_v59  ;;  %v12082_v48 = vld [vmem:[#allocation3_spill] sm:$0xff] }
 0x754   :  { %4624 = vmatmul.bf16.gmra.mxu1 %v12067_v25 }
 0x755   :  { %5071 = vst [vmem:[%s11338_s3 + $0x158] sm:$0xff] %v4921_v17  ;;  %4793 = vmatmul.bf16.gmra.mxu2 %v12068_v8 }
 0x756   :  { %4962 = vmatmul.bf16.gmra.mxu3 %v12069_v39 }
 0x758   :  { %v4754_v37 = vpop.f32.mrf.mxu2  ;;  %v4418_v27 = vpop.f32.mrf.mxu0 }
 0x759   :  { %v4755_v56 = vadd.f32 %v4754_v37, %v4586_v49  ;;  %v4923_v28 = vpop.f32.mrf.mxu3  ;;  %v4587_v31 = vpop.f32.mrf.mxu1  ;;  %v4419_v7 = vadd.f32 %v4418_v27, %v12070_v19  ;;  %v12083_v49 = vld [vmem:[#allocation4_spill] sm:$0xff]  ;;  %v12086_v27 = vld [vmem:[#allocation218_spill] sm:$0xff] }
 0x75b   :  { %v4924_v33 = vadd.f32 %v4923_v28, %v4755_v56  ;;  %v4588_v29 = vadd.f32 %v4587_v31, %v4419_v7  ;;  %v12084_v56 = vld [vmem:[#allocation216_spill] sm:$0xff]  ;;  %v12085_v28 = vld [vmem:[#allocation217_spill] sm:$0xff]  ;;  %v12087_v31 = vld [vmem:[#allocation219_spill] sm:$0xff] }
 0x75d   :  { %5073 = vst [vmem:[%s11338_s3 + $0x168] sm:$0xff] %v4924_v33 }
 0x760   :  { %v4756_v51 = vpop.f32.mrf.mxu2  ;;  %v4421_v13 = vpop.f32.mrf.mxu0 }
 0x761   :  { %v4757_v61 = vadd.f32 %v4756_v51, %v4588_v29  ;;  %v4925_v26 = vpop.f32.mrf.mxu3  ;;  %v4590_v18 = vpop.f32.mrf.mxu1  ;;  %v4422_v50 = vadd.f32 %v4421_v13, %v12071_v54  ;;  %v12088_v13 = vld [vmem:[#allocation5_spill] sm:$0xff] }
 0x763   :  { %v4926_v9 = vadd.f32 %v4925_v26, %v4757_v61  ;;  %4460 = vmatmul.bf16.gmra.mxu0 %v12072_v34  ;;  %v4591_v46 = vadd.f32 %v4590_v18, %v4422_v50 }
 0x764   :  { %4629 = vmatmul.bf16.gmra.mxu1 %v12073_v2 }
 0x765   :  { %5075 = vst [vmem:[%s11338_s3 + $0x178] sm:$0xff] %v4926_v9  ;;  %4798 = vmatmul.bf16.gmra.mxu2 %v12074_v21 }
 0x766   :  { %4967 = vmatmul.bf16.gmra.mxu3 %v12075_v16 }
 0x768   :  { %v4759_v60 = vpop.f32.mrf.mxu2  ;;  %v4423_v40 = vpop.f32.mrf.mxu0 }
 0x769   :  { %v4760_v42 = vadd.f32 %v4759_v60, %v4591_v46  ;;  %v4928_v14 = vpop.f32.mrf.mxu3  ;;  %v4592_v30 = vpop.f32.mrf.mxu1  ;;  %v4424_v35 = vadd.f32 %v4423_v40, %v12076_v6  ;;  %v12089_v46 = vld [vmem:[#allocation146_spill] sm:$0xff] }
 0x76a   :  { %v12092_v40 = vld [vmem:[#allocation222_spill] sm:$0xff] }
 0x76b   :  { %v4929_v45 = vadd.f32 %v4928_v14, %v4760_v42  ;;  %v4593_v12 = vadd.f32 %v4592_v30, %v4424_v35  ;;  %v12090_v42 = vld [vmem:[#allocation220_spill] sm:$0xff]  ;;  %v12091_v14 = vld [vmem:[#allocation221_spill] sm:$0xff]  ;;  %v12093_v30 = vld [vmem:[#allocation223_spill] sm:$0xff] }
 0x76d   :  { %5077 = vst [vmem:[%s11338_s3 + $0x188] sm:$0xff] %v4929_v45 }
 0x770   :  { %v4761_v44 = vpop.f32.mrf.mxu2  ;;  %v4426_v3 = vpop.f32.mrf.mxu0 }
 0x771   :  { %v4762_v58 = vadd.f32 %v4761_v44, %v4593_v12  ;;  %v4930_v38 = vpop.f32.mrf.mxu3  ;;  %v4595_v47 = vpop.f32.mrf.mxu1  ;;  %v4427_v62 = vadd.f32 %v4426_v3, %v12077_v1  ;;  %v12094_v3 = vld [vmem:[#allocation147_spill] sm:$0xff] }
 0x773   :  { %v4931_v41 = vadd.f32 %v4930_v38, %v4762_v58  ;;  %4465 = vmatmul.bf16.gmra.mxu0 %v12078_v22  ;;  %v4596_v0 = vadd.f32 %v4595_v47, %v4427_v62 }
 0x774   :  { %4634 = vmatmul.bf16.gmra.mxu1 %v12079_v52 }
 0x775   :  { %5079 = vst [vmem:[%s11338_s3 + $0x198] sm:$0xff] %v4931_v41  ;;  %4803 = vmatmul.bf16.gmra.mxu2 %v12080_v15 }
 0x776   :  { %4972 = vmatmul.bf16.gmra.mxu3 %v12081_v36 }
 0x778   :  { %v4764_v57 = vpop.f32.mrf.mxu2  ;;  %v4428_v32 = vpop.f32.mrf.mxu0 }
 0x779   :  { %v4765_v53 = vadd.f32 %v4764_v57, %v4596_v0  ;;  %v4933_v5 = vpop.f32.mrf.mxu3  ;;  %v4597_v23 = vpop.f32.mrf.mxu1  ;;  %v4429_v55 = vadd.f32 %v4428_v32, %v12082_v48  ;;  %v12095_v0 = vld [vmem:[#allocation6_spill] sm:$0xff] }
 0x77a   :  { %v12098_v32 = vld [vmem:[#allocation226_spill] sm:$0xff] }
 0x77b   :  { %v4934_v4 = vadd.f32 %v4933_v5, %v4765_v53  ;;  %v4598_v43 = vadd.f32 %v4597_v23, %v4429_v55  ;;  %v12096_v53 = vld [vmem:[#allocation224_spill] sm:$0xff]  ;;  %v12097_v5 = vld [vmem:[#allocation225_spill] sm:$0xff]  ;;  %v12099_v23 = vld [vmem:[#allocation227_spill] sm:$0xff] }
 0x77d   :  { %5081 = vst [vmem:[%s11338_s3 + $0x1a8] sm:$0xff] %v4934_v4 }
 0x780   :  { %v4766_v24 = vpop.f32.mrf.mxu2  ;;  %v4431_v25 = vpop.f32.mrf.mxu0 }
 0x781   :  { %v4767_v17 = vadd.f32 %v4766_v24, %v4598_v43  ;;  %v4935_v59 = vpop.f32.mrf.mxu3  ;;  %v4600_v8 = vpop.f32.mrf.mxu1  ;;  %v4432_v37 = vadd.f32 %v4431_v25, %v12083_v49  ;;  %v12100_v25 = vld [vmem:[#allocation7_spill] sm:$0xff] }
 0x783   :  { %v4936_v39 = vadd.f32 %v4935_v59, %v4767_v17  ;;  %4470 = vmatmul.bf16.gmra.mxu0 %v12084_v56  ;;  %v4601_v33 = vadd.f32 %v4600_v8, %v4432_v37 }
 0x784   :  { %4639 = vmatmul.bf16.gmra.mxu1 %v12085_v28 }
 0x785   :  { %5083 = vst [vmem:[%s11338_s3 + $0x1b8] sm:$0xff] %v4936_v39  ;;  %4808 = vmatmul.bf16.gmra.mxu2 %v12086_v27 }
 0x786   :  { %4977 = vmatmul.bf16.gmra.mxu3 %v12087_v31 }
 0x788   :  { %v4769_v19 = vpop.f32.mrf.mxu2  ;;  %v4433_v51 = vpop.f32.mrf.mxu0 }
 0x789   :  { %v4770_v7 = vadd.f32 %v4769_v19, %v4601_v33  ;;  %v4938_v29 = vpop.f32.mrf.mxu3  ;;  %v4602_v61 = vpop.f32.mrf.mxu1  ;;  %v4434_v18 = vadd.f32 %v4433_v51, %v12088_v13  ;;  %v12101_v33 = vld [vmem:[#allocation8_spill] sm:$0xff]  ;;  %v12104_v51 = vld [vmem:[#allocation230_spill] sm:$0xff] }
 0x78b   :  { %v4939_v26 = vadd.f32 %v4938_v29, %v4770_v7  ;;  %v4603_v9 = vadd.f32 %v4602_v61, %v4434_v18  ;;  %v12102_v7 = vld [vmem:[#allocation228_spill] sm:$0xff]  ;;  %v12103_v29 = vld [vmem:[#allocation229_spill] sm:$0xff]  ;;  %v12105_v61 = vld [vmem:[#allocation231_spill] sm:$0xff] }
 0x78d   :  { %5085 = vst [vmem:[%s11338_s3 + $0x1c8] sm:$0xff] %v4939_v26 }
 0x790   :  { %v4771_v54 = vpop.f32.mrf.mxu2  ;;  %v4436_v2 = vpop.f32.mrf.mxu0 }
 0x791   :  { %v4772_v50 = vadd.f32 %v4771_v54, %v4603_v9  ;;  %v4940_v34 = vpop.f32.mrf.mxu3  ;;  %v4605_v21 = vpop.f32.mrf.mxu1  ;;  %v4437_v60 = vadd.f32 %v4436_v2, %v12089_v46  ;;  %v12106_v2 = vld [vmem:[#allocation9_spill] sm:$0xff] }
 0x793   :  { %v4941_v16 = vadd.f32 %v4940_v34, %v4772_v50  ;;  %4475 = vmatmul.bf16.gmra.mxu0 %v12090_v42  ;;  %v4606_v45 = vadd.f32 %v4605_v21, %v4437_v60 }
 0x794   :  { %4644 = vmatmul.bf16.gmra.mxu1 %v12091_v14 }
 0x795   :  { %5087 = vst [vmem:[%s11338_s3 + $0x1d8] sm:$0xff] %v4941_v16  ;;  %4813 = vmatmul.bf16.gmra.mxu2 %v12092_v40 }
 0x796   :  { %4982 = vmatmul.bf16.gmra.mxu3 %v12093_v30 }
 0x798   :  { %v4774_v6 = vpop.f32.mrf.mxu2  ;;  %v4438_v44 = vpop.f32.mrf.mxu0 }
 0x799   :  { %v4775_v35 = vadd.f32 %v4774_v6, %v4606_v45  ;;  %v4943_v12 = vpop.f32.mrf.mxu3  ;;  %v4607_v58 = vpop.f32.mrf.mxu1  ;;  %v4439_v47 = vadd.f32 %v4438_v44, %v12094_v3  ;;  %v12107_v45 = vld [vmem:[#allocation152_spill] sm:$0xff]  ;;  %v12110_v44 = vld [vmem:[#allocation234_spill] sm:$0xff] }
 0x79b   :  { %v4944_v38 = vadd.f32 %v4943_v12, %v4775_v35  ;;  %v4608_v41 = vadd.f32 %v4607_v58, %v4439_v47  ;;  %v12108_v35 = vld [vmem:[#allocation232_spill] sm:$0xff]  ;;  %v12109_v12 = vld [vmem:[#allocation233_spill] sm:$0xff]  ;;  %v12111_v58 = vld [vmem:[#allocation235_spill] sm:$0xff] }
 0x79d   :  { %5089 = vst [vmem:[%s11338_s3 + $0x1e8] sm:$0xff] %v4944_v38 }
 0x7a0   :  { %v4776_v1 = vpop.f32.mrf.mxu2  ;;  %v4441_v52 = vpop.f32.mrf.mxu0 }
 0x7a1   :  { %v4777_v62 = vadd.f32 %v4776_v1, %v4608_v41  ;;  %v4945_v22 = vpop.f32.mrf.mxu3  ;;  %v4610_v15 = vpop.f32.mrf.mxu1  ;;  %v4442_v57 = vadd.f32 %v4441_v52, %v12095_v0  ;;  %v12112_v52 = vld [vmem:[#allocation153_spill] sm:$0xff] }
 0x7a3   :  { %v4946_v36 = vadd.f32 %v4945_v22, %v4777_v62  ;;  %4480 = vmatmul.bf16.gmra.mxu0 %v12096_v53  ;;  %v4611_v4 = vadd.f32 %v4610_v15, %v4442_v57 }
 0x7a4   :  { %4649 = vmatmul.bf16.gmra.mxu1 %v12097_v5 }
 0x7a5   :  { %5091 = vst [vmem:[%s11338_s3 + $0x1f8] sm:$0xff] %v4946_v36  ;;  %4818 = vmatmul.bf16.gmra.mxu2 %v12098_v32 }
 0x7a6   :  { %4987 = vmatmul.bf16.gmra.mxu3 %v12099_v23 }
 0x7a8   :  { %v4779_v48 = vpop.f32.mrf.mxu2  ;;  %v4443_v24 = vpop.f32.mrf.mxu0 }
 0x7a9   :  { %v4780_v55 = vadd.f32 %v4779_v48, %v4611_v4  ;;  %v4948_v43 = vpop.f32.mrf.mxu3  ;;  %v4612_v17 = vpop.f32.mrf.mxu1  ;;  %v4444_v8 = vadd.f32 %v4443_v24, %v12100_v25  ;;  %v12113_v4 = vld [vmem:[#allocation10_spill] sm:$0xff] }
 0x7aa   :  { %v12116_v24 = vld [vmem:[#allocation238_spill] sm:$0xff] }
 0x7ab   :  { %v4949_v59 = vadd.f32 %v4948_v43, %v4780_v55  ;;  %v4613_v39 = vadd.f32 %v4612_v17, %v4444_v8  ;;  %v12114_v55 = vld [vmem:[#allocation236_spill] sm:$0xff]  ;;  %v12115_v43 = vld [vmem:[#allocation237_spill] sm:$0xff]  ;;  %v12117_v17 = vld [vmem:[#allocation239_spill] sm:$0xff] }
 0x7ad   :  { %5093 = vst [vmem:[%s11338_s3 + $0x208] sm:$0xff] %v4949_v59 }
 0x7b0   :  { %v4781_v49 = vpop.f32.mrf.mxu2  ;;  %v4446_v28 = vpop.f32.mrf.mxu0 }
 0x7b1   :  { %v4782_v37 = vadd.f32 %v4781_v49, %v4613_v39  ;;  %v4950_v56 = vpop.f32.mrf.mxu3  ;;  %v4615_v27 = vpop.f32.mrf.mxu1  ;;  %v4447_v19 = vadd.f32 %v4446_v28, %v12101_v33  ;;  %v12118_v28 = vld [vmem:[#allocation11_spill] sm:$0xff] }
 0x7b3   :  { %v4951_v31 = vadd.f32 %v4950_v56, %v4782_v37  ;;  %4485 = vmatmul.bf16.gmra.mxu0 %v12102_v7  ;;  %v4616_v26 = vadd.f32 %v4615_v27, %v4447_v19 }
 0x7b4   :  { %4654 = vmatmul.bf16.gmra.mxu1 %v12103_v29 }
 0x7b5   :  { %5095 = vst [vmem:[%s11338_s3 + $0x218] sm:$0xff] %v4951_v31  ;;  %4823 = vmatmul.bf16.gmra.mxu2 %v12104_v51 }
 0x7b6   :  { %4992 = vmatmul.bf16.gmra.mxu3 %v12105_v61 }
 0x7b8   :  { %v4784_v13 = vpop.f32.mrf.mxu2  ;;  %v4448_v54 = vpop.f32.mrf.mxu0 }
 0x7b9   :  { %v4785_v18 = vadd.f32 %v4784_v13, %v4616_v26  ;;  %v4953_v9 = vpop.f32.mrf.mxu3  ;;  %v4617_v50 = vpop.f32.mrf.mxu1  ;;  %v4449_v21 = vadd.f32 %v4448_v54, %v12106_v2  ;;  %v12119_v26 = vld [vmem:[#allocation12_spill] sm:$0xff]  ;;  %v12122_v54 = vld [vmem:[#allocation242_spill] sm:$0xff] }
 0x7bb   :  { %v4954_v34 = vadd.f32 %v4953_v9, %v4785_v18  ;;  %v4618_v16 = vadd.f32 %v4617_v50, %v4449_v21  ;;  %v12120_v18 = vld [vmem:[#allocation240_spill] sm:$0xff]  ;;  %v12121_v9 = vld [vmem:[#allocation241_spill] sm:$0xff]  ;;  %v12123_v50 = vld [vmem:[#allocation243_spill] sm:$0xff] }
 0x7bd   :  { %5097 = vst [vmem:[%s11338_s3 + $0x228] sm:$0xff] %v4954_v34 }
 0x7c0   :  { %v4786_v46 = vpop.f32.mrf.mxu2  ;;  %v4451_v14 = vpop.f32.mrf.mxu0 }
 0x7c1   :  { %v4787_v60 = vadd.f32 %v4786_v46, %v4618_v16  ;;  %v4955_v42 = vpop.f32.mrf.mxu3  ;;  %v4620_v40 = vpop.f32.mrf.mxu1  ;;  %v4452_v6 = vadd.f32 %v4451_v14, %v12107_v45  ;;  %v12124_v14 = vld [vmem:[#allocation13_spill] sm:$0xff] }
 0x7c3   :  { %v4956_v30 = vadd.f32 %v4955_v42, %v4787_v60  ;;  %4490 = vmatmul.bf16.gmra.mxu0 %v12108_v35  ;;  %v4621_v38 = vadd.f32 %v4620_v40, %v4452_v6 }
 0x7c4   :  { %4659 = vmatmul.bf16.gmra.mxu1 %v12109_v12 }
 0x7c5   :  { %5099 = vst [vmem:[%s11338_s3 + $0x238] sm:$0xff] %v4956_v30  ;;  %4828 = vmatmul.bf16.gmra.mxu2 %v12110_v44 }
 0x7c6   :  { %4997 = vmatmul.bf16.gmra.mxu3 %v12111_v58 }
 0x7c8   :  { %v4789_v3 = vpop.f32.mrf.mxu2  ;;  %v4453_v1 = vpop.f32.mrf.mxu0 }
 0x7c9   :  { %v4790_v47 = vadd.f32 %v4789_v3, %v4621_v38  ;;  %v4958_v41 = vpop.f32.mrf.mxu3  ;;  %v4622_v62 = vpop.f32.mrf.mxu1  ;;  %v4454_v15 = vadd.f32 %v4453_v1, %v12112_v52  ;;  %v12125_v38 = vld [vmem:[#allocation158_spill] sm:$0xff]  ;;  %v12128_v1 = vld [vmem:[#allocation245_spill] sm:$0xff] }
 0x7cb   :  { %v4959_v22 = vadd.f32 %v4958_v41, %v4790_v47  ;;  %v4623_v36 = vadd.f32 %v4622_v62, %v4454_v15  ;;  %v12126_v47 = vld [vmem:[#allocation122_spill] sm:$0xff]  ;;  %v12127_v41 = vld [vmem:[#allocation244_spill] sm:$0xff] }
 0x7cc   :  { %v12129_v62 = vld [vmem:[#allocation246_spill] sm:$0xff] }
 0x7cd   :  { %5101 = vst [vmem:[%s11338_s3 + $0x248] sm:$0xff] %v4959_v22 }
 0x7d0   :  { %v4791_v0 = vpop.f32.mrf.mxu2  ;;  %v4456_v5 = vpop.f32.mrf.mxu0 }
 0x7d1   :  { %v4792_v57 = vadd.f32 %v4791_v0, %v4623_v36  ;;  %v4960_v53 = vpop.f32.mrf.mxu3  ;;  %v4625_v32 = vpop.f32.mrf.mxu1  ;;  %v4457_v48 = vadd.f32 %v4456_v5, %v12113_v4  ;;  %v12130_v5 = vld [vmem:[#allocation159_spill] sm:$0xff] }
 0x7d3   :  { %v4961_v23 = vadd.f32 %v4960_v53, %v4792_v57  ;;  %4495 = vmatmul.bf16.gmra.mxu0 %v12114_v55  ;;  %v4626_v59 = vadd.f32 %v4625_v32, %v4457_v48 }
 0x7d4   :  { %4664 = vmatmul.bf16.gmra.mxu1 %v12115_v43 }
 0x7d5   :  { %5103 = vst [vmem:[%s11338_s3 + $0x258] sm:$0xff] %v4961_v23  ;;  %4833 = vmatmul.bf16.gmra.mxu2 %v12116_v24 }
 0x7d6   :  { %5002 = vmatmul.bf16.gmra.mxu3 %v12117_v17 }
 0x7d8   :  { %v4794_v25 = vpop.f32.mrf.mxu2  ;;  %v4458_v49 = vpop.f32.mrf.mxu0 }
 0x7d9   :  { %v4795_v8 = vadd.f32 %v4794_v25, %v4626_v59  ;;  %v4963_v39 = vpop.f32.mrf.mxu3  ;;  %v4627_v37 = vpop.f32.mrf.mxu1  ;;  %v4459_v27 = vadd.f32 %v4458_v49, %v12118_v28  ;;  %v12131_v59 = vld [vmem:[#allocation14_spill] sm:$0xff]  ;;  %v12134_v49 = vld [vmem:[#allocation247_spill] sm:$0xff] }
 0x7db   :  { %v4964_v56 = vadd.f32 %v4963_v39, %v4795_v8  ;;  %v4628_v31 = vadd.f32 %v4627_v37, %v4459_v27  ;;  %v12132_v8 = vld [vmem:[#allocation123_spill] sm:$0xff]  ;;  %v12133_v39 = vld [vmem:[#allocation128_spill] sm:$0xff] }
 0x7dc   :  { %v12135_v37 = vld [vmem:[#allocation248_spill] sm:$0xff] }
 0x7dd   :  { %5105 = vst [vmem:[%s11338_s3 + $0x268] sm:$0xff] %v4964_v56 }
 0x7e0   :  { %v4796_v33 = vpop.f32.mrf.mxu2  ;;  %v4461_v29 = vpop.f32.mrf.mxu0 }
 0x7e1   :  { %v4797_v19 = vadd.f32 %v4796_v33, %v4628_v31  ;;  %v4965_v7 = vpop.f32.mrf.mxu3  ;;  %v4630_v51 = vpop.f32.mrf.mxu1  ;;  %v4462_v13 = vadd.f32 %v4461_v29, %v12119_v26  ;;  %v12136_v29 = vld [vmem:[#allocation15_spill] sm:$0xff] }
 0x7e3   :  { %v4966_v61 = vadd.f32 %v4965_v7, %v4797_v19  ;;  %4500 = vmatmul.bf16.gmra.mxu0 %v12120_v18  ;;  %v4631_v34 = vadd.f32 %v4630_v51, %v4462_v13 }
 0x7e4   :  { %4669 = vmatmul.bf16.gmra.mxu1 %v12121_v9 }
 0x7e5   :  { %5107 = vst [vmem:[%s11338_s3 + $0x278] sm:$0xff] %v4966_v61  ;;  %4838 = vmatmul.bf16.gmra.mxu2 %v12122_v54 }
 0x7e6   :  { %5007 = vmatmul.bf16.gmra.mxu3 %v12123_v50 }
 0x7e8   :  { %v4799_v2 = vpop.f32.mrf.mxu2  ;;  %v4463_v46 = vpop.f32.mrf.mxu0 }
 0x7e9   :  { %v4800_v21 = vadd.f32 %v4799_v2, %v4631_v34  ;;  %v4968_v16 = vpop.f32.mrf.mxu3  ;;  %v4632_v60 = vpop.f32.mrf.mxu1  ;;  %v4464_v40 = vadd.f32 %v4463_v46, %v12124_v14  ;;  %v12137_v34 = vld [vmem:[#allocation16_spill] sm:$0xff]  ;;  %v12140_v46 = vld [vmem:[#allocation249_spill] sm:$0xff] }
 0x7eb   :  { %v4969_v42 = vadd.f32 %v4968_v16, %v4800_v21  ;;  %v4633_v30 = vadd.f32 %v4632_v60, %v4464_v40  ;;  %v12138_v21 = vld [vmem:[#allocation129_spill] sm:$0xff]  ;;  %v12139_v16 = vld [vmem:[#allocation134_spill] sm:$0xff] }
 0x7ec   :  { %v12141_v60 = vld [vmem:[#allocation250_spill] sm:$0xff] }
 0x7ed   :  { %5109 = vst [vmem:[%s11338_s3 + $0x288] sm:$0xff] %v4969_v42 }
 0x7f0   :  { %v4801_v45 = vpop.f32.mrf.mxu2  ;;  %v4466_v12 = vpop.f32.mrf.mxu0 }
 0x7f1   :  { %v4802_v6 = vadd.f32 %v4801_v45, %v4633_v30  ;;  %v4970_v35 = vpop.f32.mrf.mxu3  ;;  %v4635_v44 = vpop.f32.mrf.mxu1  ;;  %v4467_v3 = vadd.f32 %v4466_v12, %v12125_v38  ;;  %v12142_v12 = vld [vmem:[#allocation17_spill] sm:$0xff] }
 0x7f3   :  { %v4971_v58 = vadd.f32 %v4970_v35, %v4802_v6  ;;  %4505 = vmatmul.bf16.gmra.mxu0 %v12126_v47  ;;  %v4636_v22 = vadd.f32 %v4635_v44, %v4467_v3 }
 0x7f4   :  { %4674 = vmatmul.bf16.gmra.mxu1 %v12127_v41 }
 0x7f5   :  { %5111 = vst [vmem:[%s11338_s3 + $0x298] sm:$0xff] %v4971_v58  ;;  %4843 = vmatmul.bf16.gmra.mxu2 %v12128_v1 }
 0x7f6   :  { %5012 = vmatmul.bf16.gmra.mxu3 %v12129_v62 }
 0x7f8   :  { %v4804_v52 = vpop.f32.mrf.mxu2  ;;  %v4468_v0 = vpop.f32.mrf.mxu0 }
 0x7f9   :  { %v4805_v15 = vadd.f32 %v4804_v52, %v4636_v22  ;;  %v4973_v36 = vpop.f32.mrf.mxu3  ;;  %v4637_v57 = vpop.f32.mrf.mxu1  ;;  %v4469_v32 = vadd.f32 %v4468_v0, %v12130_v5  ;;  %v12143_v22 = vld [vmem:[#allocation164_spill] sm:$0xff] }
 0x7fb   :  { %v4974_v53 = vadd.f32 %v4973_v36, %v4805_v15  ;;  %v4638_v23 = vadd.f32 %v4637_v57, %v4469_v32 }
 0x7fd   :  { %5113 = vst [vmem:[%s11338_s3 + $0x2a8] sm:$0xff] %v4974_v53 }
 0x800   :  { %v4806_v4 = vpop.f32.mrf.mxu2  ;;  %v4471_v43 = vpop.f32.mrf.mxu0 }
 0x801   :  { %v4807_v48 = vadd.f32 %v4806_v4, %v4638_v23  ;;  %v4975_v55 = vpop.f32.mrf.mxu3  ;;  %v4640_v24 = vpop.f32.mrf.mxu1  ;;  %v4472_v25 = vadd.f32 %v4471_v43, %v12131_v59  ;;  %v12144_v23 = vld [vmem:[#allocation165_spill] sm:$0xff] }
 0x803   :  { %v4976_v17 = vadd.f32 %v4975_v55, %v4807_v48  ;;  %4510 = vmatmul.bf16.gmra.mxu0 %v12132_v8  ;;  %v4641_v56 = vadd.f32 %v4640_v24, %v4472_v25  ;;  %v12145_v8 = vld [vmem:[#allocation18_spill] sm:$0xff] }
 0x804   :  { %4679 = vmatmul.bf16.gmra.mxu1 %v12133_v39 }
 0x805   :  { %5115 = vst [vmem:[%s11338_s3 + $0x2b8] sm:$0xff] %v4976_v17  ;;  %4848 = vmatmul.bf16.gmra.mxu2 %v12134_v49 }
 0x806   :  { %5017 = vmatmul.bf16.gmra.mxu3 %v12135_v37 }
 0x808   :  { %v4809_v28 = vpop.f32.mrf.mxu2  ;;  %v4473_v33 = vpop.f32.mrf.mxu0 }
 0x809   :  { %v4810_v27 = vadd.f32 %v4809_v28, %v4641_v56  ;;  %v4978_v31 = vpop.f32.mrf.mxu3  ;;  %v4642_v19 = vpop.f32.mrf.mxu1  ;;  %v4474_v51 = vadd.f32 %v4473_v33, %v12136_v29 }
 0x80b   :  { %v4979_v7 = vadd.f32 %v4978_v31, %v4810_v27  ;;  %v4643_v61 = vadd.f32 %v4642_v19, %v4474_v51  ;;  %v12146_v19 = vld [vmem:[#allocation19_spill] sm:$0xff] }
 0x80d   :  { %5117 = vst [vmem:[%s11338_s3 + $0x2c8] sm:$0xff] %v4979_v7 }
 0x810   :  { %v4811_v26 = vpop.f32.mrf.mxu2  ;;  %v4476_v9 = vpop.f32.mrf.mxu0 }
 0x811   :  { %v4812_v13 = vadd.f32 %v4811_v26, %v4643_v61  ;;  %v4980_v18 = vpop.f32.mrf.mxu3  ;;  %v4645_v54 = vpop.f32.mrf.mxu1  ;;  %v4477_v2 = vadd.f32 %v4476_v9, %v12137_v34 }
 0x813   :  { %v4981_v50 = vadd.f32 %v4980_v18, %v4812_v13  ;;  %4515 = vmatmul.bf16.gmra.mxu0 %v12138_v21  ;;  %v4646_v42 = vadd.f32 %v4645_v54, %v4477_v2  ;;  %v12147_v54 = vld [vmem:[#allocation20_spill] sm:$0xff] }
 0x814   :  { %4684 = vmatmul.bf16.gmra.mxu1 %v12139_v16 }
 0x815   :  { %5119 = vst [vmem:[%s11338_s3 + $0x2d8] sm:$0xff] %v4981_v50  ;;  %4853 = vmatmul.bf16.gmra.mxu2 %v12140_v46 }
 0x816   :  { %5022 = vmatmul.bf16.gmra.mxu3 %v12141_v60 }
 0x818   :  { %v4814_v14 = vpop.f32.mrf.mxu2  ;;  %v4478_v45 = vpop.f32.mrf.mxu0 }
 0x819   :  { %v4815_v40 = vadd.f32 %v4814_v14, %v4646_v42  ;;  %v4983_v30 = vpop.f32.mrf.mxu3  ;;  %v4647_v6 = vpop.f32.mrf.mxu1  ;;  %v4479_v44 = vadd.f32 %v4478_v45, %v12142_v12  ;;  %v12148_v14 = vld [vmem:[#allocation21_spill] sm:$0xff] }
 0x81b   :  { %v4984_v35 = vadd.f32 %v4983_v30, %v4815_v40  ;;  %v4648_v58 = vadd.f32 %v4647_v6, %v4479_v44 }
 0x81d   :  { %5121 = vst [vmem:[%s11338_s3 + $0x2e8] sm:$0xff] %v4984_v35 }
 0x820   :  { %v4816_v38 = vpop.f32.mrf.mxu2  ;;  %v4481_v41 = vpop.f32.mrf.mxu0 }
 0x821   :  { %v4817_v3 = vadd.f32 %v4816_v38, %v4648_v58  ;;  %v4985_v47 = vpop.f32.mrf.mxu3  ;;  %v4650_v1 = vpop.f32.mrf.mxu1  ;;  %v4482_v52 = vadd.f32 %v4481_v41, %v12143_v22  ;;  %v12149_v38 = vld [vmem:[#allocation170_spill] sm:$0xff] }
 0x823   :  { %v4986_v62 = vadd.f32 %v4985_v47, %v4817_v3  ;;  %v4651_v15 = vadd.f32 %v4650_v1, %v4482_v52 }
 0x825   :  { %5123 = vst [vmem:[%s11338_s3 + $0x2f8] sm:$0xff] %v4986_v62 }
 0x828   :  { %v4819_v36 = vpop.f32.mrf.mxu2  ;;  %v4483_v53 = vpop.f32.mrf.mxu0 }
 0x829   :  { %v4820_v0 = vadd.f32 %v4819_v36, %v4651_v15  ;;  %v4988_v57 = vpop.f32.mrf.mxu3  ;;  %v4652_v5 = vpop.f32.mrf.mxu1  ;;  %v4484_v4 = vadd.f32 %v4483_v53, %v12144_v23  ;;  %v12150_v36 = vld [vmem:[#allocation171_spill] sm:$0xff] }
 0x82b   :  { %v4989_v32 = vadd.f32 %v4988_v57, %v4820_v0  ;;  %v4653_v48 = vadd.f32 %v4652_v5, %v4484_v4 }
 0x82d   :  { %5125 = vst [vmem:[%s11338_s3 + $0x308] sm:$0xff] %v4989_v32 }
 0x830   :  { %v4821_v55 = vpop.f32.mrf.mxu2  ;;  %v4486_v17 = vpop.f32.mrf.mxu0 }
 0x831   :  { %v4822_v43 = vadd.f32 %v4821_v55, %v4653_v48  ;;  %v4990_v24 = vpop.f32.mrf.mxu3  ;;  %v4655_v59 = vpop.f32.mrf.mxu1  ;;  %v4487_v39 = vadd.f32 %v4486_v17, %v12145_v8  ;;  %v12151_v55 = vld [vmem:[#allocation22_spill] sm:$0xff] }
 0x833   :  { %v4991_v25 = vadd.f32 %v4990_v24, %v4822_v43  ;;  %v4656_v49 = vadd.f32 %v4655_v59, %v4487_v39 }
 0x835   :  { %5127 = vst [vmem:[%s11338_s3 + $0x318] sm:$0xff] %v4991_v25 }
 0x838   :  { %v4824_v37 = vpop.f32.mrf.mxu2  ;;  %v4488_v27 = vpop.f32.mrf.mxu0 }
 0x839   :  { %v4825_v56 = vadd.f32 %v4824_v37, %v4656_v49  ;;  %v4993_v28 = vpop.f32.mrf.mxu3  ;;  %v4657_v31 = vpop.f32.mrf.mxu1  ;;  %v4489_v7 = vadd.f32 %v4488_v27, %v12146_v19  ;;  %v12152_v37 = vld [vmem:[#allocation23_spill] sm:$0xff] }
 0x83b   :  { %v4994_v33 = vadd.f32 %v4993_v28, %v4825_v56  ;;  %v4658_v29 = vadd.f32 %v4657_v31, %v4489_v7 }
 0x83d   :  { %5129 = vst [vmem:[%s11338_s3 + $0x328] sm:$0xff] %v4994_v33 }
 0x840   :  { %v4826_v51 = vpop.f32.mrf.mxu2  ;;  %v4491_v13 = vpop.f32.mrf.mxu0 }
 0x841   :  { %v4827_v61 = vadd.f32 %v4826_v51, %v4658_v29  ;;  %v4995_v26 = vpop.f32.mrf.mxu3  ;;  %v4660_v18 = vpop.f32.mrf.mxu1  ;;  %v4492_v50 = vadd.f32 %v4491_v13, %v12147_v54 }
 0x843   :  { %v4996_v9 = vadd.f32 %v4995_v26, %v4827_v61  ;;  %v4661_v34 = vadd.f32 %v4660_v18, %v4492_v50 }
 0x845   :  { %5131 = vst [vmem:[%s11338_s3 + $0x338] sm:$0xff] %v4996_v9 }
 0x848   :  { %v4829_v2 = vpop.f32.mrf.mxu2  ;;  %v4493_v46 = vpop.f32.mrf.mxu0 }
 0x849   :  { %v4830_v21 = vadd.f32 %v4829_v2, %v4661_v34  ;;  %v4998_v16 = vpop.f32.mrf.mxu3  ;;  %v4662_v60 = vpop.f32.mrf.mxu1  ;;  %v4494_v40 = vadd.f32 %v4493_v46, %v12148_v14  ;;  %v12153_v34 = vld [vmem:[#allocation24_spill] sm:$0xff] }
 0x84b   :  { %v4999_v42 = vadd.f32 %v4998_v16, %v4830_v21  ;;  %v4663_v30 = vadd.f32 %v4662_v60, %v4494_v40 }
 0x84d   :  { %5133 = vst [vmem:[%s11338_s3 + $0x348] sm:$0xff] %v4999_v42 }
 0x850   :  { %v4831_v45 = vpop.f32.mrf.mxu2  ;;  %v4496_v12 = vpop.f32.mrf.mxu0 }
 0x851   :  { %v4832_v6 = vadd.f32 %v4831_v45, %v4663_v30  ;;  %v5000_v35 = vpop.f32.mrf.mxu3  ;;  %v4665_v44 = vpop.f32.mrf.mxu1  ;;  %v4497_v3 = vadd.f32 %v4496_v12, %v12149_v38  ;;  %v12154_v38 = vld [vmem:[#allocation25_spill] sm:$0xff] }
 0x853   :  { %v5001_v58 = vadd.f32 %v5000_v35, %v4832_v6  ;;  %v4666_v47 = vadd.f32 %v4665_v44, %v4497_v3 }
 0x855   :  { %5135 = vst [vmem:[%s11338_s3 + $0x358] sm:$0xff] %v5001_v58 }
 0x858   :  { %v4834_v41 = vpop.f32.mrf.mxu2  ;;  %v4498_v22 = vpop.f32.mrf.mxu0 }
 0x859   :  { %v4835_v1 = vadd.f32 %v4834_v41, %v4666_v47  ;;  %v5003_v62 = vpop.f32.mrf.mxu3  ;;  %v4667_v52 = vpop.f32.mrf.mxu1  ;;  %v4499_v0 = vadd.f32 %v4498_v22, %v12150_v36 }
 0x85b   :  { %v5004_v15 = vadd.f32 %v5003_v62, %v4835_v1  ;;  %v4668_v57 = vadd.f32 %v4667_v52, %v4499_v0 }
 0x85d   :  { %5137 = vst [vmem:[%s11338_s3 + $0x368] sm:$0xff] %v5004_v15 }
 0x860   :  { %v4836_v53 = vpop.f32.mrf.mxu2  ;;  %v4501_v23 = vpop.f32.mrf.mxu0 }
 0x861   :  { %v4837_v5 = vadd.f32 %v4836_v53, %v4668_v57  ;;  %v5005_v32 = vpop.f32.mrf.mxu3  ;;  %v4670_v4 = vpop.f32.mrf.mxu1  ;;  %v4502_v43 = vadd.f32 %v4501_v23, %v12151_v55 }
 0x863   :  { %v5006_v48 = vadd.f32 %v5005_v32, %v4837_v5  ;;  %v4671_v24 = vadd.f32 %v4670_v4, %v4502_v43 }
 0x865   :  { %5139 = vst [vmem:[%s11338_s3 + $0x378] sm:$0xff] %v5006_v48 }
 0x868   :  { %v4839_v17 = vpop.f32.mrf.mxu2  ;;  %v4503_v8 = vpop.f32.mrf.mxu0 }
 0x869   :  { %v4840_v59 = vadd.f32 %v4839_v17, %v4671_v24  ;;  %v5008_v25 = vpop.f32.mrf.mxu3  ;;  %v4672_v39 = vpop.f32.mrf.mxu1  ;;  %v4504_v56 = vadd.f32 %v4503_v8, %v12152_v37 }
 0x86b   :  { %v5009_v49 = vadd.f32 %v5008_v25, %v4840_v59  ;;  %v4673_v28 = vadd.f32 %v4672_v39, %v4504_v56 }
 0x86d   :  { %5141 = vst [vmem:[%s11338_s3 + $0x388] sm:$0xff] %v5009_v49 }
 0x870   :  { %v4841_v27 = vpop.f32.mrf.mxu2  ;;  %v4506_v19 = vpop.f32.mrf.mxu0 }
 0x871   :  { %v4842_v31 = vadd.f32 %v4841_v27, %v4673_v28  ;;  %v5010_v33 = vpop.f32.mrf.mxu3  ;;  %v4675_v7 = vpop.f32.mrf.mxu1  ;;  %v4507_v51 = vadd.f32 %v4506_v19, %v10959_v10 }
 0x873   :  { %v5011_v29 = vadd.f32 %v5010_v33, %v4842_v31  ;;  %v4676_v61 = vadd.f32 %v4675_v7, %v4507_v51 }
 0x875   :  { %5143 = vst [vmem:[%s11338_s3 + $0x398] sm:$0xff] %v5011_v29 }
 0x878   :  { %v4844_v26 = vpop.f32.mrf.mxu2  ;;  %v4508_v9 = vpop.f32.mrf.mxu0 }
 0x879   :  { %v4845_v13 = vadd.f32 %v4844_v26, %v4676_v61  ;;  %v5013_v18 = vpop.f32.mrf.mxu3  ;;  %v4677_v54 = vpop.f32.mrf.mxu1  ;;  %v4509_v2 = vadd.f32 %v4508_v9, %v12153_v34 }
 0x87b   :  { %v5014_v50 = vadd.f32 %v5013_v18, %v4845_v13  ;;  %v4678_v21 = vadd.f32 %v4677_v54, %v4509_v2 }
 0x87d   :  { %5145 = vst [vmem:[%s11338_s3 + $0x3a8] sm:$0xff] %v5014_v50 }
 0x880   :  { %v4846_v16 = vpop.f32.mrf.mxu2  ;;  %v4511_v60 = vpop.f32.mrf.mxu0 }
 0x881   :  { %v4847_v10 = vadd.f32 %v4846_v16, %v4678_v21  ;;  %v5015_v46 = vpop.f32.mrf.mxu3  ;;  %v4680_v42 = vpop.f32.mrf.mxu1  ;;  %v4512_v40 = vadd.f32 %v4511_v60, %v10969_v63 }
 0x883   :  { %v5016_v14 = vadd.f32 %v5015_v46, %v4847_v10  ;;  %v4681_v30 = vadd.f32 %v4680_v42, %v4512_v40 }
 0x885   :  { %5147 = vst [vmem:[%s11338_s3 + $0x3b8] sm:$0xff] %v5016_v14 }
 0x888   :  { %v4849_v45 = vpop.f32.mrf.mxu2  ;;  %v4513_v12 = vpop.f32.mrf.mxu0 }
 0x889   :  { %v4850_v6 = vadd.f32 %v4849_v45, %v4681_v30  ;;  %v5018_v35 = vpop.f32.mrf.mxu3  ;;  %v4682_v44 = vpop.f32.mrf.mxu1  ;;  %v4514_v3 = vadd.f32 %v4513_v12, %v12154_v38 }
 0x88b   :  { %v5019_v58 = vadd.f32 %v5018_v35, %v4850_v6  ;;  %v4683_v47 = vadd.f32 %v4682_v44, %v4514_v3 }
 0x88d   :  { %5149 = vst [vmem:[%s11338_s3 + $0x3c8] sm:$0xff] %v5019_v58 }
 0x890   :  { %v4851_v41 = vpop.f32.mrf.mxu2  ;;  %v4516_v62 = vpop.f32.mrf.mxu0 }
 0x891   :  { %v4852_v63 = vadd.f32 %v4851_v41, %v4683_v47  ;;  %v5020_v1 = vpop.f32.mrf.mxu3  ;;  %v4517_v52 = vadd.f32 %v4516_v62, %v10979_v20  ;;  %v4685_v15 = vpop.f32.mrf.mxu1 }
 0x893   :  { %v5021_v22 = vadd.f32 %v5020_v1, %v4852_v63  ;;  %v4686_v36 = vadd.f32 %v4685_v15, %v4517_v52 }
 0x895   :  { %5151 = vst [vmem:[%s11338_s3 + $0x3d8] sm:$0xff] %v5021_v22 }
 0x898   :  { %v4854_v0 = vpop.f32.mrf.mxu2  ;;  %v4518_v5 = vpop.f32.mrf.mxu0 }
 0x899   :  { %v4855_v57 = vadd.f32 %v4854_v0, %v4686_v36  ;;  %v5023_v53 = vpop.f32.mrf.mxu3  ;;  %v4519_v23 = vadd.f32 %v4518_v5, %v10981_v11  ;;  %v4687_v4 = vpop.f32.mrf.mxu1 }
 0x89b   :  { %v5024_v32 = vadd.f32 %v5023_v53, %v4855_v57  ;;  %v4688_v48 = vadd.f32 %v4687_v4, %v4519_v23 }
 0x89d   :  { %5153 = vst [vmem:[%s11338_s3 + $0x3e8] sm:$0xff] %v5024_v32 }
 0x8a0   :  { %v4856_v20 = vpop.f32.mrf.mxu2 }
 0x8a1   :  { %v4857_v55 = vadd.f32 %v4856_v20, %v4688_v48  ;;  %v5025_v43 = vpop.f32.mrf.mxu3 }
 0x8a3   :  { %v5026_v24 = vadd.f32 %v5025_v43, %v4857_v55 }
 0x8a5   :  { %5155 = vst [vmem:[%s11338_s3 + $0x3f8] sm:$0xff] %v5026_v24 }

</bundles_post_ra>
